<compile_context>
chip_gen: v7x
topology: tpu7x:2x2x1
jax: 0.10.0
libtpu: 0.0.40
codegen_flags: <defaults>
</compile_context>

<pallas_src>
import jax
import jax.numpy as jnp
from jax.experimental import pallas as pl
from jax.experimental.pallas import tpu as pltpu


# ---------------------------------------------------------------------------
# Static model geometry
# ---------------------------------------------------------------------------

BATCH = 8      # module's `batch_size` (PyTorch file uses 120; scaled down)
SEQ_LEN = 60   # chosen so that flatten() yields BATCH * 162 * 3 features

C0, C1, C2, C3 = 6, 18, 54, 162
K1, K2, K3 = 5, 5, 3
F1, F2 = 240, 120

L1 = SEQ_LEN - K1 + 1        # 56  conv1 output length
P1 = (L1 - 4) // 2 + 1       # 27  pool1 output length
L2 = P1 - K2 + 1             # 23  conv2 output length
P2 = (L2 - 4) // 2 + 1       # 10  pool2 output length
L3 = P2 - K3 + 1             # 8   conv3 output length
P3 = (L3 - 4) // 2 + 1       # 3   pool3 output length
FLAT = BATCH * C3 * P3       # 3888 = fc1 in_features
assert P3 == 3 and FLAT == BATCH * 162 * 3

# Padded lengths used inside the kernel (keep merge-reshapes 8-aligned and give
# the strided pooling reads room; the extra rows are junk-but-finite and are
# never consumed by a valid output).
L1_PAD = 64                  # h1 scratch rows (>= 3 + 2*(P1_PAD-1) + 1 = 58)
P1_PAD = P1 + 1              # 28, so conv2 windows of length L2_PAD fit
L2_PAD = L2 + 1              # 24 (multiple of 8 -> layout-friendly reshape)
MISC_W = 256                 # lane width of the packed bias/affine table
assert F1 <= MISC_W


# ---------------------------------------------------------------------------
# Fused Pallas kernel
# ---------------------------------------------------------------------------

def bincnn_kernel(x_ref, w1_ref, w2_ref, w3_ref, misc_ref, wf2_ref, wf3_ref,
                  wf1_hbm_ref, o_ref,
                  h1_ref, p1_ref, h2_ref, p2_ref, h3_ref, feat_ref,
                  wf1_ref, dma_sem):
    """Entire BinCNN forward. Activations laid out (batch, position, channels)."""
    # Kick off the dominant fc1-weight DMA immediately; it overlaps with the whole
    # conv stack and is awaited only just before the fc1 contraction.
    wf1_copy = pltpu.make_async_copy(wf1_hbm_ref, wf1_ref, dma_sem)
    wf1_copy.start()

    # Packed bias / affine rows (one small input instead of seven).
    t1 = misc_ref[0:1, 0:C1]
    t2 = misc_ref[1:2, 0:C2]
    s3 = misc_ref[2:3, 0:C3]
    t3 = misc_ref[3:4, 0:C3]
    b1 = misc_ref[4:5, 0:F1]
    b2 = misc_ref[5:6, 0:F2]
    b3 = misc_ref[6:7, 0:BATCH]

    def pool(h_ref, n_out):
        # MaxPool1d(kernel=4, stride=2): elementwise max of 4 strided sublane reads.
        m = h_ref[:, pl.ds(0, n_out, stride=2), :]
        for s in range(1, 4):
            m = jnp.maximum(m, h_ref[:, pl.ds(s, n_out, stride=2), :])
        return m

    # ---- stage 1: conv1 (+bias) -> ReLU -> dropout(identity) -> MaxPool(4,2) ----
    col = jnp.concatenate([x_ref[:, j:j + L1, :] for j in range(K1)], axis=-1)
    a = jnp.dot(col.reshape(BATCH * L1, C0 * K1), w1_ref[...],
                preferred_element_type=jnp.float32)                    # (448, 18)
    h1_ref[:, 0:L1, :] = jnp.maximum(a + t1, 0.0).reshape(BATCH, L1, C1)
    h1_ref[:, L1:L1_PAD, :] = jnp.zeros((BATCH, L1_PAD - L1, C1), jnp.float32)
    p1_ref[...] = pool(h1_ref, P1_PAD)   # (8, 28, 18); row 27 is junk but finite

    # ---- stage 2: conv2 (+bias) -> ReLU -> dropout(identity) -> MaxPool(4,2) ----
    col = jnp.concatenate([p1_ref[:, j:j + L2_PAD, :] for j in range(K2)], axis=-1)
    a = jnp.dot(col.reshape(BATCH * L2_PAD, C1 * K2), w2_ref[...],
                preferred_element_type=jnp.float32)                    # (192, 54)
    h2_ref[...] = jnp.maximum(a + t2, 0.0).reshape(BATCH, L2_PAD, C2)
    p2_ref[...] = pool(h2_ref, P2)       # (8, 10, 54); only valid rows are read

    # ---- stage 3: conv3 -> folded BatchNorm1d(eval) affine -> ReLU ----
    col = jnp.concatenate([p2_ref[:, j:j + L3, :] for j in range(K3)], axis=-1)
    a = jnp.dot(col.reshape(BATCH * L3, C2 * K3), w3_ref[...],
                preferred_element_type=jnp.float32)                    # (64, 162)
    h3_ref[...] = jnp.maximum(a * s3 + t3, 0.0).reshape(BATCH, L3, C3)

    # ---- MaxPool(4,2) of stage 3 + flatten into one fc1 feature row (n, t, c) ----
    for n in range(BATCH):
        for t in range(P3):
            row = jnp.maximum(
                jnp.maximum(h3_ref[n, 2 * t:2 * t + 1, :],
                            h3_ref[n, 2 * t + 1:2 * t + 2, :]),
                jnp.maximum(h3_ref[n, 2 * t + 2:2 * t + 3, :],
                            h3_ref[n, 2 * t + 3:2 * t + 4, :]))        # (1, 162)
            off = C3 * (P3 * n + t)
            feat_ref[0:1, off:off + C3] = row

    # ---- fc1 (single deep GEMV) -> fc2 -> fc3 -> sigmoid ----
    wf1_copy.wait()
    h = jnp.dot(feat_ref[...].astype(jnp.bfloat16), wf1_ref[...],
                preferred_element_type=jnp.float32) + b1               # (1, 240)
    h = jnp.dot(h, wf2_ref[...], preferred_element_type=jnp.float32) + b2
    h = jnp.dot(h, wf3_ref[...], preferred_element_type=jnp.float32) + b3
    o_ref[...] = jax.nn.sigmoid(h)


_VMEM = pl.BlockSpec(memory_space=pltpu.MemorySpace.VMEM)


def bincnn_forward(x_ncl, prep):
    """x_ncl: (BATCH, 6, SEQ_LEN) float32, PyTorch NCL layout. Returns (BATCH,)."""
    x = jnp.transpose(x_ncl, (0, 2, 1))  # tiny one-off NCL -> NLC layout change
    out = pl.pallas_call(
        bincnn_kernel,
        out_shape=jax.ShapeDtypeStruct((1, BATCH), jnp.float32),
        in_specs=[_VMEM, _VMEM, _VMEM, _VMEM, _VMEM, _VMEM, _VMEM,
                  pl.BlockSpec(memory_space=pl.ANY)],   # wf1 stays in HBM, DMA'd
        out_specs=_VMEM,
        scratch_shapes=[
            pltpu.VMEM((BATCH, L1_PAD, C1), jnp.float32),   # conv1 output (padded)
            pltpu.VMEM((BATCH, P1_PAD, C2 // 3), jnp.float32),  # pool1 output (8,28,18)
            pltpu.VMEM((BATCH, L2_PAD, C2), jnp.float32),   # conv2 output (padded)
            pltpu.VMEM((BATCH, P2, C2), jnp.float32),       # pool2 output
            pltpu.VMEM((BATCH, L3, C3), jnp.float32),       # conv3 output
            pltpu.VMEM((1, FLAT), jnp.float32),             # flattened fc1 features
            pltpu.VMEM((FLAT, F1), jnp.bfloat16),           # fc1 weight landing pad
            pltpu.SemaphoreType.DMA,                        # fc1 weight DMA sem
        ],
    )(x, prep["w1"], prep["w2"], prep["w3"], prep["misc"],
      prep["wf2"], prep["wf3"], prep["wf1"])
    return out[0]


# ---------------------------------------------------------------------------
# Parameters (PyTorch layout) + one-time repack into kernel layout
# ---------------------------------------------------------------------------

def init_params(key):
    def uniform(k, shape, fan_in):
        bound = 1.0 / jnp.sqrt(jnp.float32(fan_in))
        return jax.random.uniform(k, shape, jnp.float32, -bound, bound)

    ks = jax.random.split(key, 16)
    p = {}
    # conv weights: PyTorch layout (C_out, C_in, K)
    p["w_c1"] = uniform(ks[0], (C1, C0, K1), C0 * K1)
    p["b_c1"] = uniform(ks[1], (C1,), C0 * K1)
    p["w_c2"] = uniform(ks[2], (C2, C1, K2), C1 * K2)
    p["b_c2"] = uniform(ks[3], (C2,), C1 * K2)
    p["w_c3"] = uniform(ks[4], (C3, C2, K3), C2 * K3)
    p["b_c3"] = uniform(ks[5], (C3,), C2 * K3)
    # BatchNorm1d(162) parameters + running stats (eval mode)
    p["bn3_gamma"] = 1.0 + 0.1 * jax.random.normal(ks[6], (C3,), jnp.float32)
    p["bn3_beta"] = 0.1 * jax.random.normal(ks[7], (C3,), jnp.float32)
    p["bn3_mean"] = 0.1 * jax.random.normal(ks[8], (C3,), jnp.float32)
    p["bn3_var"] = 1.0 + 0.1 * jax.random.uniform(ks[9], (C3,), jnp.float32)
    # fully connected: PyTorch layout (out_features, in_features)
    p["w_f1"] = uniform(ks[10], (F1, FLAT), FLAT)
    p["b_f1"] = uniform(ks[11], (F1,), FLAT)
    p["w_f2"] = uniform(ks[12], (F2, F1), F1)
    p["b_f2"] = uniform(ks[13], (F2,), F1)
    p["w_f3"] = uniform(ks[14], (BATCH, F2), F2)
    p["b_f3"] = uniform(ks[15], (BATCH,), F2)
    return p


def prepare_params(p):
    """One-time repack (run OUTSIDE the per-call jit) into kernel-friendly layout."""
    # Folded BatchNorm1d (eval) for conv3: relu(acc * s3 + t3), conv bias folded in.
    inv_std = 1.0 / jnp.sqrt(p["bn3_var"] + 1e-5)
    s3 = p["bn3_gamma"] * inv_std
    t3 = p["b_c3"] * s3 + p["bn3_beta"] - p["bn3_mean"] * s3

    def pack_row(v):
        return jnp.pad(v, (0, MISC_W - v.shape[0]))

    misc = jnp.stack([
        pack_row(p["b_c1"]), pack_row(p["b_c2"]), pack_row(s3), pack_row(t3),
        pack_row(p["b_f1"]), pack_row(p["b_f2"]), pack_row(p["b_f3"]),
        jnp.zeros((MISC_W,), jnp.float32),
    ])  # (8, 256)

    # fc1: PyTorch (F1, FLAT) with column index = n*(C3*P3) + c*P3 + t
    # -> kernel layout (FLAT, F1) with row index = (n*P3 + t)*C3 + c, bf16.
    wf1 = p["w_f1"].reshape(F1, BATCH, C3, P3)   # (o, n, c, t)
    wf1 = jnp.transpose(wf1, (1, 3, 2, 0))       # (n, t, c, o)
    wf1 = wf1.reshape(FLAT, F1).astype(jnp.bfloat16)

    def conv_w(w):
        # (C_out, C_in, K) -> (K*C_in, C_out), row = j*C_in + c (matches im2col concat)
        k = w.shape[2]
        return jnp.transpose(w, (2, 1, 0)).reshape(k * w.shape[1], w.shape[0])

    return dict(
        w1=conv_w(p["w_c1"]),
        w2=conv_w(p["w_c2"]),
        w3=conv_w(p["w_c3"]),
        misc=misc,
        wf1=wf1,
        wf2=jnp.transpose(p["w_f2"]),            # (F1, F2)
        wf3=jnp.transpose(p["w_f3"]),            # (F2, BATCH)
    )


# ---------------------------------------------------------------------------
# Pure-JAX reference (f32) for a numerical sanity check
# ---------------------------------------------------------------------------

def bincnn_reference(x, p):
    def conv1d(h, w, b):
        k = w.shape[2]
        lo = h.shape[2] - k + 1
        cols = jnp.stack([h[:, :, j:j + lo] for j in range(k)], axis=-1)  # (N,C,Lo,K)
        return jnp.einsum("nclk,ock->nol", cols, w) + b[None, :, None]

    def maxpool(h):
        lp = (h.shape[2] - 4) // 2 + 1
        taps = jnp.stack([h[:, :, 2 * t:2 * t + 4] for t in range(lp)], axis=2)
        return jnp.max(taps, axis=-1)

    h = maxpool(jax.nn.relu(conv1d(x, p["w_c1"], p["b_c1"])))
    h = maxpool(jax.nn.relu(conv1d(h, p["w_c2"], p["b_c2"])))
    h = conv1d(h, p["w_c3"], p["b_c3"])
    inv = (1.0 / jnp.sqrt(p["bn3_var"] + 1e-5))[None, :, None]
    h = (h - p["bn3_mean"][None, :, None]) * inv * p["bn3_gamma"][None, :, None] \
        + p["bn3_beta"][None, :, None]
    h = maxpool(jax.nn.relu(h))
    f = h.reshape(-1)                                    # torch.flatten(whole batch)
    f = p["w_f1"] @ f + p["b_f1"]
    f = p["w_f2"] @ f + p["b_f2"]
    f = p["w_f3"] @ f + p["b_f3"]
    return jax.nn.sigmoid(f)


# ---------------------------------------------------------------------------
# Main
# ---------------------------------------------------------------------------

if __name__ == "__main__":
    key = jax.random.PRNGKey(0)
    k_x, k_p = jax.random.split(key)
    x = jax.random.normal(k_x, (BATCH, C0, SEQ_LEN), jnp.float32)  # NCL, like PyTorch
    params = init_params(k_p)
    prep = prepare_params(params)          # one-time repack; no per-call transposes

    fwd = jax.jit(bincnn_forward)
    out = jax.block_until_ready(fwd(x, prep))

    assert out.shape == (BATCH,), out.shape
    assert bool(jnp.all(jnp.isfinite(out)))
    assert bool(jnp.all((out >= 0.0) & (out <= 1.0)))

    ref = jax.block_until_ready(jax.jit(bincnn_reference)(x, params))
    max_err = float(jnp.max(jnp.abs(out - ref)))
    assert max_err < 2e-2, f"kernel vs reference mismatch: {max_err}"

    print("KERNEL_OK")
</pallas_src>

<mosaic_0001>
module attributes {stable_mosaic.version = 11 : i64} {
  func.func @bincnn_kernel(%arg0: memref<8x60x6xf32, #tpu.memory_space<vmem>>, %arg1: memref<30x18xf32, #tpu.memory_space<vmem>>, %arg2: memref<90x54xf32, #tpu.memory_space<vmem>>, %arg3: memref<162x162xf32, #tpu.memory_space<vmem>>, %arg4: memref<8x256xf32, #tpu.memory_space<vmem>>, %arg5: memref<240x120xf32, #tpu.memory_space<vmem>>, %arg6: memref<120x8xf32, #tpu.memory_space<vmem>>, %arg7: memref<3888x240xbf16, #tpu.memory_space<any>>, %arg8: memref<1x8xf32, #tpu.memory_space<vmem>>, %arg9: memref<8x64x18xf32, #tpu.memory_space<vmem>>, %arg10: memref<8x28x18xf32, #tpu.memory_space<vmem>>, %arg11: memref<8x24x54xf32, #tpu.memory_space<vmem>>, %arg12: memref<8x10x54xf32, #tpu.memory_space<vmem>>, %arg13: memref<8x8x162xf32, #tpu.memory_space<vmem>>, %arg14: memref<1x3888xf32, #tpu.memory_space<vmem>>, %arg15: memref<3888x240xbf16, #tpu.memory_space<vmem>>, %arg16: memref<!tpu.dma_semaphore, #tpu.memory_space<semaphore_mem>>) attributes {dimension_semantics = [], scalar_prefetch = 0 : i64, scratch_operands = 8 : i64, tpu.core_type = #tpu.core_type<tc>} {
    tpu.enqueue_dma source(%arg7 : memref<3888x240xbf16, #tpu.memory_space<any>>) target(%arg15 : memref<3888x240xbf16, #tpu.memory_space<vmem>>) target_semaphore(%arg16 : memref<!tpu.dma_semaphore, #tpu.memory_space<semaphore_mem>>)
    %c0 = arith.constant 0 : index
    %c0_0 = arith.constant 0 : index
    %0 = vector.load %arg4[%c0, %c0_0] : memref<8x256xf32, #tpu.memory_space<vmem>>, vector<1x18xf32>
    %c1 = arith.constant 1 : index
    %c0_1 = arith.constant 0 : index
    %1 = vector.load %arg4[%c1, %c0_1] : memref<8x256xf32, #tpu.memory_space<vmem>>, vector<1x54xf32>
    %c2 = arith.constant 2 : index
    %c0_2 = arith.constant 0 : index
    %2 = vector.load %arg4[%c2, %c0_2] : memref<8x256xf32, #tpu.memory_space<vmem>>, vector<1x162xf32>
    %c3 = arith.constant 3 : index
    %c0_3 = arith.constant 0 : index
    %3 = vector.load %arg4[%c3, %c0_3] : memref<8x256xf32, #tpu.memory_space<vmem>>, vector<1x162xf32>
    %c4 = arith.constant 4 : index
    %c0_4 = arith.constant 0 : index
    %4 = vector.load %arg4[%c4, %c0_4] : memref<8x256xf32, #tpu.memory_space<vmem>>, vector<1x240xf32>
    %c5 = arith.constant 5 : index
    %c0_5 = arith.constant 0 : index
    %5 = vector.load %arg4[%c5, %c0_5] : memref<8x256xf32, #tpu.memory_space<vmem>>, vector<1x120xf32>
    %c6 = arith.constant 6 : index
    %c0_6 = arith.constant 0 : index
    %6 = vector.load %arg4[%c6, %c0_6] : memref<8x256xf32, #tpu.memory_space<vmem>>, vector<1x8xf32>
    %c0_7 = arith.constant 0 : index
    %c0_8 = arith.constant 0 : index
    %c0_9 = arith.constant 0 : index
    %7 = vector.load %arg0[%c0_7, %c0_8, %c0_9] : memref<8x60x6xf32, #tpu.memory_space<vmem>>, vector<8x56x6xf32>
    %c0_10 = arith.constant 0 : index
    %c1_11 = arith.constant 1 : index
    %c0_12 = arith.constant 0 : index
    %8 = vector.load %arg0[%c0_10, %c1_11, %c0_12] : memref<8x60x6xf32, #tpu.memory_space<vmem>>, vector<8x56x6xf32>
    %c0_13 = arith.constant 0 : index
    %c2_14 = arith.constant 2 : index
    %c0_15 = arith.constant 0 : index
    %9 = vector.load %arg0[%c0_13, %c2_14, %c0_15] : memref<8x60x6xf32, #tpu.memory_space<vmem>>, vector<8x56x6xf32>
    %c0_16 = arith.constant 0 : index
    %c3_17 = arith.constant 3 : index
    %c0_18 = arith.constant 0 : index
    %10 = vector.load %arg0[%c0_16, %c3_17, %c0_18] : memref<8x60x6xf32, #tpu.memory_space<vmem>>, vector<8x56x6xf32>
    %c0_19 = arith.constant 0 : index
    %c4_20 = arith.constant 4 : index
    %c0_21 = arith.constant 0 : index
    %11 = vector.load %arg0[%c0_19, %c4_20, %c0_21] : memref<8x60x6xf32, #tpu.memory_space<vmem>>, vector<8x56x6xf32>
    %12 = tpu.concatenate %7, %8, %9, %10, %11 in 2 : vector<8x56x6xf32>, vector<8x56x6xf32>, vector<8x56x6xf32>, vector<8x56x6xf32>, vector<8x56x6xf32> -> vector<8x56x30xf32>
    %13 = vector.shape_cast %12 : vector<8x56x30xf32> to vector<448x30xf32>
    %c0_22 = arith.constant 0 : index
    %c0_23 = arith.constant 0 : index
    %14 = vector.load %arg1[%c0_22, %c0_23] : memref<30x18xf32, #tpu.memory_space<vmem>>, vector<30x18xf32>
    %cst = arith.constant dense<0.000000e+00> : vector<448x18xf32>
    %15 = tpu.matmul %13, %14, %cst {dimension_numbers = #tpu.dot_dimension_numbers<[1], [0], [0], [1], [0, 0, 1, 1], [], []>} : vector<448x30xf32>, vector<30x18xf32>, vector<448x18xf32> -> vector<448x18xf32>
    %16 = vector.broadcast %0 : vector<1x18xf32> to vector<448x18xf32>
    %17 = arith.addf %15, %16 : vector<448x18xf32>
    %cst_24 = arith.constant 0.000000e+00 : f32
    %18 = vector.broadcast %cst_24 : f32 to vector<448x18xf32>
    %19 = arith.maximumf %17, %18 : vector<448x18xf32>
    %20 = vector.shape_cast %19 : vector<448x18xf32> to vector<8x56x18xf32>
    %c0_25 = arith.constant 0 : index
    %c0_26 = arith.constant 0 : index
    %c0_27 = arith.constant 0 : index
    %21 = vector.load %arg9[%c0_25, %c0_26, %c0_27] : memref<8x64x18xf32, #tpu.memory_space<vmem>>, vector<8x56x18xf32>
    tpu.vector_store %arg9[%c0_25, %c0_26, %c0_27], %20 {strides = array<i32>} : memref<8x64x18xf32, #tpu.memory_space<vmem>>, vector<8x56x18xf32>,
    %cst_28 = arith.constant 0.000000e+00 : f32
    %22 = vector.broadcast %cst_28 : f32 to vector<8x8x18xf32>
    %c0_29 = arith.constant 0 : index
    %c56 = arith.constant 56 : index
    %c0_30 = arith.constant 0 : index
    %23 = vector.load %arg9[%c0_29, %c56, %c0_30] : memref<8x64x18xf32, #tpu.memory_space<vmem>>, vector<8x8x18xf32>
    tpu.vector_store %arg9[%c0_29, %c56, %c0_30], %22 {strides = array<i32>} : memref<8x64x18xf32, #tpu.memory_space<vmem>>, vector<8x8x18xf32>,
    %c0_31 = arith.constant 0 : index
    %c0_32 = arith.constant 0 : index
    %c0_33 = arith.constant 0 : index
    %24 = tpu.strided_load %arg9[%c0_31, %c0_32, %c0_33] {strides = array<i32: 1, 2, 1>} : memref<8x64x18xf32, #tpu.memory_space<vmem>>, vector<8x28x18xf32>
    %c0_34 = arith.constant 0 : index
    %c1_35 = arith.constant 1 : index
    %c0_36 = arith.constant 0 : index
    %25 = tpu.strided_load %arg9[%c0_34, %c1_35, %c0_36] {strides = array<i32: 1, 2, 1>} : memref<8x64x18xf32, #tpu.memory_space<vmem>>, vector<8x28x18xf32>
    %26 = arith.maximumf %24, %25 : vector<8x28x18xf32>
    %c0_37 = arith.constant 0 : index
    %c2_38 = arith.constant 2 : index
    %c0_39 = arith.constant 0 : index
    %27 = tpu.strided_load %arg9[%c0_37, %c2_38, %c0_39] {strides = array<i32: 1, 2, 1>} : memref<8x64x18xf32, #tpu.memory_space<vmem>>, vector<8x28x18xf32>
    %28 = arith.maximumf %26, %27 : vector<8x28x18xf32>
    %c0_40 = arith.constant 0 : index
    %c3_41 = arith.constant 3 : index
    %c0_42 = arith.constant 0 : index
    %29 = tpu.strided_load %arg9[%c0_40, %c3_41, %c0_42] {strides = array<i32: 1, 2, 1>} : memref<8x64x18xf32, #tpu.memory_space<vmem>>, vector<8x28x18xf32>
    %30 = arith.maximumf %28, %29 : vector<8x28x18xf32>
    %c0_43 = arith.constant 0 : index
    %c0_44 = arith.constant 0 : index
    %c0_45 = arith.constant 0 : index
    %31 = vector.load %arg10[%c0_43, %c0_44, %c0_45] : memref<8x28x18xf32, #tpu.memory_space<vmem>>, vector<8x28x18xf32>
    tpu.vector_store %arg10[%c0_43, %c0_44, %c0_45], %30 {strides = array<i32>} : memref<8x28x18xf32, #tpu.memory_space<vmem>>, vector<8x28x18xf32>,
    %c0_46 = arith.constant 0 : index
    %c0_47 = arith.constant 0 : index
    %c0_48 = arith.constant 0 : index
    %32 = vector.load %arg10[%c0_46, %c0_47, %c0_48] : memref<8x28x18xf32, #tpu.memory_space<vmem>>, vector<8x24x18xf32>
    %c0_49 = arith.constant 0 : index
    %c1_50 = arith.constant 1 : index
    %c0_51 = arith.constant 0 : index
    %33 = vector.load %arg10[%c0_49, %c1_50, %c0_51] : memref<8x28x18xf32, #tpu.memory_space<vmem>>, vector<8x24x18xf32>
    %c0_52 = arith.constant 0 : index
    %c2_53 = arith.constant 2 : index
    %c0_54 = arith.constant 0 : index
    %34 = vector.load %arg10[%c0_52, %c2_53, %c0_54] : memref<8x28x18xf32, #tpu.memory_space<vmem>>, vector<8x24x18xf32>
    %c0_55 = arith.constant 0 : index
    %c3_56 = arith.constant 3 : index
    %c0_57 = arith.constant 0 : index
    %35 = vector.load %arg10[%c0_55, %c3_56, %c0_57] : memref<8x28x18xf32, #tpu.memory_space<vmem>>, vector<8x24x18xf32>
    %c0_58 = arith.constant 0 : index
    %c4_59 = arith.constant 4 : index
    %c0_60 = arith.constant 0 : index
    %36 = vector.load %arg10[%c0_58, %c4_59, %c0_60] : memref<8x28x18xf32, #tpu.memory_space<vmem>>, vector<8x24x18xf32>
    %37 = tpu.concatenate %32, %33, %34, %35, %36 in 2 : vector<8x24x18xf32>, vector<8x24x18xf32>, vector<8x24x18xf32>, vector<8x24x18xf32>, vector<8x24x18xf32> -> vector<8x24x90xf32>
    %38 = vector.shape_cast %37 : vector<8x24x90xf32> to vector<192x90xf32>
    %c0_61 = arith.constant 0 : index
    %c0_62 = arith.constant 0 : index
    %39 = vector.load %arg2[%c0_61, %c0_62] : memref<90x54xf32, #tpu.memory_space<vmem>>, vector<90x54xf32>
    %cst_63 = arith.constant dense<0.000000e+00> : vector<192x54xf32>
    %40 = tpu.matmul %38, %39, %cst_63 {dimension_numbers = #tpu.dot_dimension_numbers<[1], [0], [0], [1], [0, 0, 1, 1], [], []>} : vector<192x90xf32>, vector<90x54xf32>, vector<192x54xf32> -> vector<192x54xf32>
    %41 = vector.broadcast %1 : vector<1x54xf32> to vector<192x54xf32>
    %42 = arith.addf %40, %41 : vector<192x54xf32>
    %cst_64 = arith.constant 0.000000e+00 : f32
    %43 = vector.broadcast %cst_64 : f32 to vector<192x54xf32>
    %44 = arith.maximumf %42, %43 : vector<192x54xf32>
    %45 = vector.shape_cast %44 : vector<192x54xf32> to vector<8x24x54xf32>
    %c0_65 = arith.constant 0 : index
    %c0_66 = arith.constant 0 : index
    %c0_67 = arith.constant 0 : index
    %46 = vector.load %arg11[%c0_65, %c0_66, %c0_67] : memref<8x24x54xf32, #tpu.memory_space<vmem>>, vector<8x24x54xf32>
    tpu.vector_store %arg11[%c0_65, %c0_66, %c0_67], %45 {strides = array<i32>} : memref<8x24x54xf32, #tpu.memory_space<vmem>>, vector<8x24x54xf32>,
    %c0_68 = arith.constant 0 : index
    %c0_69 = arith.constant 0 : index
    %c0_70 = arith.constant 0 : index
    %47 = tpu.strided_load %arg11[%c0_68, %c0_69, %c0_70] {strides = array<i32: 1, 2, 1>} : memref<8x24x54xf32, #tpu.memory_space<vmem>>, vector<8x10x54xf32>
    %c0_71 = arith.constant 0 : index
    %c1_72 = arith.constant 1 : index
    %c0_73 = arith.constant 0 : index
    %48 = tpu.strided_load %arg11[%c0_71, %c1_72, %c0_73] {strides = array<i32: 1, 2, 1>} : memref<8x24x54xf32, #tpu.memory_space<vmem>>, vector<8x10x54xf32>
    %49 = arith.maximumf %47, %48 : vector<8x10x54xf32>
    %c0_74 = arith.constant 0 : index
    %c2_75 = arith.constant 2 : index
    %c0_76 = arith.constant 0 : index
    %50 = tpu.strided_load %arg11[%c0_74, %c2_75, %c0_76] {strides = array<i32: 1, 2, 1>} : memref<8x24x54xf32, #tpu.memory_space<vmem>>, vector<8x10x54xf32>
    %51 = arith.maximumf %49, %50 : vector<8x10x54xf32>
    %c0_77 = arith.constant 0 : index
    %c3_78 = arith.constant 3 : index
    %c0_79 = arith.constant 0 : index
    %52 = tpu.strided_load %arg11[%c0_77, %c3_78, %c0_79] {strides = array<i32: 1, 2, 1>} : memref<8x24x54xf32, #tpu.memory_space<vmem>>, vector<8x10x54xf32>
    %53 = arith.maximumf %51, %52 : vector<8x10x54xf32>
    %c0_80 = arith.constant 0 : index
    %c0_81 = arith.constant 0 : index
    %c0_82 = arith.constant 0 : index
    %54 = vector.load %arg12[%c0_80, %c0_81, %c0_82] : memref<8x10x54xf32, #tpu.memory_space<vmem>>, vector<8x10x54xf32>
    tpu.vector_store %arg12[%c0_80, %c0_81, %c0_82], %53 {strides = array<i32>} : memref<8x10x54xf32, #tpu.memory_space<vmem>>, vector<8x10x54xf32>,
    %c0_83 = arith.constant 0 : index
    %c0_84 = arith.constant 0 : index
    %c0_85 = arith.constant 0 : index
    %55 = vector.load %arg12[%c0_83, %c0_84, %c0_85] : memref<8x10x54xf32, #tpu.memory_space<vmem>>, vector<8x8x54xf32>
    %c0_86 = arith.constant 0 : index
    %c1_87 = arith.constant 1 : index
    %c0_88 = arith.constant 0 : index
    %56 = vector.load %arg12[%c0_86, %c1_87, %c0_88] : memref<8x10x54xf32, #tpu.memory_space<vmem>>, vector<8x8x54xf32>
    %c0_89 = arith.constant 0 : index
    %c2_90 = arith.constant 2 : index
    %c0_91 = arith.constant 0 : index
    %57 = vector.load %arg12[%c0_89, %c2_90, %c0_91] : memref<8x10x54xf32, #tpu.memory_space<vmem>>, vector<8x8x54xf32>
    %58 = tpu.concatenate %55, %56, %57 in 2 : vector<8x8x54xf32>, vector<8x8x54xf32>, vector<8x8x54xf32> -> vector<8x8x162xf32>
    %59 = vector.shape_cast %58 : vector<8x8x162xf32> to vector<64x162xf32>
    %c0_92 = arith.constant 0 : index
    %c0_93 = arith.constant 0 : index
    %60 = vector.load %arg3[%c0_92, %c0_93] : memref<162x162xf32, #tpu.memory_space<vmem>>, vector<162x162xf32>
    %cst_94 = arith.constant dense<0.000000e+00> : vector<64x162xf32>
    %61 = tpu.matmul %59, %60, %cst_94 {dimension_numbers = #tpu.dot_dimension_numbers<[1], [0], [0], [1], [0, 0, 1, 1], [], []>} : vector<64x162xf32>, vector<162x162xf32>, vector<64x162xf32> -> vector<64x162xf32>
    %62 = vector.broadcast %2 : vector<1x162xf32> to vector<64x162xf32>
    %63 = arith.mulf %61, %62 : vector<64x162xf32>
    %64 = vector.broadcast %3 : vector<1x162xf32> to vector<64x162xf32>
    %65 = arith.addf %63, %64 : vector<64x162xf32>
    %cst_95 = arith.constant 0.000000e+00 : f32
    %66 = vector.broadcast %cst_95 : f32 to vector<64x162xf32>
    %67 = arith.maximumf %65, %66 : vector<64x162xf32>
    %68 = vector.shape_cast %67 : vector<64x162xf32> to vector<8x8x162xf32>
    %c0_96 = arith.constant 0 : index
    %c0_97 = arith.constant 0 : index
    %c0_98 = arith.constant 0 : index
    %69 = vector.load %arg13[%c0_96, %c0_97, %c0_98] : memref<8x8x162xf32, #tpu.memory_space<vmem>>, vector<8x8x162xf32>
    tpu.vector_store %arg13[%c0_96, %c0_97, %c0_98], %68 {strides = array<i32>} : memref<8x8x162xf32, #tpu.memory_space<vmem>>, vector<8x8x162xf32>,
    %c0_99 = arith.constant 0 : index
    %c0_100 = arith.constant 0 : index
    %c0_101 = arith.constant 0 : index
    %70 = vector.load %arg13[%c0_99, %c0_100, %c0_101] : memref<8x8x162xf32, #tpu.memory_space<vmem>>, vector<1x1x162xf32>
    %71 = vector.shape_cast %70 : vector<1x1x162xf32> to vector<1x162xf32>
    %c0_102 = arith.constant 0 : index
    %c1_103 = arith.constant 1 : index
    %c0_104 = arith.constant 0 : index
    %72 = vector.load %arg13[%c0_102, %c1_103, %c0_104] : memref<8x8x162xf32, #tpu.memory_space<vmem>>, vector<1x1x162xf32>
    %73 = vector.shape_cast %72 : vector<1x1x162xf32> to vector<1x162xf32>
    %74 = arith.maximumf %71, %73 : vector<1x162xf32>
    %c0_105 = arith.constant 0 : index
    %c2_106 = arith.constant 2 : index
    %c0_107 = arith.constant 0 : index
    %75 = vector.load %arg13[%c0_105, %c2_106, %c0_107] : memref<8x8x162xf32, #tpu.memory_space<vmem>>, vector<1x1x162xf32>
    %76 = vector.shape_cast %75 : vector<1x1x162xf32> to vector<1x162xf32>
    %c0_108 = arith.constant 0 : index
    %c3_109 = arith.constant 3 : index
    %c0_110 = arith.constant 0 : index
    %77 = vector.load %arg13[%c0_108, %c3_109, %c0_110] : memref<8x8x162xf32, #tpu.memory_space<vmem>>, vector<1x1x162xf32>
    %78 = vector.shape_cast %77 : vector<1x1x162xf32> to vector<1x162xf32>
    %79 = arith.maximumf %76, %78 : vector<1x162xf32>
    %80 = arith.maximumf %74, %79 : vector<1x162xf32>
    %c0_111 = arith.constant 0 : index
    %c0_112 = arith.constant 0 : index
    %81 = vector.load %arg14[%c0_111, %c0_112] : memref<1x3888xf32, #tpu.memory_space<vmem>>, vector<1x162xf32>
    tpu.vector_store %arg14[%c0_111, %c0_112], %80 {strides = array<i32>} : memref<1x3888xf32, #tpu.memory_space<vmem>>, vector<1x162xf32>,
    %c0_113 = arith.constant 0 : index
    %c2_114 = arith.constant 2 : index
    %c0_115 = arith.constant 0 : index
    %82 = vector.load %arg13[%c0_113, %c2_114, %c0_115] : memref<8x8x162xf32, #tpu.memory_space<vmem>>, vector<1x1x162xf32>
    %83 = vector.shape_cast %82 : vector<1x1x162xf32> to vector<1x162xf32>
    %c0_116 = arith.constant 0 : index
    %c3_117 = arith.constant 3 : index
    %c0_118 = arith.constant 0 : index
    %84 = vector.load %arg13[%c0_116, %c3_117, %c0_118] : memref<8x8x162xf32, #tpu.memory_space<vmem>>, vector<1x1x162xf32>
    %85 = vector.shape_cast %84 : vector<1x1x162xf32> to vector<1x162xf32>
    %86 = arith.maximumf %83, %85 : vector<1x162xf32>
    %c0_119 = arith.constant 0 : index
    %c4_120 = arith.constant 4 : index
    %c0_121 = arith.constant 0 : index
    %87 = vector.load %arg13[%c0_119, %c4_120, %c0_121] : memref<8x8x162xf32, #tpu.memory_space<vmem>>, vector<1x1x162xf32>
    %88 = vector.shape_cast %87 : vector<1x1x162xf32> to vector<1x162xf32>
    %c0_122 = arith.constant 0 : index
    %c5_123 = arith.constant 5 : index
    %c0_124 = arith.constant 0 : index
    %89 = vector.load %arg13[%c0_122, %c5_123, %c0_124] : memref<8x8x162xf32, #tpu.memory_space<vmem>>, vector<1x1x162xf32>
    %90 = vector.shape_cast %89 : vector<1x1x162xf32> to vector<1x162xf32>
    %91 = arith.maximumf %88, %90 : vector<1x162xf32>
    %92 = arith.maximumf %86, %91 : vector<1x162xf32>
    %c0_125 = arith.constant 0 : index
    %c162 = arith.constant 162 : index
    %93 = vector.load %arg14[%c0_125, %c162] : memref<1x3888xf32, #tpu.memory_space<vmem>>, vector<1x162xf32>
    tpu.vector_store %arg14[%c0_125, %c162], %92 {strides = array<i32>} : memref<1x3888xf32, #tpu.memory_space<vmem>>, vector<1x162xf32>,
    %c0_126 = arith.constant 0 : index
    %c4_127 = arith.constant 4 : index
    %c0_128 = arith.constant 0 : index
    %94 = vector.load %arg13[%c0_126, %c4_127, %c0_128] : memref<8x8x162xf32, #tpu.memory_space<vmem>>, vector<1x1x162xf32>
    %95 = vector.shape_cast %94 : vector<1x1x162xf32> to vector<1x162xf32>
    %c0_129 = arith.constant 0 : index
    %c5_130 = arith.constant 5 : index
    %c0_131 = arith.constant 0 : index
    %96 = vector.load %arg13[%c0_129, %c5_130, %c0_131] : memref<8x8x162xf32, #tpu.memory_space<vmem>>, vector<1x1x162xf32>
    %97 = vector.shape_cast %96 : vector<1x1x162xf32> to vector<1x162xf32>
    %98 = arith.maximumf %95, %97 : vector<1x162xf32>
    %c0_132 = arith.constant 0 : index
    %c6_133 = arith.constant 6 : index
    %c0_134 = arith.constant 0 : index
    %99 = vector.load %arg13[%c0_132, %c6_133, %c0_134] : memref<8x8x162xf32, #tpu.memory_space<vmem>>, vector<1x1x162xf32>
    %100 = vector.shape_cast %99 : vector<1x1x162xf32> to vector<1x162xf32>
    %c0_135 = arith.constant 0 : index
    %c7 = arith.constant 7 : index
    %c0_136 = arith.constant 0 : index
    %101 = vector.load %arg13[%c0_135, %c7, %c0_136] : memref<8x8x162xf32, #tpu.memory_space<vmem>>, vector<1x1x162xf32>
    %102 = vector.shape_cast %101 : vector<1x1x162xf32> to vector<1x162xf32>
    %103 = arith.maximumf %100, %102 : vector<1x162xf32>
    %104 = arith.maximumf %98, %103 : vector<1x162xf32>
    %c0_137 = arith.constant 0 : index
    %c324 = arith.constant 324 : index
    %105 = vector.load %arg14[%c0_137, %c324] : memref<1x3888xf32, #tpu.memory_space<vmem>>, vector<1x162xf32>
    tpu.vector_store %arg14[%c0_137, %c324], %104 {strides = array<i32>} : memref<1x3888xf32, #tpu.memory_space<vmem>>, vector<1x162xf32>,
    %c1_138 = arith.constant 1 : index
    %c0_139 = arith.constant 0 : index
    %c0_140 = arith.constant 0 : index
    %106 = vector.load %arg13[%c1_138, %c0_139, %c0_140] : memref<8x8x162xf32, #tpu.memory_space<vmem>>, vector<1x1x162xf32>
    %107 = vector.shape_cast %106 : vector<1x1x162xf32> to vector<1x162xf32>
    %c1_141 = arith.constant 1 : index
    %c1_142 = arith.constant 1 : index
    %c0_143 = arith.constant 0 : index
    %108 = vector.load %arg13[%c1_141, %c1_142, %c0_143] : memref<8x8x162xf32, #tpu.memory_space<vmem>>, vector<1x1x162xf32>
    %109 = vector.shape_cast %108 : vector<1x1x162xf32> to vector<1x162xf32>
    %110 = arith.maximumf %107, %109 : vector<1x162xf32>
    %c1_144 = arith.constant 1 : index
    %c2_145 = arith.constant 2 : index
    %c0_146 = arith.constant 0 : index
    %111 = vector.load %arg13[%c1_144, %c2_145, %c0_146] : memref<8x8x162xf32, #tpu.memory_space<vmem>>, vector<1x1x162xf32>
    %112 = vector.shape_cast %111 : vector<1x1x162xf32> to vector<1x162xf32>
    %c1_147 = arith.constant 1 : index
    %c3_148 = arith.constant 3 : index
    %c0_149 = arith.constant 0 : index
    %113 = vector.load %arg13[%c1_147, %c3_148, %c0_149] : memref<8x8x162xf32, #tpu.memory_space<vmem>>, vector<1x1x162xf32>
    %114 = vector.shape_cast %113 : vector<1x1x162xf32> to vector<1x162xf32>
    %115 = arith.maximumf %112, %114 : vector<1x162xf32>
    %116 = arith.maximumf %110, %115 : vector<1x162xf32>
    %c0_150 = arith.constant 0 : index
    %c486 = arith.constant 486 : index
    %117 = vector.load %arg14[%c0_150, %c486] : memref<1x3888xf32, #tpu.memory_space<vmem>>, vector<1x162xf32>
    tpu.vector_store %arg14[%c0_150, %c486], %116 {strides = array<i32>} : memref<1x3888xf32, #tpu.memory_space<vmem>>, vector<1x162xf32>,
    %c1_151 = arith.constant 1 : index
    %c2_152 = arith.constant 2 : index
    %c0_153 = arith.constant 0 : index
    %118 = vector.load %arg13[%c1_151, %c2_152, %c0_153] : memref<8x8x162xf32, #tpu.memory_space<vmem>>, vector<1x1x162xf32>
    %119 = vector.shape_cast %118 : vector<1x1x162xf32> to vector<1x162xf32>
    %c1_154 = arith.constant 1 : index
    %c3_155 = arith.constant 3 : index
    %c0_156 = arith.constant 0 : index
    %120 = vector.load %arg13[%c1_154, %c3_155, %c0_156] : memref<8x8x162xf32, #tpu.memory_space<vmem>>, vector<1x1x162xf32>
    %121 = vector.shape_cast %120 : vector<1x1x162xf32> to vector<1x162xf32>
    %122 = arith.maximumf %119, %121 : vector<1x162xf32>
    %c1_157 = arith.constant 1 : index
    %c4_158 = arith.constant 4 : index
    %c0_159 = arith.constant 0 : index
    %123 = vector.load %arg13[%c1_157, %c4_158, %c0_159] : memref<8x8x162xf32, #tpu.memory_space<vmem>>, vector<1x1x162xf32>
    %124 = vector.shape_cast %123 : vector<1x1x162xf32> to vector<1x162xf32>
    %c1_160 = arith.constant 1 : index
    %c5_161 = arith.constant 5 : index
    %c0_162 = arith.constant 0 : index
    %125 = vector.load %arg13[%c1_160, %c5_161, %c0_162] : memref<8x8x162xf32, #tpu.memory_space<vmem>>, vector<1x1x162xf32>
    %126 = vector.shape_cast %125 : vector<1x1x162xf32> to vector<1x162xf32>
    %127 = arith.maximumf %124, %126 : vector<1x162xf32>
    %128 = arith.maximumf %122, %127 : vector<1x162xf32>
    %c0_163 = arith.constant 0 : index
    %c648 = arith.constant 648 : index
    %129 = vector.load %arg14[%c0_163, %c648] : memref<1x3888xf32, #tpu.memory_space<vmem>>, vector<1x162xf32>
    tpu.vector_store %arg14[%c0_163, %c648], %128 {strides = array<i32>} : memref<1x3888xf32, #tpu.memory_space<vmem>>, vector<1x162xf32>,
    %c1_164 = arith.constant 1 : index
    %c4_165 = arith.constant 4 : index
    %c0_166 = arith.constant 0 : index
    %130 = vector.load %arg13[%c1_164, %c4_165, %c0_166] : memref<8x8x162xf32, #tpu.memory_space<vmem>>, vector<1x1x162xf32>
    %131 = vector.shape_cast %130 : vector<1x1x162xf32> to vector<1x162xf32>
    %c1_167 = arith.constant 1 : index
    %c5_168 = arith.constant 5 : index
    %c0_169 = arith.constant 0 : index
    %132 = vector.load %arg13[%c1_167, %c5_168, %c0_169] : memref<8x8x162xf32, #tpu.memory_space<vmem>>, vector<1x1x162xf32>
    %133 = vector.shape_cast %132 : vector<1x1x162xf32> to vector<1x162xf32>
    %134 = arith.maximumf %131, %133 : vector<1x162xf32>
    %c1_170 = arith.constant 1 : index
    %c6_171 = arith.constant 6 : index
    %c0_172 = arith.constant 0 : index
    %135 = vector.load %arg13[%c1_170, %c6_171, %c0_172] : memref<8x8x162xf32, #tpu.memory_space<vmem>>, vector<1x1x162xf32>
    %136 = vector.shape_cast %135 : vector<1x1x162xf32> to vector<1x162xf32>
    %c1_173 = arith.constant 1 : index
    %c7_174 = arith.constant 7 : index
    %c0_175 = arith.constant 0 : index
    %137 = vector.load %arg13[%c1_173, %c7_174, %c0_175] : memref<8x8x162xf32, #tpu.memory_space<vmem>>, vector<1x1x162xf32>
    %138 = vector.shape_cast %137 : vector<1x1x162xf32> to vector<1x162xf32>
    %139 = arith.maximumf %136, %138 : vector<1x162xf32>
    %140 = arith.maximumf %134, %139 : vector<1x162xf32>
    %c0_176 = arith.constant 0 : index
    %c810 = arith.constant 810 : index
    %141 = vector.load %arg14[%c0_176, %c810] : memref<1x3888xf32, #tpu.memory_space<vmem>>, vector<1x162xf32>
    tpu.vector_store %arg14[%c0_176, %c810], %140 {strides = array<i32>} : memref<1x3888xf32, #tpu.memory_space<vmem>>, vector<1x162xf32>,
    %c2_177 = arith.constant 2 : index
    %c0_178 = arith.constant 0 : index
    %c0_179 = arith.constant 0 : index
    %142 = vector.load %arg13[%c2_177, %c0_178, %c0_179] : memref<8x8x162xf32, #tpu.memory_space<vmem>>, vector<1x1x162xf32>
    %143 = vector.shape_cast %142 : vector<1x1x162xf32> to vector<1x162xf32>
    %c2_180 = arith.constant 2 : index
    %c1_181 = arith.constant 1 : index
    %c0_182 = arith.constant 0 : index
    %144 = vector.load %arg13[%c2_180, %c1_181, %c0_182] : memref<8x8x162xf32, #tpu.memory_space<vmem>>, vector<1x1x162xf32>
    %145 = vector.shape_cast %144 : vector<1x1x162xf32> to vector<1x162xf32>
    %146 = arith.maximumf %143, %145 : vector<1x162xf32>
    %c2_183 = arith.constant 2 : index
    %c2_184 = arith.constant 2 : index
    %c0_185 = arith.constant 0 : index
    %147 = vector.load %arg13[%c2_183, %c2_184, %c0_185] : memref<8x8x162xf32, #tpu.memory_space<vmem>>, vector<1x1x162xf32>
    %148 = vector.shape_cast %147 : vector<1x1x162xf32> to vector<1x162xf32>
    %c2_186 = arith.constant 2 : index
    %c3_187 = arith.constant 3 : index
    %c0_188 = arith.constant 0 : index
    %149 = vector.load %arg13[%c2_186, %c3_187, %c0_188] : memref<8x8x162xf32, #tpu.memory_space<vmem>>, vector<1x1x162xf32>
    %150 = vector.shape_cast %149 : vector<1x1x162xf32> to vector<1x162xf32>
    %151 = arith.maximumf %148, %150 : vector<1x162xf32>
    %152 = arith.maximumf %146, %151 : vector<1x162xf32>
    %c0_189 = arith.constant 0 : index
    %c972 = arith.constant 972 : index
    %153 = vector.load %arg14[%c0_189, %c972] : memref<1x3888xf32, #tpu.memory_space<vmem>>, vector<1x162xf32>
    tpu.vector_store %arg14[%c0_189, %c972], %152 {strides = array<i32>} : memref<1x3888xf32, #tpu.memory_space<vmem>>, vector<1x162xf32>,
    %c2_190 = arith.constant 2 : index
    %c2_191 = arith.constant 2 : index
    %c0_192 = arith.constant 0 : index
    %154 = vector.load %arg13[%c2_190, %c2_191, %c0_192] : memref<8x8x162xf32, #tpu.memory_space<vmem>>, vector<1x1x162xf32>
    %155 = vector.shape_cast %154 : vector<1x1x162xf32> to vector<1x162xf32>
    %c2_193 = arith.constant 2 : index
    %c3_194 = arith.constant 3 : index
    %c0_195 = arith.constant 0 : index
    %156 = vector.load %arg13[%c2_193, %c3_194, %c0_195] : memref<8x8x162xf32, #tpu.memory_space<vmem>>, vector<1x1x162xf32>
    %157 = vector.shape_cast %156 : vector<1x1x162xf32> to vector<1x162xf32>
    %158 = arith.maximumf %155, %157 : vector<1x162xf32>
    %c2_196 = arith.constant 2 : index
    %c4_197 = arith.constant 4 : index
    %c0_198 = arith.constant 0 : index
    %159 = vector.load %arg13[%c2_196, %c4_197, %c0_198] : memref<8x8x162xf32, #tpu.memory_space<vmem>>, vector<1x1x162xf32>
    %160 = vector.shape_cast %159 : vector<1x1x162xf32> to vector<1x162xf32>
    %c2_199 = arith.constant 2 : index
    %c5_200 = arith.constant 5 : index
    %c0_201 = arith.constant 0 : index
    %161 = vector.load %arg13[%c2_199, %c5_200, %c0_201] : memref<8x8x162xf32, #tpu.memory_space<vmem>>, vector<1x1x162xf32>
    %162 = vector.shape_cast %161 : vector<1x1x162xf32> to vector<1x162xf32>
    %163 = arith.maximumf %160, %162 : vector<1x162xf32>
    %164 = arith.maximumf %158, %163 : vector<1x162xf32>
    %c0_202 = arith.constant 0 : index
    %c1134 = arith.constant 1134 : index
    %165 = vector.load %arg14[%c0_202, %c1134] : memref<1x3888xf32, #tpu.memory_space<vmem>>, vector<1x162xf32>
    tpu.vector_store %arg14[%c0_202, %c1134], %164 {strides = array<i32>} : memref<1x3888xf32, #tpu.memory_space<vmem>>, vector<1x162xf32>,
    %c2_203 = arith.constant 2 : index
    %c4_204 = arith.constant 4 : index
    %c0_205 = arith.constant 0 : index
    %166 = vector.load %arg13[%c2_203, %c4_204, %c0_205] : memref<8x8x162xf32, #tpu.memory_space<vmem>>, vector<1x1x162xf32>
    %167 = vector.shape_cast %166 : vector<1x1x162xf32> to vector<1x162xf32>
    %c2_206 = arith.constant 2 : index
    %c5_207 = arith.constant 5 : index
    %c0_208 = arith.constant 0 : index
    %168 = vector.load %arg13[%c2_206, %c5_207, %c0_208] : memref<8x8x162xf32, #tpu.memory_space<vmem>>, vector<1x1x162xf32>
    %169 = vector.shape_cast %168 : vector<1x1x162xf32> to vector<1x162xf32>
    %170 = arith.maximumf %167, %169 : vector<1x162xf32>
    %c2_209 = arith.constant 2 : index
    %c6_210 = arith.constant 6 : index
    %c0_211 = arith.constant 0 : index
    %171 = vector.load %arg13[%c2_209, %c6_210, %c0_211] : memref<8x8x162xf32, #tpu.memory_space<vmem>>, vector<1x1x162xf32>
    %172 = vector.shape_cast %171 : vector<1x1x162xf32> to vector<1x162xf32>
    %c2_212 = arith.constant 2 : index
    %c7_213 = arith.constant 7 : index
    %c0_214 = arith.constant 0 : index
    %173 = vector.load %arg13[%c2_212, %c7_213, %c0_214] : memref<8x8x162xf32, #tpu.memory_space<vmem>>, vector<1x1x162xf32>
    %174 = vector.shape_cast %173 : vector<1x1x162xf32> to vector<1x162xf32>
    %175 = arith.maximumf %172, %174 : vector<1x162xf32>
    %176 = arith.maximumf %170, %175 : vector<1x162xf32>
    %c0_215 = arith.constant 0 : index
    %c1296 = arith.constant 1296 : index
    %177 = vector.load %arg14[%c0_215, %c1296] : memref<1x3888xf32, #tpu.memory_space<vmem>>, vector<1x162xf32>
    tpu.vector_store %arg14[%c0_215, %c1296], %176 {strides = array<i32>} : memref<1x3888xf32, #tpu.memory_space<vmem>>, vector<1x162xf32>,
    %c3_216 = arith.constant 3 : index
    %c0_217 = arith.constant 0 : index
    %c0_218 = arith.constant 0 : index
    %178 = vector.load %arg13[%c3_216, %c0_217, %c0_218] : memref<8x8x162xf32, #tpu.memory_space<vmem>>, vector<1x1x162xf32>
    %179 = vector.shape_cast %178 : vector<1x1x162xf32> to vector<1x162xf32>
    %c3_219 = arith.constant 3 : index
    %c1_220 = arith.constant 1 : index
    %c0_221 = arith.constant 0 : index
    %180 = vector.load %arg13[%c3_219, %c1_220, %c0_221] : memref<8x8x162xf32, #tpu.memory_space<vmem>>, vector<1x1x162xf32>
    %181 = vector.shape_cast %180 : vector<1x1x162xf32> to vector<1x162xf32>
    %182 = arith.maximumf %179, %181 : vector<1x162xf32>
    %c3_222 = arith.constant 3 : index
    %c2_223 = arith.constant 2 : index
    %c0_224 = arith.constant 0 : index
    %183 = vector.load %arg13[%c3_222, %c2_223, %c0_224] : memref<8x8x162xf32, #tpu.memory_space<vmem>>, vector<1x1x162xf32>
    %184 = vector.shape_cast %183 : vector<1x1x162xf32> to vector<1x162xf32>
    %c3_225 = arith.constant 3 : index
    %c3_226 = arith.constant 3 : index
    %c0_227 = arith.constant 0 : index
    %185 = vector.load %arg13[%c3_225, %c3_226, %c0_227] : memref<8x8x162xf32, #tpu.memory_space<vmem>>, vector<1x1x162xf32>
    %186 = vector.shape_cast %185 : vector<1x1x162xf32> to vector<1x162xf32>
    %187 = arith.maximumf %184, %186 : vector<1x162xf32>
    %188 = arith.maximumf %182, %187 : vector<1x162xf32>
    %c0_228 = arith.constant 0 : index
    %c1458 = arith.constant 1458 : index
    %189 = vector.load %arg14[%c0_228, %c1458] : memref<1x3888xf32, #tpu.memory_space<vmem>>, vector<1x162xf32>
    tpu.vector_store %arg14[%c0_228, %c1458], %188 {strides = array<i32>} : memref<1x3888xf32, #tpu.memory_space<vmem>>, vector<1x162xf32>,
    %c3_229 = arith.constant 3 : index
    %c2_230 = arith.constant 2 : index
    %c0_231 = arith.constant 0 : index
    %190 = vector.load %arg13[%c3_229, %c2_230, %c0_231] : memref<8x8x162xf32, #tpu.memory_space<vmem>>, vector<1x1x162xf32>
    %191 = vector.shape_cast %190 : vector<1x1x162xf32> to vector<1x162xf32>
    %c3_232 = arith.constant 3 : index
    %c3_233 = arith.constant 3 : index
    %c0_234 = arith.constant 0 : index
    %192 = vector.load %arg13[%c3_232, %c3_233, %c0_234] : memref<8x8x162xf32, #tpu.memory_space<vmem>>, vector<1x1x162xf32>
    %193 = vector.shape_cast %192 : vector<1x1x162xf32> to vector<1x162xf32>
    %194 = arith.maximumf %191, %193 : vector<1x162xf32>
    %c3_235 = arith.constant 3 : index
    %c4_236 = arith.constant 4 : index
    %c0_237 = arith.constant 0 : index
    %195 = vector.load %arg13[%c3_235, %c4_236, %c0_237] : memref<8x8x162xf32, #tpu.memory_space<vmem>>, vector<1x1x162xf32>
    %196 = vector.shape_cast %195 : vector<1x1x162xf32> to vector<1x162xf32>
    %c3_238 = arith.constant 3 : index
    %c5_239 = arith.constant 5 : index
    %c0_240 = arith.constant 0 : index
    %197 = vector.load %arg13[%c3_238, %c5_239, %c0_240] : memref<8x8x162xf32, #tpu.memory_space<vmem>>, vector<1x1x162xf32>
    %198 = vector.shape_cast %197 : vector<1x1x162xf32> to vector<1x162xf32>
    %199 = arith.maximumf %196, %198 : vector<1x162xf32>
    %200 = arith.maximumf %194, %199 : vector<1x162xf32>
    %c0_241 = arith.constant 0 : index
    %c1620 = arith.constant 1620 : index
    %201 = vector.load %arg14[%c0_241, %c1620] : memref<1x3888xf32, #tpu.memory_space<vmem>>, vector<1x162xf32>
    tpu.vector_store %arg14[%c0_241, %c1620], %200 {strides = array<i32>} : memref<1x3888xf32, #tpu.memory_space<vmem>>, vector<1x162xf32>,
    %c3_242 = arith.constant 3 : index
    %c4_243 = arith.constant 4 : index
    %c0_244 = arith.constant 0 : index
    %202 = vector.load %arg13[%c3_242, %c4_243, %c0_244] : memref<8x8x162xf32, #tpu.memory_space<vmem>>, vector<1x1x162xf32>
    %203 = vector.shape_cast %202 : vector<1x1x162xf32> to vector<1x162xf32>
    %c3_245 = arith.constant 3 : index
    %c5_246 = arith.constant 5 : index
    %c0_247 = arith.constant 0 : index
    %204 = vector.load %arg13[%c3_245, %c5_246, %c0_247] : memref<8x8x162xf32, #tpu.memory_space<vmem>>, vector<1x1x162xf32>
    %205 = vector.shape_cast %204 : vector<1x1x162xf32> to vector<1x162xf32>
    %206 = arith.maximumf %203, %205 : vector<1x162xf32>
    %c3_248 = arith.constant 3 : index
    %c6_249 = arith.constant 6 : index
    %c0_250 = arith.constant 0 : index
    %207 = vector.load %arg13[%c3_248, %c6_249, %c0_250] : memref<8x8x162xf32, #tpu.memory_space<vmem>>, vector<1x1x162xf32>
    %208 = vector.shape_cast %207 : vector<1x1x162xf32> to vector<1x162xf32>
    %c3_251 = arith.constant 3 : index
    %c7_252 = arith.constant 7 : index
    %c0_253 = arith.constant 0 : index
    %209 = vector.load %arg13[%c3_251, %c7_252, %c0_253] : memref<8x8x162xf32, #tpu.memory_space<vmem>>, vector<1x1x162xf32>
    %210 = vector.shape_cast %209 : vector<1x1x162xf32> to vector<1x162xf32>
    %211 = arith.maximumf %208, %210 : vector<1x162xf32>
    %212 = arith.maximumf %206, %211 : vector<1x162xf32>
    %c0_254 = arith.constant 0 : index
    %c1782 = arith.constant 1782 : index
    %213 = vector.load %arg14[%c0_254, %c1782] : memref<1x3888xf32, #tpu.memory_space<vmem>>, vector<1x162xf32>
    tpu.vector_store %arg14[%c0_254, %c1782], %212 {strides = array<i32>} : memref<1x3888xf32, #tpu.memory_space<vmem>>, vector<1x162xf32>,
    %c4_255 = arith.constant 4 : index
    %c0_256 = arith.constant 0 : index
    %c0_257 = arith.constant 0 : index
    %214 = vector.load %arg13[%c4_255, %c0_256, %c0_257] : memref<8x8x162xf32, #tpu.memory_space<vmem>>, vector<1x1x162xf32>
    %215 = vector.shape_cast %214 : vector<1x1x162xf32> to vector<1x162xf32>
    %c4_258 = arith.constant 4 : index
    %c1_259 = arith.constant 1 : index
    %c0_260 = arith.constant 0 : index
    %216 = vector.load %arg13[%c4_258, %c1_259, %c0_260] : memref<8x8x162xf32, #tpu.memory_space<vmem>>, vector<1x1x162xf32>
    %217 = vector.shape_cast %216 : vector<1x1x162xf32> to vector<1x162xf32>
    %218 = arith.maximumf %215, %217 : vector<1x162xf32>
    %c4_261 = arith.constant 4 : index
    %c2_262 = arith.constant 2 : index
    %c0_263 = arith.constant 0 : index
    %219 = vector.load %arg13[%c4_261, %c2_262, %c0_263] : memref<8x8x162xf32, #tpu.memory_space<vmem>>, vector<1x1x162xf32>
    %220 = vector.shape_cast %219 : vector<1x1x162xf32> to vector<1x162xf32>
    %c4_264 = arith.constant 4 : index
    %c3_265 = arith.constant 3 : index
    %c0_266 = arith.constant 0 : index
    %221 = vector.load %arg13[%c4_264, %c3_265, %c0_266] : memref<8x8x162xf32, #tpu.memory_space<vmem>>, vector<1x1x162xf32>
    %222 = vector.shape_cast %221 : vector<1x1x162xf32> to vector<1x162xf32>
    %223 = arith.maximumf %220, %222 : vector<1x162xf32>
    %224 = arith.maximumf %218, %223 : vector<1x162xf32>
    %c0_267 = arith.constant 0 : index
    %c1944 = arith.constant 1944 : index
    %225 = vector.load %arg14[%c0_267, %c1944] : memref<1x3888xf32, #tpu.memory_space<vmem>>, vector<1x162xf32>
    tpu.vector_store %arg14[%c0_267, %c1944], %224 {strides = array<i32>} : memref<1x3888xf32, #tpu.memory_space<vmem>>, vector<1x162xf32>,
    %c4_268 = arith.constant 4 : index
    %c2_269 = arith.constant 2 : index
    %c0_270 = arith.constant 0 : index
    %226 = vector.load %arg13[%c4_268, %c2_269, %c0_270] : memref<8x8x162xf32, #tpu.memory_space<vmem>>, vector<1x1x162xf32>
    %227 = vector.shape_cast %226 : vector<1x1x162xf32> to vector<1x162xf32>
    %c4_271 = arith.constant 4 : index
    %c3_272 = arith.constant 3 : index
    %c0_273 = arith.constant 0 : index
    %228 = vector.load %arg13[%c4_271, %c3_272, %c0_273] : memref<8x8x162xf32, #tpu.memory_space<vmem>>, vector<1x1x162xf32>
    %229 = vector.shape_cast %228 : vector<1x1x162xf32> to vector<1x162xf32>
    %230 = arith.maximumf %227, %229 : vector<1x162xf32>
    %c4_274 = arith.constant 4 : index
    %c4_275 = arith.constant 4 : index
    %c0_276 = arith.constant 0 : index
    %231 = vector.load %arg13[%c4_274, %c4_275, %c0_276] : memref<8x8x162xf32, #tpu.memory_space<vmem>>, vector<1x1x162xf32>
    %232 = vector.shape_cast %231 : vector<1x1x162xf32> to vector<1x162xf32>
    %c4_277 = arith.constant 4 : index
    %c5_278 = arith.constant 5 : index
    %c0_279 = arith.constant 0 : index
    %233 = vector.load %arg13[%c4_277, %c5_278, %c0_279] : memref<8x8x162xf32, #tpu.memory_space<vmem>>, vector<1x1x162xf32>
    %234 = vector.shape_cast %233 : vector<1x1x162xf32> to vector<1x162xf32>
    %235 = arith.maximumf %232, %234 : vector<1x162xf32>
    %236 = arith.maximumf %230, %235 : vector<1x162xf32>
    %c0_280 = arith.constant 0 : index
    %c2106 = arith.constant 2106 : index
    %237 = vector.load %arg14[%c0_280, %c2106] : memref<1x3888xf32, #tpu.memory_space<vmem>>, vector<1x162xf32>
    tpu.vector_store %arg14[%c0_280, %c2106], %236 {strides = array<i32>} : memref<1x3888xf32, #tpu.memory_space<vmem>>, vector<1x162xf32>,
    %c4_281 = arith.constant 4 : index
    %c4_282 = arith.constant 4 : index
    %c0_283 = arith.constant 0 : index
    %238 = vector.load %arg13[%c4_281, %c4_282, %c0_283] : memref<8x8x162xf32, #tpu.memory_space<vmem>>, vector<1x1x162xf32>
    %239 = vector.shape_cast %238 : vector<1x1x162xf32> to vector<1x162xf32>
    %c4_284 = arith.constant 4 : index
    %c5_285 = arith.constant 5 : index
    %c0_286 = arith.constant 0 : index
    %240 = vector.load %arg13[%c4_284, %c5_285, %c0_286] : memref<8x8x162xf32, #tpu.memory_space<vmem>>, vector<1x1x162xf32>
    %241 = vector.shape_cast %240 : vector<1x1x162xf32> to vector<1x162xf32>
    %242 = arith.maximumf %239, %241 : vector<1x162xf32>
    %c4_287 = arith.constant 4 : index
    %c6_288 = arith.constant 6 : index
    %c0_289 = arith.constant 0 : index
    %243 = vector.load %arg13[%c4_287, %c6_288, %c0_289] : memref<8x8x162xf32, #tpu.memory_space<vmem>>, vector<1x1x162xf32>
    %244 = vector.shape_cast %243 : vector<1x1x162xf32> to vector<1x162xf32>
    %c4_290 = arith.constant 4 : index
    %c7_291 = arith.constant 7 : index
    %c0_292 = arith.constant 0 : index
    %245 = vector.load %arg13[%c4_290, %c7_291, %c0_292] : memref<8x8x162xf32, #tpu.memory_space<vmem>>, vector<1x1x162xf32>
    %246 = vector.shape_cast %245 : vector<1x1x162xf32> to vector<1x162xf32>
    %247 = arith.maximumf %244, %246 : vector<1x162xf32>
    %248 = arith.maximumf %242, %247 : vector<1x162xf32>
    %c0_293 = arith.constant 0 : index
    %c2268 = arith.constant 2268 : index
    %249 = vector.load %arg14[%c0_293, %c2268] : memref<1x3888xf32, #tpu.memory_space<vmem>>, vector<1x162xf32>
    tpu.vector_store %arg14[%c0_293, %c2268], %248 {strides = array<i32>} : memref<1x3888xf32, #tpu.memory_space<vmem>>, vector<1x162xf32>,
    %c5_294 = arith.constant 5 : index
    %c0_295 = arith.constant 0 : index
    %c0_296 = arith.constant 0 : index
    %250 = vector.load %arg13[%c5_294, %c0_295, %c0_296] : memref<8x8x162xf32, #tpu.memory_space<vmem>>, vector<1x1x162xf32>
    %251 = vector.shape_cast %250 : vector<1x1x162xf32> to vector<1x162xf32>
    %c5_297 = arith.constant 5 : index
    %c1_298 = arith.constant 1 : index
    %c0_299 = arith.constant 0 : index
    %252 = vector.load %arg13[%c5_297, %c1_298, %c0_299] : memref<8x8x162xf32, #tpu.memory_space<vmem>>, vector<1x1x162xf32>
    %253 = vector.shape_cast %252 : vector<1x1x162xf32> to vector<1x162xf32>
    %254 = arith.maximumf %251, %253 : vector<1x162xf32>
    %c5_300 = arith.constant 5 : index
    %c2_301 = arith.constant 2 : index
    %c0_302 = arith.constant 0 : index
    %255 = vector.load %arg13[%c5_300, %c2_301, %c0_302] : memref<8x8x162xf32, #tpu.memory_space<vmem>>, vector<1x1x162xf32>
    %256 = vector.shape_cast %255 : vector<1x1x162xf32> to vector<1x162xf32>
    %c5_303 = arith.constant 5 : index
    %c3_304 = arith.constant 3 : index
    %c0_305 = arith.constant 0 : index
    %257 = vector.load %arg13[%c5_303, %c3_304, %c0_305] : memref<8x8x162xf32, #tpu.memory_space<vmem>>, vector<1x1x162xf32>
    %258 = vector.shape_cast %257 : vector<1x1x162xf32> to vector<1x162xf32>
    %259 = arith.maximumf %256, %258 : vector<1x162xf32>
    %260 = arith.maximumf %254, %259 : vector<1x162xf32>
    %c0_306 = arith.constant 0 : index
    %c2430 = arith.constant 2430 : index
    %261 = vector.load %arg14[%c0_306, %c2430] : memref<1x3888xf32, #tpu.memory_space<vmem>>, vector<1x162xf32>
    tpu.vector_store %arg14[%c0_306, %c2430], %260 {strides = array<i32>} : memref<1x3888xf32, #tpu.memory_space<vmem>>, vector<1x162xf32>,
    %c5_307 = arith.constant 5 : index
    %c2_308 = arith.constant 2 : index
    %c0_309 = arith.constant 0 : index
    %262 = vector.load %arg13[%c5_307, %c2_308, %c0_309] : memref<8x8x162xf32, #tpu.memory_space<vmem>>, vector<1x1x162xf32>
    %263 = vector.shape_cast %262 : vector<1x1x162xf32> to vector<1x162xf32>
    %c5_310 = arith.constant 5 : index
    %c3_311 = arith.constant 3 : index
    %c0_312 = arith.constant 0 : index
    %264 = vector.load %arg13[%c5_310, %c3_311, %c0_312] : memref<8x8x162xf32, #tpu.memory_space<vmem>>, vector<1x1x162xf32>
    %265 = vector.shape_cast %264 : vector<1x1x162xf32> to vector<1x162xf32>
    %266 = arith.maximumf %263, %265 : vector<1x162xf32>
    %c5_313 = arith.constant 5 : index
    %c4_314 = arith.constant 4 : index
    %c0_315 = arith.constant 0 : index
    %267 = vector.load %arg13[%c5_313, %c4_314, %c0_315] : memref<8x8x162xf32, #tpu.memory_space<vmem>>, vector<1x1x162xf32>
    %268 = vector.shape_cast %267 : vector<1x1x162xf32> to vector<1x162xf32>
    %c5_316 = arith.constant 5 : index
    %c5_317 = arith.constant 5 : index
    %c0_318 = arith.constant 0 : index
    %269 = vector.load %arg13[%c5_316, %c5_317, %c0_318] : memref<8x8x162xf32, #tpu.memory_space<vmem>>, vector<1x1x162xf32>
    %270 = vector.shape_cast %269 : vector<1x1x162xf32> to vector<1x162xf32>
    %271 = arith.maximumf %268, %270 : vector<1x162xf32>
    %272 = arith.maximumf %266, %271 : vector<1x162xf32>
    %c0_319 = arith.constant 0 : index
    %c2592 = arith.constant 2592 : index
    %273 = vector.load %arg14[%c0_319, %c2592] : memref<1x3888xf32, #tpu.memory_space<vmem>>, vector<1x162xf32>
    tpu.vector_store %arg14[%c0_319, %c2592], %272 {strides = array<i32>} : memref<1x3888xf32, #tpu.memory_space<vmem>>, vector<1x162xf32>,
    %c5_320 = arith.constant 5 : index
    %c4_321 = arith.constant 4 : index
    %c0_322 = arith.constant 0 : index
    %274 = vector.load %arg13[%c5_320, %c4_321, %c0_322] : memref<8x8x162xf32, #tpu.memory_space<vmem>>, vector<1x1x162xf32>
    %275 = vector.shape_cast %274 : vector<1x1x162xf32> to vector<1x162xf32>
    %c5_323 = arith.constant 5 : index
    %c5_324 = arith.constant 5 : index
    %c0_325 = arith.constant 0 : index
    %276 = vector.load %arg13[%c5_323, %c5_324, %c0_325] : memref<8x8x162xf32, #tpu.memory_space<vmem>>, vector<1x1x162xf32>
    %277 = vector.shape_cast %276 : vector<1x1x162xf32> to vector<1x162xf32>
    %278 = arith.maximumf %275, %277 : vector<1x162xf32>
    %c5_326 = arith.constant 5 : index
    %c6_327 = arith.constant 6 : index
    %c0_328 = arith.constant 0 : index
    %279 = vector.load %arg13[%c5_326, %c6_327, %c0_328] : memref<8x8x162xf32, #tpu.memory_space<vmem>>, vector<1x1x162xf32>
    %280 = vector.shape_cast %279 : vector<1x1x162xf32> to vector<1x162xf32>
    %c5_329 = arith.constant 5 : index
    %c7_330 = arith.constant 7 : index
    %c0_331 = arith.constant 0 : index
    %281 = vector.load %arg13[%c5_329, %c7_330, %c0_331] : memref<8x8x162xf32, #tpu.memory_space<vmem>>, vector<1x1x162xf32>
    %282 = vector.shape_cast %281 : vector<1x1x162xf32> to vector<1x162xf32>
    %283 = arith.maximumf %280, %282 : vector<1x162xf32>
    %284 = arith.maximumf %278, %283 : vector<1x162xf32>
    %c0_332 = arith.constant 0 : index
    %c2754 = arith.constant 2754 : index
    %285 = vector.load %arg14[%c0_332, %c2754] : memref<1x3888xf32, #tpu.memory_space<vmem>>, vector<1x162xf32>
    tpu.vector_store %arg14[%c0_332, %c2754], %284 {strides = array<i32>} : memref<1x3888xf32, #tpu.memory_space<vmem>>, vector<1x162xf32>,
    %c6_333 = arith.constant 6 : index
    %c0_334 = arith.constant 0 : index
    %c0_335 = arith.constant 0 : index
    %286 = vector.load %arg13[%c6_333, %c0_334, %c0_335] : memref<8x8x162xf32, #tpu.memory_space<vmem>>, vector<1x1x162xf32>
    %287 = vector.shape_cast %286 : vector<1x1x162xf32> to vector<1x162xf32>
    %c6_336 = arith.constant 6 : index
    %c1_337 = arith.constant 1 : index
    %c0_338 = arith.constant 0 : index
    %288 = vector.load %arg13[%c6_336, %c1_337, %c0_338] : memref<8x8x162xf32, #tpu.memory_space<vmem>>, vector<1x1x162xf32>
    %289 = vector.shape_cast %288 : vector<1x1x162xf32> to vector<1x162xf32>
    %290 = arith.maximumf %287, %289 : vector<1x162xf32>
    %c6_339 = arith.constant 6 : index
    %c2_340 = arith.constant 2 : index
    %c0_341 = arith.constant 0 : index
    %291 = vector.load %arg13[%c6_339, %c2_340, %c0_341] : memref<8x8x162xf32, #tpu.memory_space<vmem>>, vector<1x1x162xf32>
    %292 = vector.shape_cast %291 : vector<1x1x162xf32> to vector<1x162xf32>
    %c6_342 = arith.constant 6 : index
    %c3_343 = arith.constant 3 : index
    %c0_344 = arith.constant 0 : index
    %293 = vector.load %arg13[%c6_342, %c3_343, %c0_344] : memref<8x8x162xf32, #tpu.memory_space<vmem>>, vector<1x1x162xf32>
    %294 = vector.shape_cast %293 : vector<1x1x162xf32> to vector<1x162xf32>
    %295 = arith.maximumf %292, %294 : vector<1x162xf32>
    %296 = arith.maximumf %290, %295 : vector<1x162xf32>
    %c0_345 = arith.constant 0 : index
    %c2916 = arith.constant 2916 : index
    %297 = vector.load %arg14[%c0_345, %c2916] : memref<1x3888xf32, #tpu.memory_space<vmem>>, vector<1x162xf32>
    tpu.vector_store %arg14[%c0_345, %c2916], %296 {strides = array<i32>} : memref<1x3888xf32, #tpu.memory_space<vmem>>, vector<1x162xf32>,
    %c6_346 = arith.constant 6 : index
    %c2_347 = arith.constant 2 : index
    %c0_348 = arith.constant 0 : index
    %298 = vector.load %arg13[%c6_346, %c2_347, %c0_348] : memref<8x8x162xf32, #tpu.memory_space<vmem>>, vector<1x1x162xf32>
    %299 = vector.shape_cast %298 : vector<1x1x162xf32> to vector<1x162xf32>
    %c6_349 = arith.constant 6 : index
    %c3_350 = arith.constant 3 : index
    %c0_351 = arith.constant 0 : index
    %300 = vector.load %arg13[%c6_349, %c3_350, %c0_351] : memref<8x8x162xf32, #tpu.memory_space<vmem>>, vector<1x1x162xf32>
    %301 = vector.shape_cast %300 : vector<1x1x162xf32> to vector<1x162xf32>
    %302 = arith.maximumf %299, %301 : vector<1x162xf32>
    %c6_352 = arith.constant 6 : index
    %c4_353 = arith.constant 4 : index
    %c0_354 = arith.constant 0 : index
    %303 = vector.load %arg13[%c6_352, %c4_353, %c0_354] : memref<8x8x162xf32, #tpu.memory_space<vmem>>, vector<1x1x162xf32>
    %304 = vector.shape_cast %303 : vector<1x1x162xf32> to vector<1x162xf32>
    %c6_355 = arith.constant 6 : index
    %c5_356 = arith.constant 5 : index
    %c0_357 = arith.constant 0 : index
    %305 = vector.load %arg13[%c6_355, %c5_356, %c0_357] : memref<8x8x162xf32, #tpu.memory_space<vmem>>, vector<1x1x162xf32>
    %306 = vector.shape_cast %305 : vector<1x1x162xf32> to vector<1x162xf32>
    %307 = arith.maximumf %304, %306 : vector<1x162xf32>
    %308 = arith.maximumf %302, %307 : vector<1x162xf32>
    %c0_358 = arith.constant 0 : index
    %c3078 = arith.constant 3078 : index
    %309 = vector.load %arg14[%c0_358, %c3078] : memref<1x3888xf32, #tpu.memory_space<vmem>>, vector<1x162xf32>
    tpu.vector_store %arg14[%c0_358, %c3078], %308 {strides = array<i32>} : memref<1x3888xf32, #tpu.memory_space<vmem>>, vector<1x162xf32>,
    %c6_359 = arith.constant 6 : index
    %c4_360 = arith.constant 4 : index
    %c0_361 = arith.constant 0 : index
    %310 = vector.load %arg13[%c6_359, %c4_360, %c0_361] : memref<8x8x162xf32, #tpu.memory_space<vmem>>, vector<1x1x162xf32>
    %311 = vector.shape_cast %310 : vector<1x1x162xf32> to vector<1x162xf32>
    %c6_362 = arith.constant 6 : index
    %c5_363 = arith.constant 5 : index
    %c0_364 = arith.constant 0 : index
    %312 = vector.load %arg13[%c6_362, %c5_363, %c0_364] : memref<8x8x162xf32, #tpu.memory_space<vmem>>, vector<1x1x162xf32>
    %313 = vector.shape_cast %312 : vector<1x1x162xf32> to vector<1x162xf32>
    %314 = arith.maximumf %311, %313 : vector<1x162xf32>
    %c6_365 = arith.constant 6 : index
    %c6_366 = arith.constant 6 : index
    %c0_367 = arith.constant 0 : index
    %315 = vector.load %arg13[%c6_365, %c6_366, %c0_367] : memref<8x8x162xf32, #tpu.memory_space<vmem>>, vector<1x1x162xf32>
    %316 = vector.shape_cast %315 : vector<1x1x162xf32> to vector<1x162xf32>
    %c6_368 = arith.constant 6 : index
    %c7_369 = arith.constant 7 : index
    %c0_370 = arith.constant 0 : index
    %317 = vector.load %arg13[%c6_368, %c7_369, %c0_370] : memref<8x8x162xf32, #tpu.memory_space<vmem>>, vector<1x1x162xf32>
    %318 = vector.shape_cast %317 : vector<1x1x162xf32> to vector<1x162xf32>
    %319 = arith.maximumf %316, %318 : vector<1x162xf32>
    %320 = arith.maximumf %314, %319 : vector<1x162xf32>
    %c0_371 = arith.constant 0 : index
    %c3240 = arith.constant 3240 : index
    %321 = vector.load %arg14[%c0_371, %c3240] : memref<1x3888xf32, #tpu.memory_space<vmem>>, vector<1x162xf32>
    tpu.vector_store %arg14[%c0_371, %c3240], %320 {strides = array<i32>} : memref<1x3888xf32, #tpu.memory_space<vmem>>, vector<1x162xf32>,
    %c7_372 = arith.constant 7 : index
    %c0_373 = arith.constant 0 : index
    %c0_374 = arith.constant 0 : index
    %322 = vector.load %arg13[%c7_372, %c0_373, %c0_374] : memref<8x8x162xf32, #tpu.memory_space<vmem>>, vector<1x1x162xf32>
    %323 = vector.shape_cast %322 : vector<1x1x162xf32> to vector<1x162xf32>
    %c7_375 = arith.constant 7 : index
    %c1_376 = arith.constant 1 : index
    %c0_377 = arith.constant 0 : index
    %324 = vector.load %arg13[%c7_375, %c1_376, %c0_377] : memref<8x8x162xf32, #tpu.memory_space<vmem>>, vector<1x1x162xf32>
    %325 = vector.shape_cast %324 : vector<1x1x162xf32> to vector<1x162xf32>
    %326 = arith.maximumf %323, %325 : vector<1x162xf32>
    %c7_378 = arith.constant 7 : index
    %c2_379 = arith.constant 2 : index
    %c0_380 = arith.constant 0 : index
    %327 = vector.load %arg13[%c7_378, %c2_379, %c0_380] : memref<8x8x162xf32, #tpu.memory_space<vmem>>, vector<1x1x162xf32>
    %328 = vector.shape_cast %327 : vector<1x1x162xf32> to vector<1x162xf32>
    %c7_381 = arith.constant 7 : index
    %c3_382 = arith.constant 3 : index
    %c0_383 = arith.constant 0 : index
    %329 = vector.load %arg13[%c7_381, %c3_382, %c0_383] : memref<8x8x162xf32, #tpu.memory_space<vmem>>, vector<1x1x162xf32>
    %330 = vector.shape_cast %329 : vector<1x1x162xf32> to vector<1x162xf32>
    %331 = arith.maximumf %328, %330 : vector<1x162xf32>
    %332 = arith.maximumf %326, %331 : vector<1x162xf32>
    %c0_384 = arith.constant 0 : index
    %c3402 = arith.constant 3402 : index
    %333 = vector.load %arg14[%c0_384, %c3402] : memref<1x3888xf32, #tpu.memory_space<vmem>>, vector<1x162xf32>
    tpu.vector_store %arg14[%c0_384, %c3402], %332 {strides = array<i32>} : memref<1x3888xf32, #tpu.memory_space<vmem>>, vector<1x162xf32>,
    %c7_385 = arith.constant 7 : index
    %c2_386 = arith.constant 2 : index
    %c0_387 = arith.constant 0 : index
    %334 = vector.load %arg13[%c7_385, %c2_386, %c0_387] : memref<8x8x162xf32, #tpu.memory_space<vmem>>, vector<1x1x162xf32>
    %335 = vector.shape_cast %334 : vector<1x1x162xf32> to vector<1x162xf32>
    %c7_388 = arith.constant 7 : index
    %c3_389 = arith.constant 3 : index
    %c0_390 = arith.constant 0 : index
    %336 = vector.load %arg13[%c7_388, %c3_389, %c0_390] : memref<8x8x162xf32, #tpu.memory_space<vmem>>, vector<1x1x162xf32>
    %337 = vector.shape_cast %336 : vector<1x1x162xf32> to vector<1x162xf32>
    %338 = arith.maximumf %335, %337 : vector<1x162xf32>
    %c7_391 = arith.constant 7 : index
    %c4_392 = arith.constant 4 : index
    %c0_393 = arith.constant 0 : index
    %339 = vector.load %arg13[%c7_391, %c4_392, %c0_393] : memref<8x8x162xf32, #tpu.memory_space<vmem>>, vector<1x1x162xf32>
    %340 = vector.shape_cast %339 : vector<1x1x162xf32> to vector<1x162xf32>
    %c7_394 = arith.constant 7 : index
    %c5_395 = arith.constant 5 : index
    %c0_396 = arith.constant 0 : index
    %341 = vector.load %arg13[%c7_394, %c5_395, %c0_396] : memref<8x8x162xf32, #tpu.memory_space<vmem>>, vector<1x1x162xf32>
    %342 = vector.shape_cast %341 : vector<1x1x162xf32> to vector<1x162xf32>
    %343 = arith.maximumf %340, %342 : vector<1x162xf32>
    %344 = arith.maximumf %338, %343 : vector<1x162xf32>
    %c0_397 = arith.constant 0 : index
    %c3564 = arith.constant 3564 : index
    %345 = vector.load %arg14[%c0_397, %c3564] : memref<1x3888xf32, #tpu.memory_space<vmem>>, vector<1x162xf32>
    tpu.vector_store %arg14[%c0_397, %c3564], %344 {strides = array<i32>} : memref<1x3888xf32, #tpu.memory_space<vmem>>, vector<1x162xf32>,
    %c7_398 = arith.constant 7 : index
    %c4_399 = arith.constant 4 : index
    %c0_400 = arith.constant 0 : index
    %346 = vector.load %arg13[%c7_398, %c4_399, %c0_400] : memref<8x8x162xf32, #tpu.memory_space<vmem>>, vector<1x1x162xf32>
    %347 = vector.shape_cast %346 : vector<1x1x162xf32> to vector<1x162xf32>
    %c7_401 = arith.constant 7 : index
    %c5_402 = arith.constant 5 : index
    %c0_403 = arith.constant 0 : index
    %348 = vector.load %arg13[%c7_401, %c5_402, %c0_403] : memref<8x8x162xf32, #tpu.memory_space<vmem>>, vector<1x1x162xf32>
    %349 = vector.shape_cast %348 : vector<1x1x162xf32> to vector<1x162xf32>
    %350 = arith.maximumf %347, %349 : vector<1x162xf32>
    %c7_404 = arith.constant 7 : index
    %c6_405 = arith.constant 6 : index
    %c0_406 = arith.constant 0 : index
    %351 = vector.load %arg13[%c7_404, %c6_405, %c0_406] : memref<8x8x162xf32, #tpu.memory_space<vmem>>, vector<1x1x162xf32>
    %352 = vector.shape_cast %351 : vector<1x1x162xf32> to vector<1x162xf32>
    %c7_407 = arith.constant 7 : index
    %c7_408 = arith.constant 7 : index
    %c0_409 = arith.constant 0 : index
    %353 = vector.load %arg13[%c7_407, %c7_408, %c0_409] : memref<8x8x162xf32, #tpu.memory_space<vmem>>, vector<1x1x162xf32>
    %354 = vector.shape_cast %353 : vector<1x1x162xf32> to vector<1x162xf32>
    %355 = arith.maximumf %352, %354 : vector<1x162xf32>
    %356 = arith.maximumf %350, %355 : vector<1x162xf32>
    %c0_410 = arith.constant 0 : index
    %c3726 = arith.constant 3726 : index
    %357 = vector.load %arg14[%c0_410, %c3726] : memref<1x3888xf32, #tpu.memory_space<vmem>>, vector<1x162xf32>
    tpu.vector_store %arg14[%c0_410, %c3726], %356 {strides = array<i32>} : memref<1x3888xf32, #tpu.memory_space<vmem>>, vector<1x162xf32>,
    tpu.wait_dma2 semaphore(%arg16 : memref<!tpu.dma_semaphore, #tpu.memory_space<semaphore_mem>>) src(%arg7 : memref<3888x240xbf16, #tpu.memory_space<any>>) dst(%arg15 : memref<3888x240xbf16, #tpu.memory_space<vmem>>)
    %c0_411 = arith.constant 0 : index
    %c0_412 = arith.constant 0 : index
    %358 = vector.load %arg14[%c0_411, %c0_412] : memref<1x3888xf32, #tpu.memory_space<vmem>>, vector<1x3888xf32>
    %359 = arith.truncf %358 : vector<1x3888xf32> to vector<1x3888xbf16>
    %c0_413 = arith.constant 0 : index
    %c0_414 = arith.constant 0 : index
    %360 = vector.load %arg15[%c0_413, %c0_414] : memref<3888x240xbf16, #tpu.memory_space<vmem>>, vector<3888x240xbf16>
    %cst_415 = arith.constant dense<0.000000e+00> : vector<1x240xf32>
    %361 = tpu.matmul %359, %360, %cst_415 {dimension_numbers = #tpu.dot_dimension_numbers<[1], [0], [0], [1], [0, 0, 1, 1], [], []>} : vector<1x3888xbf16>, vector<3888x240xbf16>, vector<1x240xf32> -> vector<1x240xf32>
    %362 = arith.addf %361, %4 : vector<1x240xf32>
    %c0_416 = arith.constant 0 : index
    %c0_417 = arith.constant 0 : index
    %363 = vector.load %arg5[%c0_416, %c0_417] : memref<240x120xf32, #tpu.memory_space<vmem>>, vector<240x120xf32>
    %cst_418 = arith.constant dense<0.000000e+00> : vector<1x120xf32>
    %364 = tpu.matmul %362, %363, %cst_418 {dimension_numbers = #tpu.dot_dimension_numbers<[1], [0], [0], [1], [0, 0, 1, 1], [], []>} : vector<1x240xf32>, vector<240x120xf32>, vector<1x120xf32> -> vector<1x120xf32>
    %365 = arith.addf %364, %5 : vector<1x120xf32>
    %c0_419 = arith.constant 0 : index
    %c0_420 = arith.constant 0 : index
    %366 = vector.load %arg6[%c0_419, %c0_420] : memref<120x8xf32, #tpu.memory_space<vmem>>, vector<120x8xf32>
    %cst_421 = arith.constant dense<0.000000e+00> : vector<1x8xf32>
    %367 = tpu.matmul %365, %366, %cst_421 {dimension_numbers = #tpu.dot_dimension_numbers<[1], [0], [0], [1], [0, 0, 1, 1], [], []>} : vector<1x120xf32>, vector<120x8xf32>, vector<1x8xf32> -> vector<1x8xf32>
    %368 = arith.addf %367, %6 : vector<1x8xf32>
    %369 = arith.negf %368 : vector<1x8xf32>
    %370 = math.exp %369 : vector<1x8xf32>
    %cst_422 = arith.constant 1.000000e+00 : f32
    %371 = vector.broadcast %cst_422 : f32 to vector<1x8xf32>
    %372 = arith.addf %371, %370 : vector<1x8xf32>
    %373 = arith.divf %371, %372 : vector<1x8xf32>
    %c0_423 = arith.constant 0 : index
    %c0_424 = arith.constant 0 : index
    %374 = vector.load %arg8[%c0_423, %c0_424] : memref<1x8xf32, #tpu.memory_space<vmem>>, vector<1x8xf32>
    tpu.vector_store %arg8[%c0_423, %c0_424], %373 {strides = array<i32>} : memref<1x8xf32, #tpu.memory_space<vmem>>, vector<1x8xf32>,
    return
  }
}

</mosaic_0001>

<bundles_post_ra>
// kernel: bincnn_forward.1
= control target key start
LH: loop header
LB: loop body
LE: loop exit
PB: predicated region body
PF: predicated region fallthrough
CT: control target
= control target key end

     0   :  { %13 = vsyncpa [#allocation11], 0  ;;  %s14641_s17 = smov 12   ;;  %s14642_s18 = smov 6   ;;  %s19537_s0 = inlined_call_operand.vmem [shape: f32[8,60,6], index: 0, kind: input, shape index: {}]   ;;  %s19538_s1 = inlined_call_operand.vmem [shape: f32[30,18], index: 1, kind: input, shape index: {}]   ;;  %s19539_s2 = inlined_call_operand.vmem [shape: f32[90,54], index: 2, kind: input, shape index: {}]   ;;  %s19540_s3 = inlined_call_operand.vmem [shape: f32[162,162], index: 3, kind: input, shape index: {}]   ;;  %s19541_s4 = inlined_call_operand.vmem [shape: f32[8,256], index: 4, kind: input, shape index: {}]   ;;  %s19542_s5 = inlined_call_operand.vmem [shape: f32[240,120], index: 5, kind: input, shape index: {}]   ;;  %s19543_s6 = inlined_call_operand.vmem [shape: f32[120,8], index: 6, kind: input, shape index: {}]   ;;  %s19544_s7 = inlined_call_operand.vmem [shape: bf16[3888,240], index: 7, kind: input, shape index: {}]   ;;  %s19545_s8 = inlined_call_operand.hbm [shape: f32[1,8], index: 8, kind: output, shape index: {}]  }
   0x1   :  { %v46_v0 = vld [vmem:[%s19544_s7] sm:$0xf]  ;;  %v48_v1 = vld [vmem:[%s19544_s7 + $0x8] sm:$0xf]  ;;  %v50_v2 = vld [vmem:[%s19544_s7 + $0x4] sm:$0xf] }
   0x2   :  { %47 = vst [vmem:[#allocation8] sm:$0xf] %v46_v0  ;;  %49 = vst [vmem:[#allocation8 + $0x4] sm:$0xf] %v48_v1  ;;  %v52_v3 = vld [vmem:[%s19544_s7 + $0xc] sm:$0xff]   ;;  %v60_v6 = vld [vmem:[%s19544_s7 + $0x1c] sm:$0xff]  }
   0x3   :  { %v56_v4 = vld [vmem:[%s19544_s7 + $0x18] sm:$0xf]  ;;  %51 = vst [vmem:[#allocation8 + $0x8] sm:$0xf] %v50_v2  ;;  %53 = vst [vmem:[#allocation8 + $0xc] sm:$0xff] %v52_v3   ;;  %v68_v9 = vld [vmem:[%s19544_s7 + $0x2c] sm:$0xff]  }
   0x4   :  { %57 = vst [vmem:[#allocation8 + $0x14] sm:$0xf] %v56_v4  ;;  %v58_v5 = vld [vmem:[%s19544_s7 + $0x14] sm:$0xf]  ;;  %v64_v7 = vld [vmem:[%s19544_s7 + $0x28] sm:$0xf] }
   0x5   :  { %59 = vst [vmem:[#allocation8 + $0x18] sm:$0xf] %v58_v5  ;;  %61 = vst [vmem:[#allocation8 + $0x1c] sm:$0xff] %v60_v6   ;;  %v66_v8 = vld [vmem:[%s19544_s7 + $0x24] sm:$0xf]  ;;  %v76_v12 = vld [vmem:[%s19544_s7 + $0x3c] sm:$0xff]  }
   0x6   :  { %65 = vst [vmem:[#allocation8 + $0x24] sm:$0xf] %v64_v7  ;;  %v72_v10 = vld [vmem:[%s19544_s7 + $0x38] sm:$0xf]  ;;  %67 = vst [vmem:[#allocation8 + $0x28] sm:$0xf] %v66_v8 }
   0x7   :  { %69 = vst [vmem:[#allocation8 + $0x2c] sm:$0xff] %v68_v9   ;;  %73 = vst [vmem:[#allocation8 + $0x34] sm:$0xf] %v72_v10  ;;  %v74_v11 = vld [vmem:[%s19544_s7 + $0x34] sm:$0xf]  ;;  %v84_v15 = vld [vmem:[%s19544_s7 + $0x4c] sm:$0xff]  }
   0x8   :  { %v80_v13 = vld [vmem:[%s19544_s7 + $0x48] sm:$0xf]  ;;  %75 = vst [vmem:[#allocation8 + $0x38] sm:$0xf] %v74_v11  ;;  %77 = vst [vmem:[#allocation8 + $0x3c] sm:$0xff] %v76_v12   ;;  %v92_v18 = vld [vmem:[%s19544_s7 + $0x5c] sm:$0xff]  }
   0x9   :  { %81 = vst [vmem:[#allocation8 + $0x44] sm:$0xf] %v80_v13  ;;  %v82_v14 = vld [vmem:[%s19544_s7 + $0x44] sm:$0xf]  ;;  %v88_v16 = vld [vmem:[%s19544_s7 + $0x58] sm:$0xf] }
   0xa   :  { %83 = vst [vmem:[#allocation8 + $0x48] sm:$0xf] %v82_v14  ;;  %85 = vst [vmem:[#allocation8 + $0x4c] sm:$0xff] %v84_v15   ;;  %v90_v17 = vld [vmem:[%s19544_s7 + $0x54] sm:$0xf]  ;;  %v100_v21 = vld [vmem:[%s19544_s7 + $0x6c] sm:$0xff]  }
   0xb   :  { %89 = vst [vmem:[#allocation8 + $0x54] sm:$0xf] %v88_v16  ;;  %v96_v19 = vld [vmem:[%s19544_s7 + $0x68] sm:$0xf]  ;;  %91 = vst [vmem:[#allocation8 + $0x58] sm:$0xf] %v90_v17 }
   0xc   :  { %93 = vst [vmem:[#allocation8 + $0x5c] sm:$0xff] %v92_v18   ;;  %97 = vst [vmem:[#allocation8 + $0x64] sm:$0xf] %v96_v19  ;;  %v98_v20 = vld [vmem:[%s19544_s7 + $0x64] sm:$0xf]  ;;  %v108_v24 = vld [vmem:[%s19544_s7 + $0x7c] sm:$0xff]  }
   0xd   :  { %v104_v22 = vld [vmem:[%s19544_s7 + $0x78] sm:$0xf]  ;;  %99 = vst [vmem:[#allocation8 + $0x68] sm:$0xf] %v98_v20  ;;  %101 = vst [vmem:[#allocation8 + $0x6c] sm:$0xff] %v100_v21   ;;  %v116_v27 = vld [vmem:[%s19544_s7 + $0x8c] sm:$0xff]  }
   0xe   :  { %105 = vst [vmem:[#allocation8 + $0x74] sm:$0xf] %v104_v22  ;;  %v106_v23 = vld [vmem:[%s19544_s7 + $0x74] sm:$0xf]  ;;  %v112_v25 = vld [vmem:[%s19544_s7 + $0x88] sm:$0xf] }
   0xf   :  { %107 = vst [vmem:[#allocation8 + $0x78] sm:$0xf] %v106_v23  ;;  %109 = vst [vmem:[#allocation8 + $0x7c] sm:$0xff] %v108_v24   ;;  %v114_v26 = vld [vmem:[%s19544_s7 + $0x84] sm:$0xf]  ;;  %v124_v30 = vld [vmem:[%s19544_s7 + $0x9c] sm:$0xff]  }
  0x10   :  { %113 = vst [vmem:[#allocation8 + $0x84] sm:$0xf] %v112_v25  ;;  %v120_v28 = vld [vmem:[%s19544_s7 + $0x98] sm:$0xf]  ;;  %115 = vst [vmem:[#allocation8 + $0x88] sm:$0xf] %v114_v26 }
  0x11   :  { %117 = vst [vmem:[#allocation8 + $0x8c] sm:$0xff] %v116_v27   ;;  %121 = vst [vmem:[#allocation8 + $0x94] sm:$0xf] %v120_v28  ;;  %v122_v29 = vld [vmem:[%s19544_s7 + $0x94] sm:$0xf]  ;;  %v132_v33 = vld [vmem:[%s19544_s7 + $0xac] sm:$0xff]  }
  0x12   :  { %v128_v31 = vld [vmem:[%s19544_s7 + $0xa8] sm:$0xf]  ;;  %123 = vst [vmem:[#allocation8 + $0x98] sm:$0xf] %v122_v29  ;;  %125 = vst [vmem:[#allocation8 + $0x9c] sm:$0xff] %v124_v30   ;;  %v140_v36 = vld [vmem:[%s19544_s7 + $0xbc] sm:$0xff]  }
  0x13   :  { %129 = vst [vmem:[#allocation8 + $0xa4] sm:$0xf] %v128_v31  ;;  %v130_v32 = vld [vmem:[%s19544_s7 + $0xa4] sm:$0xf]  ;;  %v136_v34 = vld [vmem:[%s19544_s7 + $0xb8] sm:$0xf] }
  0x14   :  { %131 = vst [vmem:[#allocation8 + $0xa8] sm:$0xf] %v130_v32  ;;  %133 = vst [vmem:[#allocation8 + $0xac] sm:$0xff] %v132_v33   ;;  %v138_v35 = vld [vmem:[%s19544_s7 + $0xb4] sm:$0xf]  ;;  %v148_v39 = vld [vmem:[%s19544_s7 + $0xcc] sm:$0xff]  }
  0x15   :  { %137 = vst [vmem:[#allocation8 + $0xb4] sm:$0xf] %v136_v34  ;;  %v144_v37 = vld [vmem:[%s19544_s7 + $0xc8] sm:$0xf]  ;;  %139 = vst [vmem:[#allocation8 + $0xb8] sm:$0xf] %v138_v35 }
  0x16   :  { %141 = vst [vmem:[#allocation8 + $0xbc] sm:$0xff] %v140_v36   ;;  %145 = vst [vmem:[#allocation8 + $0xc4] sm:$0xf] %v144_v37  ;;  %v146_v38 = vld [vmem:[%s19544_s7 + $0xc4] sm:$0xf]  ;;  %v156_v42 = vld [vmem:[%s19544_s7 + $0xdc] sm:$0xff]  }
  0x17   :  { %v152_v40 = vld [vmem:[%s19544_s7 + $0xd8] sm:$0xf]  ;;  %147 = vst [vmem:[#allocation8 + $0xc8] sm:$0xf] %v146_v38  ;;  %149 = vst [vmem:[#allocation8 + $0xcc] sm:$0xff] %v148_v39   ;;  %v164_v45 = vld [vmem:[%s19544_s7 + $0xec] sm:$0xff]  }
  0x18   :  { %153 = vst [vmem:[#allocation8 + $0xd4] sm:$0xf] %v152_v40  ;;  %v154_v41 = vld [vmem:[%s19544_s7 + $0xd4] sm:$0xf]  ;;  %v160_v43 = vld [vmem:[%s19544_s7 + $0xe8] sm:$0xf] }
  0x19   :  { %155 = vst [vmem:[#allocation8 + $0xd8] sm:$0xf] %v154_v41  ;;  %157 = vst [vmem:[#allocation8 + $0xdc] sm:$0xff] %v156_v42   ;;  %v162_v44 = vld [vmem:[%s19544_s7 + $0xe4] sm:$0xf]  ;;  %v172_v48 = vld [vmem:[%s19544_s7 + $0xfc] sm:$0xff]  }
  0x1a   :  { %161 = vst [vmem:[#allocation8 + $0xe4] sm:$0xf] %v160_v43  ;;  %v168_v46 = vld [vmem:[%s19544_s7 + $0xf8] sm:$0xf]  ;;  %163 = vst [vmem:[#allocation8 + $0xe8] sm:$0xf] %v162_v44 }
  0x1b   :  { %165 = vst [vmem:[#allocation8 + $0xec] sm:$0xff] %v164_v45   ;;  %169 = vst [vmem:[#allocation8 + $0xf4] sm:$0xf] %v168_v46  ;;  %v170_v47 = vld [vmem:[%s19544_s7 + $0xf4] sm:$0xf]  ;;  %v180_v51 = vld [vmem:[%s19544_s7 + $0x10c] sm:$0xff]  }
  0x1c   :  { %v176_v49 = vld [vmem:[%s19544_s7 + $0x108] sm:$0xf]  ;;  %171 = vst [vmem:[#allocation8 + $0xf8] sm:$0xf] %v170_v47  ;;  %173 = vst [vmem:[#allocation8 + $0xfc] sm:$0xff] %v172_v48   ;;  %v188_v54 = vld [vmem:[%s19544_s7 + $0x11c] sm:$0xff]  }
  0x1d   :  { %177 = vst [vmem:[#allocation8 + $0x104] sm:$0xf] %v176_v49  ;;  %v178_v50 = vld [vmem:[%s19544_s7 + $0x104] sm:$0xf]  ;;  %v184_v52 = vld [vmem:[%s19544_s7 + $0x118] sm:$0xf] }
  0x1e   :  { %179 = vst [vmem:[#allocation8 + $0x108] sm:$0xf] %v178_v50  ;;  %181 = vst [vmem:[#allocation8 + $0x10c] sm:$0xff] %v180_v51   ;;  %v186_v53 = vld [vmem:[%s19544_s7 + $0x114] sm:$0xf]  ;;  %v196_v57 = vld [vmem:[%s19544_s7 + $0x12c] sm:$0xff]  }
  0x1f   :  { %185 = vst [vmem:[#allocation8 + $0x114] sm:$0xf] %v184_v52  ;;  %v192_v55 = vld [vmem:[%s19544_s7 + $0x128] sm:$0xf]  ;;  %187 = vst [vmem:[#allocation8 + $0x118] sm:$0xf] %v186_v53 }
  0x20   :  { %189 = vst [vmem:[#allocation8 + $0x11c] sm:$0xff] %v188_v54   ;;  %193 = vst [vmem:[#allocation8 + $0x124] sm:$0xf] %v192_v55  ;;  %v194_v56 = vld [vmem:[%s19544_s7 + $0x124] sm:$0xf]  ;;  %v204_v60 = vld [vmem:[%s19544_s7 + $0x13c] sm:$0xff]  }
  0x21   :  { %v200_v58 = vld [vmem:[%s19544_s7 + $0x138] sm:$0xf]  ;;  %195 = vst [vmem:[#allocation8 + $0x128] sm:$0xf] %v194_v56  ;;  %197 = vst [vmem:[#allocation8 + $0x12c] sm:$0xff] %v196_v57   ;;  %v212_v63 = vld [vmem:[%s19544_s7 + $0x14c] sm:$0xff]  }
  0x22   :  { %201 = vst [vmem:[#allocation8 + $0x134] sm:$0xf] %v200_v58  ;;  %v202_v59 = vld [vmem:[%s19544_s7 + $0x134] sm:$0xf]  ;;  %v208_v61 = vld [vmem:[%s19544_s7 + $0x148] sm:$0xf] }
  0x23   :  { %203 = vst [vmem:[#allocation8 + $0x138] sm:$0xf] %v202_v59  ;;  %205 = vst [vmem:[#allocation8 + $0x13c] sm:$0xff] %v204_v60   ;;  %v210_v62 = vld [vmem:[%s19544_s7 + $0x144] sm:$0xf]  ;;  %v220_v2 = vld [vmem:[%s19544_s7 + $0x15c] sm:$0xff]  }
  0x24   :  { %209 = vst [vmem:[#allocation8 + $0x144] sm:$0xf] %v208_v61  ;;  %v216_v0 = vld [vmem:[%s19544_s7 + $0x158] sm:$0xf]  ;;  %211 = vst [vmem:[#allocation8 + $0x148] sm:$0xf] %v210_v62 }
  0x25   :  { %213 = vst [vmem:[#allocation8 + $0x14c] sm:$0xff] %v212_v63   ;;  %217 = vst [vmem:[#allocation8 + $0x154] sm:$0xf] %v216_v0  ;;  %v218_v1 = vld [vmem:[%s19544_s7 + $0x154] sm:$0xf]  ;;  %v228_v5 = vld [vmem:[%s19544_s7 + $0x16c] sm:$0xff]  }
  0x26   :  { %v224_v3 = vld [vmem:[%s19544_s7 + $0x168] sm:$0xf]  ;;  %219 = vst [vmem:[#allocation8 + $0x158] sm:$0xf] %v218_v1  ;;  %221 = vst [vmem:[#allocation8 + $0x15c] sm:$0xff] %v220_v2   ;;  %v236_v8 = vld [vmem:[%s19544_s7 + $0x17c] sm:$0xff]  }
  0x27   :  { %225 = vst [vmem:[#allocation8 + $0x164] sm:$0xf] %v224_v3  ;;  %v226_v4 = vld [vmem:[%s19544_s7 + $0x164] sm:$0xf]  ;;  %v232_v6 = vld [vmem:[%s19544_s7 + $0x178] sm:$0xf] }
  0x28   :  { %227 = vst [vmem:[#allocation8 + $0x168] sm:$0xf] %v226_v4  ;;  %229 = vst [vmem:[#allocation8 + $0x16c] sm:$0xff] %v228_v5   ;;  %v234_v7 = vld [vmem:[%s19544_s7 + $0x174] sm:$0xf]  ;;  %v244_v11 = vld [vmem:[%s19544_s7 + $0x18c] sm:$0xff]  }
  0x29   :  { %233 = vst [vmem:[#allocation8 + $0x174] sm:$0xf] %v232_v6  ;;  %v240_v9 = vld [vmem:[%s19544_s7 + $0x188] sm:$0xf]  ;;  %235 = vst [vmem:[#allocation8 + $0x178] sm:$0xf] %v234_v7 }
  0x2a   :  { %237 = vst [vmem:[#allocation8 + $0x17c] sm:$0xff] %v236_v8   ;;  %241 = vst [vmem:[#allocation8 + $0x184] sm:$0xf] %v240_v9  ;;  %v242_v10 = vld [vmem:[%s19544_s7 + $0x184] sm:$0xf]  ;;  %v252_v14 = vld [vmem:[%s19544_s7 + $0x19c] sm:$0xff]  }
  0x2b   :  { %v248_v12 = vld [vmem:[%s19544_s7 + $0x198] sm:$0xf]  ;;  %243 = vst [vmem:[#allocation8 + $0x188] sm:$0xf] %v242_v10  ;;  %245 = vst [vmem:[#allocation8 + $0x18c] sm:$0xff] %v244_v11   ;;  %v260_v17 = vld [vmem:[%s19544_s7 + $0x1ac] sm:$0xff]  }
  0x2c   :  { %249 = vst [vmem:[#allocation8 + $0x194] sm:$0xf] %v248_v12  ;;  %v250_v13 = vld [vmem:[%s19544_s7 + $0x194] sm:$0xf]  ;;  %v256_v15 = vld [vmem:[%s19544_s7 + $0x1a8] sm:$0xf] }
  0x2d   :  { %251 = vst [vmem:[#allocation8 + $0x198] sm:$0xf] %v250_v13  ;;  %253 = vst [vmem:[#allocation8 + $0x19c] sm:$0xff] %v252_v14   ;;  %v258_v16 = vld [vmem:[%s19544_s7 + $0x1a4] sm:$0xf]  ;;  %v268_v20 = vld [vmem:[%s19544_s7 + $0x1bc] sm:$0xff]  }
  0x2e   :  { %257 = vst [vmem:[#allocation8 + $0x1a4] sm:$0xf] %v256_v15  ;;  %v264_v18 = vld [vmem:[%s19544_s7 + $0x1b8] sm:$0xf]  ;;  %259 = vst [vmem:[#allocation8 + $0x1a8] sm:$0xf] %v258_v16 }
  0x2f   :  { %261 = vst [vmem:[#allocation8 + $0x1ac] sm:$0xff] %v260_v17   ;;  %265 = vst [vmem:[#allocation8 + $0x1b4] sm:$0xf] %v264_v18  ;;  %v266_v19 = vld [vmem:[%s19544_s7 + $0x1b4] sm:$0xf]  ;;  %v276_v23 = vld [vmem:[%s19544_s7 + $0x1cc] sm:$0xff]  }
  0x30   :  { %v272_v21 = vld [vmem:[%s19544_s7 + $0x1c8] sm:$0xf]  ;;  %267 = vst [vmem:[#allocation8 + $0x1b8] sm:$0xf] %v266_v19  ;;  %269 = vst [vmem:[#allocation8 + $0x1bc] sm:$0xff] %v268_v20   ;;  %v284_v26 = vld [vmem:[%s19544_s7 + $0x1dc] sm:$0xff]  }
  0x31   :  { %273 = vst [vmem:[#allocation8 + $0x1c4] sm:$0xf] %v272_v21  ;;  %v274_v22 = vld [vmem:[%s19544_s7 + $0x1c4] sm:$0xf]  ;;  %v280_v24 = vld [vmem:[%s19544_s7 + $0x1d8] sm:$0xf] }
  0x32   :  { %275 = vst [vmem:[#allocation8 + $0x1c8] sm:$0xf] %v274_v22  ;;  %277 = vst [vmem:[#allocation8 + $0x1cc] sm:$0xff] %v276_v23   ;;  %v282_v25 = vld [vmem:[%s19544_s7 + $0x1d4] sm:$0xf]  ;;  %v292_v29 = vld [vmem:[%s19544_s7 + $0x1ec] sm:$0xff]  }
  0x33   :  { %281 = vst [vmem:[#allocation8 + $0x1d4] sm:$0xf] %v280_v24  ;;  %v288_v27 = vld [vmem:[%s19544_s7 + $0x1e8] sm:$0xf]  ;;  %283 = vst [vmem:[#allocation8 + $0x1d8] sm:$0xf] %v282_v25 }
  0x34   :  { %285 = vst [vmem:[#allocation8 + $0x1dc] sm:$0xff] %v284_v26   ;;  %289 = vst [vmem:[#allocation8 + $0x1e4] sm:$0xf] %v288_v27  ;;  %v290_v28 = vld [vmem:[%s19544_s7 + $0x1e4] sm:$0xf]  ;;  %v300_v32 = vld [vmem:[%s19544_s7 + $0x1fc] sm:$0xff]  }
  0x35   :  { %v296_v30 = vld [vmem:[%s19544_s7 + $0x1f8] sm:$0xf]  ;;  %291 = vst [vmem:[#allocation8 + $0x1e8] sm:$0xf] %v290_v28  ;;  %293 = vst [vmem:[#allocation8 + $0x1ec] sm:$0xff] %v292_v29   ;;  %v308_v35 = vld [vmem:[%s19544_s7 + $0x20c] sm:$0xff]  }
  0x36   :  { %297 = vst [vmem:[#allocation8 + $0x1f4] sm:$0xf] %v296_v30  ;;  %v298_v31 = vld [vmem:[%s19544_s7 + $0x1f4] sm:$0xf]  ;;  %v304_v33 = vld [vmem:[%s19544_s7 + $0x208] sm:$0xf] }
  0x37   :  { %299 = vst [vmem:[#allocation8 + $0x1f8] sm:$0xf] %v298_v31  ;;  %301 = vst [vmem:[#allocation8 + $0x1fc] sm:$0xff] %v300_v32   ;;  %v306_v34 = vld [vmem:[%s19544_s7 + $0x204] sm:$0xf]  ;;  %v316_v38 = vld [vmem:[%s19544_s7 + $0x21c] sm:$0xff]  }
  0x38   :  { %305 = vst [vmem:[#allocation8 + $0x204] sm:$0xf] %v304_v33  ;;  %v312_v36 = vld [vmem:[%s19544_s7 + $0x218] sm:$0xf]  ;;  %307 = vst [vmem:[#allocation8 + $0x208] sm:$0xf] %v306_v34 }
  0x39   :  { %309 = vst [vmem:[#allocation8 + $0x20c] sm:$0xff] %v308_v35   ;;  %313 = vst [vmem:[#allocation8 + $0x214] sm:$0xf] %v312_v36  ;;  %v314_v37 = vld [vmem:[%s19544_s7 + $0x214] sm:$0xf]  ;;  %v324_v41 = vld [vmem:[%s19544_s7 + $0x22c] sm:$0xff]  }
  0x3a   :  { %v320_v39 = vld [vmem:[%s19544_s7 + $0x228] sm:$0xf]  ;;  %315 = vst [vmem:[#allocation8 + $0x218] sm:$0xf] %v314_v37  ;;  %317 = vst [vmem:[#allocation8 + $0x21c] sm:$0xff] %v316_v38   ;;  %v332_v44 = vld [vmem:[%s19544_s7 + $0x23c] sm:$0xff]  }
  0x3b   :  { %321 = vst [vmem:[#allocation8 + $0x224] sm:$0xf] %v320_v39  ;;  %v322_v40 = vld [vmem:[%s19544_s7 + $0x224] sm:$0xf]  ;;  %v328_v42 = vld [vmem:[%s19544_s7 + $0x238] sm:$0xf] }
  0x3c   :  { %323 = vst [vmem:[#allocation8 + $0x228] sm:$0xf] %v322_v40  ;;  %325 = vst [vmem:[#allocation8 + $0x22c] sm:$0xff] %v324_v41   ;;  %v330_v43 = vld [vmem:[%s19544_s7 + $0x234] sm:$0xf]  ;;  %v340_v47 = vld [vmem:[%s19544_s7 + $0x24c] sm:$0xff]  }
  0x3d   :  { %329 = vst [vmem:[#allocation8 + $0x234] sm:$0xf] %v328_v42  ;;  %v336_v45 = vld [vmem:[%s19544_s7 + $0x248] sm:$0xf]  ;;  %331 = vst [vmem:[#allocation8 + $0x238] sm:$0xf] %v330_v43 }
  0x3e   :  { %333 = vst [vmem:[#allocation8 + $0x23c] sm:$0xff] %v332_v44   ;;  %337 = vst [vmem:[#allocation8 + $0x244] sm:$0xf] %v336_v45  ;;  %v338_v46 = vld [vmem:[%s19544_s7 + $0x244] sm:$0xf]  ;;  %v348_v50 = vld [vmem:[%s19544_s7 + $0x25c] sm:$0xff]  }
  0x3f   :  { %v344_v48 = vld [vmem:[%s19544_s7 + $0x258] sm:$0xf]  ;;  %339 = vst [vmem:[#allocation8 + $0x248] sm:$0xf] %v338_v46  ;;  %341 = vst [vmem:[#allocation8 + $0x24c] sm:$0xff] %v340_v47   ;;  %v356_v53 = vld [vmem:[%s19544_s7 + $0x26c] sm:$0xff]  }
  0x40   :  { %345 = vst [vmem:[#allocation8 + $0x254] sm:$0xf] %v344_v48  ;;  %v346_v49 = vld [vmem:[%s19544_s7 + $0x254] sm:$0xf]  ;;  %v352_v51 = vld [vmem:[%s19544_s7 + $0x268] sm:$0xf] }
  0x41   :  { %347 = vst [vmem:[#allocation8 + $0x258] sm:$0xf] %v346_v49  ;;  %349 = vst [vmem:[#allocation8 + $0x25c] sm:$0xff] %v348_v50   ;;  %v354_v52 = vld [vmem:[%s19544_s7 + $0x264] sm:$0xf]  ;;  %v364_v56 = vld [vmem:[%s19544_s7 + $0x27c] sm:$0xff]  }
  0x42   :  { %353 = vst [vmem:[#allocation8 + $0x264] sm:$0xf] %v352_v51  ;;  %v360_v54 = vld [vmem:[%s19544_s7 + $0x278] sm:$0xf]  ;;  %355 = vst [vmem:[#allocation8 + $0x268] sm:$0xf] %v354_v52 }
  0x43   :  { %357 = vst [vmem:[#allocation8 + $0x26c] sm:$0xff] %v356_v53   ;;  %361 = vst [vmem:[#allocation8 + $0x274] sm:$0xf] %v360_v54  ;;  %v362_v55 = vld [vmem:[%s19544_s7 + $0x274] sm:$0xf]  ;;  %v372_v59 = vld [vmem:[%s19544_s7 + $0x28c] sm:$0xff]  }
  0x44   :  { %v368_v57 = vld [vmem:[%s19544_s7 + $0x288] sm:$0xf]  ;;  %363 = vst [vmem:[#allocation8 + $0x278] sm:$0xf] %v362_v55  ;;  %365 = vst [vmem:[#allocation8 + $0x27c] sm:$0xff] %v364_v56   ;;  %v380_v62 = vld [vmem:[%s19544_s7 + $0x29c] sm:$0xff]  }
  0x45   :  { %369 = vst [vmem:[#allocation8 + $0x284] sm:$0xf] %v368_v57  ;;  %v370_v58 = vld [vmem:[%s19544_s7 + $0x284] sm:$0xf]  ;;  %v376_v60 = vld [vmem:[%s19544_s7 + $0x298] sm:$0xf] }
  0x46   :  { %371 = vst [vmem:[#allocation8 + $0x288] sm:$0xf] %v370_v58  ;;  %373 = vst [vmem:[#allocation8 + $0x28c] sm:$0xff] %v372_v59   ;;  %v378_v61 = vld [vmem:[%s19544_s7 + $0x294] sm:$0xf]  ;;  %v388_v1 = vld [vmem:[%s19544_s7 + $0x2ac] sm:$0xff]  }
  0x47   :  { %377 = vst [vmem:[#allocation8 + $0x294] sm:$0xf] %v376_v60  ;;  %v384_v63 = vld [vmem:[%s19544_s7 + $0x2a8] sm:$0xf]  ;;  %379 = vst [vmem:[#allocation8 + $0x298] sm:$0xf] %v378_v61 }
  0x48   :  { %381 = vst [vmem:[#allocation8 + $0x29c] sm:$0xff] %v380_v62   ;;  %385 = vst [vmem:[#allocation8 + $0x2a4] sm:$0xf] %v384_v63  ;;  %v386_v0 = vld [vmem:[%s19544_s7 + $0x2a4] sm:$0xf]  ;;  %v396_v4 = vld [vmem:[%s19544_s7 + $0x2bc] sm:$0xff]  }
  0x49   :  { %v392_v2 = vld [vmem:[%s19544_s7 + $0x2b8] sm:$0xf]  ;;  %387 = vst [vmem:[#allocation8 + $0x2a8] sm:$0xf] %v386_v0  ;;  %389 = vst [vmem:[#allocation8 + $0x2ac] sm:$0xff] %v388_v1   ;;  %v404_v7 = vld [vmem:[%s19544_s7 + $0x2cc] sm:$0xff]  }
  0x4a   :  { %393 = vst [vmem:[#allocation8 + $0x2b4] sm:$0xf] %v392_v2  ;;  %v394_v3 = vld [vmem:[%s19544_s7 + $0x2b4] sm:$0xf]  ;;  %v400_v5 = vld [vmem:[%s19544_s7 + $0x2c8] sm:$0xf] }
  0x4b   :  { %395 = vst [vmem:[#allocation8 + $0x2b8] sm:$0xf] %v394_v3  ;;  %397 = vst [vmem:[#allocation8 + $0x2bc] sm:$0xff] %v396_v4   ;;  %v402_v6 = vld [vmem:[%s19544_s7 + $0x2c4] sm:$0xf]  ;;  %v412_v10 = vld [vmem:[%s19544_s7 + $0x2dc] sm:$0xff]  }
  0x4c   :  { %401 = vst [vmem:[#allocation8 + $0x2c4] sm:$0xf] %v400_v5  ;;  %v408_v8 = vld [vmem:[%s19544_s7 + $0x2d8] sm:$0xf]  ;;  %403 = vst [vmem:[#allocation8 + $0x2c8] sm:$0xf] %v402_v6 }
  0x4d   :  { %405 = vst [vmem:[#allocation8 + $0x2cc] sm:$0xff] %v404_v7   ;;  %409 = vst [vmem:[#allocation8 + $0x2d4] sm:$0xf] %v408_v8  ;;  %v410_v9 = vld [vmem:[%s19544_s7 + $0x2d4] sm:$0xf]  ;;  %v420_v13 = vld [vmem:[%s19544_s7 + $0x2ec] sm:$0xff]  }
  0x4e   :  { %v416_v11 = vld [vmem:[%s19544_s7 + $0x2e8] sm:$0xf]  ;;  %411 = vst [vmem:[#allocation8 + $0x2d8] sm:$0xf] %v410_v9  ;;  %413 = vst [vmem:[#allocation8 + $0x2dc] sm:$0xff] %v412_v10   ;;  %v428_v16 = vld [vmem:[%s19544_s7 + $0x2fc] sm:$0xff]  }
  0x4f   :  { %417 = vst [vmem:[#allocation8 + $0x2e4] sm:$0xf] %v416_v11  ;;  %v418_v12 = vld [vmem:[%s19544_s7 + $0x2e4] sm:$0xf]  ;;  %v424_v14 = vld [vmem:[%s19544_s7 + $0x2f8] sm:$0xf] }
  0x50   :  { %419 = vst [vmem:[#allocation8 + $0x2e8] sm:$0xf] %v418_v12  ;;  %421 = vst [vmem:[#allocation8 + $0x2ec] sm:$0xff] %v420_v13   ;;  %v426_v15 = vld [vmem:[%s19544_s7 + $0x2f4] sm:$0xf]  ;;  %v436_v19 = vld [vmem:[%s19544_s7 + $0x30c] sm:$0xff]  }
  0x51   :  { %425 = vst [vmem:[#allocation8 + $0x2f4] sm:$0xf] %v424_v14  ;;  %v432_v17 = vld [vmem:[%s19544_s7 + $0x308] sm:$0xf]  ;;  %427 = vst [vmem:[#allocation8 + $0x2f8] sm:$0xf] %v426_v15 }
  0x52   :  { %429 = vst [vmem:[#allocation8 + $0x2fc] sm:$0xff] %v428_v16   ;;  %433 = vst [vmem:[#allocation8 + $0x304] sm:$0xf] %v432_v17  ;;  %v434_v18 = vld [vmem:[%s19544_s7 + $0x304] sm:$0xf]  ;;  %v444_v22 = vld [vmem:[%s19544_s7 + $0x31c] sm:$0xff]  }
  0x53   :  { %v440_v20 = vld [vmem:[%s19544_s7 + $0x318] sm:$0xf]  ;;  %435 = vst [vmem:[#allocation8 + $0x308] sm:$0xf] %v434_v18  ;;  %437 = vst [vmem:[#allocation8 + $0x30c] sm:$0xff] %v436_v19   ;;  %v452_v25 = vld [vmem:[%s19544_s7 + $0x32c] sm:$0xff]  }
  0x54   :  { %441 = vst [vmem:[#allocation8 + $0x314] sm:$0xf] %v440_v20  ;;  %v442_v21 = vld [vmem:[%s19544_s7 + $0x314] sm:$0xf]  ;;  %v448_v23 = vld [vmem:[%s19544_s7 + $0x328] sm:$0xf] }
  0x55   :  { %443 = vst [vmem:[#allocation8 + $0x318] sm:$0xf] %v442_v21  ;;  %445 = vst [vmem:[#allocation8 + $0x31c] sm:$0xff] %v444_v22   ;;  %v450_v24 = vld [vmem:[%s19544_s7 + $0x324] sm:$0xf]  ;;  %v460_v28 = vld [vmem:[%s19544_s7 + $0x33c] sm:$0xff]  }
  0x56   :  { %449 = vst [vmem:[#allocation8 + $0x324] sm:$0xf] %v448_v23  ;;  %v456_v26 = vld [vmem:[%s19544_s7 + $0x338] sm:$0xf]  ;;  %451 = vst [vmem:[#allocation8 + $0x328] sm:$0xf] %v450_v24 }
  0x57   :  { %453 = vst [vmem:[#allocation8 + $0x32c] sm:$0xff] %v452_v25   ;;  %457 = vst [vmem:[#allocation8 + $0x334] sm:$0xf] %v456_v26  ;;  %v458_v27 = vld [vmem:[%s19544_s7 + $0x334] sm:$0xf]  ;;  %v468_v31 = vld [vmem:[%s19544_s7 + $0x34c] sm:$0xff]  }
  0x58   :  { %v464_v29 = vld [vmem:[%s19544_s7 + $0x348] sm:$0xf]  ;;  %459 = vst [vmem:[#allocation8 + $0x338] sm:$0xf] %v458_v27  ;;  %461 = vst [vmem:[#allocation8 + $0x33c] sm:$0xff] %v460_v28   ;;  %v476_v34 = vld [vmem:[%s19544_s7 + $0x35c] sm:$0xff]  }
  0x59   :  { %465 = vst [vmem:[#allocation8 + $0x344] sm:$0xf] %v464_v29  ;;  %v466_v30 = vld [vmem:[%s19544_s7 + $0x344] sm:$0xf]  ;;  %v472_v32 = vld [vmem:[%s19544_s7 + $0x358] sm:$0xf] }
  0x5a   :  { %467 = vst [vmem:[#allocation8 + $0x348] sm:$0xf] %v466_v30  ;;  %469 = vst [vmem:[#allocation8 + $0x34c] sm:$0xff] %v468_v31   ;;  %v474_v33 = vld [vmem:[%s19544_s7 + $0x354] sm:$0xf]  ;;  %v484_v37 = vld [vmem:[%s19544_s7 + $0x36c] sm:$0xff]  }
  0x5b   :  { %473 = vst [vmem:[#allocation8 + $0x354] sm:$0xf] %v472_v32  ;;  %v480_v35 = vld [vmem:[%s19544_s7 + $0x368] sm:$0xf]  ;;  %475 = vst [vmem:[#allocation8 + $0x358] sm:$0xf] %v474_v33 }
  0x5c   :  { %477 = vst [vmem:[#allocation8 + $0x35c] sm:$0xff] %v476_v34   ;;  %481 = vst [vmem:[#allocation8 + $0x364] sm:$0xf] %v480_v35  ;;  %v482_v36 = vld [vmem:[%s19544_s7 + $0x364] sm:$0xf]  ;;  %v492_v40 = vld [vmem:[%s19544_s7 + $0x37c] sm:$0xff]  }
  0x5d   :  { %v488_v38 = vld [vmem:[%s19544_s7 + $0x378] sm:$0xf]  ;;  %483 = vst [vmem:[#allocation8 + $0x368] sm:$0xf] %v482_v36  ;;  %485 = vst [vmem:[#allocation8 + $0x36c] sm:$0xff] %v484_v37   ;;  %v500_v43 = vld [vmem:[%s19544_s7 + $0x38c] sm:$0xff]  }
  0x5e   :  { %489 = vst [vmem:[#allocation8 + $0x374] sm:$0xf] %v488_v38  ;;  %v490_v39 = vld [vmem:[%s19544_s7 + $0x374] sm:$0xf]  ;;  %v496_v41 = vld [vmem:[%s19544_s7 + $0x388] sm:$0xf] }
  0x5f   :  { %491 = vst [vmem:[#allocation8 + $0x378] sm:$0xf] %v490_v39  ;;  %493 = vst [vmem:[#allocation8 + $0x37c] sm:$0xff] %v492_v40   ;;  %v498_v42 = vld [vmem:[%s19544_s7 + $0x384] sm:$0xf]  ;;  %v508_v46 = vld [vmem:[%s19544_s7 + $0x39c] sm:$0xff]  }
  0x60   :  { %497 = vst [vmem:[#allocation8 + $0x384] sm:$0xf] %v496_v41  ;;  %v504_v44 = vld [vmem:[%s19544_s7 + $0x398] sm:$0xf]  ;;  %499 = vst [vmem:[#allocation8 + $0x388] sm:$0xf] %v498_v42 }
  0x61   :  { %501 = vst [vmem:[#allocation8 + $0x38c] sm:$0xff] %v500_v43   ;;  %505 = vst [vmem:[#allocation8 + $0x394] sm:$0xf] %v504_v44  ;;  %v506_v45 = vld [vmem:[%s19544_s7 + $0x394] sm:$0xf]  ;;  %v516_v49 = vld [vmem:[%s19544_s7 + $0x3ac] sm:$0xff]  }
  0x62   :  { %v512_v47 = vld [vmem:[%s19544_s7 + $0x3a8] sm:$0xf]  ;;  %507 = vst [vmem:[#allocation8 + $0x398] sm:$0xf] %v506_v45  ;;  %509 = vst [vmem:[#allocation8 + $0x39c] sm:$0xff] %v508_v46   ;;  %v524_v52 = vld [vmem:[%s19544_s7 + $0x3bc] sm:$0xff]  }
  0x63   :  { %513 = vst [vmem:[#allocation8 + $0x3a4] sm:$0xf] %v512_v47  ;;  %v514_v48 = vld [vmem:[%s19544_s7 + $0x3a4] sm:$0xf]  ;;  %v520_v50 = vld [vmem:[%s19544_s7 + $0x3b8] sm:$0xf] }
  0x64   :  { %515 = vst [vmem:[#allocation8 + $0x3a8] sm:$0xf] %v514_v48  ;;  %517 = vst [vmem:[#allocation8 + $0x3ac] sm:$0xff] %v516_v49   ;;  %v522_v51 = vld [vmem:[%s19544_s7 + $0x3b4] sm:$0xf]  ;;  %v532_v55 = vld [vmem:[%s19544_s7 + $0x3cc] sm:$0xff]  }
  0x65   :  { %521 = vst [vmem:[#allocation8 + $0x3b4] sm:$0xf] %v520_v50  ;;  %v528_v53 = vld [vmem:[%s19544_s7 + $0x3c8] sm:$0xf]  ;;  %523 = vst [vmem:[#allocation8 + $0x3b8] sm:$0xf] %v522_v51 }
  0x66   :  { %525 = vst [vmem:[#allocation8 + $0x3bc] sm:$0xff] %v524_v52   ;;  %529 = vst [vmem:[#allocation8 + $0x3c4] sm:$0xf] %v528_v53  ;;  %v530_v54 = vld [vmem:[%s19544_s7 + $0x3c4] sm:$0xf]  ;;  %v540_v58 = vld [vmem:[%s19544_s7 + $0x3dc] sm:$0xff]  }
  0x67   :  { %v536_v56 = vld [vmem:[%s19544_s7 + $0x3d8] sm:$0xf]  ;;  %531 = vst [vmem:[#allocation8 + $0x3c8] sm:$0xf] %v530_v54  ;;  %533 = vst [vmem:[#allocation8 + $0x3cc] sm:$0xff] %v532_v55   ;;  %v548_v61 = vld [vmem:[%s19544_s7 + $0x3ec] sm:$0xff]  }
  0x68   :  { %537 = vst [vmem:[#allocation8 + $0x3d4] sm:$0xf] %v536_v56  ;;  %v538_v57 = vld [vmem:[%s19544_s7 + $0x3d4] sm:$0xf]  ;;  %v544_v59 = vld [vmem:[%s19544_s7 + $0x3e8] sm:$0xf] }
  0x69   :  { %539 = vst [vmem:[#allocation8 + $0x3d8] sm:$0xf] %v538_v57  ;;  %541 = vst [vmem:[#allocation8 + $0x3dc] sm:$0xff] %v540_v58   ;;  %v546_v60 = vld [vmem:[%s19544_s7 + $0x3e4] sm:$0xf]  ;;  %v556_v0 = vld [vmem:[%s19544_s7 + $0x3fc] sm:$0xff]  }
  0x6a   :  { %545 = vst [vmem:[#allocation8 + $0x3e4] sm:$0xf] %v544_v59  ;;  %v552_v62 = vld [vmem:[%s19544_s7 + $0x3f8] sm:$0xf]  ;;  %547 = vst [vmem:[#allocation8 + $0x3e8] sm:$0xf] %v546_v60 }
  0x6b   :  { %549 = vst [vmem:[#allocation8 + $0x3ec] sm:$0xff] %v548_v61   ;;  %553 = vst [vmem:[#allocation8 + $0x3f4] sm:$0xf] %v552_v62  ;;  %v554_v63 = vld [vmem:[%s19544_s7 + $0x3f4] sm:$0xf]  ;;  %v564_v3 = vld [vmem:[%s19544_s7 + $0x40c] sm:$0xff]  }
  0x6c   :  { %v560_v1 = vld [vmem:[%s19544_s7 + $0x408] sm:$0xf]  ;;  %555 = vst [vmem:[#allocation8 + $0x3f8] sm:$0xf] %v554_v63  ;;  %557 = vst [vmem:[#allocation8 + $0x3fc] sm:$0xff] %v556_v0   ;;  %v572_v6 = vld [vmem:[%s19544_s7 + $0x41c] sm:$0xff]  }
  0x6d   :  { %561 = vst [vmem:[#allocation8 + $0x404] sm:$0xf] %v560_v1  ;;  %v562_v2 = vld [vmem:[%s19544_s7 + $0x404] sm:$0xf]  ;;  %v568_v4 = vld [vmem:[%s19544_s7 + $0x418] sm:$0xf] }
  0x6e   :  { %563 = vst [vmem:[#allocation8 + $0x408] sm:$0xf] %v562_v2  ;;  %565 = vst [vmem:[#allocation8 + $0x40c] sm:$0xff] %v564_v3   ;;  %v570_v5 = vld [vmem:[%s19544_s7 + $0x414] sm:$0xf]  ;;  %v580_v9 = vld [vmem:[%s19544_s7 + $0x42c] sm:$0xff]  }
  0x6f   :  { %569 = vst [vmem:[#allocation8 + $0x414] sm:$0xf] %v568_v4  ;;  %v576_v7 = vld [vmem:[%s19544_s7 + $0x428] sm:$0xf]  ;;  %571 = vst [vmem:[#allocation8 + $0x418] sm:$0xf] %v570_v5 }
  0x70   :  { %573 = vst [vmem:[#allocation8 + $0x41c] sm:$0xff] %v572_v6   ;;  %577 = vst [vmem:[#allocation8 + $0x424] sm:$0xf] %v576_v7  ;;  %v578_v8 = vld [vmem:[%s19544_s7 + $0x424] sm:$0xf]  ;;  %v588_v12 = vld [vmem:[%s19544_s7 + $0x43c] sm:$0xff]  }
  0x71   :  { %v584_v10 = vld [vmem:[%s19544_s7 + $0x438] sm:$0xf]  ;;  %579 = vst [vmem:[#allocation8 + $0x428] sm:$0xf] %v578_v8  ;;  %581 = vst [vmem:[#allocation8 + $0x42c] sm:$0xff] %v580_v9   ;;  %v596_v15 = vld [vmem:[%s19544_s7 + $0x44c] sm:$0xff]  }
  0x72   :  { %585 = vst [vmem:[#allocation8 + $0x434] sm:$0xf] %v584_v10  ;;  %v586_v11 = vld [vmem:[%s19544_s7 + $0x434] sm:$0xf]  ;;  %v592_v13 = vld [vmem:[%s19544_s7 + $0x448] sm:$0xf] }
  0x73   :  { %587 = vst [vmem:[#allocation8 + $0x438] sm:$0xf] %v586_v11  ;;  %589 = vst [vmem:[#allocation8 + $0x43c] sm:$0xff] %v588_v12   ;;  %v594_v14 = vld [vmem:[%s19544_s7 + $0x444] sm:$0xf]  ;;  %v604_v18 = vld [vmem:[%s19544_s7 + $0x45c] sm:$0xff]  }
  0x74   :  { %593 = vst [vmem:[#allocation8 + $0x444] sm:$0xf] %v592_v13  ;;  %v600_v16 = vld [vmem:[%s19544_s7 + $0x458] sm:$0xf]  ;;  %595 = vst [vmem:[#allocation8 + $0x448] sm:$0xf] %v594_v14 }
  0x75   :  { %597 = vst [vmem:[#allocation8 + $0x44c] sm:$0xff] %v596_v15   ;;  %601 = vst [vmem:[#allocation8 + $0x454] sm:$0xf] %v600_v16  ;;  %v602_v17 = vld [vmem:[%s19544_s7 + $0x454] sm:$0xf]  ;;  %v612_v21 = vld [vmem:[%s19544_s7 + $0x46c] sm:$0xff]  }
  0x76   :  { %v608_v19 = vld [vmem:[%s19544_s7 + $0x468] sm:$0xf]  ;;  %603 = vst [vmem:[#allocation8 + $0x458] sm:$0xf] %v602_v17  ;;  %605 = vst [vmem:[#allocation8 + $0x45c] sm:$0xff] %v604_v18   ;;  %v620_v24 = vld [vmem:[%s19544_s7 + $0x47c] sm:$0xff]  }
  0x77   :  { %609 = vst [vmem:[#allocation8 + $0x464] sm:$0xf] %v608_v19  ;;  %v610_v20 = vld [vmem:[%s19544_s7 + $0x464] sm:$0xf]  ;;  %v616_v22 = vld [vmem:[%s19544_s7 + $0x478] sm:$0xf] }
  0x78   :  { %611 = vst [vmem:[#allocation8 + $0x468] sm:$0xf] %v610_v20  ;;  %613 = vst [vmem:[#allocation8 + $0x46c] sm:$0xff] %v612_v21   ;;  %v618_v23 = vld [vmem:[%s19544_s7 + $0x474] sm:$0xf]  ;;  %v628_v27 = vld [vmem:[%s19544_s7 + $0x48c] sm:$0xff]  }
  0x79   :  { %617 = vst [vmem:[#allocation8 + $0x474] sm:$0xf] %v616_v22  ;;  %v624_v25 = vld [vmem:[%s19544_s7 + $0x488] sm:$0xf]  ;;  %619 = vst [vmem:[#allocation8 + $0x478] sm:$0xf] %v618_v23 }
  0x7a   :  { %621 = vst [vmem:[#allocation8 + $0x47c] sm:$0xff] %v620_v24   ;;  %625 = vst [vmem:[#allocation8 + $0x484] sm:$0xf] %v624_v25  ;;  %v626_v26 = vld [vmem:[%s19544_s7 + $0x484] sm:$0xf]  ;;  %v636_v30 = vld [vmem:[%s19544_s7 + $0x49c] sm:$0xff]  }
  0x7b   :  { %v632_v28 = vld [vmem:[%s19544_s7 + $0x498] sm:$0xf]  ;;  %627 = vst [vmem:[#allocation8 + $0x488] sm:$0xf] %v626_v26  ;;  %629 = vst [vmem:[#allocation8 + $0x48c] sm:$0xff] %v628_v27   ;;  %v644_v33 = vld [vmem:[%s19544_s7 + $0x4ac] sm:$0xff]  }
  0x7c   :  { %633 = vst [vmem:[#allocation8 + $0x494] sm:$0xf] %v632_v28  ;;  %v634_v29 = vld [vmem:[%s19544_s7 + $0x494] sm:$0xf]  ;;  %v640_v31 = vld [vmem:[%s19544_s7 + $0x4a8] sm:$0xf] }
  0x7d   :  { %635 = vst [vmem:[#allocation8 + $0x498] sm:$0xf] %v634_v29  ;;  %637 = vst [vmem:[#allocation8 + $0x49c] sm:$0xff] %v636_v30   ;;  %v642_v32 = vld [vmem:[%s19544_s7 + $0x4a4] sm:$0xf]  ;;  %v652_v36 = vld [vmem:[%s19544_s7 + $0x4bc] sm:$0xff]  }
  0x7e   :  { %641 = vst [vmem:[#allocation8 + $0x4a4] sm:$0xf] %v640_v31  ;;  %v648_v34 = vld [vmem:[%s19544_s7 + $0x4b8] sm:$0xf]  ;;  %643 = vst [vmem:[#allocation8 + $0x4a8] sm:$0xf] %v642_v32 }
  0x7f   :  { %645 = vst [vmem:[#allocation8 + $0x4ac] sm:$0xff] %v644_v33   ;;  %649 = vst [vmem:[#allocation8 + $0x4b4] sm:$0xf] %v648_v34  ;;  %v650_v35 = vld [vmem:[%s19544_s7 + $0x4b4] sm:$0xf]  ;;  %v660_v39 = vld [vmem:[%s19544_s7 + $0x4cc] sm:$0xff]  }
  0x80   :  { %v656_v37 = vld [vmem:[%s19544_s7 + $0x4c8] sm:$0xf]  ;;  %651 = vst [vmem:[#allocation8 + $0x4b8] sm:$0xf] %v650_v35  ;;  %653 = vst [vmem:[#allocation8 + $0x4bc] sm:$0xff] %v652_v36   ;;  %v668_v42 = vld [vmem:[%s19544_s7 + $0x4dc] sm:$0xff]  }
  0x81   :  { %657 = vst [vmem:[#allocation8 + $0x4c4] sm:$0xf] %v656_v37  ;;  %v658_v38 = vld [vmem:[%s19544_s7 + $0x4c4] sm:$0xf]  ;;  %v664_v40 = vld [vmem:[%s19544_s7 + $0x4d8] sm:$0xf] }
  0x82   :  { %659 = vst [vmem:[#allocation8 + $0x4c8] sm:$0xf] %v658_v38  ;;  %661 = vst [vmem:[#allocation8 + $0x4cc] sm:$0xff] %v660_v39   ;;  %v666_v41 = vld [vmem:[%s19544_s7 + $0x4d4] sm:$0xf]  ;;  %v676_v45 = vld [vmem:[%s19544_s7 + $0x4ec] sm:$0xff]  }
  0x83   :  { %665 = vst [vmem:[#allocation8 + $0x4d4] sm:$0xf] %v664_v40  ;;  %v672_v43 = vld [vmem:[%s19544_s7 + $0x4e8] sm:$0xf]  ;;  %667 = vst [vmem:[#allocation8 + $0x4d8] sm:$0xf] %v666_v41 }
  0x84   :  { %669 = vst [vmem:[#allocation8 + $0x4dc] sm:$0xff] %v668_v42   ;;  %673 = vst [vmem:[#allocation8 + $0x4e4] sm:$0xf] %v672_v43  ;;  %v674_v44 = vld [vmem:[%s19544_s7 + $0x4e4] sm:$0xf]  ;;  %v684_v48 = vld [vmem:[%s19544_s7 + $0x4fc] sm:$0xff]  }
  0x85   :  { %v680_v46 = vld [vmem:[%s19544_s7 + $0x4f8] sm:$0xf]  ;;  %675 = vst [vmem:[#allocation8 + $0x4e8] sm:$0xf] %v674_v44  ;;  %677 = vst [vmem:[#allocation8 + $0x4ec] sm:$0xff] %v676_v45   ;;  %v692_v51 = vld [vmem:[%s19544_s7 + $0x50c] sm:$0xff]  }
  0x86   :  { %681 = vst [vmem:[#allocation8 + $0x4f4] sm:$0xf] %v680_v46  ;;  %v682_v47 = vld [vmem:[%s19544_s7 + $0x4f4] sm:$0xf]  ;;  %v688_v49 = vld [vmem:[%s19544_s7 + $0x508] sm:$0xf] }
  0x87   :  { %683 = vst [vmem:[#allocation8 + $0x4f8] sm:$0xf] %v682_v47  ;;  %685 = vst [vmem:[#allocation8 + $0x4fc] sm:$0xff] %v684_v48   ;;  %v690_v50 = vld [vmem:[%s19544_s7 + $0x504] sm:$0xf]  ;;  %v700_v54 = vld [vmem:[%s19544_s7 + $0x51c] sm:$0xff]  }
  0x88   :  { %689 = vst [vmem:[#allocation8 + $0x504] sm:$0xf] %v688_v49  ;;  %v696_v52 = vld [vmem:[%s19544_s7 + $0x518] sm:$0xf]  ;;  %691 = vst [vmem:[#allocation8 + $0x508] sm:$0xf] %v690_v50 }
  0x89   :  { %693 = vst [vmem:[#allocation8 + $0x50c] sm:$0xff] %v692_v51   ;;  %697 = vst [vmem:[#allocation8 + $0x514] sm:$0xf] %v696_v52  ;;  %v698_v53 = vld [vmem:[%s19544_s7 + $0x514] sm:$0xf]  ;;  %v708_v57 = vld [vmem:[%s19544_s7 + $0x52c] sm:$0xff]  }
  0x8a   :  { %v704_v55 = vld [vmem:[%s19544_s7 + $0x528] sm:$0xf]  ;;  %699 = vst [vmem:[#allocation8 + $0x518] sm:$0xf] %v698_v53  ;;  %701 = vst [vmem:[#allocation8 + $0x51c] sm:$0xff] %v700_v54   ;;  %v716_v60 = vld [vmem:[%s19544_s7 + $0x53c] sm:$0xff]  }
  0x8b   :  { %705 = vst [vmem:[#allocation8 + $0x524] sm:$0xf] %v704_v55  ;;  %v706_v56 = vld [vmem:[%s19544_s7 + $0x524] sm:$0xf]  ;;  %v712_v58 = vld [vmem:[%s19544_s7 + $0x538] sm:$0xf] }
  0x8c   :  { %707 = vst [vmem:[#allocation8 + $0x528] sm:$0xf] %v706_v56  ;;  %709 = vst [vmem:[#allocation8 + $0x52c] sm:$0xff] %v708_v57   ;;  %v714_v59 = vld [vmem:[%s19544_s7 + $0x534] sm:$0xf]  ;;  %v724_v63 = vld [vmem:[%s19544_s7 + $0x54c] sm:$0xff]  }
  0x8d   :  { %713 = vst [vmem:[#allocation8 + $0x534] sm:$0xf] %v712_v58  ;;  %v720_v61 = vld [vmem:[%s19544_s7 + $0x548] sm:$0xf]  ;;  %715 = vst [vmem:[#allocation8 + $0x538] sm:$0xf] %v714_v59 }
  0x8e   :  { %717 = vst [vmem:[#allocation8 + $0x53c] sm:$0xff] %v716_v60   ;;  %721 = vst [vmem:[#allocation8 + $0x544] sm:$0xf] %v720_v61  ;;  %v722_v62 = vld [vmem:[%s19544_s7 + $0x544] sm:$0xf]  ;;  %v732_v2 = vld [vmem:[%s19544_s7 + $0x55c] sm:$0xff]  }
  0x8f   :  { %v728_v0 = vld [vmem:[%s19544_s7 + $0x558] sm:$0xf]  ;;  %723 = vst [vmem:[#allocation8 + $0x548] sm:$0xf] %v722_v62  ;;  %725 = vst [vmem:[#allocation8 + $0x54c] sm:$0xff] %v724_v63   ;;  %v740_v5 = vld [vmem:[%s19544_s7 + $0x56c] sm:$0xff]  }
  0x90   :  { %729 = vst [vmem:[#allocation8 + $0x554] sm:$0xf] %v728_v0  ;;  %v730_v1 = vld [vmem:[%s19544_s7 + $0x554] sm:$0xf]  ;;  %v736_v3 = vld [vmem:[%s19544_s7 + $0x568] sm:$0xf] }
  0x91   :  { %731 = vst [vmem:[#allocation8 + $0x558] sm:$0xf] %v730_v1  ;;  %733 = vst [vmem:[#allocation8 + $0x55c] sm:$0xff] %v732_v2   ;;  %v738_v4 = vld [vmem:[%s19544_s7 + $0x564] sm:$0xf]  ;;  %v748_v8 = vld [vmem:[%s19544_s7 + $0x57c] sm:$0xff]  }
  0x92   :  { %737 = vst [vmem:[#allocation8 + $0x564] sm:$0xf] %v736_v3  ;;  %v744_v6 = vld [vmem:[%s19544_s7 + $0x578] sm:$0xf]  ;;  %739 = vst [vmem:[#allocation8 + $0x568] sm:$0xf] %v738_v4 }
  0x93   :  { %741 = vst [vmem:[#allocation8 + $0x56c] sm:$0xff] %v740_v5   ;;  %745 = vst [vmem:[#allocation8 + $0x574] sm:$0xf] %v744_v6  ;;  %v746_v7 = vld [vmem:[%s19544_s7 + $0x574] sm:$0xf]  ;;  %v756_v11 = vld [vmem:[%s19544_s7 + $0x58c] sm:$0xff]  }
  0x94   :  { %v752_v9 = vld [vmem:[%s19544_s7 + $0x588] sm:$0xf]  ;;  %747 = vst [vmem:[#allocation8 + $0x578] sm:$0xf] %v746_v7  ;;  %749 = vst [vmem:[#allocation8 + $0x57c] sm:$0xff] %v748_v8   ;;  %v764_v14 = vld [vmem:[%s19544_s7 + $0x59c] sm:$0xff]  }
  0x95   :  { %753 = vst [vmem:[#allocation8 + $0x584] sm:$0xf] %v752_v9  ;;  %v754_v10 = vld [vmem:[%s19544_s7 + $0x584] sm:$0xf]  ;;  %v760_v12 = vld [vmem:[%s19544_s7 + $0x598] sm:$0xf] }
  0x96   :  { %755 = vst [vmem:[#allocation8 + $0x588] sm:$0xf] %v754_v10  ;;  %757 = vst [vmem:[#allocation8 + $0x58c] sm:$0xff] %v756_v11   ;;  %v762_v13 = vld [vmem:[%s19544_s7 + $0x594] sm:$0xf]  ;;  %v772_v17 = vld [vmem:[%s19544_s7 + $0x5ac] sm:$0xff]  }
  0x97   :  { %761 = vst [vmem:[#allocation8 + $0x594] sm:$0xf] %v760_v12  ;;  %v768_v15 = vld [vmem:[%s19544_s7 + $0x5a8] sm:$0xf]  ;;  %763 = vst [vmem:[#allocation8 + $0x598] sm:$0xf] %v762_v13 }
  0x98   :  { %765 = vst [vmem:[#allocation8 + $0x59c] sm:$0xff] %v764_v14   ;;  %769 = vst [vmem:[#allocation8 + $0x5a4] sm:$0xf] %v768_v15  ;;  %v770_v16 = vld [vmem:[%s19544_s7 + $0x5a4] sm:$0xf]  ;;  %v780_v20 = vld [vmem:[%s19544_s7 + $0x5bc] sm:$0xff]  }
  0x99   :  { %v776_v18 = vld [vmem:[%s19544_s7 + $0x5b8] sm:$0xf]  ;;  %771 = vst [vmem:[#allocation8 + $0x5a8] sm:$0xf] %v770_v16  ;;  %773 = vst [vmem:[#allocation8 + $0x5ac] sm:$0xff] %v772_v17   ;;  %v788_v23 = vld [vmem:[%s19544_s7 + $0x5cc] sm:$0xff]  }
  0x9a   :  { %777 = vst [vmem:[#allocation8 + $0x5b4] sm:$0xf] %v776_v18  ;;  %v778_v19 = vld [vmem:[%s19544_s7 + $0x5b4] sm:$0xf]  ;;  %v784_v21 = vld [vmem:[%s19544_s7 + $0x5c8] sm:$0xf] }
  0x9b   :  { %779 = vst [vmem:[#allocation8 + $0x5b8] sm:$0xf] %v778_v19  ;;  %781 = vst [vmem:[#allocation8 + $0x5bc] sm:$0xff] %v780_v20   ;;  %v786_v22 = vld [vmem:[%s19544_s7 + $0x5c4] sm:$0xf]  ;;  %v796_v26 = vld [vmem:[%s19544_s7 + $0x5dc] sm:$0xff]  }
  0x9c   :  { %785 = vst [vmem:[#allocation8 + $0x5c4] sm:$0xf] %v784_v21  ;;  %v792_v24 = vld [vmem:[%s19544_s7 + $0x5d8] sm:$0xf]  ;;  %787 = vst [vmem:[#allocation8 + $0x5c8] sm:$0xf] %v786_v22 }
  0x9d   :  { %789 = vst [vmem:[#allocation8 + $0x5cc] sm:$0xff] %v788_v23   ;;  %793 = vst [vmem:[#allocation8 + $0x5d4] sm:$0xf] %v792_v24  ;;  %v794_v25 = vld [vmem:[%s19544_s7 + $0x5d4] sm:$0xf]  ;;  %v804_v29 = vld [vmem:[%s19544_s7 + $0x5ec] sm:$0xff]  }
  0x9e   :  { %v800_v27 = vld [vmem:[%s19544_s7 + $0x5e8] sm:$0xf]  ;;  %795 = vst [vmem:[#allocation8 + $0x5d8] sm:$0xf] %v794_v25  ;;  %797 = vst [vmem:[#allocation8 + $0x5dc] sm:$0xff] %v796_v26   ;;  %v812_v32 = vld [vmem:[%s19544_s7 + $0x5fc] sm:$0xff]  }
  0x9f   :  { %801 = vst [vmem:[#allocation8 + $0x5e4] sm:$0xf] %v800_v27  ;;  %v802_v28 = vld [vmem:[%s19544_s7 + $0x5e4] sm:$0xf]  ;;  %v808_v30 = vld [vmem:[%s19544_s7 + $0x5f8] sm:$0xf] }
  0xa0   :  { %803 = vst [vmem:[#allocation8 + $0x5e8] sm:$0xf] %v802_v28  ;;  %805 = vst [vmem:[#allocation8 + $0x5ec] sm:$0xff] %v804_v29   ;;  %v810_v31 = vld [vmem:[%s19544_s7 + $0x5f4] sm:$0xf]  ;;  %v820_v35 = vld [vmem:[%s19544_s7 + $0x60c] sm:$0xff]  }
  0xa1   :  { %809 = vst [vmem:[#allocation8 + $0x5f4] sm:$0xf] %v808_v30  ;;  %v816_v33 = vld [vmem:[%s19544_s7 + $0x608] sm:$0xf]  ;;  %811 = vst [vmem:[#allocation8 + $0x5f8] sm:$0xf] %v810_v31 }
  0xa2   :  { %813 = vst [vmem:[#allocation8 + $0x5fc] sm:$0xff] %v812_v32   ;;  %817 = vst [vmem:[#allocation8 + $0x604] sm:$0xf] %v816_v33  ;;  %v818_v34 = vld [vmem:[%s19544_s7 + $0x604] sm:$0xf]  ;;  %v828_v38 = vld [vmem:[%s19544_s7 + $0x61c] sm:$0xff]  }
  0xa3   :  { %v824_v36 = vld [vmem:[%s19544_s7 + $0x618] sm:$0xf]  ;;  %819 = vst [vmem:[#allocation8 + $0x608] sm:$0xf] %v818_v34  ;;  %821 = vst [vmem:[#allocation8 + $0x60c] sm:$0xff] %v820_v35   ;;  %v836_v41 = vld [vmem:[%s19544_s7 + $0x62c] sm:$0xff]  }
  0xa4   :  { %825 = vst [vmem:[#allocation8 + $0x614] sm:$0xf] %v824_v36  ;;  %v826_v37 = vld [vmem:[%s19544_s7 + $0x614] sm:$0xf]  ;;  %v832_v39 = vld [vmem:[%s19544_s7 + $0x628] sm:$0xf] }
  0xa5   :  { %827 = vst [vmem:[#allocation8 + $0x618] sm:$0xf] %v826_v37  ;;  %829 = vst [vmem:[#allocation8 + $0x61c] sm:$0xff] %v828_v38   ;;  %v834_v40 = vld [vmem:[%s19544_s7 + $0x624] sm:$0xf]  ;;  %v844_v44 = vld [vmem:[%s19544_s7 + $0x63c] sm:$0xff]  }
  0xa6   :  { %833 = vst [vmem:[#allocation8 + $0x624] sm:$0xf] %v832_v39  ;;  %v840_v42 = vld [vmem:[%s19544_s7 + $0x638] sm:$0xf]  ;;  %835 = vst [vmem:[#allocation8 + $0x628] sm:$0xf] %v834_v40 }
  0xa7   :  { %837 = vst [vmem:[#allocation8 + $0x62c] sm:$0xff] %v836_v41   ;;  %841 = vst [vmem:[#allocation8 + $0x634] sm:$0xf] %v840_v42  ;;  %v842_v43 = vld [vmem:[%s19544_s7 + $0x634] sm:$0xf]  ;;  %v852_v47 = vld [vmem:[%s19544_s7 + $0x64c] sm:$0xff]  }
  0xa8   :  { %v848_v45 = vld [vmem:[%s19544_s7 + $0x648] sm:$0xf]  ;;  %843 = vst [vmem:[#allocation8 + $0x638] sm:$0xf] %v842_v43  ;;  %845 = vst [vmem:[#allocation8 + $0x63c] sm:$0xff] %v844_v44   ;;  %v860_v50 = vld [vmem:[%s19544_s7 + $0x65c] sm:$0xff]  }
  0xa9   :  { %849 = vst [vmem:[#allocation8 + $0x644] sm:$0xf] %v848_v45  ;;  %v850_v46 = vld [vmem:[%s19544_s7 + $0x644] sm:$0xf]  ;;  %v856_v48 = vld [vmem:[%s19544_s7 + $0x658] sm:$0xf] }
  0xaa   :  { %851 = vst [vmem:[#allocation8 + $0x648] sm:$0xf] %v850_v46  ;;  %853 = vst [vmem:[#allocation8 + $0x64c] sm:$0xff] %v852_v47   ;;  %v858_v49 = vld [vmem:[%s19544_s7 + $0x654] sm:$0xf]  ;;  %v868_v53 = vld [vmem:[%s19544_s7 + $0x66c] sm:$0xff]  }
  0xab   :  { %857 = vst [vmem:[#allocation8 + $0x654] sm:$0xf] %v856_v48  ;;  %v864_v51 = vld [vmem:[%s19544_s7 + $0x668] sm:$0xf]  ;;  %859 = vst [vmem:[#allocation8 + $0x658] sm:$0xf] %v858_v49 }
  0xac   :  { %861 = vst [vmem:[#allocation8 + $0x65c] sm:$0xff] %v860_v50   ;;  %865 = vst [vmem:[#allocation8 + $0x664] sm:$0xf] %v864_v51  ;;  %v866_v52 = vld [vmem:[%s19544_s7 + $0x664] sm:$0xf]  ;;  %v876_v56 = vld [vmem:[%s19544_s7 + $0x67c] sm:$0xff]  }
  0xad   :  { %v872_v54 = vld [vmem:[%s19544_s7 + $0x678] sm:$0xf]  ;;  %867 = vst [vmem:[#allocation8 + $0x668] sm:$0xf] %v866_v52  ;;  %869 = vst [vmem:[#allocation8 + $0x66c] sm:$0xff] %v868_v53   ;;  %v884_v59 = vld [vmem:[%s19544_s7 + $0x68c] sm:$0xff]  }
  0xae   :  { %873 = vst [vmem:[#allocation8 + $0x674] sm:$0xf] %v872_v54  ;;  %v874_v55 = vld [vmem:[%s19544_s7 + $0x674] sm:$0xf]  ;;  %v880_v57 = vld [vmem:[%s19544_s7 + $0x688] sm:$0xf] }
  0xaf   :  { %875 = vst [vmem:[#allocation8 + $0x678] sm:$0xf] %v874_v55  ;;  %877 = vst [vmem:[#allocation8 + $0x67c] sm:$0xff] %v876_v56   ;;  %v882_v58 = vld [vmem:[%s19544_s7 + $0x684] sm:$0xf]  ;;  %v892_v62 = vld [vmem:[%s19544_s7 + $0x69c] sm:$0xff]  }
  0xb0   :  { %881 = vst [vmem:[#allocation8 + $0x684] sm:$0xf] %v880_v57  ;;  %v888_v60 = vld [vmem:[%s19544_s7 + $0x698] sm:$0xf]  ;;  %883 = vst [vmem:[#allocation8 + $0x688] sm:$0xf] %v882_v58 }
  0xb1   :  { %885 = vst [vmem:[#allocation8 + $0x68c] sm:$0xff] %v884_v59   ;;  %889 = vst [vmem:[#allocation8 + $0x694] sm:$0xf] %v888_v60  ;;  %v890_v61 = vld [vmem:[%s19544_s7 + $0x694] sm:$0xf]  ;;  %v900_v1 = vld [vmem:[%s19544_s7 + $0x6ac] sm:$0xff]  }
  0xb2   :  { %v896_v63 = vld [vmem:[%s19544_s7 + $0x6a8] sm:$0xf]  ;;  %891 = vst [vmem:[#allocation8 + $0x698] sm:$0xf] %v890_v61  ;;  %893 = vst [vmem:[#allocation8 + $0x69c] sm:$0xff] %v892_v62   ;;  %v908_v4 = vld [vmem:[%s19544_s7 + $0x6bc] sm:$0xff]  }
  0xb3   :  { %897 = vst [vmem:[#allocation8 + $0x6a4] sm:$0xf] %v896_v63  ;;  %v898_v0 = vld [vmem:[%s19544_s7 + $0x6a4] sm:$0xf]  ;;  %v904_v2 = vld [vmem:[%s19544_s7 + $0x6b8] sm:$0xf] }
  0xb4   :  { %899 = vst [vmem:[#allocation8 + $0x6a8] sm:$0xf] %v898_v0  ;;  %901 = vst [vmem:[#allocation8 + $0x6ac] sm:$0xff] %v900_v1   ;;  %v906_v3 = vld [vmem:[%s19544_s7 + $0x6b4] sm:$0xf]  ;;  %v916_v7 = vld [vmem:[%s19544_s7 + $0x6cc] sm:$0xff]  }
  0xb5   :  { %905 = vst [vmem:[#allocation8 + $0x6b4] sm:$0xf] %v904_v2  ;;  %v912_v5 = vld [vmem:[%s19544_s7 + $0x6c8] sm:$0xf]  ;;  %907 = vst [vmem:[#allocation8 + $0x6b8] sm:$0xf] %v906_v3 }
  0xb6   :  { %909 = vst [vmem:[#allocation8 + $0x6bc] sm:$0xff] %v908_v4   ;;  %913 = vst [vmem:[#allocation8 + $0x6c4] sm:$0xf] %v912_v5  ;;  %v914_v6 = vld [vmem:[%s19544_s7 + $0x6c4] sm:$0xf]  ;;  %v924_v10 = vld [vmem:[%s19544_s7 + $0x6dc] sm:$0xff]  }
  0xb7   :  { %v920_v8 = vld [vmem:[%s19544_s7 + $0x6d8] sm:$0xf]  ;;  %915 = vst [vmem:[#allocation8 + $0x6c8] sm:$0xf] %v914_v6  ;;  %917 = vst [vmem:[#allocation8 + $0x6cc] sm:$0xff] %v916_v7   ;;  %v932_v13 = vld [vmem:[%s19544_s7 + $0x6ec] sm:$0xff]  }
  0xb8   :  { %921 = vst [vmem:[#allocation8 + $0x6d4] sm:$0xf] %v920_v8  ;;  %v922_v9 = vld [vmem:[%s19544_s7 + $0x6d4] sm:$0xf]  ;;  %v928_v11 = vld [vmem:[%s19544_s7 + $0x6e8] sm:$0xf] }
  0xb9   :  { %923 = vst [vmem:[#allocation8 + $0x6d8] sm:$0xf] %v922_v9  ;;  %925 = vst [vmem:[#allocation8 + $0x6dc] sm:$0xff] %v924_v10   ;;  %v930_v12 = vld [vmem:[%s19544_s7 + $0x6e4] sm:$0xf]  ;;  %v940_v16 = vld [vmem:[%s19544_s7 + $0x6fc] sm:$0xff]  }
  0xba   :  { %929 = vst [vmem:[#allocation8 + $0x6e4] sm:$0xf] %v928_v11  ;;  %v936_v14 = vld [vmem:[%s19544_s7 + $0x6f8] sm:$0xf]  ;;  %931 = vst [vmem:[#allocation8 + $0x6e8] sm:$0xf] %v930_v12 }
  0xbb   :  { %933 = vst [vmem:[#allocation8 + $0x6ec] sm:$0xff] %v932_v13   ;;  %937 = vst [vmem:[#allocation8 + $0x6f4] sm:$0xf] %v936_v14  ;;  %v938_v15 = vld [vmem:[%s19544_s7 + $0x6f4] sm:$0xf]  ;;  %v948_v19 = vld [vmem:[%s19544_s7 + $0x70c] sm:$0xff]  }
  0xbc   :  { %v944_v17 = vld [vmem:[%s19544_s7 + $0x708] sm:$0xf]  ;;  %939 = vst [vmem:[#allocation8 + $0x6f8] sm:$0xf] %v938_v15  ;;  %941 = vst [vmem:[#allocation8 + $0x6fc] sm:$0xff] %v940_v16   ;;  %v956_v22 = vld [vmem:[%s19544_s7 + $0x71c] sm:$0xff]  }
  0xbd   :  { %945 = vst [vmem:[#allocation8 + $0x704] sm:$0xf] %v944_v17  ;;  %v946_v18 = vld [vmem:[%s19544_s7 + $0x704] sm:$0xf]  ;;  %v952_v20 = vld [vmem:[%s19544_s7 + $0x718] sm:$0xf] }
  0xbe   :  { %947 = vst [vmem:[#allocation8 + $0x708] sm:$0xf] %v946_v18  ;;  %949 = vst [vmem:[#allocation8 + $0x70c] sm:$0xff] %v948_v19   ;;  %v954_v21 = vld [vmem:[%s19544_s7 + $0x714] sm:$0xf]  ;;  %v964_v25 = vld [vmem:[%s19544_s7 + $0x72c] sm:$0xff]  }
  0xbf   :  { %953 = vst [vmem:[#allocation8 + $0x714] sm:$0xf] %v952_v20  ;;  %v960_v23 = vld [vmem:[%s19544_s7 + $0x728] sm:$0xf]  ;;  %955 = vst [vmem:[#allocation8 + $0x718] sm:$0xf] %v954_v21 }
  0xc0   :  { %957 = vst [vmem:[#allocation8 + $0x71c] sm:$0xff] %v956_v22   ;;  %961 = vst [vmem:[#allocation8 + $0x724] sm:$0xf] %v960_v23  ;;  %v962_v24 = vld [vmem:[%s19544_s7 + $0x724] sm:$0xf]  ;;  %v972_v28 = vld [vmem:[%s19544_s7 + $0x73c] sm:$0xff]  }
  0xc1   :  { %v968_v26 = vld [vmem:[%s19544_s7 + $0x738] sm:$0xf]  ;;  %963 = vst [vmem:[#allocation8 + $0x728] sm:$0xf] %v962_v24  ;;  %965 = vst [vmem:[#allocation8 + $0x72c] sm:$0xff] %v964_v25   ;;  %v980_v31 = vld [vmem:[%s19544_s7 + $0x74c] sm:$0xff]  }
  0xc2   :  { %969 = vst [vmem:[#allocation8 + $0x734] sm:$0xf] %v968_v26  ;;  %v970_v27 = vld [vmem:[%s19544_s7 + $0x734] sm:$0xf]  ;;  %v976_v29 = vld [vmem:[%s19544_s7 + $0x748] sm:$0xf] }
  0xc3   :  { %971 = vst [vmem:[#allocation8 + $0x738] sm:$0xf] %v970_v27  ;;  %973 = vst [vmem:[#allocation8 + $0x73c] sm:$0xff] %v972_v28   ;;  %v978_v30 = vld [vmem:[%s19544_s7 + $0x744] sm:$0xf]  ;;  %v988_v34 = vld [vmem:[%s19544_s7 + $0x75c] sm:$0xff]  }
  0xc4   :  { %977 = vst [vmem:[#allocation8 + $0x744] sm:$0xf] %v976_v29  ;;  %v984_v32 = vld [vmem:[%s19544_s7 + $0x758] sm:$0xf]  ;;  %979 = vst [vmem:[#allocation8 + $0x748] sm:$0xf] %v978_v30 }
  0xc5   :  { %981 = vst [vmem:[#allocation8 + $0x74c] sm:$0xff] %v980_v31   ;;  %985 = vst [vmem:[#allocation8 + $0x754] sm:$0xf] %v984_v32  ;;  %v986_v33 = vld [vmem:[%s19544_s7 + $0x754] sm:$0xf]  ;;  %v996_v37 = vld [vmem:[%s19544_s7 + $0x76c] sm:$0xff]  }
  0xc6   :  { %v992_v35 = vld [vmem:[%s19544_s7 + $0x768] sm:$0xf]  ;;  %987 = vst [vmem:[#allocation8 + $0x758] sm:$0xf] %v986_v33  ;;  %989 = vst [vmem:[#allocation8 + $0x75c] sm:$0xff] %v988_v34   ;;  %v1004_v40 = vld [vmem:[%s19544_s7 + $0x77c] sm:$0xff]  }
  0xc7   :  { %993 = vst [vmem:[#allocation8 + $0x764] sm:$0xf] %v992_v35  ;;  %v994_v36 = vld [vmem:[%s19544_s7 + $0x764] sm:$0xf]  ;;  %v1000_v38 = vld [vmem:[%s19544_s7 + $0x778] sm:$0xf] }
  0xc8   :  { %995 = vst [vmem:[#allocation8 + $0x768] sm:$0xf] %v994_v36  ;;  %997 = vst [vmem:[#allocation8 + $0x76c] sm:$0xff] %v996_v37   ;;  %v1002_v39 = vld [vmem:[%s19544_s7 + $0x774] sm:$0xf]  ;;  %v1012_v43 = vld [vmem:[%s19544_s7 + $0x78c] sm:$0xff]  }
  0xc9   :  { %1001 = vst [vmem:[#allocation8 + $0x774] sm:$0xf] %v1000_v38  ;;  %v1008_v41 = vld [vmem:[%s19544_s7 + $0x788] sm:$0xf]  ;;  %1003 = vst [vmem:[#allocation8 + $0x778] sm:$0xf] %v1002_v39 }
  0xca   :  { %1005 = vst [vmem:[#allocation8 + $0x77c] sm:$0xff] %v1004_v40   ;;  %1009 = vst [vmem:[#allocation8 + $0x784] sm:$0xf] %v1008_v41  ;;  %v1010_v42 = vld [vmem:[%s19544_s7 + $0x784] sm:$0xf]  ;;  %v1020_v46 = vld [vmem:[%s19544_s7 + $0x79c] sm:$0xff]  }
  0xcb   :  { %v1016_v44 = vld [vmem:[%s19544_s7 + $0x798] sm:$0xf]  ;;  %1011 = vst [vmem:[#allocation8 + $0x788] sm:$0xf] %v1010_v42  ;;  %1013 = vst [vmem:[#allocation8 + $0x78c] sm:$0xff] %v1012_v43   ;;  %v1028_v49 = vld [vmem:[%s19544_s7 + $0x7ac] sm:$0xff]  }
  0xcc   :  { %1017 = vst [vmem:[#allocation8 + $0x794] sm:$0xf] %v1016_v44  ;;  %v1018_v45 = vld [vmem:[%s19544_s7 + $0x794] sm:$0xf]  ;;  %v1024_v47 = vld [vmem:[%s19544_s7 + $0x7a8] sm:$0xf] }
  0xcd   :  { %1019 = vst [vmem:[#allocation8 + $0x798] sm:$0xf] %v1018_v45  ;;  %1021 = vst [vmem:[#allocation8 + $0x79c] sm:$0xff] %v1020_v46   ;;  %v1026_v48 = vld [vmem:[%s19544_s7 + $0x7a4] sm:$0xf]  ;;  %v1036_v52 = vld [vmem:[%s19544_s7 + $0x7bc] sm:$0xff]  }
  0xce   :  { %1025 = vst [vmem:[#allocation8 + $0x7a4] sm:$0xf] %v1024_v47  ;;  %v1032_v50 = vld [vmem:[%s19544_s7 + $0x7b8] sm:$0xf]  ;;  %1027 = vst [vmem:[#allocation8 + $0x7a8] sm:$0xf] %v1026_v48 }
  0xcf   :  { %1029 = vst [vmem:[#allocation8 + $0x7ac] sm:$0xff] %v1028_v49   ;;  %1033 = vst [vmem:[#allocation8 + $0x7b4] sm:$0xf] %v1032_v50  ;;  %v1034_v51 = vld [vmem:[%s19544_s7 + $0x7b4] sm:$0xf]  ;;  %v1044_v55 = vld [vmem:[%s19544_s7 + $0x7cc] sm:$0xff]  }
  0xd0   :  { %v1040_v53 = vld [vmem:[%s19544_s7 + $0x7c8] sm:$0xf]  ;;  %1035 = vst [vmem:[#allocation8 + $0x7b8] sm:$0xf] %v1034_v51  ;;  %1037 = vst [vmem:[#allocation8 + $0x7bc] sm:$0xff] %v1036_v52   ;;  %v1052_v58 = vld [vmem:[%s19544_s7 + $0x7dc] sm:$0xff]  }
  0xd1   :  { %1041 = vst [vmem:[#allocation8 + $0x7c4] sm:$0xf] %v1040_v53  ;;  %v1042_v54 = vld [vmem:[%s19544_s7 + $0x7c4] sm:$0xf]  ;;  %v1048_v56 = vld [vmem:[%s19544_s7 + $0x7d8] sm:$0xf] }
  0xd2   :  { %1043 = vst [vmem:[#allocation8 + $0x7c8] sm:$0xf] %v1042_v54  ;;  %1045 = vst [vmem:[#allocation8 + $0x7cc] sm:$0xff] %v1044_v55   ;;  %v1050_v57 = vld [vmem:[%s19544_s7 + $0x7d4] sm:$0xf]  ;;  %v1060_v61 = vld [vmem:[%s19544_s7 + $0x7ec] sm:$0xff]  }
  0xd3   :  { %1049 = vst [vmem:[#allocation8 + $0x7d4] sm:$0xf] %v1048_v56  ;;  %v1056_v59 = vld [vmem:[%s19544_s7 + $0x7e8] sm:$0xf]  ;;  %1051 = vst [vmem:[#allocation8 + $0x7d8] sm:$0xf] %v1050_v57 }
  0xd4   :  { %1053 = vst [vmem:[#allocation8 + $0x7dc] sm:$0xff] %v1052_v58   ;;  %1057 = vst [vmem:[#allocation8 + $0x7e4] sm:$0xf] %v1056_v59  ;;  %v1058_v60 = vld [vmem:[%s19544_s7 + $0x7e4] sm:$0xf]  ;;  %v1068_v0 = vld [vmem:[%s19544_s7 + $0x7fc] sm:$0xff]  }
  0xd5   :  { %v1064_v62 = vld [vmem:[%s19544_s7 + $0x7f8] sm:$0xf]  ;;  %1059 = vst [vmem:[#allocation8 + $0x7e8] sm:$0xf] %v1058_v60  ;;  %1061 = vst [vmem:[#allocation8 + $0x7ec] sm:$0xff] %v1060_v61   ;;  %v1076_v3 = vld [vmem:[%s19544_s7 + $0x80c] sm:$0xff]  }
  0xd6   :  { %1065 = vst [vmem:[#allocation8 + $0x7f4] sm:$0xf] %v1064_v62  ;;  %v1066_v63 = vld [vmem:[%s19544_s7 + $0x7f4] sm:$0xf]  ;;  %v1072_v1 = vld [vmem:[%s19544_s7 + $0x808] sm:$0xf] }
  0xd7   :  { %1067 = vst [vmem:[#allocation8 + $0x7f8] sm:$0xf] %v1066_v63  ;;  %1069 = vst [vmem:[#allocation8 + $0x7fc] sm:$0xff] %v1068_v0   ;;  %v1074_v2 = vld [vmem:[%s19544_s7 + $0x804] sm:$0xf]  ;;  %v1084_v6 = vld [vmem:[%s19544_s7 + $0x81c] sm:$0xff]  }
  0xd8   :  { %1073 = vst [vmem:[#allocation8 + $0x804] sm:$0xf] %v1072_v1  ;;  %v1080_v4 = vld [vmem:[%s19544_s7 + $0x818] sm:$0xf]  ;;  %1075 = vst [vmem:[#allocation8 + $0x808] sm:$0xf] %v1074_v2 }
  0xd9   :  { %1077 = vst [vmem:[#allocation8 + $0x80c] sm:$0xff] %v1076_v3   ;;  %1081 = vst [vmem:[#allocation8 + $0x814] sm:$0xf] %v1080_v4  ;;  %v1082_v5 = vld [vmem:[%s19544_s7 + $0x814] sm:$0xf]  ;;  %v1092_v9 = vld [vmem:[%s19544_s7 + $0x82c] sm:$0xff]  }
  0xda   :  { %v1088_v7 = vld [vmem:[%s19544_s7 + $0x828] sm:$0xf]  ;;  %1083 = vst [vmem:[#allocation8 + $0x818] sm:$0xf] %v1082_v5  ;;  %1085 = vst [vmem:[#allocation8 + $0x81c] sm:$0xff] %v1084_v6   ;;  %v1100_v12 = vld [vmem:[%s19544_s7 + $0x83c] sm:$0xff]  }
  0xdb   :  { %1089 = vst [vmem:[#allocation8 + $0x824] sm:$0xf] %v1088_v7  ;;  %v1090_v8 = vld [vmem:[%s19544_s7 + $0x824] sm:$0xf]  ;;  %v1096_v10 = vld [vmem:[%s19544_s7 + $0x838] sm:$0xf] }
  0xdc   :  { %1091 = vst [vmem:[#allocation8 + $0x828] sm:$0xf] %v1090_v8  ;;  %1093 = vst [vmem:[#allocation8 + $0x82c] sm:$0xff] %v1092_v9   ;;  %v1098_v11 = vld [vmem:[%s19544_s7 + $0x834] sm:$0xf]  ;;  %v1108_v15 = vld [vmem:[%s19544_s7 + $0x84c] sm:$0xff]  }
  0xdd   :  { %1097 = vst [vmem:[#allocation8 + $0x834] sm:$0xf] %v1096_v10  ;;  %v1104_v13 = vld [vmem:[%s19544_s7 + $0x848] sm:$0xf]  ;;  %1099 = vst [vmem:[#allocation8 + $0x838] sm:$0xf] %v1098_v11 }
  0xde   :  { %1101 = vst [vmem:[#allocation8 + $0x83c] sm:$0xff] %v1100_v12   ;;  %1105 = vst [vmem:[#allocation8 + $0x844] sm:$0xf] %v1104_v13  ;;  %v1106_v14 = vld [vmem:[%s19544_s7 + $0x844] sm:$0xf]  ;;  %v1116_v18 = vld [vmem:[%s19544_s7 + $0x85c] sm:$0xff]  }
  0xdf   :  { %v1112_v16 = vld [vmem:[%s19544_s7 + $0x858] sm:$0xf]  ;;  %1107 = vst [vmem:[#allocation8 + $0x848] sm:$0xf] %v1106_v14  ;;  %1109 = vst [vmem:[#allocation8 + $0x84c] sm:$0xff] %v1108_v15   ;;  %v1124_v21 = vld [vmem:[%s19544_s7 + $0x86c] sm:$0xff]  }
  0xe0   :  { %1113 = vst [vmem:[#allocation8 + $0x854] sm:$0xf] %v1112_v16  ;;  %v1114_v17 = vld [vmem:[%s19544_s7 + $0x854] sm:$0xf]  ;;  %v1120_v19 = vld [vmem:[%s19544_s7 + $0x868] sm:$0xf] }
  0xe1   :  { %1115 = vst [vmem:[#allocation8 + $0x858] sm:$0xf] %v1114_v17  ;;  %1117 = vst [vmem:[#allocation8 + $0x85c] sm:$0xff] %v1116_v18   ;;  %v1122_v20 = vld [vmem:[%s19544_s7 + $0x864] sm:$0xf]  ;;  %v1132_v24 = vld [vmem:[%s19544_s7 + $0x87c] sm:$0xff]  }
  0xe2   :  { %1121 = vst [vmem:[#allocation8 + $0x864] sm:$0xf] %v1120_v19  ;;  %v1128_v22 = vld [vmem:[%s19544_s7 + $0x878] sm:$0xf]  ;;  %1123 = vst [vmem:[#allocation8 + $0x868] sm:$0xf] %v1122_v20 }
  0xe3   :  { %1125 = vst [vmem:[#allocation8 + $0x86c] sm:$0xff] %v1124_v21   ;;  %1129 = vst [vmem:[#allocation8 + $0x874] sm:$0xf] %v1128_v22  ;;  %v1130_v23 = vld [vmem:[%s19544_s7 + $0x874] sm:$0xf]  ;;  %v1140_v27 = vld [vmem:[%s19544_s7 + $0x88c] sm:$0xff]  }
  0xe4   :  { %v1136_v25 = vld [vmem:[%s19544_s7 + $0x888] sm:$0xf]  ;;  %1131 = vst [vmem:[#allocation8 + $0x878] sm:$0xf] %v1130_v23  ;;  %1133 = vst [vmem:[#allocation8 + $0x87c] sm:$0xff] %v1132_v24   ;;  %v1148_v30 = vld [vmem:[%s19544_s7 + $0x89c] sm:$0xff]  }
  0xe5   :  { %1137 = vst [vmem:[#allocation8 + $0x884] sm:$0xf] %v1136_v25  ;;  %v1138_v26 = vld [vmem:[%s19544_s7 + $0x884] sm:$0xf]  ;;  %v1144_v28 = vld [vmem:[%s19544_s7 + $0x898] sm:$0xf] }
  0xe6   :  { %1139 = vst [vmem:[#allocation8 + $0x888] sm:$0xf] %v1138_v26  ;;  %1141 = vst [vmem:[#allocation8 + $0x88c] sm:$0xff] %v1140_v27   ;;  %v1146_v29 = vld [vmem:[%s19544_s7 + $0x894] sm:$0xf]  ;;  %v1156_v33 = vld [vmem:[%s19544_s7 + $0x8ac] sm:$0xff]  }
  0xe7   :  { %1145 = vst [vmem:[#allocation8 + $0x894] sm:$0xf] %v1144_v28  ;;  %v1152_v31 = vld [vmem:[%s19544_s7 + $0x8a8] sm:$0xf]  ;;  %1147 = vst [vmem:[#allocation8 + $0x898] sm:$0xf] %v1146_v29 }
  0xe8   :  { %1149 = vst [vmem:[#allocation8 + $0x89c] sm:$0xff] %v1148_v30   ;;  %1153 = vst [vmem:[#allocation8 + $0x8a4] sm:$0xf] %v1152_v31  ;;  %v1154_v32 = vld [vmem:[%s19544_s7 + $0x8a4] sm:$0xf]  ;;  %v1164_v36 = vld [vmem:[%s19544_s7 + $0x8bc] sm:$0xff]  }
  0xe9   :  { %v1160_v34 = vld [vmem:[%s19544_s7 + $0x8b8] sm:$0xf]  ;;  %1155 = vst [vmem:[#allocation8 + $0x8a8] sm:$0xf] %v1154_v32  ;;  %1157 = vst [vmem:[#allocation8 + $0x8ac] sm:$0xff] %v1156_v33   ;;  %v1172_v39 = vld [vmem:[%s19544_s7 + $0x8cc] sm:$0xff]  }
  0xea   :  { %1161 = vst [vmem:[#allocation8 + $0x8b4] sm:$0xf] %v1160_v34  ;;  %v1162_v35 = vld [vmem:[%s19544_s7 + $0x8b4] sm:$0xf]  ;;  %v1168_v37 = vld [vmem:[%s19544_s7 + $0x8c8] sm:$0xf] }
  0xeb   :  { %1163 = vst [vmem:[#allocation8 + $0x8b8] sm:$0xf] %v1162_v35  ;;  %1165 = vst [vmem:[#allocation8 + $0x8bc] sm:$0xff] %v1164_v36   ;;  %v1170_v38 = vld [vmem:[%s19544_s7 + $0x8c4] sm:$0xf]  ;;  %v1180_v42 = vld [vmem:[%s19544_s7 + $0x8dc] sm:$0xff]  }
  0xec   :  { %1169 = vst [vmem:[#allocation8 + $0x8c4] sm:$0xf] %v1168_v37  ;;  %v1176_v40 = vld [vmem:[%s19544_s7 + $0x8d8] sm:$0xf]  ;;  %1171 = vst [vmem:[#allocation8 + $0x8c8] sm:$0xf] %v1170_v38 }
  0xed   :  { %1173 = vst [vmem:[#allocation8 + $0x8cc] sm:$0xff] %v1172_v39   ;;  %1177 = vst [vmem:[#allocation8 + $0x8d4] sm:$0xf] %v1176_v40  ;;  %v1178_v41 = vld [vmem:[%s19544_s7 + $0x8d4] sm:$0xf]  ;;  %v1188_v45 = vld [vmem:[%s19544_s7 + $0x8ec] sm:$0xff]  }
  0xee   :  { %v1184_v43 = vld [vmem:[%s19544_s7 + $0x8e8] sm:$0xf]  ;;  %1179 = vst [vmem:[#allocation8 + $0x8d8] sm:$0xf] %v1178_v41  ;;  %1181 = vst [vmem:[#allocation8 + $0x8dc] sm:$0xff] %v1180_v42   ;;  %v1196_v48 = vld [vmem:[%s19544_s7 + $0x8fc] sm:$0xff]  }
  0xef   :  { %1185 = vst [vmem:[#allocation8 + $0x8e4] sm:$0xf] %v1184_v43  ;;  %v1186_v44 = vld [vmem:[%s19544_s7 + $0x8e4] sm:$0xf]  ;;  %v1192_v46 = vld [vmem:[%s19544_s7 + $0x8f8] sm:$0xf] }
  0xf0   :  { %1187 = vst [vmem:[#allocation8 + $0x8e8] sm:$0xf] %v1186_v44  ;;  %1189 = vst [vmem:[#allocation8 + $0x8ec] sm:$0xff] %v1188_v45   ;;  %v1194_v47 = vld [vmem:[%s19544_s7 + $0x8f4] sm:$0xf]  ;;  %v1204_v51 = vld [vmem:[%s19544_s7 + $0x90c] sm:$0xff]  }
  0xf1   :  { %1193 = vst [vmem:[#allocation8 + $0x8f4] sm:$0xf] %v1192_v46  ;;  %v1200_v49 = vld [vmem:[%s19544_s7 + $0x908] sm:$0xf]  ;;  %1195 = vst [vmem:[#allocation8 + $0x8f8] sm:$0xf] %v1194_v47 }
  0xf2   :  { %1197 = vst [vmem:[#allocation8 + $0x8fc] sm:$0xff] %v1196_v48   ;;  %1201 = vst [vmem:[#allocation8 + $0x904] sm:$0xf] %v1200_v49  ;;  %v1202_v50 = vld [vmem:[%s19544_s7 + $0x904] sm:$0xf]  ;;  %v1212_v54 = vld [vmem:[%s19544_s7 + $0x91c] sm:$0xff]  }
  0xf3   :  { %v1208_v52 = vld [vmem:[%s19544_s7 + $0x918] sm:$0xf]  ;;  %1203 = vst [vmem:[#allocation8 + $0x908] sm:$0xf] %v1202_v50  ;;  %1205 = vst [vmem:[#allocation8 + $0x90c] sm:$0xff] %v1204_v51   ;;  %v1220_v57 = vld [vmem:[%s19544_s7 + $0x92c] sm:$0xff]  }
  0xf4   :  { %1209 = vst [vmem:[#allocation8 + $0x914] sm:$0xf] %v1208_v52  ;;  %v1210_v53 = vld [vmem:[%s19544_s7 + $0x914] sm:$0xf]  ;;  %v1216_v55 = vld [vmem:[%s19544_s7 + $0x928] sm:$0xf] }
  0xf5   :  { %1211 = vst [vmem:[#allocation8 + $0x918] sm:$0xf] %v1210_v53  ;;  %1213 = vst [vmem:[#allocation8 + $0x91c] sm:$0xff] %v1212_v54   ;;  %v1218_v56 = vld [vmem:[%s19544_s7 + $0x924] sm:$0xf]  ;;  %v1228_v60 = vld [vmem:[%s19544_s7 + $0x93c] sm:$0xff]  }
  0xf6   :  { %1217 = vst [vmem:[#allocation8 + $0x924] sm:$0xf] %v1216_v55  ;;  %v1224_v58 = vld [vmem:[%s19544_s7 + $0x938] sm:$0xf]  ;;  %1219 = vst [vmem:[#allocation8 + $0x928] sm:$0xf] %v1218_v56 }
  0xf7   :  { %1221 = vst [vmem:[#allocation8 + $0x92c] sm:$0xff] %v1220_v57   ;;  %1225 = vst [vmem:[#allocation8 + $0x934] sm:$0xf] %v1224_v58  ;;  %v1226_v59 = vld [vmem:[%s19544_s7 + $0x934] sm:$0xf]  ;;  %v1236_v63 = vld [vmem:[%s19544_s7 + $0x94c] sm:$0xff]  }
  0xf8   :  { %v1232_v61 = vld [vmem:[%s19544_s7 + $0x948] sm:$0xf]  ;;  %1227 = vst [vmem:[#allocation8 + $0x938] sm:$0xf] %v1226_v59  ;;  %1229 = vst [vmem:[#allocation8 + $0x93c] sm:$0xff] %v1228_v60   ;;  %v1244_v2 = vld [vmem:[%s19544_s7 + $0x95c] sm:$0xff]  }
  0xf9   :  { %1233 = vst [vmem:[#allocation8 + $0x944] sm:$0xf] %v1232_v61  ;;  %v1234_v62 = vld [vmem:[%s19544_s7 + $0x944] sm:$0xf]  ;;  %v1240_v0 = vld [vmem:[%s19544_s7 + $0x958] sm:$0xf] }
  0xfa   :  { %1235 = vst [vmem:[#allocation8 + $0x948] sm:$0xf] %v1234_v62  ;;  %1237 = vst [vmem:[#allocation8 + $0x94c] sm:$0xff] %v1236_v63   ;;  %v1242_v1 = vld [vmem:[%s19544_s7 + $0x954] sm:$0xf]  ;;  %v1252_v5 = vld [vmem:[%s19544_s7 + $0x96c] sm:$0xff]  }
  0xfb   :  { %1241 = vst [vmem:[#allocation8 + $0x954] sm:$0xf] %v1240_v0  ;;  %v1248_v3 = vld [vmem:[%s19544_s7 + $0x968] sm:$0xf]  ;;  %1243 = vst [vmem:[#allocation8 + $0x958] sm:$0xf] %v1242_v1 }
  0xfc   :  { %1245 = vst [vmem:[#allocation8 + $0x95c] sm:$0xff] %v1244_v2   ;;  %1249 = vst [vmem:[#allocation8 + $0x964] sm:$0xf] %v1248_v3  ;;  %v1250_v4 = vld [vmem:[%s19544_s7 + $0x964] sm:$0xf]  ;;  %v1260_v8 = vld [vmem:[%s19544_s7 + $0x97c] sm:$0xff]  }
  0xfd   :  { %v1256_v6 = vld [vmem:[%s19544_s7 + $0x978] sm:$0xf]  ;;  %1251 = vst [vmem:[#allocation8 + $0x968] sm:$0xf] %v1250_v4  ;;  %1253 = vst [vmem:[#allocation8 + $0x96c] sm:$0xff] %v1252_v5   ;;  %v1268_v11 = vld [vmem:[%s19544_s7 + $0x98c] sm:$0xff]  }
  0xfe   :  { %1257 = vst [vmem:[#allocation8 + $0x974] sm:$0xf] %v1256_v6  ;;  %v1258_v7 = vld [vmem:[%s19544_s7 + $0x974] sm:$0xf]  ;;  %v1264_v9 = vld [vmem:[%s19544_s7 + $0x988] sm:$0xf] }
  0xff   :  { %1259 = vst [vmem:[#allocation8 + $0x978] sm:$0xf] %v1258_v7  ;;  %1261 = vst [vmem:[#allocation8 + $0x97c] sm:$0xff] %v1260_v8   ;;  %v1266_v10 = vld [vmem:[%s19544_s7 + $0x984] sm:$0xf]  ;;  %v1276_v14 = vld [vmem:[%s19544_s7 + $0x99c] sm:$0xff]  }
 0x100   :  { %1265 = vst [vmem:[#allocation8 + $0x984] sm:$0xf] %v1264_v9  ;;  %v1272_v12 = vld [vmem:[%s19544_s7 + $0x998] sm:$0xf]  ;;  %1267 = vst [vmem:[#allocation8 + $0x988] sm:$0xf] %v1266_v10 }
 0x101   :  { %1269 = vst [vmem:[#allocation8 + $0x98c] sm:$0xff] %v1268_v11   ;;  %1273 = vst [vmem:[#allocation8 + $0x994] sm:$0xf] %v1272_v12  ;;  %v1274_v13 = vld [vmem:[%s19544_s7 + $0x994] sm:$0xf]  ;;  %v1284_v17 = vld [vmem:[%s19544_s7 + $0x9ac] sm:$0xff]  }
 0x102   :  { %v1280_v15 = vld [vmem:[%s19544_s7 + $0x9a8] sm:$0xf]  ;;  %1275 = vst [vmem:[#allocation8 + $0x998] sm:$0xf] %v1274_v13  ;;  %1277 = vst [vmem:[#allocation8 + $0x99c] sm:$0xff] %v1276_v14   ;;  %v1292_v20 = vld [vmem:[%s19544_s7 + $0x9bc] sm:$0xff]  }
 0x103   :  { %1281 = vst [vmem:[#allocation8 + $0x9a4] sm:$0xf] %v1280_v15  ;;  %v1282_v16 = vld [vmem:[%s19544_s7 + $0x9a4] sm:$0xf]  ;;  %v1288_v18 = vld [vmem:[%s19544_s7 + $0x9b8] sm:$0xf] }
 0x104   :  { %1283 = vst [vmem:[#allocation8 + $0x9a8] sm:$0xf] %v1282_v16  ;;  %1285 = vst [vmem:[#allocation8 + $0x9ac] sm:$0xff] %v1284_v17   ;;  %v1290_v19 = vld [vmem:[%s19544_s7 + $0x9b4] sm:$0xf]  ;;  %v1300_v23 = vld [vmem:[%s19544_s7 + $0x9cc] sm:$0xff]  }
 0x105   :  { %1289 = vst [vmem:[#allocation8 + $0x9b4] sm:$0xf] %v1288_v18  ;;  %v1296_v21 = vld [vmem:[%s19544_s7 + $0x9c8] sm:$0xf]  ;;  %1291 = vst [vmem:[#allocation8 + $0x9b8] sm:$0xf] %v1290_v19 }
 0x106   :  { %1293 = vst [vmem:[#allocation8 + $0x9bc] sm:$0xff] %v1292_v20   ;;  %1297 = vst [vmem:[#allocation8 + $0x9c4] sm:$0xf] %v1296_v21  ;;  %v1298_v22 = vld [vmem:[%s19544_s7 + $0x9c4] sm:$0xf]  ;;  %v1308_v26 = vld [vmem:[%s19544_s7 + $0x9dc] sm:$0xff]  }
 0x107   :  { %v1304_v24 = vld [vmem:[%s19544_s7 + $0x9d8] sm:$0xf]  ;;  %1299 = vst [vmem:[#allocation8 + $0x9c8] sm:$0xf] %v1298_v22  ;;  %1301 = vst [vmem:[#allocation8 + $0x9cc] sm:$0xff] %v1300_v23   ;;  %v1316_v29 = vld [vmem:[%s19544_s7 + $0x9ec] sm:$0xff]  }
 0x108   :  { %1305 = vst [vmem:[#allocation8 + $0x9d4] sm:$0xf] %v1304_v24  ;;  %v1306_v25 = vld [vmem:[%s19544_s7 + $0x9d4] sm:$0xf]  ;;  %v1312_v27 = vld [vmem:[%s19544_s7 + $0x9e8] sm:$0xf] }
 0x109   :  { %1307 = vst [vmem:[#allocation8 + $0x9d8] sm:$0xf] %v1306_v25  ;;  %1309 = vst [vmem:[#allocation8 + $0x9dc] sm:$0xff] %v1308_v26   ;;  %v1314_v28 = vld [vmem:[%s19544_s7 + $0x9e4] sm:$0xf]  ;;  %v1324_v32 = vld [vmem:[%s19544_s7 + $0x9fc] sm:$0xff]  }
 0x10a   :  { %1313 = vst [vmem:[#allocation8 + $0x9e4] sm:$0xf] %v1312_v27  ;;  %v1320_v30 = vld [vmem:[%s19544_s7 + $0x9f8] sm:$0xf]  ;;  %1315 = vst [vmem:[#allocation8 + $0x9e8] sm:$0xf] %v1314_v28 }
 0x10b   :  { %1317 = vst [vmem:[#allocation8 + $0x9ec] sm:$0xff] %v1316_v29   ;;  %1321 = vst [vmem:[#allocation8 + $0x9f4] sm:$0xf] %v1320_v30  ;;  %v1322_v31 = vld [vmem:[%s19544_s7 + $0x9f4] sm:$0xf]  ;;  %v1332_v35 = vld [vmem:[%s19544_s7 + $0xa0c] sm:$0xff]  }
 0x10c   :  { %v1328_v33 = vld [vmem:[%s19544_s7 + $0xa08] sm:$0xf]  ;;  %1323 = vst [vmem:[#allocation8 + $0x9f8] sm:$0xf] %v1322_v31  ;;  %1325 = vst [vmem:[#allocation8 + $0x9fc] sm:$0xff] %v1324_v32   ;;  %v1340_v38 = vld [vmem:[%s19544_s7 + $0xa1c] sm:$0xff]  }
 0x10d   :  { %1329 = vst [vmem:[#allocation8 + $0xa04] sm:$0xf] %v1328_v33  ;;  %v1330_v34 = vld [vmem:[%s19544_s7 + $0xa04] sm:$0xf]  ;;  %v1336_v36 = vld [vmem:[%s19544_s7 + $0xa18] sm:$0xf] }
 0x10e   :  { %1331 = vst [vmem:[#allocation8 + $0xa08] sm:$0xf] %v1330_v34  ;;  %1333 = vst [vmem:[#allocation8 + $0xa0c] sm:$0xff] %v1332_v35   ;;  %v1338_v37 = vld [vmem:[%s19544_s7 + $0xa14] sm:$0xf]  ;;  %v1348_v41 = vld [vmem:[%s19544_s7 + $0xa2c] sm:$0xff]  }
 0x10f   :  { %1337 = vst [vmem:[#allocation8 + $0xa14] sm:$0xf] %v1336_v36  ;;  %v1344_v39 = vld [vmem:[%s19544_s7 + $0xa28] sm:$0xf]  ;;  %1339 = vst [vmem:[#allocation8 + $0xa18] sm:$0xf] %v1338_v37 }
 0x110   :  { %1341 = vst [vmem:[#allocation8 + $0xa1c] sm:$0xff] %v1340_v38   ;;  %1345 = vst [vmem:[#allocation8 + $0xa24] sm:$0xf] %v1344_v39  ;;  %v1346_v40 = vld [vmem:[%s19544_s7 + $0xa24] sm:$0xf]  ;;  %v1356_v44 = vld [vmem:[%s19544_s7 + $0xa3c] sm:$0xff]  }
 0x111   :  { %v1352_v42 = vld [vmem:[%s19544_s7 + $0xa38] sm:$0xf]  ;;  %1347 = vst [vmem:[#allocation8 + $0xa28] sm:$0xf] %v1346_v40  ;;  %1349 = vst [vmem:[#allocation8 + $0xa2c] sm:$0xff] %v1348_v41   ;;  %v1364_v47 = vld [vmem:[%s19544_s7 + $0xa4c] sm:$0xff]  }
 0x112   :  { %1353 = vst [vmem:[#allocation8 + $0xa34] sm:$0xf] %v1352_v42  ;;  %v1354_v43 = vld [vmem:[%s19544_s7 + $0xa34] sm:$0xf]  ;;  %v1360_v45 = vld [vmem:[%s19544_s7 + $0xa48] sm:$0xf] }
 0x113   :  { %1355 = vst [vmem:[#allocation8 + $0xa38] sm:$0xf] %v1354_v43  ;;  %1357 = vst [vmem:[#allocation8 + $0xa3c] sm:$0xff] %v1356_v44   ;;  %v1362_v46 = vld [vmem:[%s19544_s7 + $0xa44] sm:$0xf]  ;;  %v1372_v50 = vld [vmem:[%s19544_s7 + $0xa5c] sm:$0xff]  }
 0x114   :  { %1361 = vst [vmem:[#allocation8 + $0xa44] sm:$0xf] %v1360_v45  ;;  %v1368_v48 = vld [vmem:[%s19544_s7 + $0xa58] sm:$0xf]  ;;  %1363 = vst [vmem:[#allocation8 + $0xa48] sm:$0xf] %v1362_v46 }
 0x115   :  { %1365 = vst [vmem:[#allocation8 + $0xa4c] sm:$0xff] %v1364_v47   ;;  %1369 = vst [vmem:[#allocation8 + $0xa54] sm:$0xf] %v1368_v48  ;;  %v1370_v49 = vld [vmem:[%s19544_s7 + $0xa54] sm:$0xf]  ;;  %v1380_v53 = vld [vmem:[%s19544_s7 + $0xa6c] sm:$0xff]  }
 0x116   :  { %v1376_v51 = vld [vmem:[%s19544_s7 + $0xa68] sm:$0xf]  ;;  %1371 = vst [vmem:[#allocation8 + $0xa58] sm:$0xf] %v1370_v49  ;;  %1373 = vst [vmem:[#allocation8 + $0xa5c] sm:$0xff] %v1372_v50   ;;  %v1388_v56 = vld [vmem:[%s19544_s7 + $0xa7c] sm:$0xff]  }
 0x117   :  { %1377 = vst [vmem:[#allocation8 + $0xa64] sm:$0xf] %v1376_v51  ;;  %v1378_v52 = vld [vmem:[%s19544_s7 + $0xa64] sm:$0xf]  ;;  %v1384_v54 = vld [vmem:[%s19544_s7 + $0xa78] sm:$0xf] }
 0x118   :  { %1379 = vst [vmem:[#allocation8 + $0xa68] sm:$0xf] %v1378_v52  ;;  %1381 = vst [vmem:[#allocation8 + $0xa6c] sm:$0xff] %v1380_v53   ;;  %v1386_v55 = vld [vmem:[%s19544_s7 + $0xa74] sm:$0xf]  ;;  %v1396_v59 = vld [vmem:[%s19544_s7 + $0xa8c] sm:$0xff]  }
 0x119   :  { %1385 = vst [vmem:[#allocation8 + $0xa74] sm:$0xf] %v1384_v54  ;;  %v1392_v57 = vld [vmem:[%s19544_s7 + $0xa88] sm:$0xf]  ;;  %1387 = vst [vmem:[#allocation8 + $0xa78] sm:$0xf] %v1386_v55 }
 0x11a   :  { %1389 = vst [vmem:[#allocation8 + $0xa7c] sm:$0xff] %v1388_v56   ;;  %1393 = vst [vmem:[#allocation8 + $0xa84] sm:$0xf] %v1392_v57  ;;  %v1394_v58 = vld [vmem:[%s19544_s7 + $0xa84] sm:$0xf]  ;;  %v1404_v62 = vld [vmem:[%s19544_s7 + $0xa9c] sm:$0xff]  }
 0x11b   :  { %v1400_v60 = vld [vmem:[%s19544_s7 + $0xa98] sm:$0xf]  ;;  %1395 = vst [vmem:[#allocation8 + $0xa88] sm:$0xf] %v1394_v58  ;;  %1397 = vst [vmem:[#allocation8 + $0xa8c] sm:$0xff] %v1396_v59   ;;  %v1412_v1 = vld [vmem:[%s19544_s7 + $0xaac] sm:$0xff]  }
 0x11c   :  { %1401 = vst [vmem:[#allocation8 + $0xa94] sm:$0xf] %v1400_v60  ;;  %v1402_v61 = vld [vmem:[%s19544_s7 + $0xa94] sm:$0xf]  ;;  %v1408_v63 = vld [vmem:[%s19544_s7 + $0xaa8] sm:$0xf] }
 0x11d   :  { %1403 = vst [vmem:[#allocation8 + $0xa98] sm:$0xf] %v1402_v61  ;;  %1405 = vst [vmem:[#allocation8 + $0xa9c] sm:$0xff] %v1404_v62   ;;  %v1410_v0 = vld [vmem:[%s19544_s7 + $0xaa4] sm:$0xf]  ;;  %v1420_v4 = vld [vmem:[%s19544_s7 + $0xabc] sm:$0xff]  }
 0x11e   :  { %1409 = vst [vmem:[#allocation8 + $0xaa4] sm:$0xf] %v1408_v63  ;;  %v1416_v2 = vld [vmem:[%s19544_s7 + $0xab8] sm:$0xf]  ;;  %1411 = vst [vmem:[#allocation8 + $0xaa8] sm:$0xf] %v1410_v0 }
 0x11f   :  { %1413 = vst [vmem:[#allocation8 + $0xaac] sm:$0xff] %v1412_v1   ;;  %1417 = vst [vmem:[#allocation8 + $0xab4] sm:$0xf] %v1416_v2  ;;  %v1418_v3 = vld [vmem:[%s19544_s7 + $0xab4] sm:$0xf]  ;;  %v1428_v7 = vld [vmem:[%s19544_s7 + $0xacc] sm:$0xff]  }
 0x120   :  { %v1424_v5 = vld [vmem:[%s19544_s7 + $0xac8] sm:$0xf]  ;;  %1419 = vst [vmem:[#allocation8 + $0xab8] sm:$0xf] %v1418_v3  ;;  %1421 = vst [vmem:[#allocation8 + $0xabc] sm:$0xff] %v1420_v4   ;;  %v1436_v10 = vld [vmem:[%s19544_s7 + $0xadc] sm:$0xff]  }
 0x121   :  { %1425 = vst [vmem:[#allocation8 + $0xac4] sm:$0xf] %v1424_v5  ;;  %v1426_v6 = vld [vmem:[%s19544_s7 + $0xac4] sm:$0xf]  ;;  %v1432_v8 = vld [vmem:[%s19544_s7 + $0xad8] sm:$0xf] }
 0x122   :  { %1427 = vst [vmem:[#allocation8 + $0xac8] sm:$0xf] %v1426_v6  ;;  %1429 = vst [vmem:[#allocation8 + $0xacc] sm:$0xff] %v1428_v7   ;;  %v1434_v9 = vld [vmem:[%s19544_s7 + $0xad4] sm:$0xf]  ;;  %v1444_v13 = vld [vmem:[%s19544_s7 + $0xaec] sm:$0xff]  }
 0x123   :  { %1433 = vst [vmem:[#allocation8 + $0xad4] sm:$0xf] %v1432_v8  ;;  %v1440_v11 = vld [vmem:[%s19544_s7 + $0xae8] sm:$0xf]  ;;  %1435 = vst [vmem:[#allocation8 + $0xad8] sm:$0xf] %v1434_v9 }
 0x124   :  { %1437 = vst [vmem:[#allocation8 + $0xadc] sm:$0xff] %v1436_v10   ;;  %1441 = vst [vmem:[#allocation8 + $0xae4] sm:$0xf] %v1440_v11  ;;  %v1442_v12 = vld [vmem:[%s19544_s7 + $0xae4] sm:$0xf]  ;;  %v1452_v16 = vld [vmem:[%s19544_s7 + $0xafc] sm:$0xff]  }
 0x125   :  { %v1448_v14 = vld [vmem:[%s19544_s7 + $0xaf8] sm:$0xf]  ;;  %1443 = vst [vmem:[#allocation8 + $0xae8] sm:$0xf] %v1442_v12  ;;  %1445 = vst [vmem:[#allocation8 + $0xaec] sm:$0xff] %v1444_v13   ;;  %v1460_v19 = vld [vmem:[%s19544_s7 + $0xb0c] sm:$0xff]  }
 0x126   :  { %1449 = vst [vmem:[#allocation8 + $0xaf4] sm:$0xf] %v1448_v14  ;;  %v1450_v15 = vld [vmem:[%s19544_s7 + $0xaf4] sm:$0xf]  ;;  %v1456_v17 = vld [vmem:[%s19544_s7 + $0xb08] sm:$0xf] }
 0x127   :  { %1451 = vst [vmem:[#allocation8 + $0xaf8] sm:$0xf] %v1450_v15  ;;  %1453 = vst [vmem:[#allocation8 + $0xafc] sm:$0xff] %v1452_v16   ;;  %v1458_v18 = vld [vmem:[%s19544_s7 + $0xb04] sm:$0xf]  ;;  %v1468_v22 = vld [vmem:[%s19544_s7 + $0xb1c] sm:$0xff]  }
 0x128   :  { %1457 = vst [vmem:[#allocation8 + $0xb04] sm:$0xf] %v1456_v17  ;;  %v1464_v20 = vld [vmem:[%s19544_s7 + $0xb18] sm:$0xf]  ;;  %1459 = vst [vmem:[#allocation8 + $0xb08] sm:$0xf] %v1458_v18 }
 0x129   :  { %1461 = vst [vmem:[#allocation8 + $0xb0c] sm:$0xff] %v1460_v19   ;;  %1465 = vst [vmem:[#allocation8 + $0xb14] sm:$0xf] %v1464_v20  ;;  %v1466_v21 = vld [vmem:[%s19544_s7 + $0xb14] sm:$0xf]  ;;  %v1476_v25 = vld [vmem:[%s19544_s7 + $0xb2c] sm:$0xff]  }
 0x12a   :  { %v1472_v23 = vld [vmem:[%s19544_s7 + $0xb28] sm:$0xf]  ;;  %1467 = vst [vmem:[#allocation8 + $0xb18] sm:$0xf] %v1466_v21  ;;  %1469 = vst [vmem:[#allocation8 + $0xb1c] sm:$0xff] %v1468_v22   ;;  %v1484_v28 = vld [vmem:[%s19544_s7 + $0xb3c] sm:$0xff]  }
 0x12b   :  { %1473 = vst [vmem:[#allocation8 + $0xb24] sm:$0xf] %v1472_v23  ;;  %v1474_v24 = vld [vmem:[%s19544_s7 + $0xb24] sm:$0xf]  ;;  %v1480_v26 = vld [vmem:[%s19544_s7 + $0xb38] sm:$0xf] }
 0x12c   :  { %1475 = vst [vmem:[#allocation8 + $0xb28] sm:$0xf] %v1474_v24  ;;  %1477 = vst [vmem:[#allocation8 + $0xb2c] sm:$0xff] %v1476_v25   ;;  %v1482_v27 = vld [vmem:[%s19544_s7 + $0xb34] sm:$0xf]  ;;  %v1492_v31 = vld [vmem:[%s19544_s7 + $0xb4c] sm:$0xff]  }
 0x12d   :  { %1481 = vst [vmem:[#allocation8 + $0xb34] sm:$0xf] %v1480_v26  ;;  %v1488_v29 = vld [vmem:[%s19544_s7 + $0xb48] sm:$0xf]  ;;  %1483 = vst [vmem:[#allocation8 + $0xb38] sm:$0xf] %v1482_v27 }
 0x12e   :  { %1485 = vst [vmem:[#allocation8 + $0xb3c] sm:$0xff] %v1484_v28   ;;  %1489 = vst [vmem:[#allocation8 + $0xb44] sm:$0xf] %v1488_v29  ;;  %v1490_v30 = vld [vmem:[%s19544_s7 + $0xb44] sm:$0xf]  ;;  %v1500_v34 = vld [vmem:[%s19544_s7 + $0xb5c] sm:$0xff]  }
 0x12f   :  { %v1496_v32 = vld [vmem:[%s19544_s7 + $0xb58] sm:$0xf]  ;;  %1491 = vst [vmem:[#allocation8 + $0xb48] sm:$0xf] %v1490_v30  ;;  %1493 = vst [vmem:[#allocation8 + $0xb4c] sm:$0xff] %v1492_v31   ;;  %v1508_v37 = vld [vmem:[%s19544_s7 + $0xb6c] sm:$0xff]  }
 0x130   :  { %1497 = vst [vmem:[#allocation8 + $0xb54] sm:$0xf] %v1496_v32  ;;  %v1498_v33 = vld [vmem:[%s19544_s7 + $0xb54] sm:$0xf]  ;;  %v1504_v35 = vld [vmem:[%s19544_s7 + $0xb68] sm:$0xf] }
 0x131   :  { %1499 = vst [vmem:[#allocation8 + $0xb58] sm:$0xf] %v1498_v33  ;;  %1501 = vst [vmem:[#allocation8 + $0xb5c] sm:$0xff] %v1500_v34   ;;  %v1506_v36 = vld [vmem:[%s19544_s7 + $0xb64] sm:$0xf]  ;;  %v1516_v40 = vld [vmem:[%s19544_s7 + $0xb7c] sm:$0xff]  }
 0x132   :  { %1505 = vst [vmem:[#allocation8 + $0xb64] sm:$0xf] %v1504_v35  ;;  %v1512_v38 = vld [vmem:[%s19544_s7 + $0xb78] sm:$0xf]  ;;  %1507 = vst [vmem:[#allocation8 + $0xb68] sm:$0xf] %v1506_v36 }
 0x133   :  { %1509 = vst [vmem:[#allocation8 + $0xb6c] sm:$0xff] %v1508_v37   ;;  %1513 = vst [vmem:[#allocation8 + $0xb74] sm:$0xf] %v1512_v38  ;;  %v1514_v39 = vld [vmem:[%s19544_s7 + $0xb74] sm:$0xf]  ;;  %v1524_v43 = vld [vmem:[%s19544_s7 + $0xb8c] sm:$0xff]  }
 0x134   :  { %v1520_v41 = vld [vmem:[%s19544_s7 + $0xb88] sm:$0xf]  ;;  %1515 = vst [vmem:[#allocation8 + $0xb78] sm:$0xf] %v1514_v39  ;;  %1517 = vst [vmem:[#allocation8 + $0xb7c] sm:$0xff] %v1516_v40   ;;  %v1532_v46 = vld [vmem:[%s19544_s7 + $0xb9c] sm:$0xff]  }
 0x135   :  { %1521 = vst [vmem:[#allocation8 + $0xb84] sm:$0xf] %v1520_v41  ;;  %v1522_v42 = vld [vmem:[%s19544_s7 + $0xb84] sm:$0xf]  ;;  %v1528_v44 = vld [vmem:[%s19544_s7 + $0xb98] sm:$0xf] }
 0x136   :  { %1523 = vst [vmem:[#allocation8 + $0xb88] sm:$0xf] %v1522_v42  ;;  %1525 = vst [vmem:[#allocation8 + $0xb8c] sm:$0xff] %v1524_v43   ;;  %v1530_v45 = vld [vmem:[%s19544_s7 + $0xb94] sm:$0xf]  ;;  %v1540_v49 = vld [vmem:[%s19544_s7 + $0xbac] sm:$0xff]  }
 0x137   :  { %1529 = vst [vmem:[#allocation8 + $0xb94] sm:$0xf] %v1528_v44  ;;  %v1536_v47 = vld [vmem:[%s19544_s7 + $0xba8] sm:$0xf]  ;;  %1531 = vst [vmem:[#allocation8 + $0xb98] sm:$0xf] %v1530_v45 }
 0x138   :  { %1533 = vst [vmem:[#allocation8 + $0xb9c] sm:$0xff] %v1532_v46   ;;  %1537 = vst [vmem:[#allocation8 + $0xba4] sm:$0xf] %v1536_v47  ;;  %v1538_v48 = vld [vmem:[%s19544_s7 + $0xba4] sm:$0xf]  ;;  %v1548_v52 = vld [vmem:[%s19544_s7 + $0xbbc] sm:$0xff]  }
 0x139   :  { %v1544_v50 = vld [vmem:[%s19544_s7 + $0xbb8] sm:$0xf]  ;;  %1539 = vst [vmem:[#allocation8 + $0xba8] sm:$0xf] %v1538_v48  ;;  %1541 = vst [vmem:[#allocation8 + $0xbac] sm:$0xff] %v1540_v49   ;;  %v1556_v55 = vld [vmem:[%s19544_s7 + $0xbcc] sm:$0xff]  }
 0x13a   :  { %1545 = vst [vmem:[#allocation8 + $0xbb4] sm:$0xf] %v1544_v50  ;;  %v1546_v51 = vld [vmem:[%s19544_s7 + $0xbb4] sm:$0xf]  ;;  %v1552_v53 = vld [vmem:[%s19544_s7 + $0xbc8] sm:$0xf] }
 0x13b   :  { %1547 = vst [vmem:[#allocation8 + $0xbb8] sm:$0xf] %v1546_v51  ;;  %1549 = vst [vmem:[#allocation8 + $0xbbc] sm:$0xff] %v1548_v52   ;;  %v1554_v54 = vld [vmem:[%s19544_s7 + $0xbc4] sm:$0xf]  ;;  %v1564_v58 = vld [vmem:[%s19544_s7 + $0xbdc] sm:$0xff]  }
 0x13c   :  { %1553 = vst [vmem:[#allocation8 + $0xbc4] sm:$0xf] %v1552_v53  ;;  %v1560_v56 = vld [vmem:[%s19544_s7 + $0xbd8] sm:$0xf]  ;;  %1555 = vst [vmem:[#allocation8 + $0xbc8] sm:$0xf] %v1554_v54 }
 0x13d   :  { %1557 = vst [vmem:[#allocation8 + $0xbcc] sm:$0xff] %v1556_v55   ;;  %1561 = vst [vmem:[#allocation8 + $0xbd4] sm:$0xf] %v1560_v56  ;;  %v1562_v57 = vld [vmem:[%s19544_s7 + $0xbd4] sm:$0xf]  ;;  %v1572_v61 = vld [vmem:[%s19544_s7 + $0xbec] sm:$0xff]  }
 0x13e   :  { %v1568_v59 = vld [vmem:[%s19544_s7 + $0xbe8] sm:$0xf]  ;;  %1563 = vst [vmem:[#allocation8 + $0xbd8] sm:$0xf] %v1562_v57  ;;  %1565 = vst [vmem:[#allocation8 + $0xbdc] sm:$0xff] %v1564_v58   ;;  %v1580_v0 = vld [vmem:[%s19544_s7 + $0xbfc] sm:$0xff]  }
 0x13f   :  { %1569 = vst [vmem:[#allocation8 + $0xbe4] sm:$0xf] %v1568_v59  ;;  %v1570_v60 = vld [vmem:[%s19544_s7 + $0xbe4] sm:$0xf]  ;;  %v1576_v62 = vld [vmem:[%s19544_s7 + $0xbf8] sm:$0xf] }
 0x140   :  { %1571 = vst [vmem:[#allocation8 + $0xbe8] sm:$0xf] %v1570_v60  ;;  %1573 = vst [vmem:[#allocation8 + $0xbec] sm:$0xff] %v1572_v61   ;;  %v1578_v63 = vld [vmem:[%s19544_s7 + $0xbf4] sm:$0xf]  ;;  %v1588_v3 = vld [vmem:[%s19544_s7 + $0xc0c] sm:$0xff]  }
 0x141   :  { %1577 = vst [vmem:[#allocation8 + $0xbf4] sm:$0xf] %v1576_v62  ;;  %v1584_v1 = vld [vmem:[%s19544_s7 + $0xc08] sm:$0xf]  ;;  %1579 = vst [vmem:[#allocation8 + $0xbf8] sm:$0xf] %v1578_v63 }
 0x142   :  { %1581 = vst [vmem:[#allocation8 + $0xbfc] sm:$0xff] %v1580_v0   ;;  %1585 = vst [vmem:[#allocation8 + $0xc04] sm:$0xf] %v1584_v1  ;;  %v1586_v2 = vld [vmem:[%s19544_s7 + $0xc04] sm:$0xf]  ;;  %v1596_v6 = vld [vmem:[%s19544_s7 + $0xc1c] sm:$0xff]  }
 0x143   :  { %v1592_v4 = vld [vmem:[%s19544_s7 + $0xc18] sm:$0xf]  ;;  %1587 = vst [vmem:[#allocation8 + $0xc08] sm:$0xf] %v1586_v2  ;;  %1589 = vst [vmem:[#allocation8 + $0xc0c] sm:$0xff] %v1588_v3   ;;  %v1604_v9 = vld [vmem:[%s19544_s7 + $0xc2c] sm:$0xff]  }
 0x144   :  { %1593 = vst [vmem:[#allocation8 + $0xc14] sm:$0xf] %v1592_v4  ;;  %v1594_v5 = vld [vmem:[%s19544_s7 + $0xc14] sm:$0xf]  ;;  %v1600_v7 = vld [vmem:[%s19544_s7 + $0xc28] sm:$0xf] }
 0x145   :  { %1595 = vst [vmem:[#allocation8 + $0xc18] sm:$0xf] %v1594_v5  ;;  %1597 = vst [vmem:[#allocation8 + $0xc1c] sm:$0xff] %v1596_v6   ;;  %v1602_v8 = vld [vmem:[%s19544_s7 + $0xc24] sm:$0xf]  ;;  %v1612_v12 = vld [vmem:[%s19544_s7 + $0xc3c] sm:$0xff]  }
 0x146   :  { %1601 = vst [vmem:[#allocation8 + $0xc24] sm:$0xf] %v1600_v7  ;;  %v1608_v10 = vld [vmem:[%s19544_s7 + $0xc38] sm:$0xf]  ;;  %1603 = vst [vmem:[#allocation8 + $0xc28] sm:$0xf] %v1602_v8 }
 0x147   :  { %1605 = vst [vmem:[#allocation8 + $0xc2c] sm:$0xff] %v1604_v9   ;;  %1609 = vst [vmem:[#allocation8 + $0xc34] sm:$0xf] %v1608_v10  ;;  %v1610_v11 = vld [vmem:[%s19544_s7 + $0xc34] sm:$0xf]  ;;  %v1620_v15 = vld [vmem:[%s19544_s7 + $0xc4c] sm:$0xff]  }
 0x148   :  { %v1616_v13 = vld [vmem:[%s19544_s7 + $0xc48] sm:$0xf]  ;;  %1611 = vst [vmem:[#allocation8 + $0xc38] sm:$0xf] %v1610_v11  ;;  %1613 = vst [vmem:[#allocation8 + $0xc3c] sm:$0xff] %v1612_v12   ;;  %v1628_v18 = vld [vmem:[%s19544_s7 + $0xc5c] sm:$0xff]  }
 0x149   :  { %1617 = vst [vmem:[#allocation8 + $0xc44] sm:$0xf] %v1616_v13  ;;  %v1618_v14 = vld [vmem:[%s19544_s7 + $0xc44] sm:$0xf]  ;;  %v1624_v16 = vld [vmem:[%s19544_s7 + $0xc58] sm:$0xf] }
 0x14a   :  { %1619 = vst [vmem:[#allocation8 + $0xc48] sm:$0xf] %v1618_v14  ;;  %1621 = vst [vmem:[#allocation8 + $0xc4c] sm:$0xff] %v1620_v15   ;;  %v1626_v17 = vld [vmem:[%s19544_s7 + $0xc54] sm:$0xf]  ;;  %v1636_v21 = vld [vmem:[%s19544_s7 + $0xc6c] sm:$0xff]  }
 0x14b   :  { %1625 = vst [vmem:[#allocation8 + $0xc54] sm:$0xf] %v1624_v16  ;;  %v1632_v19 = vld [vmem:[%s19544_s7 + $0xc68] sm:$0xf]  ;;  %1627 = vst [vmem:[#allocation8 + $0xc58] sm:$0xf] %v1626_v17 }
 0x14c   :  { %1629 = vst [vmem:[#allocation8 + $0xc5c] sm:$0xff] %v1628_v18   ;;  %1633 = vst [vmem:[#allocation8 + $0xc64] sm:$0xf] %v1632_v19  ;;  %v1634_v20 = vld [vmem:[%s19544_s7 + $0xc64] sm:$0xf]  ;;  %v1644_v24 = vld [vmem:[%s19544_s7 + $0xc7c] sm:$0xff]  }
 0x14d   :  { %v1640_v22 = vld [vmem:[%s19544_s7 + $0xc78] sm:$0xf]  ;;  %1635 = vst [vmem:[#allocation8 + $0xc68] sm:$0xf] %v1634_v20  ;;  %1637 = vst [vmem:[#allocation8 + $0xc6c] sm:$0xff] %v1636_v21   ;;  %v1652_v27 = vld [vmem:[%s19544_s7 + $0xc8c] sm:$0xff]  }
 0x14e   :  { %1641 = vst [vmem:[#allocation8 + $0xc74] sm:$0xf] %v1640_v22  ;;  %v1642_v23 = vld [vmem:[%s19544_s7 + $0xc74] sm:$0xf]  ;;  %v1648_v25 = vld [vmem:[%s19544_s7 + $0xc88] sm:$0xf] }
 0x14f   :  { %1643 = vst [vmem:[#allocation8 + $0xc78] sm:$0xf] %v1642_v23  ;;  %1645 = vst [vmem:[#allocation8 + $0xc7c] sm:$0xff] %v1644_v24   ;;  %v1650_v26 = vld [vmem:[%s19544_s7 + $0xc84] sm:$0xf]  ;;  %v1660_v30 = vld [vmem:[%s19544_s7 + $0xc9c] sm:$0xff]  }
 0x150   :  { %1649 = vst [vmem:[#allocation8 + $0xc84] sm:$0xf] %v1648_v25  ;;  %v1656_v28 = vld [vmem:[%s19544_s7 + $0xc98] sm:$0xf]  ;;  %1651 = vst [vmem:[#allocation8 + $0xc88] sm:$0xf] %v1650_v26 }
 0x151   :  { %1653 = vst [vmem:[#allocation8 + $0xc8c] sm:$0xff] %v1652_v27   ;;  %1657 = vst [vmem:[#allocation8 + $0xc94] sm:$0xf] %v1656_v28  ;;  %v1658_v29 = vld [vmem:[%s19544_s7 + $0xc94] sm:$0xf]  ;;  %v1668_v33 = vld [vmem:[%s19544_s7 + $0xcac] sm:$0xff]  }
 0x152   :  { %v1664_v31 = vld [vmem:[%s19544_s7 + $0xca8] sm:$0xf]  ;;  %1659 = vst [vmem:[#allocation8 + $0xc98] sm:$0xf] %v1658_v29  ;;  %1661 = vst [vmem:[#allocation8 + $0xc9c] sm:$0xff] %v1660_v30   ;;  %v1676_v36 = vld [vmem:[%s19544_s7 + $0xcbc] sm:$0xff]  }
 0x153   :  { %1665 = vst [vmem:[#allocation8 + $0xca4] sm:$0xf] %v1664_v31  ;;  %v1666_v32 = vld [vmem:[%s19544_s7 + $0xca4] sm:$0xf]  ;;  %v1672_v34 = vld [vmem:[%s19544_s7 + $0xcb8] sm:$0xf] }
 0x154   :  { %1667 = vst [vmem:[#allocation8 + $0xca8] sm:$0xf] %v1666_v32  ;;  %1669 = vst [vmem:[#allocation8 + $0xcac] sm:$0xff] %v1668_v33   ;;  %v1674_v35 = vld [vmem:[%s19544_s7 + $0xcb4] sm:$0xf]  ;;  %v1684_v39 = vld [vmem:[%s19544_s7 + $0xccc] sm:$0xff]  }
 0x155   :  { %1673 = vst [vmem:[#allocation8 + $0xcb4] sm:$0xf] %v1672_v34  ;;  %v1680_v37 = vld [vmem:[%s19544_s7 + $0xcc8] sm:$0xf]  ;;  %1675 = vst [vmem:[#allocation8 + $0xcb8] sm:$0xf] %v1674_v35 }
 0x156   :  { %1677 = vst [vmem:[#allocation8 + $0xcbc] sm:$0xff] %v1676_v36   ;;  %1681 = vst [vmem:[#allocation8 + $0xcc4] sm:$0xf] %v1680_v37  ;;  %v1682_v38 = vld [vmem:[%s19544_s7 + $0xcc4] sm:$0xf]  ;;  %v1692_v42 = vld [vmem:[%s19544_s7 + $0xcdc] sm:$0xff]  }
 0x157   :  { %v1688_v40 = vld [vmem:[%s19544_s7 + $0xcd8] sm:$0xf]  ;;  %1683 = vst [vmem:[#allocation8 + $0xcc8] sm:$0xf] %v1682_v38  ;;  %1685 = vst [vmem:[#allocation8 + $0xccc] sm:$0xff] %v1684_v39   ;;  %v1700_v45 = vld [vmem:[%s19544_s7 + $0xcec] sm:$0xff]  }
 0x158   :  { %1689 = vst [vmem:[#allocation8 + $0xcd4] sm:$0xf] %v1688_v40  ;;  %v1690_v41 = vld [vmem:[%s19544_s7 + $0xcd4] sm:$0xf]  ;;  %v1696_v43 = vld [vmem:[%s19544_s7 + $0xce8] sm:$0xf] }
 0x159   :  { %1691 = vst [vmem:[#allocation8 + $0xcd8] sm:$0xf] %v1690_v41  ;;  %1693 = vst [vmem:[#allocation8 + $0xcdc] sm:$0xff] %v1692_v42   ;;  %v1698_v44 = vld [vmem:[%s19544_s7 + $0xce4] sm:$0xf]  ;;  %v1708_v48 = vld [vmem:[%s19544_s7 + $0xcfc] sm:$0xff]  }
 0x15a   :  { %1697 = vst [vmem:[#allocation8 + $0xce4] sm:$0xf] %v1696_v43  ;;  %v1704_v46 = vld [vmem:[%s19544_s7 + $0xcf8] sm:$0xf]  ;;  %1699 = vst [vmem:[#allocation8 + $0xce8] sm:$0xf] %v1698_v44 }
 0x15b   :  { %1701 = vst [vmem:[#allocation8 + $0xcec] sm:$0xff] %v1700_v45   ;;  %1705 = vst [vmem:[#allocation8 + $0xcf4] sm:$0xf] %v1704_v46  ;;  %v1706_v47 = vld [vmem:[%s19544_s7 + $0xcf4] sm:$0xf]  ;;  %v1716_v51 = vld [vmem:[%s19544_s7 + $0xd0c] sm:$0xff]  }
 0x15c   :  { %v1712_v49 = vld [vmem:[%s19544_s7 + $0xd08] sm:$0xf]  ;;  %1707 = vst [vmem:[#allocation8 + $0xcf8] sm:$0xf] %v1706_v47  ;;  %1709 = vst [vmem:[#allocation8 + $0xcfc] sm:$0xff] %v1708_v48   ;;  %v1724_v54 = vld [vmem:[%s19544_s7 + $0xd1c] sm:$0xff]  }
 0x15d   :  { %1713 = vst [vmem:[#allocation8 + $0xd04] sm:$0xf] %v1712_v49  ;;  %v1714_v50 = vld [vmem:[%s19544_s7 + $0xd04] sm:$0xf]  ;;  %v1720_v52 = vld [vmem:[%s19544_s7 + $0xd18] sm:$0xf] }
 0x15e   :  { %1715 = vst [vmem:[#allocation8 + $0xd08] sm:$0xf] %v1714_v50  ;;  %1717 = vst [vmem:[#allocation8 + $0xd0c] sm:$0xff] %v1716_v51   ;;  %v1722_v53 = vld [vmem:[%s19544_s7 + $0xd14] sm:$0xf]  ;;  %v1732_v57 = vld [vmem:[%s19544_s7 + $0xd2c] sm:$0xff]  }
 0x15f   :  { %1721 = vst [vmem:[#allocation8 + $0xd14] sm:$0xf] %v1720_v52  ;;  %v1728_v55 = vld [vmem:[%s19544_s7 + $0xd28] sm:$0xf]  ;;  %1723 = vst [vmem:[#allocation8 + $0xd18] sm:$0xf] %v1722_v53 }
 0x160   :  { %1725 = vst [vmem:[#allocation8 + $0xd1c] sm:$0xff] %v1724_v54   ;;  %1729 = vst [vmem:[#allocation8 + $0xd24] sm:$0xf] %v1728_v55  ;;  %v1730_v56 = vld [vmem:[%s19544_s7 + $0xd24] sm:$0xf]  ;;  %v1740_v60 = vld [vmem:[%s19544_s7 + $0xd3c] sm:$0xff]  }
 0x161   :  { %v1736_v58 = vld [vmem:[%s19544_s7 + $0xd38] sm:$0xf]  ;;  %1731 = vst [vmem:[#allocation8 + $0xd28] sm:$0xf] %v1730_v56  ;;  %1733 = vst [vmem:[#allocation8 + $0xd2c] sm:$0xff] %v1732_v57   ;;  %v1748_v63 = vld [vmem:[%s19544_s7 + $0xd4c] sm:$0xff]  }
 0x162   :  { %1737 = vst [vmem:[#allocation8 + $0xd34] sm:$0xf] %v1736_v58  ;;  %v1738_v59 = vld [vmem:[%s19544_s7 + $0xd34] sm:$0xf]  ;;  %v1744_v61 = vld [vmem:[%s19544_s7 + $0xd48] sm:$0xf] }
 0x163   :  { %1739 = vst [vmem:[#allocation8 + $0xd38] sm:$0xf] %v1738_v59  ;;  %1741 = vst [vmem:[#allocation8 + $0xd3c] sm:$0xff] %v1740_v60   ;;  %v1746_v62 = vld [vmem:[%s19544_s7 + $0xd44] sm:$0xf]  ;;  %v1756_v2 = vld [vmem:[%s19544_s7 + $0xd5c] sm:$0xff]  }
 0x164   :  { %1745 = vst [vmem:[#allocation8 + $0xd44] sm:$0xf] %v1744_v61  ;;  %v1752_v0 = vld [vmem:[%s19544_s7 + $0xd58] sm:$0xf]  ;;  %1747 = vst [vmem:[#allocation8 + $0xd48] sm:$0xf] %v1746_v62 }
 0x165   :  { %1749 = vst [vmem:[#allocation8 + $0xd4c] sm:$0xff] %v1748_v63   ;;  %1753 = vst [vmem:[#allocation8 + $0xd54] sm:$0xf] %v1752_v0  ;;  %v1754_v1 = vld [vmem:[%s19544_s7 + $0xd54] sm:$0xf]  ;;  %v1764_v5 = vld [vmem:[%s19544_s7 + $0xd6c] sm:$0xff]  }
 0x166   :  { %v1760_v3 = vld [vmem:[%s19544_s7 + $0xd68] sm:$0xf]  ;;  %1755 = vst [vmem:[#allocation8 + $0xd58] sm:$0xf] %v1754_v1  ;;  %1757 = vst [vmem:[#allocation8 + $0xd5c] sm:$0xff] %v1756_v2   ;;  %v1772_v8 = vld [vmem:[%s19544_s7 + $0xd7c] sm:$0xff]  }
 0x167   :  { %1761 = vst [vmem:[#allocation8 + $0xd64] sm:$0xf] %v1760_v3  ;;  %v1762_v4 = vld [vmem:[%s19544_s7 + $0xd64] sm:$0xf]  ;;  %v1768_v6 = vld [vmem:[%s19544_s7 + $0xd78] sm:$0xf] }
 0x168   :  { %1763 = vst [vmem:[#allocation8 + $0xd68] sm:$0xf] %v1762_v4  ;;  %1765 = vst [vmem:[#allocation8 + $0xd6c] sm:$0xff] %v1764_v5   ;;  %v1770_v7 = vld [vmem:[%s19544_s7 + $0xd74] sm:$0xf]  ;;  %v1780_v11 = vld [vmem:[%s19544_s7 + $0xd8c] sm:$0xff]  }
 0x169   :  { %1769 = vst [vmem:[#allocation8 + $0xd74] sm:$0xf] %v1768_v6  ;;  %v1776_v9 = vld [vmem:[%s19544_s7 + $0xd88] sm:$0xf]  ;;  %1771 = vst [vmem:[#allocation8 + $0xd78] sm:$0xf] %v1770_v7 }
 0x16a   :  { %1773 = vst [vmem:[#allocation8 + $0xd7c] sm:$0xff] %v1772_v8   ;;  %1777 = vst [vmem:[#allocation8 + $0xd84] sm:$0xf] %v1776_v9  ;;  %v1778_v10 = vld [vmem:[%s19544_s7 + $0xd84] sm:$0xf]  ;;  %v1788_v14 = vld [vmem:[%s19544_s7 + $0xd9c] sm:$0xff]  }
 0x16b   :  { %v1784_v12 = vld [vmem:[%s19544_s7 + $0xd98] sm:$0xf]  ;;  %1779 = vst [vmem:[#allocation8 + $0xd88] sm:$0xf] %v1778_v10  ;;  %1781 = vst [vmem:[#allocation8 + $0xd8c] sm:$0xff] %v1780_v11   ;;  %v1796_v17 = vld [vmem:[%s19544_s7 + $0xdac] sm:$0xff]  }
 0x16c   :  { %1785 = vst [vmem:[#allocation8 + $0xd94] sm:$0xf] %v1784_v12  ;;  %v1786_v13 = vld [vmem:[%s19544_s7 + $0xd94] sm:$0xf]  ;;  %v1792_v15 = vld [vmem:[%s19544_s7 + $0xda8] sm:$0xf] }
 0x16d   :  { %1787 = vst [vmem:[#allocation8 + $0xd98] sm:$0xf] %v1786_v13  ;;  %1789 = vst [vmem:[#allocation8 + $0xd9c] sm:$0xff] %v1788_v14   ;;  %v1794_v16 = vld [vmem:[%s19544_s7 + $0xda4] sm:$0xf]  ;;  %v1804_v20 = vld [vmem:[%s19544_s7 + $0xdbc] sm:$0xff]  }
 0x16e   :  { %1793 = vst [vmem:[#allocation8 + $0xda4] sm:$0xf] %v1792_v15  ;;  %v1800_v18 = vld [vmem:[%s19544_s7 + $0xdb8] sm:$0xf]  ;;  %1795 = vst [vmem:[#allocation8 + $0xda8] sm:$0xf] %v1794_v16 }
 0x16f   :  { %1797 = vst [vmem:[#allocation8 + $0xdac] sm:$0xff] %v1796_v17   ;;  %1801 = vst [vmem:[#allocation8 + $0xdb4] sm:$0xf] %v1800_v18  ;;  %v1802_v19 = vld [vmem:[%s19544_s7 + $0xdb4] sm:$0xf]  ;;  %v1812_v23 = vld [vmem:[%s19544_s7 + $0xdcc] sm:$0xff]  }
 0x170   :  { %v1808_v21 = vld [vmem:[%s19544_s7 + $0xdc8] sm:$0xf]  ;;  %1803 = vst [vmem:[#allocation8 + $0xdb8] sm:$0xf] %v1802_v19  ;;  %1805 = vst [vmem:[#allocation8 + $0xdbc] sm:$0xff] %v1804_v20   ;;  %v1820_v26 = vld [vmem:[%s19544_s7 + $0xddc] sm:$0xff]  }
 0x171   :  { %1809 = vst [vmem:[#allocation8 + $0xdc4] sm:$0xf] %v1808_v21  ;;  %v1810_v22 = vld [vmem:[%s19544_s7 + $0xdc4] sm:$0xf]  ;;  %v1816_v24 = vld [vmem:[%s19544_s7 + $0xdd8] sm:$0xf] }
 0x172   :  { %1811 = vst [vmem:[#allocation8 + $0xdc8] sm:$0xf] %v1810_v22  ;;  %1813 = vst [vmem:[#allocation8 + $0xdcc] sm:$0xff] %v1812_v23   ;;  %v1818_v25 = vld [vmem:[%s19544_s7 + $0xdd4] sm:$0xf]  ;;  %v1828_v29 = vld [vmem:[%s19544_s7 + $0xdec] sm:$0xff]  }
 0x173   :  { %1817 = vst [vmem:[#allocation8 + $0xdd4] sm:$0xf] %v1816_v24  ;;  %v1824_v27 = vld [vmem:[%s19544_s7 + $0xde8] sm:$0xf]  ;;  %1819 = vst [vmem:[#allocation8 + $0xdd8] sm:$0xf] %v1818_v25 }
 0x174   :  { %1821 = vst [vmem:[#allocation8 + $0xddc] sm:$0xff] %v1820_v26   ;;  %1825 = vst [vmem:[#allocation8 + $0xde4] sm:$0xf] %v1824_v27  ;;  %v1826_v28 = vld [vmem:[%s19544_s7 + $0xde4] sm:$0xf]  ;;  %v1836_v32 = vld [vmem:[%s19544_s7 + $0xdfc] sm:$0xff]  }
 0x175   :  { %v1832_v30 = vld [vmem:[%s19544_s7 + $0xdf8] sm:$0xf]  ;;  %1827 = vst [vmem:[#allocation8 + $0xde8] sm:$0xf] %v1826_v28  ;;  %1829 = vst [vmem:[#allocation8 + $0xdec] sm:$0xff] %v1828_v29   ;;  %v1844_v35 = vld [vmem:[%s19544_s7 + $0xe0c] sm:$0xff]  }
 0x176   :  { %1833 = vst [vmem:[#allocation8 + $0xdf4] sm:$0xf] %v1832_v30  ;;  %v1834_v31 = vld [vmem:[%s19544_s7 + $0xdf4] sm:$0xf]  ;;  %v1840_v33 = vld [vmem:[%s19544_s7 + $0xe08] sm:$0xf] }
 0x177   :  { %1835 = vst [vmem:[#allocation8 + $0xdf8] sm:$0xf] %v1834_v31  ;;  %1837 = vst [vmem:[#allocation8 + $0xdfc] sm:$0xff] %v1836_v32   ;;  %v1842_v34 = vld [vmem:[%s19544_s7 + $0xe04] sm:$0xf]  ;;  %v1852_v38 = vld [vmem:[%s19544_s7 + $0xe1c] sm:$0xff]  }
 0x178   :  { %1841 = vst [vmem:[#allocation8 + $0xe04] sm:$0xf] %v1840_v33  ;;  %v1848_v36 = vld [vmem:[%s19544_s7 + $0xe18] sm:$0xf]  ;;  %1843 = vst [vmem:[#allocation8 + $0xe08] sm:$0xf] %v1842_v34 }
 0x179   :  { %1845 = vst [vmem:[#allocation8 + $0xe0c] sm:$0xff] %v1844_v35   ;;  %1849 = vst [vmem:[#allocation8 + $0xe14] sm:$0xf] %v1848_v36  ;;  %v1850_v37 = vld [vmem:[%s19544_s7 + $0xe14] sm:$0xf]  ;;  %v1860_v41 = vld [vmem:[%s19544_s7 + $0xe2c] sm:$0xff]  }
 0x17a   :  { %v1856_v39 = vld [vmem:[%s19544_s7 + $0xe28] sm:$0xf]  ;;  %1851 = vst [vmem:[#allocation8 + $0xe18] sm:$0xf] %v1850_v37  ;;  %1853 = vst [vmem:[#allocation8 + $0xe1c] sm:$0xff] %v1852_v38   ;;  %v1868_v44 = vld [vmem:[%s19544_s7 + $0xe3c] sm:$0xff]  }
 0x17b   :  { %1857 = vst [vmem:[#allocation8 + $0xe24] sm:$0xf] %v1856_v39  ;;  %v1858_v40 = vld [vmem:[%s19544_s7 + $0xe24] sm:$0xf]  ;;  %v1864_v42 = vld [vmem:[%s19544_s7 + $0xe38] sm:$0xf] }
 0x17c   :  { %1859 = vst [vmem:[#allocation8 + $0xe28] sm:$0xf] %v1858_v40  ;;  %1861 = vst [vmem:[#allocation8 + $0xe2c] sm:$0xff] %v1860_v41   ;;  %v1866_v43 = vld [vmem:[%s19544_s7 + $0xe34] sm:$0xf]  ;;  %v1876_v47 = vld [vmem:[%s19544_s7 + $0xe4c] sm:$0xff]  }
 0x17d   :  { %1865 = vst [vmem:[#allocation8 + $0xe34] sm:$0xf] %v1864_v42  ;;  %v1872_v45 = vld [vmem:[%s19544_s7 + $0xe48] sm:$0xf]  ;;  %1867 = vst [vmem:[#allocation8 + $0xe38] sm:$0xf] %v1866_v43 }
 0x17e   :  { %1869 = vst [vmem:[#allocation8 + $0xe3c] sm:$0xff] %v1868_v44   ;;  %1873 = vst [vmem:[#allocation8 + $0xe44] sm:$0xf] %v1872_v45  ;;  %v1874_v46 = vld [vmem:[%s19544_s7 + $0xe44] sm:$0xf]  ;;  %v1884_v50 = vld [vmem:[%s19544_s7 + $0xe5c] sm:$0xff]  }
 0x17f   :  { %v1880_v48 = vld [vmem:[%s19544_s7 + $0xe58] sm:$0xf]  ;;  %1875 = vst [vmem:[#allocation8 + $0xe48] sm:$0xf] %v1874_v46  ;;  %1877 = vst [vmem:[#allocation8 + $0xe4c] sm:$0xff] %v1876_v47   ;;  %v1892_v53 = vld [vmem:[%s19544_s7 + $0xe6c] sm:$0xff]  }
 0x180   :  { %1881 = vst [vmem:[#allocation8 + $0xe54] sm:$0xf] %v1880_v48  ;;  %v1882_v49 = vld [vmem:[%s19544_s7 + $0xe54] sm:$0xf]  ;;  %v1888_v51 = vld [vmem:[%s19544_s7 + $0xe68] sm:$0xf] }
 0x181   :  { %1883 = vst [vmem:[#allocation8 + $0xe58] sm:$0xf] %v1882_v49  ;;  %1885 = vst [vmem:[#allocation8 + $0xe5c] sm:$0xff] %v1884_v50   ;;  %v1890_v52 = vld [vmem:[%s19544_s7 + $0xe64] sm:$0xf]  ;;  %v1900_v56 = vld [vmem:[%s19544_s7 + $0xe7c] sm:$0xff]  }
 0x182   :  { %1889 = vst [vmem:[#allocation8 + $0xe64] sm:$0xf] %v1888_v51  ;;  %v1896_v54 = vld [vmem:[%s19544_s7 + $0xe78] sm:$0xf]  ;;  %1891 = vst [vmem:[#allocation8 + $0xe68] sm:$0xf] %v1890_v52 }
 0x183   :  { %1893 = vst [vmem:[#allocation8 + $0xe6c] sm:$0xff] %v1892_v53   ;;  %1897 = vst [vmem:[#allocation8 + $0xe74] sm:$0xf] %v1896_v54  ;;  %v1898_v55 = vld [vmem:[%s19544_s7 + $0xe74] sm:$0xf]  ;;  %v1908_v59 = vld [vmem:[%s19544_s7 + $0xe8c] sm:$0xff]  }
 0x184   :  { %v1904_v57 = vld [vmem:[%s19544_s7 + $0xe88] sm:$0xf]  ;;  %1899 = vst [vmem:[#allocation8 + $0xe78] sm:$0xf] %v1898_v55  ;;  %1901 = vst [vmem:[#allocation8 + $0xe7c] sm:$0xff] %v1900_v56   ;;  %v1916_v62 = vld [vmem:[%s19544_s7 + $0xe9c] sm:$0xff]  }
 0x185   :  { %1905 = vst [vmem:[#allocation8 + $0xe84] sm:$0xf] %v1904_v57  ;;  %v1906_v58 = vld [vmem:[%s19544_s7 + $0xe84] sm:$0xf]  ;;  %v1912_v60 = vld [vmem:[%s19544_s7 + $0xe98] sm:$0xf] }
 0x186   :  { %1907 = vst [vmem:[#allocation8 + $0xe88] sm:$0xf] %v1906_v58  ;;  %1909 = vst [vmem:[#allocation8 + $0xe8c] sm:$0xff] %v1908_v59   ;;  %v1914_v61 = vld [vmem:[%s19544_s7 + $0xe94] sm:$0xf]  ;;  %v1924_v1 = vld [vmem:[%s19544_s7 + $0xeac] sm:$0xff]  }
 0x187   :  { %1913 = vst [vmem:[#allocation8 + $0xe94] sm:$0xf] %v1912_v60  ;;  %v1920_v63 = vld [vmem:[%s19544_s7 + $0xea8] sm:$0xf]  ;;  %1915 = vst [vmem:[#allocation8 + $0xe98] sm:$0xf] %v1914_v61 }
 0x188   :  { %1917 = vst [vmem:[#allocation8 + $0xe9c] sm:$0xff] %v1916_v62   ;;  %1921 = vst [vmem:[#allocation8 + $0xea4] sm:$0xf] %v1920_v63  ;;  %v1922_v0 = vld [vmem:[%s19544_s7 + $0xea4] sm:$0xf]  ;;  %v1932_v4 = vld [vmem:[%s19544_s7 + $0xebc] sm:$0xff]  }
 0x189   :  { %v1928_v2 = vld [vmem:[%s19544_s7 + $0xeb8] sm:$0xf]  ;;  %1923 = vst [vmem:[#allocation8 + $0xea8] sm:$0xf] %v1922_v0  ;;  %1925 = vst [vmem:[#allocation8 + $0xeac] sm:$0xff] %v1924_v1   ;;  %v1940_v7 = vld [vmem:[%s19544_s7 + $0xecc] sm:$0xff]  }
 0x18a   :  { %1929 = vst [vmem:[#allocation8 + $0xeb4] sm:$0xf] %v1928_v2  ;;  %v1930_v3 = vld [vmem:[%s19544_s7 + $0xeb4] sm:$0xf]  ;;  %v1936_v5 = vld [vmem:[%s19544_s7 + $0xec8] sm:$0xf] }
 0x18b   :  { %1931 = vst [vmem:[#allocation8 + $0xeb8] sm:$0xf] %v1930_v3  ;;  %1933 = vst [vmem:[#allocation8 + $0xebc] sm:$0xff] %v1932_v4   ;;  %v1938_v6 = vld [vmem:[%s19544_s7 + $0xec4] sm:$0xf]  ;;  %v1948_v10 = vld [vmem:[%s19544_s7 + $0xedc] sm:$0xff]  }
 0x18c   :  { %1937 = vst [vmem:[#allocation8 + $0xec4] sm:$0xf] %v1936_v5  ;;  %v1944_v8 = vld [vmem:[%s19544_s7 + $0xed8] sm:$0xf]  ;;  %1939 = vst [vmem:[#allocation8 + $0xec8] sm:$0xf] %v1938_v6 }
 0x18d   :  { %1941 = vst [vmem:[#allocation8 + $0xecc] sm:$0xff] %v1940_v7   ;;  %1945 = vst [vmem:[#allocation8 + $0xed4] sm:$0xf] %v1944_v8  ;;  %v1946_v9 = vld [vmem:[%s19544_s7 + $0xed4] sm:$0xf]  ;;  %v1956_v13 = vld [vmem:[%s19544_s7 + $0xeec] sm:$0xff]  }
 0x18e   :  { %v1952_v11 = vld [vmem:[%s19544_s7 + $0xee8] sm:$0xf]  ;;  %1947 = vst [vmem:[#allocation8 + $0xed8] sm:$0xf] %v1946_v9  ;;  %1949 = vst [vmem:[#allocation8 + $0xedc] sm:$0xff] %v1948_v10   ;;  %v1964_v16 = vld [vmem:[%s19544_s7 + $0xefc] sm:$0xff]  }
 0x18f   :  { %1953 = vst [vmem:[#allocation8 + $0xee4] sm:$0xf] %v1952_v11  ;;  %v1954_v12 = vld [vmem:[%s19544_s7 + $0xee4] sm:$0xf]  ;;  %v1960_v14 = vld [vmem:[%s19544_s7 + $0xef8] sm:$0xf] }
 0x190   :  { %1955 = vst [vmem:[#allocation8 + $0xee8] sm:$0xf] %v1954_v12  ;;  %1957 = vst [vmem:[#allocation8 + $0xeec] sm:$0xff] %v1956_v13   ;;  %v1962_v15 = vld [vmem:[%s19544_s7 + $0xef4] sm:$0xf]  ;;  %v1972_v19 = vld [vmem:[%s19544_s7 + $0xf0c] sm:$0xff]  }
 0x191   :  { %1961 = vst [vmem:[#allocation8 + $0xef4] sm:$0xf] %v1960_v14  ;;  %v1968_v17 = vld [vmem:[%s19544_s7 + $0xf08] sm:$0xf]  ;;  %1963 = vst [vmem:[#allocation8 + $0xef8] sm:$0xf] %v1962_v15 }
 0x192   :  { %1965 = vst [vmem:[#allocation8 + $0xefc] sm:$0xff] %v1964_v16   ;;  %1969 = vst [vmem:[#allocation8 + $0xf04] sm:$0xf] %v1968_v17  ;;  %v1970_v18 = vld [vmem:[%s19544_s7 + $0xf04] sm:$0xf]  ;;  %v1980_v22 = vld [vmem:[%s19544_s7 + $0xf1c] sm:$0xff]  }
 0x193   :  { %v1976_v20 = vld [vmem:[%s19544_s7 + $0xf18] sm:$0xf]  ;;  %1971 = vst [vmem:[#allocation8 + $0xf08] sm:$0xf] %v1970_v18  ;;  %1973 = vst [vmem:[#allocation8 + $0xf0c] sm:$0xff] %v1972_v19   ;;  %v8008_v26 = vld [vmem:[%s19537_s0 + $0x2] sm:$0xff] }
 0x194   :  { %1977 = vst [vmem:[#allocation8 + $0xf14] sm:$0xf] %v1976_v20  ;;  %v1978_v21 = vld [vmem:[%s19544_s7 + $0xf14] sm:$0xf]  ;;  %v1984_v23 = vld [vmem:[%s19544_s7 + $0xf28] sm:$0xf]  ;;  %8456 = vrot.lane.b32.xlu1 %v8008_v26, %s14641_s17 }
 0x195   :  { %1979 = vst [vmem:[#allocation8 + $0xf18] sm:$0xf] %v1978_v21  ;;  %1981 = vst [vmem:[#allocation8 + $0xf1c] sm:$0xff] %v1980_v22   ;;  %v1986_v24 = vld [vmem:[%s19544_s7 + $0xf24] sm:$0xf]  ;;  %v8009_v28 = vld [vmem:[%s19537_s0 + $0xa] sm:$0xff] }
 0x196   :  { %1985 = vst [vmem:[#allocation8 + $0xf24] sm:$0xf] %v1984_v23  ;;  %v1988_v25 = vld [vmem:[%s19544_s7 + $0xf2c] sm:$0xf]  ;;  %1987 = vst [vmem:[#allocation8 + $0xf28] sm:$0xf] %v1986_v24 }
 0x197   :  { %1989 = vst [vmem:[#allocation8 + $0xf2c] sm:$0xf] %v1988_v25  ;;  %v7952_v27 = vld [vmem:[%s19537_s0 + $0x1] sm:$0xff]  ;;  %v7953_v29 = vld [vmem:[%s19537_s0 + $0x9] sm:$0xff]  ;;  %s14643_s26 = smov 18   ;;  %v7954_v32 = vld [vmem:[%s19537_s0 + $0x11] sm:$0xff] }
 0x198   :  { %8232 = vrot.lane.b32.xlu0 %v7952_v27, %s14642_s18  ;;  %8458 = vrot.lane.b32.xlu1 %v8009_v28, %s14641_s17  ;;  %v8065_v30 = vld [vmem:[%s19537_s0 + $0xb] sm:$0xff]  ;;  %v8064_v31 = vld [vmem:[%s19537_s0 + $0x3] sm:$0xff]  ;;  %s14644_s9 = smov 24  }
 0x199   :  { %v8120_v33 = vld [vmem:[%s19537_s0 + $0x4] sm:$0xff]  ;;  %v7955_v34 = vld [vmem:[%s19537_s0 + $0x19] sm:$0xff]  ;;  %v8121_v35 = vld [vmem:[%s19537_s0 + $0xc] sm:$0xff] }
 0x19a   :  { %v8011_v36 = vld [vmem:[%s19537_s0 + $0x1a] sm:$0xff]  ;;  %v8010_v37 = vld [vmem:[%s19537_s0 + $0x12] sm:$0xff] }
 0x19b   :  { %v8067_v38 = vld [vmem:[%s19537_s0 + $0x1b] sm:$0xff]  ;;  %v8066_v39 = vld [vmem:[%s19537_s0 + $0x13] sm:$0xff] }
 0x19c   :  { %8234 = vrot.lane.b32.xlu0 %v7953_v29, %s14642_s18  ;;  %8682 = vrot.lane.b32.xlu1 %v8065_v30, %s14643_s26 }
 0x1a0   :  { %8680 = vrot.lane.b32.xlu0 %v8064_v31, %s14643_s26  ;;  %8236 = vrot.lane.b32.xlu1 %v7954_v32, %s14642_s18 }
 0x1a4   :  { %8904 = vrot.lane.b32.xlu0 %v8120_v33, %s14644_s9  ;;  %8238 = vrot.lane.b32.xlu1 %v7955_v34, %s14642_s18 }
 0x1a8   :  { %8906 = vrot.lane.b32.xlu0 %v8121_v35, %s14644_s9  ;;  %8462 = vrot.lane.b32.xlu1 %v8011_v36, %s14641_s17 }
 0x1ac   :  { %8460 = vrot.lane.b32.xlu0 %v8010_v37, %s14641_s17 }
 0x1ad   :  { %7885 = vsyncadd [#allocation9], 62208  ;;  %v16967_v40 = vld [vmem:[%s19541_s4 + $0x4] ss:$8 sm:$0x3]  ;;  %8686 = vrot.lane.b32.xlu1 %v8067_v38, %s14643_s26  ;;  %vm9473_vm0 = vcmask 1045504  }
 0x1ae   :  { %v16972_v41 = vld [vmem:[%s19541_s4 + $0x5] ss:$0 sm:$0xff]  ;;  %v16977_v42 = vld [vmem:[%s19541_s4 + $0x6] ss:$0 sm:$0xff]  ;;  %v9301_v44 = vld [vmem:[%s19538_s1 + $0x8] sm:$0xff]  ;;  %vm14645_vm1 = vmmov 1  }
 0x1af   :  { %v9300_v43 = vld [vmem:[%s19538_s1] sm:$0xff]  ;;  %v8122_v46 = vld [vmem:[%s19537_s0 + $0x14] sm:$0xff]  ;;  %vm14374_vm2 = vmpackc.low %vm9473_vm0, %vm14645_vm1  ;;  %vm9072_vm3 = vcmask 48128   ;;  %vm9129_vm4 = vcmask 97280   ;;  %vm9186_vm5 = vcmask 146432   ;;  %vm9243_vm6 = vcmask 195584  }
 0x1b0   :  { %8684 = vrot.lane.b32.xlu0 %v8066_v39, %s14643_s26  ;;  %v7956_v45 = vld [vmem:[%s19537_s0 + $0x21] sm:$0xff]  ;;  %v14369_v47 = vpack.c.bf16 %v9301_v44, %v9300_v43  ;;  %v9302_v48 = vld [vmem:[%s19538_s1 + $0x10] sm:$0xff]  ;;  %v9303_v49 = vld [vmem:[%s19538_s1 + $0x18] sm:$0x3f]  ;;  %vm9304_vm7 = vcmask 244736   ;;  %vm10296_vm8 = vcmask 142336  }
 0x1b1   :  { %v14373_v50 = vpack.c.bf16 %v9303_v49, %v9302_v48  ;;  %8240 = vrot.lane.b32.xlu1 %v7956_v45, %s14642_s18  ;;  %v7957_v51 = vld [vmem:[%s19537_s0 + $0x29] sm:$0xff]  ;;  %v8123_v52 = vld [vmem:[%s19537_s0 + $0x1c] sm:$0xff]  ;;  %v7958_v57 = vld [vmem:[%s19537_s0 + $0x31] sm:$0xff]  ;;  %s14647_s23 = smov 36   ;;  %vm11014_vm9 = vcmask 1041408   ;;  %vm10854_vm11 = vcmask 293888  }
 0x1b2   :  { %14370 = vmatprep.subr.bf16.mxu0 %v14369_v47  ;;  %14511 = vmatprep.subr.bf16.mxu1 %v14369_v47  ;;  %v8013_v53 = vld [vmem:[%s19537_s0 + $0x2a] sm:$0xff]  ;;  %v8012_v54 = vld [vmem:[%s19537_s0 + $0x22] sm:$0xff]  ;;  %v8014_v62 = vld [vmem:[%s19537_s0 + $0x32] sm:$0xff]  ;;  %vm10879_vm12 = vcmask 441344   ;;  %vm10904_vm13 = vcmask 588800   ;;  %vm10941_vm14 = vcmask 736256  }
 0x1b3   :  { %14372 = vmatpush3.bf16.msra.mxu0 %v14369_v47  ;;  %14513 = vmatpush3.bf16.msra.mxu1 %v14369_v47  ;;  %v8069_v55 = vld [vmem:[%s19537_s0 + $0x2b] sm:$0xff]  ;;  %v8068_v56 = vld [vmem:[%s19537_s0 + $0x23] sm:$0xff]  ;;  %v8070_v0 = vld [vmem:[%s19537_s0 + $0x33] sm:$0xff]  ;;  %vm11427_vm15 = vcmask 435200   ;;  %s14650_s21 = smov 108   ;;  %vm11590_vm0 = vcmask 277504  }
 0x1b4   :  { %8908 = vrot.lane.b32.xlu0 %v8122_v46, %s14644_s9  ;;  %14375 = vmatprep.subr.msk.bf16.mxu0 %vm14374_vm2, %v14373_v50  ;;  %v8124_v58 = vld [vmem:[%s19537_s0 + $0x24] sm:$0xff]  ;;  %v8125_v60 = vld [vmem:[%s19537_s0 + $0x2c] sm:$0xff]  ;;  %v8126_v2 = vld [vmem:[%s19537_s0 + $0x34] sm:$0xff]  ;;  %s14653_s1 = smov 8   ;;  %s14654_s27 = smov 102  }
 0x1b5   :  { %14512 = vmatprep.subr.msk.bf16.mxu1 %vm14374_vm2, %v14373_v50  ;;  %8242 = vrot.lane.b32.xlu1 %v7957_v51, %s14642_s18  ;;  %v7959_v59 = vld [vmem:[%s19537_s0 + $0x41] sm:$0xff]  ;;  %v7960_v1 = vld [vmem:[%s19537_s0 + $0x49] sm:$0xff]  ;;  %v7961_v3 = vld [vmem:[%s19537_s0 + $0x51] sm:$0xff]  ;;  %s14655_s28 = smov 42   ;;  %s14657_s29 = smov 110  }
 0x1b6   :  { %v8015_v61 = vld [vmem:[%s19537_s0 + $0x42] sm:$0xff]  ;;  %v8017_v5 = vld [vmem:[%s19537_s0 + $0x52] sm:$0xff]  ;;  %v8016_v6 = vld [vmem:[%s19537_s0 + $0x4a] sm:$0xff]  ;;  %s14658_s30 = smov 16   ;;  %s14659_s10 = smov 84  }
 0x1b7   :  { %14378 = vmatpush3.bf16.msk.msra.mxu0 %vm14374_vm2, %v14373_v50  ;;  %14514 = vmatpush3.bf16.msk.msra.mxu1 %vm14374_vm2, %v14373_v50  ;;  %v8071_v63 = vld [vmem:[%s19537_s0 + $0x43] sm:$0xff]  ;;  %v8073_v7 = vld [vmem:[%s19537_s0 + $0x53] sm:$0xff]  ;;  %v8072_v8 = vld [vmem:[%s19537_s0 + $0x4b] sm:$0xff]  ;;  %s14660_s11 = smov 50   ;;  %s14661_s12 = smov 118  }
 0x1b8   :  { %8910 = vrot.lane.b32.xlu0 %v8123_v52, %s14644_s9  ;;  %v8127_v4 = vld [vmem:[%s19537_s0 + $0x44] sm:$0xff]  ;;  %v7962_v9 = vld [vmem:[%s19537_s0 + $0x59] sm:$0xff]  ;;  %v8128_v10 = vld [vmem:[%s19537_s0 + $0x4c] sm:$0xff]  ;;  %s14662_s13 = smov 58   ;;  %s14664_s14 = smov 32  }
 0x1b9   :  { %8466 = vrot.lane.b32.xlu1 %v8013_v53, %s14641_s17  ;;  %v7963_v11 = vld [vmem:[%s19537_s0 + $0x61] sm:$0xff]  ;;  %v8129_v12 = vld [vmem:[%s19537_s0 + $0x54] sm:$0xff]  ;;  %v7964_v17 = vld [vmem:[%s19537_s0 + $0x69] sm:$0xff]  ;;  %s14666_s15 = smov 66   ;;  %s14667_s16 = smov 100  }
 0x1ba   :  { %v8019_v13 = vld [vmem:[%s19537_s0 + $0x62] sm:$0xff]  ;;  %v8018_v14 = vld [vmem:[%s19537_s0 + $0x5a] sm:$0xff]  ;;  %v7965_v19 = vld [vmem:[%s19537_s0 + $0x71] sm:$0xff]  ;;  %s14670_s19 = smov 14  }
 0x1bb   :  { %v8075_v15 = vld [vmem:[%s19537_s0 + $0x63] sm:$0xff]  ;;  %v8074_v16 = vld [vmem:[%s19537_s0 + $0x5b] sm:$0xff]  ;;  %v8021_v21 = vld [vmem:[%s19537_s0 + $0x72] sm:$0xff] }
 0x1bc   :  { %8464 = vrot.lane.b32.xlu0 %v8012_v54, %s14641_s17  ;;  %v8130_v18 = vld [vmem:[%s19537_s0 + $0x5c] sm:$0xff]  ;;  %v8131_v20 = vld [vmem:[%s19537_s0 + $0x64] sm:$0xff]  ;;  %v8077_v23 = vld [vmem:[%s19537_s0 + $0x73] sm:$0xff] }
 0x1bd   :  { %8690 = vrot.lane.b32.xlu1 %v8069_v55, %s14643_s26  ;;  %v8020_v22 = vld [vmem:[%s19537_s0 + $0x6a] sm:$0xff]  ;;  %v7966_v25 = vld [vmem:[%s19537_s0 + $0x81] sm:$0xff]  ;;  %v8133_v28 = vld [vmem:[%s19537_s0 + $0x74] sm:$0xff] }
 0x1be   :  { %v8076_v24 = vld [vmem:[%s19537_s0 + $0x6b] sm:$0xff]  ;;  %v8022_v30 = vld [vmem:[%s19537_s0 + $0x82] sm:$0xff]  ;;  %v7969_v48 = vld [vmem:[%s19537_s0 + $0x99] sm:$0xff] }
 0x1bf   :  { %v8132_v26 = vld [vmem:[%s19537_s0 + $0x6c] sm:$0xff]  ;;  %v8078_v34 = vld [vmem:[%s19537_s0 + $0x83] sm:$0xff]  ;;  %vm18332_vm10 = vmpackc.low %vm11014_vm9, %vm14645_vm1  ;;  %vm11539_vm1 = vcmask 883712  }
 0x1c0   :  { %8688 = vrot.lane.b32.xlu0 %v8068_v56, %s14643_s26  ;;  %v7967_v27 = vld [vmem:[%s19537_s0 + $0x89] sm:$0xff]  ;;  %v7896_v37 = vld [vmem:[%s19537_s0] sm:$0xff]  ;;  %v7968_v38 = vld [vmem:[%s19537_s0 + $0x91] sm:$0xff] }
 0x1c1   :  { %8244 = vrot.lane.b32.xlu1 %v7958_v57, %s14642_s18  ;;  %v8023_v29 = vld [vmem:[%s19537_s0 + $0x8a] sm:$0xff]  ;;  %v8025_v56 = vld [vmem:[%s19537_s0 + $0x9a] sm:$0xff]  ;;  %v8024_v57 = vld [vmem:[%s19537_s0 + $0x92] sm:$0xff] }
 0x1c2   :  { %v8079_v33 = vld [vmem:[%s19537_s0 + $0x8b] sm:$0xff] }
 0x1c3   :  { %v8134_v39 = vld [vmem:[%s19537_s0 + $0x84] sm:$0xff]  ;;  %v8135_v49 = vld [vmem:[%s19537_s0 + $0x8c] sm:$0xff] }
 0x1c4   :  { %8912 = vrot.lane.b32.xlu0 %v8124_v58, %s14644_s9  ;;  %v7897_v46 = vld [vmem:[%s19537_s0 + $0x8] sm:$0xff] }
 0x1c5   :  { %8246 = vrot.lane.b32.xlu1 %v7959_v59, %s14642_s18 }
 0x1c8   :  { %8914 = vrot.lane.b32.xlu0 %v8125_v60, %s14644_s9 }
 0x1c9   :  { %8470 = vrot.lane.b32.xlu1 %v8015_v61, %s14641_s17 }
 0x1cc   :  { %8468 = vrot.lane.b32.xlu0 %v8014_v62, %s14641_s17  ;;  %v8081_v62 = vld [vmem:[%s19537_s0 + $0x9b] sm:$0xff] }
 0x1cd   :  { %8694 = vrot.lane.b32.xlu1 %v8071_v63, %s14643_s26  ;;  %v8080_v63 = vld [vmem:[%s19537_s0 + $0x93] sm:$0xff] }
 0x1d0   :  { %8692 = vrot.lane.b32.xlu0 %v8070_v0, %s14643_s26 }
 0x1d1   :  { %8248 = vrot.lane.b32.xlu1 %v7960_v1, %s14642_s18 }
 0x1d4   :  { %8916 = vrot.lane.b32.xlu0 %v8126_v2, %s14644_s9  ;;  %v7898_v2 = vld [vmem:[%s19537_s0 + $0x10] sm:$0xff] }
 0x1d5   :  { %8250 = vrot.lane.b32.xlu1 %v7961_v3, %s14642_s18  ;;  %v7970_v3 = vld [vmem:[%s19537_s0 + $0xa1] sm:$0xff] }
 0x1d8   :  { %8918 = vrot.lane.b32.xlu0 %v8127_v4, %s14644_s9  ;;  %v8136_v4 = vld [vmem:[%s19537_s0 + $0x94] sm:$0xff] }
 0x1d9   :  { %8474 = vrot.lane.b32.xlu1 %v8017_v5, %s14641_s17 }
 0x1dc   :  { %8472 = vrot.lane.b32.xlu0 %v8016_v6, %s14641_s17 }
 0x1dd   :  { %8698 = vrot.lane.b32.xlu1 %v8073_v7, %s14643_s26 }
 0x1e0   :  { %8696 = vrot.lane.b32.xlu0 %v8072_v8, %s14643_s26  ;;  %v7899_v8 = vld [vmem:[%s19537_s0 + $0x18] sm:$0xff] }
 0x1e1   :  { %8252 = vrot.lane.b32.xlu1 %v7962_v9, %s14642_s18 }
 0x1e4   :  { %8920 = vrot.lane.b32.xlu0 %v8128_v10, %s14644_s9  ;;  %v8137_v10 = vld [vmem:[%s19537_s0 + $0x9c] sm:$0xff] }
 0x1e5   :  { %8254 = vrot.lane.b32.xlu1 %v7963_v11, %s14642_s18  ;;  %v7984_v11 = vld [vmem:[%s19537_s0 + $0x121] sm:$0xff] }
 0x1e8   :  { %8922 = vrot.lane.b32.xlu0 %v8129_v12, %s14644_s9 }
 0x1e9   :  { %8478 = vrot.lane.b32.xlu1 %v8019_v13, %s14641_s17 }
 0x1ec   :  { %8476 = vrot.lane.b32.xlu0 %v8018_v14, %s14641_s17 }
 0x1ed   :  { %8702 = vrot.lane.b32.xlu1 %v8075_v15, %s14643_s26 }
 0x1f0   :  { %8700 = vrot.lane.b32.xlu0 %v8074_v16, %s14643_s26 }
 0x1f1   :  { %8256 = vrot.lane.b32.xlu1 %v7964_v17, %s14642_s18 }
 0x1f4   :  { %8924 = vrot.lane.b32.xlu0 %v8130_v18, %s14644_s9  ;;  %v7985_v18 = vld [vmem:[%s19537_s0 + $0x129] sm:$0xff] }
 0x1f5   :  { %8258 = vrot.lane.b32.xlu1 %v7965_v19, %s14642_s18  ;;  %v7971_v19 = vld [vmem:[%s19537_s0 + $0xa9] sm:$0xff] }
 0x1f8   :  { %8926 = vrot.lane.b32.xlu0 %v8131_v20, %s14644_s9 }
 0x1f9   :  { %8482 = vrot.lane.b32.xlu1 %v8021_v21, %s14641_s17 }
 0x1fc   :  { %8480 = vrot.lane.b32.xlu0 %v8020_v22, %s14641_s17 }
 0x1fd   :  { %8706 = vrot.lane.b32.xlu1 %v8077_v23, %s14643_s26 }
 0x200   :  { %8704 = vrot.lane.b32.xlu0 %v8076_v24, %s14643_s26  ;;  %v8040_v24 = vld [vmem:[%s19537_s0 + $0x122] sm:$0xff] }
 0x201   :  { %8260 = vrot.lane.b32.xlu1 %v7966_v25, %s14642_s18  ;;  %v8026_v25 = vld [vmem:[%s19537_s0 + $0xa2] sm:$0xff] }
 0x204   :  { %8928 = vrot.lane.b32.xlu0 %v8132_v26, %s14644_s9 }
 0x205   :  { %8262 = vrot.lane.b32.xlu1 %v7967_v27, %s14642_s18 }
 0x206   :  { %v8457_v31 = vpop.permute.xlu1 %8456 }
 0x208   :  { %8930 = vrot.lane.b32.xlu0 %v8133_v28, %s14644_s9  ;;  %v7900_v28 = vld [vmem:[%s19537_s0 + $0x20] sm:$0xff] }
 0x209   :  { %8486 = vrot.lane.b32.xlu1 %v8023_v29, %s14641_s17  ;;  %v8041_v29 = vld [vmem:[%s19537_s0 + $0x12a] sm:$0xff] }
 0x20a   :  { %v8233_v32 = vpop.permute.xlu0 %8232  ;;  %v8459_v35 = vpop.permute.xlu1 %8458 }
 0x20b   :  { %v9073_v43 = vsel %vm9072_vm3, %v7896_v37, %v8233_v32  ;;  %v8082_v37 = vld [vmem:[%s19537_s0 + $0xa3] sm:$0xff] }
 0x20c   :  { %8484 = vrot.lane.b32.xlu0 %v8022_v30, %s14641_s17  ;;  %v9130_v47 = vsel %vm9129_vm4, %v9073_v43, %v8457_v31  ;;  %v8027_v30 = vld [vmem:[%s19537_s0 + $0xaa] sm:$0xff] }
 0x20d   :  { %8710 = vrot.lane.b32.xlu1 %v8079_v33, %s14643_s26 }
 0x20e   :  { %v8235_v36 = vpop.permute.xlu0 %8234  ;;  %v8683_v44 = vpop.permute.xlu1 %8682 }
 0x20f   :  { %v9074_v50 = vsel %vm9072_vm3, %v7897_v46, %v8235_v36  ;;  %v8096_v36 = vld [vmem:[%s19537_s0 + $0x123] sm:$0xff] }
 0x210   :  { %8708 = vrot.lane.b32.xlu0 %v8078_v34, %s14643_s26  ;;  %v9131_v55 = vsel %vm9129_vm4, %v9074_v50, %v8459_v35  ;;  %v7901_v34 = vld [vmem:[%s19537_s0 + $0x28] sm:$0xff] }
 0x211   :  { %8264 = vrot.lane.b32.xlu1 %v7968_v38, %s14642_s18  ;;  %v9188_v58 = vsel %vm9186_vm5, %v9131_v55, %v8683_v44 }
 0x212   :  { %v8681_v45 = vpop.permute.xlu0 %8680  ;;  %v8237_v52 = vpop.permute.xlu1 %8236 }
 0x213   :  { %v9187_v51 = vsel %vm9186_vm5, %v9130_v47, %v8681_v45  ;;  %v9075_v7 = vsel %vm9072_vm3, %v7898_v2, %v8237_v52  ;;  %v8097_v47 = vld [vmem:[%s19537_s0 + $0x12b] sm:$0xff] }
 0x214   :  { %8932 = vrot.lane.b32.xlu0 %v8134_v39, %s14644_s9  ;;  %v8139_v2 = vld [vmem:[%s19537_s0 + $0xac] sm:$0xff] }
 0x215   :  { %8266 = vrot.lane.b32.xlu1 %v7969_v48, %s14642_s18  ;;  %v8083_v48 = vld [vmem:[%s19537_s0 + $0xab] sm:$0xff] }
 0x216   :  { %v8905_v53 = vpop.permute.xlu0 %8904  ;;  %v8239_v59 = vpop.permute.xlu1 %8238 }
 0x217   :  { %v9244_v54 = vsel %vm9243_vm6, %v9187_v51, %v8905_v53  ;;  %v9076_v16 = vsel %vm9072_vm3, %v7899_v8, %v8239_v59  ;;  %v8152_v53 = vld [vmem:[%s19537_s0 + $0x124] sm:$0xff]  ;;  %v7972_v59 = vld [vmem:[%s19537_s0 + $0xb1] sm:$0xff] }
 0x218   :  { %8934 = vrot.lane.b32.xlu0 %v8135_v49, %s14644_s9  ;;  %14192 = vmatprep.mubr.msk.f32.mxu0 %vm9304_vm7, %v9244_v54  ;;  %v8138_v54 = vld [vmem:[%s19537_s0 + $0xa4] sm:$0xff] }
 0x219   :  { %8490 = vrot.lane.b32.xlu1 %v8025_v56, %s14641_s17 }
 0x21a   :  { %v8907_v60 = vpop.permute.xlu0 %8906  ;;  %v8463_v0 = vpop.permute.xlu1 %8462 }
 0x21b   :  { %v9245_v61 = vsel %vm9243_vm6, %v9188_v58, %v8907_v60  ;;  %v9133_v17 = vsel %vm9129_vm4, %v9076_v16, %v8463_v0  ;;  %v7986_v58 = vld [vmem:[%s19537_s0 + $0x131] sm:$0xff] }
 0x21c   :  { %8488 = vrot.lane.b32.xlu0 %v8024_v57, %s14641_s17  ;;  %14193 = vmatmul.mubr.msk.f32.vlgmr.msra.gmra.mrb[0].mxu0 %vm9304_vm7, %v9245_v61  ;;  %v7902_v57 = vld [vmem:[%s19537_s0 + $0x30] sm:$0xff] }
 0x21d   :  { %8714 = vrot.lane.b32.xlu1 %v8081_v62, %s14643_s26  ;;  %v8028_v16 = vld [vmem:[%s19537_s0 + $0xb2] sm:$0xff] }
 0x21e   :  { %v8461_v1 = vpop.permute.xlu0 %8460 }
 0x21f   :  { %v8687_v5 = vpop.permute.xlu1 %8686  ;;  %v9132_v9 = vsel %vm9129_vm4, %v9075_v7, %v8461_v1  ;;  %v8153_v1 = vld [vmem:[%s19537_s0 + $0x12c] sm:$0xff] }
 0x220   :  { %8712 = vrot.lane.b32.xlu0 %v8080_v63, %s14643_s26  ;;  %v9190_v20 = vsel %vm9186_vm5, %v9133_v17, %v8687_v5  ;;  %v7903_v63 = vld [vmem:[%s19537_s0 + $0x40] sm:$0xff] }
 0x221   :  { %8268 = vrot.lane.b32.xlu1 %v7970_v3, %s14642_s18 }
 0x222   :  { %v8685_v6 = vpop.permute.xlu0 %8684 }
 0x223   :  { %v9189_v12 = vsel %vm9186_vm5, %v9132_v9, %v8685_v6  ;;  %v8241_v13 = vpop.permute.xlu1 %8240  ;;  %v7987_v9 = vld [vmem:[%s19537_s0 + $0x141] sm:$0xff] }
 0x224   :  { %8936 = vrot.lane.b32.xlu0 %v8136_v4, %s14644_s9  ;;  %v9077_v33 = vsel %vm9072_vm3, %v7900_v28, %v8241_v13  ;;  %v8084_v28 = vld [vmem:[%s19537_s0 + $0xb3] sm:$0xff] }
 0x225   :  { %8938 = vrot.lane.b32.xlu1 %v8137_v10, %s14644_s9  ;;  %v7973_v10 = vld [vmem:[%s19537_s0 + $0xc1] sm:$0xff] }
 0x226   :  { %v8909_v14 = vpop.permute.xlu0 %8908 }
 0x227   :  { %v9246_v15 = vsel %vm9243_vm6, %v9189_v12, %v8909_v14  ;;  %v8243_v21 = vpop.permute.xlu1 %8242 }
 0x228   :  { %8296 = vrot.lane.b32.xlu0 %v7984_v11, %s14642_s18  ;;  %14195 = vmatprep.mubr.msk.f32.mxu0 %vm9304_vm7, %v9246_v15  ;;  %v9078_v45 = vsel %vm9072_vm3, %v7901_v34, %v8243_v21  ;;  %v8042_v15 = vld [vmem:[%s19537_s0 + $0x132] sm:$0xff]  ;;  %v8029_v21 = vld [vmem:[%s19537_s0 + $0xc2] sm:$0xff] }
 0x229   :  { %8298 = vrot.lane.b32.xlu1 %v7985_v18, %s14642_s18 }
 0x22a   :  { %v8911_v22 = vpop.permute.xlu0 %8910 }
 0x22b   :  { %v9247_v23 = vsel %vm9243_vm6, %v9190_v20, %v8911_v22  ;;  %v8467_v26 = vpop.permute.xlu1 %8466  ;;  %v8043_v20 = vld [vmem:[%s19537_s0 + $0x142] sm:$0xff] }
 0x22c   :  { %8270 = vrot.lane.b32.xlu0 %v7971_v19, %s14642_s18  ;;  %14196 = vmatmul.mubr.msk.f32.gmra.mrb[2].mxu0 %vm9304_vm7, %v9247_v23  ;;  %v9135_v46 = vsel %vm9129_vm4, %v9078_v45, %v8467_v26  ;;  %v7904_v19 = vld [vmem:[%s19537_s0 + $0x48] sm:$0xff]  ;;  %v8140_v45 = vld [vmem:[%s19537_s0 + $0xb4] sm:$0xff] }
 0x22d   :  { %8520 = vrot.lane.b32.xlu1 %v8040_v24, %s14641_s17 }
 0x22e   :  { %v8465_v27 = vpop.permute.xlu0 %8464 }
 0x22f   :  { %v8691_v31 = vpop.permute.xlu1 %8690  ;;  %v9134_v35 = vsel %vm9129_vm4, %v9077_v33, %v8465_v27  ;;  %v8098_v27 = vld [vmem:[%s19537_s0 + $0x133] sm:$0xff] }
 0x230   :  { %8492 = vrot.lane.b32.xlu0 %v8026_v25, %s14641_s17  ;;  %v9192_v49 = vsel %vm9186_vm5, %v9135_v46, %v8691_v31  ;;  %v7905_v25 = vld [vmem:[%s19537_s0 + $0x50] sm:$0xff] }
 0x231   :  { %8522 = vrot.lane.b32.xlu1 %v8041_v29, %s14641_s17 }
 0x232   :  { %v8689_v32 = vpop.permute.xlu0 %8688 }
 0x233   :  { %v9191_v38 = vsel %vm9186_vm5, %v9134_v35, %v8689_v32  ;;  %v8245_v39 = vpop.permute.xlu1 %8244  ;;  %v8099_v35 = vld [vmem:[%s19537_s0 + $0x143] sm:$0xff] }
 0x234   :  { %8494 = vrot.lane.b32.xlu0 %v8027_v30, %s14641_s17  ;;  %v9079_v62 = vsel %vm9072_vm3, %v7902_v57, %v8245_v39  ;;  %v8141_v57 = vld [vmem:[%s19537_s0 + $0xc4] sm:$0xff] }
 0x235   :  { %8744 = vrot.lane.b32.xlu1 %v8096_v36, %s14643_s26  ;;  %v8085_v36 = vld [vmem:[%s19537_s0 + $0xc3] sm:$0xff] }
 0x236   :  { %v8913_v43 = vpop.permute.xlu0 %8912 }
 0x237   :  { %v9248_v44 = vsel %vm9243_vm6, %v9191_v38, %v8913_v43  ;;  %v8247_v50 = vpop.permute.xlu1 %8246 }
 0x238   :  { %8716 = vrot.lane.b32.xlu0 %v8082_v37, %s14643_s26  ;;  %14198 = vmatprep.mubr.msk.f32.mxu0 %vm9304_vm7, %v9248_v44  ;;  %v9080_v7 = vsel %vm9072_vm3, %v7903_v63, %v8247_v50  ;;  %v8154_v44 = vld [vmem:[%s19537_s0 + $0x134] sm:$0xff]  ;;  %v7974_v50 = vld [vmem:[%s19537_s0 + $0xc9] sm:$0xff] }
 0x239   :  { %8746 = vrot.lane.b32.xlu1 %v8097_v47, %s14643_s26 }
 0x23a   :  { %v8915_v51 = vpop.permute.xlu0 %8914 }
 0x23b   :  { %v9249_v52 = vsel %vm9243_vm6, %v9192_v49, %v8915_v51  ;;  %v8471_v55 = vpop.permute.xlu1 %8470  ;;  %v7988_v49 = vld [vmem:[%s19537_s0 + $0x149] sm:$0xff] }
 0x23c   :  { %8718 = vrot.lane.b32.xlu0 %v8083_v48, %s14643_s26  ;;  %14199 = vmatmul.mubr.msk.f32.gmra.mrb[4].mxu0 %vm9304_vm7, %v9249_v52  ;;  %v9137_v8 = vsel %vm9129_vm4, %v9080_v7, %v8471_v55  ;;  %v7906_v48 = vld [vmem:[%s19537_s0 + $0x58] sm:$0xff]  ;;  %v8030_v7 = vld [vmem:[%s19537_s0 + $0xca] sm:$0xff] }
 0x23d   :  { %8968 = vrot.lane.b32.xlu1 %v8152_v53, %s14644_s9 }
 0x23e   :  { %v8469_v56 = vpop.permute.xlu0 %8468 }
 0x23f   :  { %v8695_v60 = vpop.permute.xlu1 %8694  ;;  %v9136_v0 = vsel %vm9129_vm4, %v9079_v62, %v8469_v56  ;;  %v8155_v56 = vld [vmem:[%s19537_s0 + $0x144] sm:$0xff] }
 0x240   :  { %8940 = vrot.lane.b32.xlu0 %v8138_v54, %s14644_s9  ;;  %v9194_v11 = vsel %vm9186_vm5, %v9137_v8, %v8695_v60  ;;  %v7907_v54 = vld [vmem:[%s19537_s0 + $0x60] sm:$0xff] }
 0x241   :  { %8300 = vrot.lane.b32.xlu1 %v7986_v58, %s14642_s18 }
 0x242   :  { %v8693_v61 = vpop.permute.xlu0 %8692 }
 0x243   :  { %v9193_v3 = vsel %vm9186_vm5, %v9136_v0, %v8693_v61  ;;  %v8249_v4 = vpop.permute.xlu1 %8248  ;;  %v7989_v0 = vld [vmem:[%s19537_s0 + $0x151] sm:$0xff] }
 0x244   :  { %8272 = vrot.lane.b32.xlu0 %v7972_v59, %s14642_s18  ;;  %v9081_v24 = vsel %vm9072_vm3, %v7904_v19, %v8249_v4  ;;  %v8086_v19 = vld [vmem:[%s19537_s0 + $0xcb] sm:$0xff] }
 0x245   :  { %8970 = vrot.lane.b32.xlu1 %v8153_v1, %s14644_s9  ;;  %v7975_v1 = vld [vmem:[%s19537_s0 + $0xd1] sm:$0xff] }
 0x246   :  { %v8917_v5 = vpop.permute.xlu0 %8916 }
 0x247   :  { %v9250_v6 = vsel %vm9243_vm6, %v9193_v3, %v8917_v5  ;;  %v8251_v12 = vpop.permute.xlu1 %8250 }
 0x248   :  { %8942 = vrot.lane.b32.xlu0 %v8139_v2, %s14644_s9  ;;  %14201 = vmatprep.mubr.msk.f32.mxu0 %vm9304_vm7, %v9250_v6  ;;  %v9082_v33 = vsel %vm9072_vm3, %v7905_v25, %v8251_v12  ;;  %v8044_v6 = vld [vmem:[%s19537_s0 + $0x14a] sm:$0xff]  ;;  %v8031_v12 = vld [vmem:[%s19537_s0 + $0xd2] sm:$0xff] }
 0x249   :  { %8302 = vrot.lane.b32.xlu1 %v7987_v9, %s14642_s18 }
 0x24a   :  { %v8919_v13 = vpop.permute.xlu0 %8918 }
 0x24b   :  { %v9251_v14 = vsel %vm9243_vm6, %v9194_v11, %v8919_v13  ;;  %v8475_v17 = vpop.permute.xlu1 %8474  ;;  %v8045_v11 = vld [vmem:[%s19537_s0 + $0x152] sm:$0xff] }
 0x24c   :  { %8274 = vrot.lane.b32.xlu0 %v7973_v10, %s14642_s18  ;;  %14202 = vmatmul.mubr.msk.f32.gmra.mrb[6].mxu0 %vm9304_vm7, %v9251_v14  ;;  %v9139_v34 = vsel %vm9129_vm4, %v9082_v33, %v8475_v17  ;;  %v7908_v10 = vld [vmem:[%s19537_s0 + $0x68] sm:$0xff] }
 0x24d   :  { %8524 = vrot.lane.b32.xlu1 %v8042_v15, %s14641_s17  ;;  %v8142_v33 = vld [vmem:[%s19537_s0 + $0xcc] sm:$0xff] }
 0x24e   :  { %v8473_v18 = vpop.permute.xlu0 %8472 }
 0x24f   :  { %v8699_v22 = vpop.permute.xlu1 %8698  ;;  %v9138_v26 = vsel %vm9129_vm4, %v9081_v24, %v8473_v18  ;;  %v8100_v18 = vld [vmem:[%s19537_s0 + $0x14b] sm:$0xff] }
 0x250   :  { %8496 = vrot.lane.b32.xlu0 %v8028_v16, %s14641_s17  ;;  %v9196_v37 = vsel %vm9186_vm5, %v9139_v34, %v8699_v22  ;;  %v7909_v16 = vld [vmem:[%s19537_s0 + $0x70] sm:$0xff] }
 0x251   :  { %8526 = vrot.lane.b32.xlu1 %v8043_v20, %s14641_s17 }
 0x252   :  { %v8697_v23 = vpop.permute.xlu0 %8696 }
 0x253   :  { %v9195_v29 = vsel %vm9186_vm5, %v9138_v26, %v8697_v23  ;;  %v8253_v30 = vpop.permute.xlu1 %8252  ;;  %v8101_v26 = vld [vmem:[%s19537_s0 + $0x153] sm:$0xff] }
 0x254   :  { %8498 = vrot.lane.b32.xlu0 %v8029_v21, %s14641_s17  ;;  %v9083_v53 = vsel %vm9072_vm3, %v7906_v48, %v8253_v30  ;;  %v8143_v48 = vld [vmem:[%s19537_s0 + $0xd4] sm:$0xff] }
 0x255   :  { %8748 = vrot.lane.b32.xlu1 %v8098_v27, %s14643_s26  ;;  %v8087_v27 = vld [vmem:[%s19537_s0 + $0xd3] sm:$0xff] }
 0x256   :  { %v8921_v31 = vpop.permute.xlu0 %8920 }
 0x257   :  { %v9252_v32 = vsel %vm9243_vm6, %v9195_v29, %v8921_v31  ;;  %v8255_v38 = vpop.permute.xlu1 %8254 }
 0x258   :  { %8720 = vrot.lane.b32.xlu0 %v8084_v28, %s14643_s26  ;;  %14204 = vmatprep.mubr.msk.f32.mxu0 %vm9304_vm7, %v9252_v32  ;;  %v9084_v62 = vsel %vm9072_vm3, %v7907_v54, %v8255_v38  ;;  %v8156_v32 = vld [vmem:[%s19537_s0 + $0x14c] sm:$0xff]  ;;  %v7976_v38 = vld [vmem:[%s19537_s0 + $0xd9] sm:$0xff] }
 0x259   :  { %8750 = vrot.lane.b32.xlu1 %v8099_v35, %s14643_s26 }
 0x25a   :  { %v8923_v39 = vpop.permute.xlu0 %8922 }
 0x25b   :  { %v9253_v43 = vsel %vm9243_vm6, %v9196_v37, %v8923_v39  ;;  %v8479_v46 = vpop.permute.xlu1 %8478  ;;  %v7990_v37 = vld [vmem:[%s19537_s0 + $0x159] sm:$0xff] }
 0x25c   :  { %8722 = vrot.lane.b32.xlu0 %v8085_v36, %s14643_s26  ;;  %14205 = vmatmul.mubr.msk.f32.gmra.mrb[8].mxu0 %vm9304_vm7, %v9253_v43  ;;  %v9141_v63 = vsel %vm9129_vm4, %v9084_v62, %v8479_v46  ;;  %v7910_v36 = vld [vmem:[%s19537_s0 + $0x80] sm:$0xff] }
 0x25d   :  { %8972 = vrot.lane.b32.xlu1 %v8154_v44, %s14644_s9  ;;  %v8032_v62 = vld [vmem:[%s19537_s0 + $0xda] sm:$0xff] }
 0x25e   :  { %v8477_v47 = vpop.permute.xlu0 %8476 }
 0x25f   :  { %v8703_v51 = vpop.permute.xlu1 %8702  ;;  %v9140_v55 = vsel %vm9129_vm4, %v9083_v53, %v8477_v47  ;;  %v8157_v47 = vld [vmem:[%s19537_s0 + $0x154] sm:$0xff] }
 0x260   :  { %8944 = vrot.lane.b32.xlu0 %v8140_v45, %s14644_s9  ;;  %v9198_v2 = vsel %vm9186_vm5, %v9141_v63, %v8703_v51  ;;  %v7911_v45 = vld [vmem:[%s19537_s0 + $0x88] sm:$0xff] }
 0x261   :  { %8304 = vrot.lane.b32.xlu1 %v7988_v49, %s14642_s18 }
 0x262   :  { %v8701_v52 = vpop.permute.xlu0 %8700 }
 0x263   :  { %v9197_v58 = vsel %vm9186_vm5, %v9140_v55, %v8701_v52  ;;  %v8257_v59 = vpop.permute.xlu1 %8256  ;;  %v7991_v55 = vld [vmem:[%s19537_s0 + $0x161] sm:$0xff] }
 0x264   :  { %8276 = vrot.lane.b32.xlu0 %v7974_v50, %s14642_s18  ;;  %v9085_v15 = vsel %vm9072_vm3, %v7908_v10, %v8257_v59  ;;  %v8088_v10 = vld [vmem:[%s19537_s0 + $0xdb] sm:$0xff] }
 0x265   :  { %8974 = vrot.lane.b32.xlu1 %v8155_v56, %s14644_s9  ;;  %v7977_v56 = vld [vmem:[%s19537_s0 + $0xe1] sm:$0xff] }
 0x266   :  { %v8925_v60 = vpop.permute.xlu0 %8924 }
 0x267   :  { %v9254_v61 = vsel %vm9243_vm6, %v9197_v58, %v8925_v60  ;;  %v8259_v3 = vpop.permute.xlu1 %8258 }
 0x268   :  { %8946 = vrot.lane.b32.xlu0 %v8141_v57, %s14644_s9  ;;  %14207 = vmatprep.mubr.msk.f32.mxu0 %vm9304_vm7, %v9254_v61  ;;  %v9086_v24 = vsel %vm9072_vm3, %v7909_v16, %v8259_v3  ;;  %v8046_v61 = vld [vmem:[%s19537_s0 + $0x15a] sm:$0xff]  ;;  %v8033_v3 = vld [vmem:[%s19537_s0 + $0xe2] sm:$0xff] }
 0x269   :  { %8306 = vrot.lane.b32.xlu1 %v7989_v0, %s14642_s18 }
 0x26a   :  { %v8927_v4 = vpop.permute.xlu0 %8926 }
 0x26b   :  { %v9255_v5 = vsel %vm9243_vm6, %v9198_v2, %v8927_v4  ;;  %v8483_v8 = vpop.permute.xlu1 %8482  ;;  %v8047_v2 = vld [vmem:[%s19537_s0 + $0x162] sm:$0xff] }
 0x26c   :  { %8278 = vrot.lane.b32.xlu0 %v7975_v1, %s14642_s18  ;;  %14208 = vmatmul.mubr.msk.f32.gmra.mrb[10].mxu0 %vm9304_vm7, %v9255_v5  ;;  %v9143_v25 = vsel %vm9129_vm4, %v9086_v24, %v8483_v8  ;;  %v7912_v1 = vld [vmem:[%s19537_s0 + $0x90] sm:$0xff]  ;;  %v8144_v24 = vld [vmem:[%s19537_s0 + $0xdc] sm:$0xff] }
 0x26d   :  { %8528 = vrot.lane.b32.xlu1 %v8044_v6, %s14641_s17 }
 0x26e   :  { %v8481_v9 = vpop.permute.xlu0 %8480 }
 0x26f   :  { %v8707_v13 = vpop.permute.xlu1 %8706  ;;  %v9142_v17 = vsel %vm9129_vm4, %v9085_v15, %v8481_v9  ;;  %v8102_v9 = vld [vmem:[%s19537_s0 + $0x15b] sm:$0xff] }
 0x270   :  { %8500 = vrot.lane.b32.xlu0 %v8030_v7, %s14641_s17  ;;  %v9200_v28 = vsel %vm9186_vm5, %v9143_v25, %v8707_v13  ;;  %v7913_v7 = vld [vmem:[%s19537_s0 + $0x98] sm:$0xff] }
 0x271   :  { %8530 = vrot.lane.b32.xlu1 %v8045_v11, %s14641_s17 }
 0x272   :  { %v8705_v14 = vpop.permute.xlu0 %8704 }
 0x273   :  { %v9199_v20 = vsel %vm9186_vm5, %v9142_v17, %v8705_v14  ;;  %v8261_v21 = vpop.permute.xlu1 %8260  ;;  %v8103_v17 = vld [vmem:[%s19537_s0 + $0x163] sm:$0xff] }
 0x274   :  { %8502 = vrot.lane.b32.xlu0 %v8031_v12, %s14641_s17  ;;  %v9087_v44 = vsel %vm9072_vm3, %v7910_v36, %v8261_v21  ;;  %v7993_v36 = vld [vmem:[%s19537_s0 + $0x171] sm:$0xff] }
 0x275   :  { %8752 = vrot.lane.b32.xlu1 %v8100_v18, %s14643_s26  ;;  %v8089_v18 = vld [vmem:[%s19537_s0 + $0xe3] sm:$0xff] }
 0x276   :  { %v8929_v22 = vpop.permute.xlu0 %8928 }
 0x277   :  { %v9256_v23 = vsel %vm9243_vm6, %v9199_v20, %v8929_v22  ;;  %v8263_v29 = vpop.permute.xlu1 %8262 }
 0x278   :  { %8724 = vrot.lane.b32.xlu0 %v8086_v19, %s14643_s26  ;;  %14210 = vmatprep.mubr.msk.f32.mxu0 %vm9304_vm7, %v9256_v23  ;;  %v9088_v53 = vsel %vm9072_vm3, %v7911_v45, %v8263_v29  ;;  %v8158_v23 = vld [vmem:[%s19537_s0 + $0x15c] sm:$0xff]  ;;  %v8048_v45 = vld [vmem:[%s19537_s0 + $0x16a] sm:$0xff] }
 0x279   :  { %8754 = vrot.lane.b32.xlu1 %v8101_v26, %s14643_s26 }
 0x27a   :  { %v8931_v30 = vpop.permute.xlu0 %8930 }
 0x27b   :  { %v9257_v31 = vsel %vm9243_vm6, %v9200_v28, %v8931_v30  ;;  %v8487_v34 = vpop.permute.xlu1 %8486  ;;  %v7978_v28 = vld [vmem:[%s19537_s0 + $0xe9] sm:$0xff] }
 0x27c   :  { %8726 = vrot.lane.b32.xlu0 %v8087_v27, %s14643_s26  ;;  %14211 = vmatmul.mubr.msk.f32.gmra.mrb[12].mxu0 %vm9304_vm7, %v9257_v31  ;;  %v9145_v54 = vsel %vm9129_vm4, %v9088_v53, %v8487_v34  ;;  %v7992_v27 = vld [vmem:[%s19537_s0 + $0x169] sm:$0xff]  ;;  %v8049_v53 = vld [vmem:[%s19537_s0 + $0x172] sm:$0xff] }
 0x27d   :  { %8976 = vrot.lane.b32.xlu1 %v8156_v32, %s14644_s9  ;;  %v8159_v31 = vld [vmem:[%s19537_s0 + $0x164] sm:$0xff] }
 0x27e   :  { %v8485_v35 = vpop.permute.xlu0 %8484  ;;  %v8145_v32 = vld [vmem:[%s19537_s0 + $0xe4] sm:$0xff] }
 0x27f   :  { %v8711_v39 = vpop.permute.xlu1 %8710  ;;  %v9144_v46 = vsel %vm9129_vm4, %v9087_v44, %v8485_v35  ;;  %v14646_v35 = vmov 0.0   ;;  %v7928_v44 = vld [vmem:[%s19537_s0 + $0x120] sm:$0xff] }
 0x280   :  { %8948 = vrot.lane.b32.xlu0 %v8142_v33, %s14644_s9  ;;  %v9202_v57 = vsel %vm9186_vm5, %v9145_v54, %v8711_v39  ;;  %9934 = vst.msk [vmem:[#allocation2 + $0x38] sm:$0xff] %vm9186_vm5, %v14646_v35  ;;  %9935 = vst.msk [vmem:[#allocation2 + $0x78] sm:$0xff] %vm9186_vm5, %v14646_v35  ;;  %v8035_v54 = vld [vmem:[%s19537_s0 + $0xf2] sm:$0xff] }
 0x281   :  { %8308 = vrot.lane.b32.xlu1 %v7990_v37, %s14642_s18  ;;  %9936 = vst.msk [vmem:[#allocation2 + $0xb8] sm:$0xff] %vm9186_vm5, %v14646_v35  ;;  %9937 = vst.msk [vmem:[#allocation2 + $0xf8] sm:$0xff] %vm9186_vm5, %v14646_v35  ;;  %v7979_v37 = vld [vmem:[%s19537_s0 + $0xf1] sm:$0xff] }
 0x282   :  { %v8709_v43 = vpop.permute.xlu0 %8708  ;;  %9938 = vst.msk [vmem:[#allocation2 + $0x138] sm:$0xff] %vm9186_vm5, %v14646_v35  ;;  %9939 = vst.msk [vmem:[#allocation2 + $0x178] sm:$0xff] %vm9186_vm5, %v14646_v35 }
 0x283   :  { %v9201_v49 = vsel %vm9186_vm5, %v9144_v46, %v8709_v43  ;;  %v8265_v50 = vpop.permute.xlu1 %8264  ;;  %9940 = vst.msk [vmem:[#allocation2 + $0x1b8] sm:$0xff] %vm9186_vm5, %v14646_v35  ;;  %9941 = vst.msk [vmem:[#allocation2 + $0x1f8] sm:$0xff] %vm9186_vm5, %v14646_v35  ;;  %v7914_v43 = vld [vmem:[%s19537_s0 + $0xa0] sm:$0xff]  ;;  %v8034_v46 = vld [vmem:[%s19537_s0 + $0xea] sm:$0xff] }
 0x284   :  { %8280 = vrot.lane.b32.xlu0 %v7976_v38, %s14642_s18  ;;  %v9089_v6 = vsel %vm9072_vm3, %v7912_v1, %v8265_v50 }
 0x285   :  { %8978 = vrot.lane.b32.xlu1 %v8157_v47, %s14644_s9 }
 0x286   :  { %v8933_v51 = vpop.permute.xlu0 %8932 }
 0x287   :  { %v9258_v52 = vsel %vm9243_vm6, %v9201_v49, %v8933_v51  ;;  %v8267_v58 = vpop.permute.xlu1 %8266 }
 0x288   :  { %8950 = vrot.lane.b32.xlu0 %v8143_v48, %s14644_s9  ;;  %14213 = vmatprep.mubr.msk.f32.mxu0 %vm9304_vm7, %v9258_v52  ;;  %v9090_v15 = vsel %vm9072_vm3, %v7913_v7, %v8267_v58  ;;  %v8105_v7 = vld [vmem:[%s19537_s0 + $0x173] sm:$0xff] }
 0x289   :  { %8310 = vrot.lane.b32.xlu1 %v7991_v55, %s14642_s18 }
 0x28a   :  { %v8935_v59 = vpop.permute.xlu0 %8934 }
 0x28b   :  { %v9259_v60 = vsel %vm9243_vm6, %v9202_v57, %v8935_v59  ;;  %v8491_v63 = vpop.permute.xlu1 %8490 }
 0x28c   :  { %8282 = vrot.lane.b32.xlu0 %v7977_v56, %s14642_s18  ;;  %14214 = vmatmul.mubr.msk.f32.gmra.mrb[14].mxu0 %vm9304_vm7, %v9259_v60  ;;  %v9147_v16 = vsel %vm9129_vm4, %v9090_v15, %v8491_v63  ;;  %v8104_v63 = vld [vmem:[%s19537_s0 + $0x16b] sm:$0xff] }
 0x28d   :  { %8532 = vrot.lane.b32.xlu1 %v8046_v61, %s14641_s17  ;;  %v7929_v61 = vld [vmem:[%s19537_s0 + $0x128] sm:$0xff] }
 0x28e   :  { %v8489_v0 = vpop.permute.xlu0 %8488  ;;  %v8160_v15 = vld [vmem:[%s19537_s0 + $0x16c] sm:$0xff] }
 0x28f   :  { %v8715_v4 = vpop.permute.xlu1 %8714  ;;  %v9146_v8 = vsel %vm9129_vm4, %v9089_v6, %v8489_v0  ;;  %v8090_v0 = vld [vmem:[%s19537_s0 + $0xeb] sm:$0xff] }
 0x290   :  { %8504 = vrot.lane.b32.xlu0 %v8032_v62, %s14641_s17  ;;  %v9204_v19 = vsel %vm9186_vm5, %v9147_v16, %v8715_v4  ;;  %v7915_v62 = vld [vmem:[%s19537_s0 + $0xa8] sm:$0xff] }
 0x291   :  { %8534 = vrot.lane.b32.xlu1 %v8047_v2, %s14641_s17  ;;  %v8146_v16 = vld [vmem:[%s19537_s0 + $0xec] sm:$0xff] }
 0x292   :  { %v8713_v5 = vpop.permute.xlu0 %8712 }
 0x293   :  { %v9203_v11 = vsel %vm9186_vm5, %v9146_v8, %v8713_v5  ;;  %v8269_v12 = vpop.permute.xlu1 %8268  ;;  %v8091_v8 = vld [vmem:[%s19537_s0 + $0xf3] sm:$0xff] }
 0x294   :  { %8506 = vrot.lane.b32.xlu0 %v8033_v3, %s14641_s17  ;;  %v9091_v49 = vsel %vm9072_vm3, %v7914_v43, %v8269_v12 }
 0x295   :  { %8756 = vrot.lane.b32.xlu1 %v8102_v9, %s14643_s26 }
 0x296   :  { %v8937_v13 = vpop.permute.xlu0 %8936 }
 0x297   :  { %v9260_v14 = vsel %vm9243_vm6, %v9203_v11, %v8937_v13  ;;  %v8939_v20 = vpop.permute.xlu1 %8938 }
 0x298   :  { %8728 = vrot.lane.b32.xlu0 %v8088_v10, %s14643_s26  ;;  %14216 = vmatprep.mubr.msk.f32.mxu0 %vm9304_vm7, %v9260_v14  ;;  %v9261_v22 = vsel %vm9243_vm6, %v9204_v19, %v8939_v20  ;;  %v7994_v19 = vld [vmem:[%s19537_s0 + $0x181] sm:$0xff] }
 0x299   :  { %8758 = vrot.lane.b32.xlu1 %v8103_v17, %s14643_s26  ;;  %14217 = vmatmul.mubr.msk.f32.gmra.mrb[16].mxu0 %vm9304_vm7, %v9261_v22  ;;  %v7980_v20 = vld [vmem:[%s19537_s0 + $0x101] sm:$0xff] }
 0x29a   :  { %v8297_v21 = vpop.permute.xlu0 %8296 }
 0x29b   :  { %v8299_v25 = vpop.permute.xlu1 %8298  ;;  %v9105_v50 = vsel %vm9072_vm3, %v7928_v44, %v8297_v21 }
 0x29c   :  { %8730 = vrot.lane.b32.xlu0 %v8089_v18, %s14643_s26  ;;  %v9106_v3 = vsel %vm9072_vm3, %v7929_v61, %v8299_v25 }
 0x29d   :  { %8980 = vrot.lane.b32.xlu1 %v8158_v23, %s14644_s9  ;;  %v8161_v23 = vld [vmem:[%s19537_s0 + $0x174] sm:$0xff] }
 0x29e   :  { %v8271_v26 = vpop.permute.xlu0 %8270 }
 0x29f   :  { %v8521_v29 = vpop.permute.xlu1 %8520  ;;  %v9092_v4 = vsel %vm9072_vm3, %v7915_v62, %v8271_v26 }
 0x2a0   :  { %8952 = vrot.lane.b32.xlu0 %v8144_v24, %s14644_s9  ;;  %v9162_v51 = vsel %vm9129_vm4, %v9105_v50, %v8521_v29  ;;  %v8147_v24 = vld [vmem:[%s19537_s0 + $0xf4] sm:$0xff] }
 0x2a1   :  { %8312 = vrot.lane.b32.xlu1 %v7992_v27, %s14642_s18  ;;  %v7995_v27 = vld [vmem:[%s19537_s0 + $0x189] sm:$0xff] }
 0x2a2   :  { %v8493_v30 = vpop.permute.xlu0 %8492 }
 0x2a3   :  { %v8523_v33 = vpop.permute.xlu1 %8522  ;;  %v9148_v52 = vsel %vm9129_vm4, %v9091_v49, %v8493_v30 }
 0x2a4   :  { %8284 = vrot.lane.b32.xlu0 %v7978_v28, %s14642_s18  ;;  %v9163_v5 = vsel %vm9129_vm4, %v9106_v3, %v8523_v33  ;;  %v7981_v28 = vld [vmem:[%s19537_s0 + $0x109] sm:$0xff] }
 0x2a5   :  { %8982 = vrot.lane.b32.xlu1 %v8159_v31, %s14644_s9  ;;  %v7930_v31 = vld [vmem:[%s19537_s0 + $0x130] sm:$0xff]  ;;  %v8050_v33 = vld [vmem:[%s19537_s0 + $0x182] sm:$0xff] }
 0x2a6   :  { %v8495_v34 = vpop.permute.xlu0 %8494 }
 0x2a7   :  { %v8745_v38 = vpop.permute.xlu1 %8744  ;;  %v9149_v6 = vsel %vm9129_vm4, %v9092_v4, %v8495_v34  ;;  %v8036_v34 = vld [vmem:[%s19537_s0 + $0x102] sm:$0xff] }
 0x2a8   :  { %8954 = vrot.lane.b32.xlu0 %v8145_v32, %s14644_s9  ;;  %v9219_v55 = vsel %vm9186_vm5, %v9162_v51, %v8745_v38  ;;  %v7916_v32 = vld [vmem:[%s19537_s0 + $0xb0] sm:$0xff] }
 0x2a9   :  { %8314 = vrot.lane.b32.xlu1 %v7993_v36, %s14642_s18 }
 0x2aa   :  { %v8717_v39 = vpop.permute.xlu0 %8716 }
 0x2ab   :  { %v8747_v47 = vpop.permute.xlu1 %8746  ;;  %v9205_v56 = vsel %vm9186_vm5, %v9148_v52, %v8717_v39 }
 0x2ac   :  { %8286 = vrot.lane.b32.xlu0 %v7979_v37, %s14642_s18  ;;  %v9220_v9 = vsel %vm9186_vm5, %v9163_v5, %v8747_v47 }
 0x2ad   :  { %8536 = vrot.lane.b32.xlu1 %v8048_v45, %s14641_s17  ;;  %v8051_v45 = vld [vmem:[%s19537_s0 + $0x18a] sm:$0xff] }
 0x2ae   :  { %v8719_v48 = vpop.permute.xlu0 %8718 }
 0x2af   :  { %v8969_v57 = vpop.permute.xlu1 %8968  ;;  %v9206_v10 = vsel %vm9186_vm5, %v9149_v6, %v8719_v48 }
 0x2b0   :  { %8508 = vrot.lane.b32.xlu0 %v8034_v46, %s14641_s17  ;;  %v9276_v60 = vsel %vm9243_vm6, %v9219_v55, %v8969_v57  ;;  %v8037_v46 = vld [vmem:[%s19537_s0 + $0x10a] sm:$0xff] }
 0x2b1   :  { %8538 = vrot.lane.b32.xlu1 %v8049_v53, %s14641_s17  ;;  %14240 = vmatprep.mubr.msk.f32.mxu1 %vm9304_vm7, %v9276_v60  ;;  %v7931_v53 = vld [vmem:[%s19537_s0 + $0x140] sm:$0xff] }
 0x2b2   :  { %v8941_v58 = vpop.permute.xlu0 %8940  ;;  %v8106_v55 = vld [vmem:[%s19537_s0 + $0x183] sm:$0xff] }
 0x2b3   :  { %v9262_v59 = vsel %vm9243_vm6, %v9205_v56, %v8941_v58  ;;  %v8301_v1 = vpop.permute.xlu1 %8300  ;;  %v8092_v56 = vld [vmem:[%s19537_s0 + $0x103] sm:$0xff] }
 0x2b4   :  { %8510 = vrot.lane.b32.xlu0 %v8035_v54, %s14641_s17  ;;  %14219 = vmatprep.mubr.msk.f32.mxu0 %vm9304_vm7, %v9262_v59  ;;  %v9107_v38 = vsel %vm9072_vm3, %v7930_v31, %v8301_v1  ;;  %v7917_v54 = vld [vmem:[%s19537_s0 + $0xc0] sm:$0xff] }
 0x2b5   :  { %8760 = vrot.lane.b32.xlu1 %v8104_v63, %s14643_s26  ;;  %v8107_v63 = vld [vmem:[%s19537_s0 + $0x18b] sm:$0xff] }
 0x2b6   :  { %v8273_v2 = vpop.permute.xlu0 %8272 }
 0x2b7   :  { %v8971_v11 = vpop.permute.xlu1 %8970  ;;  %v9093_v39 = vsel %vm9072_vm3, %v7916_v32, %v8273_v2 }
 0x2b8   :  { %8732 = vrot.lane.b32.xlu0 %v8090_v0, %s14643_s26  ;;  %v9277_v13 = vsel %vm9243_vm6, %v9220_v9, %v8971_v11  ;;  %v8093_v0 = vld [vmem:[%s19537_s0 + $0x10b] sm:$0xff] }
 0x2b9   :  { %8762 = vrot.lane.b32.xlu1 %v8105_v7, %s14643_s26  ;;  %14241 = vmatmul.mubr.msk.f32.vlgmr.msra.gmra.mrb[0].mxu1 %vm9304_vm7, %v9277_v13  ;;  %v8162_v7 = vld [vmem:[%s19537_s0 + $0x184] sm:$0xff]  ;;  %v7996_v11 = vld [vmem:[%s19537_s0 + $0x191] sm:$0xff] }
 0x2ba   :  { %v8943_v12 = vpop.permute.xlu0 %8942 }
 0x2bb   :  { %v9263_v14 = vsel %vm9243_vm6, %v9206_v10, %v8943_v12  ;;  %v8303_v17 = vpop.permute.xlu1 %8302  ;;  %v7982_v12 = vld [vmem:[%s19537_s0 + $0x111] sm:$0xff] }
 0x2bc   :  { %8734 = vrot.lane.b32.xlu0 %v8091_v8, %s14643_s26  ;;  %14220 = vmatmul.mubr.msk.f32.gmra.mrb[18].mxu0 %vm9304_vm7, %v9263_v14  ;;  %v9108_v59 = vsel %vm9072_vm3, %v7931_v53, %v8303_v17  ;;  %v8148_v8 = vld [vmem:[%s19537_s0 + $0x104] sm:$0xff]  ;;  %v7919_v53 = vld [vmem:[%s19537_s0 + $0xd0] sm:$0xff] }
 0x2bd   :  { %8984 = vrot.lane.b32.xlu1 %v8160_v15, %s14644_s9  ;;  %v8163_v15 = vld [vmem:[%s19537_s0 + $0x18c] sm:$0xff] }
 0x2be   :  { %v8275_v18 = vpop.permute.xlu0 %8274 }
 0x2bf   :  { %v8525_v21 = vpop.permute.xlu1 %8524  ;;  %v9094_v60 = vsel %vm9072_vm3, %v7917_v54, %v8275_v18  ;;  %v8108_v54 = vld [vmem:[%s19537_s0 + $0x193] sm:$0xff] }
 0x2c0   :  { %8956 = vrot.lane.b32.xlu0 %v8146_v16, %s14644_s9  ;;  %v9164_v43 = vsel %vm9129_vm4, %v9107_v38, %v8525_v21  ;;  %v8149_v16 = vld [vmem:[%s19537_s0 + $0x10c] sm:$0xff]  ;;  %v8053_v38 = vld [vmem:[%s19537_s0 + $0x19a] sm:$0xff] }
 0x2c1   :  { %8316 = vrot.lane.b32.xlu1 %v7994_v19, %s14642_s18  ;;  %v7997_v19 = vld [vmem:[%s19537_s0 + $0x199] sm:$0xff] }
 0x2c2   :  { %v8497_v22 = vpop.permute.xlu0 %8496 }
 0x2c3   :  { %v8527_v25 = vpop.permute.xlu1 %8526  ;;  %v9150_v44 = vsel %vm9129_vm4, %v9093_v39, %v8497_v22  ;;  %v8039_v39 = vld [vmem:[%s19537_s0 + $0x11a] sm:$0xff] }
 0x2c4   :  { %8288 = vrot.lane.b32.xlu0 %v7980_v20, %s14642_s18  ;;  %v9165_v61 = vsel %vm9129_vm4, %v9108_v59, %v8527_v25  ;;  %v7983_v20 = vld [vmem:[%s19537_s0 + $0x119] sm:$0xff] }
 0x2c5   :  { %8986 = vrot.lane.b32.xlu1 %v8161_v23, %s14644_s9  ;;  %v7932_v23 = vld [vmem:[%s19537_s0 + $0x148] sm:$0xff]  ;;  %v8052_v25 = vld [vmem:[%s19537_s0 + $0x192] sm:$0xff] }
 0x2c6   :  { %v8499_v26 = vpop.permute.xlu0 %8498 }
 0x2c7   :  { %v8749_v29 = vpop.permute.xlu1 %8748  ;;  %v9151_v62 = vsel %vm9129_vm4, %v9094_v60, %v8499_v26  ;;  %v8038_v26 = vld [vmem:[%s19537_s0 + $0x112] sm:$0xff] }
 0x2c8   :  { %8958 = vrot.lane.b32.xlu0 %v8147_v24, %s14644_s9  ;;  %v9221_v47 = vsel %vm9186_vm5, %v9164_v43, %v8749_v29  ;;  %v7918_v24 = vld [vmem:[%s19537_s0 + $0xc8] sm:$0xff]  ;;  %v17865_v29 = vld [vmem:[%s19541_s4] ss:$0 sm:$0xff] }
 0x2c9   :  { %8318 = vrot.lane.b32.xlu1 %v7995_v27, %s14642_s18 }
 0x2ca   :  { %v8721_v30 = vpop.permute.xlu0 %8720 }
 0x2cb   :  { %v8751_v36 = vpop.permute.xlu1 %8750  ;;  %v9207_v48 = vsel %vm9186_vm5, %v9150_v44, %v8721_v30 }
 0x2cc   :  { %8290 = vrot.lane.b32.xlu0 %v7981_v28, %s14642_s18  ;;  %v9222_v1 = vsel %vm9186_vm5, %v9165_v61, %v8751_v36 }
 0x2cd   :  { %8540 = vrot.lane.b32.xlu1 %v8050_v33, %s14641_s17 }
 0x2ce   :  { %v8723_v37 = vpop.permute.xlu0 %8722 }
 0x2cf   :  { %v8973_v49 = vpop.permute.xlu1 %8972  ;;  %v9208_v2 = vsel %vm9186_vm5, %v9151_v62, %v8723_v37  ;;  %v8109_v62 = vld [vmem:[%s19537_s0 + $0x19b] sm:$0xff] }
 0x2d0   :  { %8512 = vrot.lane.b32.xlu0 %v8036_v34, %s14641_s17  ;;  %v9278_v51 = vsel %vm9243_vm6, %v9221_v47, %v8973_v49 }
 0x2d1   :  { %8542 = vrot.lane.b32.xlu1 %v8051_v45, %s14641_s17  ;;  %14243 = vmatprep.mubr.msk.f32.mxu1 %vm9304_vm7, %v9278_v51  ;;  %v7933_v51 = vld [vmem:[%s19537_s0 + $0x150] sm:$0xff] }
 0x2d2   :  { %v8945_v50 = vpop.permute.xlu0 %8944 }
 0x2d3   :  { %v9264_v52 = vsel %vm9243_vm6, %v9207_v48, %v8945_v50  ;;  %v8305_v57 = vpop.permute.xlu1 %8304 }
 0x2d4   :  { %8514 = vrot.lane.b32.xlu0 %v8037_v46, %s14641_s17  ;;  %14222 = vmatprep.mubr.msk.f32.mxu0 %vm9304_vm7, %v9264_v52  ;;  %v9109_v30 = vsel %vm9072_vm3, %v7932_v23, %v8305_v57 }
 0x2d5   :  { %8764 = vrot.lane.b32.xlu1 %v8106_v55, %s14643_s26  ;;  %v8094_v55 = vld [vmem:[%s19537_s0 + $0x113] sm:$0xff] }
 0x2d6   :  { %v8277_v58 = vpop.permute.xlu0 %8276 }
 0x2d7   :  { %v8975_v3 = vpop.permute.xlu1 %8974  ;;  %v9095_v31 = vsel %vm9072_vm3, %v7918_v24, %v8277_v58  ;;  %v8055_v24 = vld [vmem:[%s19537_s0 + $0x1aa] sm:$0xff] }
 0x2d8   :  { %8736 = vrot.lane.b32.xlu0 %v8092_v56, %s14643_s26  ;;  %v9279_v5 = vsel %vm9243_vm6, %v9222_v1, %v8975_v3 }
 0x2d9   :  { %8766 = vrot.lane.b32.xlu1 %v8107_v63, %s14643_s26  ;;  %14244 = vmatmul.mubr.msk.f32.gmra.mrb[2].mxu1 %vm9304_vm7, %v9279_v5  ;;  %v8095_v63 = vld [vmem:[%s19537_s0 + $0x11b] sm:$0xff] }
 0x2da   :  { %v8947_v4 = vpop.permute.xlu0 %8946 }
 0x2db   :  { %v9265_v6 = vsel %vm9243_vm6, %v9208_v2, %v8947_v4  ;;  %v8307_v9 = vpop.permute.xlu1 %8306 }
 0x2dc   :  { %8738 = vrot.lane.b32.xlu0 %v8093_v0, %s14643_s26  ;;  %14223 = vmatmul.mubr.msk.f32.gmra.mrb[20].mxu0 %vm9304_vm7, %v9265_v6  ;;  %v9110_v58 = vsel %vm9072_vm3, %v7933_v51, %v8307_v9  ;;  %v8164_v6 = vld [vmem:[%s19537_s0 + $0x194] sm:$0xff] }
 0x2dd   :  { %8988 = vrot.lane.b32.xlu1 %v8162_v7, %s14644_s9  ;;  %v8150_v7 = vld [vmem:[%s19537_s0 + $0x114] sm:$0xff] }
 0x2de   :  { %v8279_v10 = vpop.permute.xlu0 %8278 }
 0x2df   :  { %v8529_v13 = vpop.permute.xlu1 %8528  ;;  %v9096_v59 = vsel %vm9072_vm3, %v7919_v53, %v8279_v10  ;;  %v8000_v53 = vld [vmem:[%s19537_s0 + $0x1b1] sm:$0xff] }
 0x2e0   :  { %8960 = vrot.lane.b32.xlu0 %v8148_v8, %s14644_s9  ;;  %v9166_v33 = vsel %vm9129_vm4, %v9109_v30, %v8529_v13  ;;  %v8151_v13 = vld [vmem:[%s19537_s0 + $0x11c] sm:$0xff] }
 0x2e1   :  { %8320 = vrot.lane.b32.xlu1 %v7996_v11, %s14642_s18 }
 0x2e2   :  { %v8501_v14 = vpop.permute.xlu0 %8500 }
 0x2e3   :  { %v8531_v17 = vpop.permute.xlu1 %8530  ;;  %v9152_v34 = vsel %vm9129_vm4, %v9095_v31, %v8501_v14  ;;  %v7998_v14 = vld [vmem:[%s19537_s0 + $0x1a1] sm:$0xff] }
 0x2e4   :  { %8292 = vrot.lane.b32.xlu0 %v7982_v12, %s14642_s18  ;;  %v9167_v60 = vsel %vm9129_vm4, %v9110_v58, %v8531_v17 }
 0x2e5   :  { %8990 = vrot.lane.b32.xlu1 %v8163_v15, %s14644_s9 }
 0x2e6   :  { %v8503_v18 = vpop.permute.xlu0 %8502 }
 0x2e7   :  { %v8753_v21 = vpop.permute.xlu1 %8752  ;;  %v9153_v61 = vsel %vm9129_vm4, %v9096_v59, %v8503_v18 }
 0x2e8   :  { %8962 = vrot.lane.b32.xlu0 %v8149_v16, %s14644_s9  ;;  %v9223_v43 = vsel %vm9186_vm5, %v9166_v33, %v8753_v21  ;;  %v8165_v21 = vld [vmem:[%s19537_s0 + $0x19c] sm:$0xff] }
 0x2e9   :  { %8322 = vrot.lane.b32.xlu1 %v7997_v19, %s14642_s18  ;;  %v7920_v33 = vld [vmem:[%s19537_s0 + $0xd8] sm:$0xff] }
 0x2ea   :  { %v8725_v22 = vpop.permute.xlu0 %8724 }
 0x2eb   :  { %v8755_v27 = vpop.permute.xlu1 %8754  ;;  %v9209_v44 = vsel %vm9186_vm5, %v9152_v34, %v8725_v22 }
 0x2ec   :  { %8294 = vrot.lane.b32.xlu0 %v7983_v20, %s14642_s18  ;;  %v9224_v0 = vsel %vm9186_vm5, %v9167_v60, %v8755_v27  ;;  %v7999_v20 = vld [vmem:[%s19537_s0 + $0x1a9] sm:$0xff] }
 0x2ed   :  { %8544 = vrot.lane.b32.xlu1 %v8052_v25, %s14641_s17  ;;  %v8054_v27 = vld [vmem:[%s19537_s0 + $0x1a2] sm:$0xff] }
 0x2ee   :  { %v8727_v28 = vpop.permute.xlu0 %8726 }
 0x2ef   :  { %v14194_v32 = vpop.f32.mrb[0].mxu0  ;;  %v8977_v46 = vpop.permute.xlu1 %8976  ;;  %v9210_v1 = vsel %vm9186_vm5, %v9153_v61, %v8727_v28 }
 0x2f0   :  { %8516 = vrot.lane.b32.xlu0 %v8038_v26, %s14641_s17  ;;  %v9549_v36 = vadd.f32 %v14194_v32, %v17865_v29  ;;  %v9543_v37 = vpop.f32.mrb[1].mxu0  ;;  %v9280_v49 = vsel %vm9243_vm6, %v9223_v43, %v8977_v46  ;;  %v7934_v32 = vld [vmem:[%s19537_s0 + $0x158] sm:$0xff] }
 0x2f1   :  { %v9544_v45 = vadd.f32 %v9543_v37, %v17865_v29  ;;  %8546 = vrot.lane.b32.xlu1 %v8053_v38, %s14641_s17  ;;  %14246 = vmatprep.mubr.msk.f32.mxu1 %vm9304_vm7, %v9280_v49  ;;  %v8110_v37 = vld [vmem:[%s19537_s0 + $0x1a3] sm:$0xff] }
 0x2f2   :  { %v8949_v47 = vpop.permute.xlu0 %8948  ;;  %v9823_v48 = vmax.f32 %v9549_v36, 0.0  ;;  %v8111_v36 = vld [vmem:[%s19537_s0 + $0x1ab] sm:$0xff] }
 0x2f3   :  { %v9266_v50 = vsel %vm9243_vm6, %v9209_v44, %v8949_v47  ;;  %v9822_v52 = vmax.f32 %v9544_v45, 0.0  ;;  %v17903_v56 = vpop.permute.xlu1 %8308 }
 0x2f4   :  { %8518 = vrot.lane.b32.xlu0 %v8039_v39, %s14641_s17  ;;  %9879 = vst.msk [vmem:[#allocation2 + $0x8] sm:$0xff] %vm9186_vm5, %v9823_v48  ;;  %14225 = vmatprep.mubr.msk.f32.mxu0 %vm9304_vm7, %v9266_v50  ;;  %v9111_v45 = vsel %vm9072_vm3, %v7934_v32, %v17903_v56 }
 0x2f5   :  { %9878 = vst.msk [vmem:[#allocation2] sm:$0xff] %vm9186_vm5, %v9822_v52  ;;  %8768 = vrot.lane.b32.xlu1 %v8108_v54, %s14643_s26  ;;  %v8166_v54 = vld [vmem:[%s19537_s0 + $0x1a4] sm:$0xff] }
 0x2f6   :  { %v17905_v57 = vpop.permute.xlu0 %8280 }
 0x2f7   :  { %v8979_v2 = vpop.permute.xlu1 %8978  ;;  %v9097_v46 = vsel %vm9072_vm3, %v7920_v33, %v17905_v57  ;;  %v8002_v33 = vld [vmem:[%s19537_s0 + $0x1c9] sm:$0xff] }
 0x2f8   :  { %8740 = vrot.lane.b32.xlu0 %v8094_v55, %s14643_s26  ;;  %v9281_v4 = vsel %vm9243_vm6, %v9224_v0, %v8979_v2  ;;  %v8001_v2 = vld [vmem:[%s19537_s0 + $0x1c1] sm:$0xff] }
 0x2f9   :  { %8770 = vrot.lane.b32.xlu1 %v8109_v62, %s14643_s26  ;;  %14247 = vmatmul.mubr.msk.f32.gmra.mrb[4].mxu1 %vm9304_vm7, %v9281_v4 }
 0x2fa   :  { %v8951_v3 = vpop.permute.xlu0 %8950 }
 0x2fb   :  { %v9267_v5 = vsel %vm9243_vm6, %v9210_v1, %v8951_v3  ;;  %v17933_v8 = vpop.permute.xlu1 %8310  ;;  %v7921_v1 = vld [vmem:[%s19537_s0 + $0xe0] sm:$0xff]  ;;  %v8167_v3 = vld [vmem:[%s19537_s0 + $0x1ac] sm:$0xff] }
 0x2fc   :  { %8742 = vrot.lane.b32.xlu0 %v8095_v63, %s14643_s26  ;;  %14226 = vmatmul.mubr.msk.f32.gmra.mrb[22].mxu0 %vm9304_vm7, %v9267_v5  ;;  %v9942_v25 = vld [vmem:[#allocation2] ss:$2 sm:$0xff]  ;;  %v10006_v26 = vld [vmem:[#allocation2 + $0x1] ss:$2 sm:$0xff] }
 0x2fd   :  { %8992 = vrot.lane.b32.xlu1 %v8164_v6, %s14644_s9  ;;  %v10069_v31 = vmax.f32 %v9942_v25, %v10006_v26  ;;  %v7935_v63 = vld [vmem:[%s19537_s0 + $0x160] sm:$0xff] }
 0x2fe   :  { %v17935_v9 = vpop.permute.xlu0 %8282  ;;  %v9112_v6 = vsel %vm9072_vm3, %v7935_v63, %v17933_v8  ;;  %v8056_v8 = vld [vmem:[%s19537_s0 + $0x1b2] sm:$0xff] }
 0x2ff   :  { %v14197_v10 = vpop.f32.mrb[2].mxu0  ;;  %v8533_v16 = vpop.permute.xlu1 %8532 }
 0x300   :  { %8964 = vrot.lane.b32.xlu0 %v8150_v7, %s14644_s9  ;;  %v9559_v11 = vadd.f32 %v14197_v10, %v17865_v29  ;;  %v9553_v12 = vpop.f32.mrb[3].mxu0  ;;  %v9168_v49 = vsel %vm9129_vm4, %v9111_v45, %v8533_v16  ;;  %v9098_v7 = vsel %vm9072_vm3, %v7921_v1, %v17935_v9  ;;  %v8057_v10 = vld [vmem:[%s19537_s0 + $0x1c2] sm:$0xff] }
 0x301   :  { %v9554_v15 = vadd.f32 %v9553_v12, %v17865_v29  ;;  %8966 = vrot.lane.b32.xlu1 %v8151_v13, %s14644_s9  ;;  %v8169_v45 = vld [vmem:[%s19537_s0 + $0x1c4] sm:$0xff] }
 0x302   :  { %v8505_v17 = vpop.permute.xlu0 %8504  ;;  %v9825_v18 = vmax.f32 %v9559_v11, 0.0 }
 0x303   :  { %v9824_v19 = vmax.f32 %v9554_v15, 0.0  ;;  %v17957_v22 = vpop.permute.xlu1 %8534  ;;  %v9154_v50 = vsel %vm9129_vm4, %v9097_v46, %v8505_v17 }
 0x304   :  { %8324 = vrot.lane.b32.xlu0 %v7998_v14, %s14642_s18  ;;  %9881 = vst.msk [vmem:[#allocation2 + $0x18] sm:$0xff] %vm9186_vm5, %v9825_v18  ;;  %v9169_v13 = vsel %vm9129_vm4, %v9112_v6, %v17957_v22  ;;  %v8113_v22 = vld [vmem:[%s19537_s0 + $0x1c3] sm:$0xff] }
 0x305   :  { %9880 = vst.msk [vmem:[#allocation2 + $0x10] sm:$0xff] %vm9186_vm5, %v9824_v19  ;;  %8326 = vrot.lane.b32.xlu1 %v7999_v20, %s14642_s18 }
 0x306   :  { %v17959_v23 = vpop.permute.xlu0 %8506 }
 0x307   :  { %v8757_v28 = vpop.permute.xlu1 %8756  ;;  %v9155_v14 = vsel %vm9129_vm4, %v9098_v7, %v17959_v23  ;;  %v8112_v23 = vld [vmem:[%s19537_s0 + $0x1b3] sm:$0xff] }
 0x308   :  { %8994 = vrot.lane.b32.xlu0 %v8165_v21, %s14644_s9  ;;  %v9225_v55 = vsel %vm9186_vm5, %v9168_v49, %v8757_v28  ;;  %v8058_v49 = vld [vmem:[%s19537_s0 + $0x1ca] sm:$0xff] }
 0x309   :  { %8550 = vrot.lane.b32.xlu1 %v8055_v24, %s14641_s17 }
 0x30a   :  { %v8729_v30 = vpop.permute.xlu0 %8728 }
 0x30b   :  { %v8759_v39 = vpop.permute.xlu1 %8758  ;;  %v9211_v56 = vsel %vm9186_vm5, %v9154_v50, %v8729_v30 }
 0x30c   :  { %8548 = vrot.lane.b32.xlu0 %v8054_v27, %s14641_s17  ;;  %v10102_v34 = vld [vmem:[#allocation2 + $0x2] ss:$2 sm:$0xff]  ;;  %v10198_v44 = vld [vmem:[#allocation2 + $0x3] ss:$2 sm:$0xff]  ;;  %v9226_v9 = vsel %vm9186_vm5, %v9169_v13, %v8759_v39 }
 0x30d   :  { %v10165_v38 = vmax.f32 %v10069_v31, %v10102_v34  ;;  %8774 = vrot.lane.b32.xlu1 %v8111_v36, %s14643_s26  ;;  %v9944_v11 = vld [vmem:[#allocation2 + $0x10] ss:$2 sm:$0xff]  ;;  %v10008_v12 = vld [vmem:[#allocation2 + $0x11] ss:$2 sm:$0xff] }
 0x30e   :  { %v8731_v43 = vpop.permute.xlu0 %8730  ;;  %v10070_v20 = vmax.f32 %v9944_v11, %v10008_v12  ;;  %v8168_v34 = vld [vmem:[%s19537_s0 + $0x1b4] sm:$0xff] }
 0x30f   :  { %v10261_v47 = vmax.f32 %v10165_v38, %v10198_v44  ;;  %v14200_v48 = vpop.f32.mrb[4].mxu0  ;;  %v8981_v58 = vpop.permute.xlu1 %8980  ;;  %v9212_v15 = vsel %vm9186_vm5, %v9155_v14, %v8731_v43  ;;  %v8003_v44 = vld [vmem:[%s19537_s0 + $0x1d1] sm:$0xff] }
 0x310   :  { %8772 = vrot.lane.b32.xlu0 %v8110_v37, %s14643_s26  ;;  %v9569_v51 = vadd.f32 %v14200_v48, %v17865_v29  ;;  %v9563_v52 = vpop.f32.mrb[5].mxu0  ;;  %v9282_v61 = vsel %vm9243_vm6, %v9225_v55, %v8981_v58  ;;  %v8059_v48 = vld [vmem:[%s19537_s0 + $0x1d2] sm:$0xff]  ;;  %v7922_v55 = vld [vmem:[%s19537_s0 + $0xe8] sm:$0xff] }
 0x311   :  { %10293 = vst.msk [vmem:[#allocation3] sm:$0xff] %vm9186_vm5, %v10261_v47  ;;  %v9564_v57 = vadd.f32 %v9563_v52, %v17865_v29  ;;  %8328 = vrot.lane.b32.xlu1 %v8000_v53, %s14642_s18  ;;  %14249 = vmatprep.mubr.msk.f32.mxu1 %vm9304_vm7, %v9282_v61 }
 0x312   :  { %v8953_v59 = vpop.permute.xlu0 %8952  ;;  %v9827_v60 = vmax.f32 %v9569_v51, 0.0 }
 0x313   :  { %v9268_v62 = vsel %vm9243_vm6, %v9211_v56, %v8953_v59  ;;  %v9826_v0 = vmax.f32 %v9564_v57, 0.0  ;;  %v18022_v4 = vpop.permute.xlu1 %8312  ;;  %v8115_v56 = vld [vmem:[%s19537_s0 + $0x1d3] sm:$0xff]  ;;  %v8114_v57 = vld [vmem:[%s19537_s0 + $0x1cb] sm:$0xff] }
 0x314   :  { %8996 = vrot.lane.b32.xlu0 %v8166_v54, %s14644_s9  ;;  %9883 = vst.msk [vmem:[#allocation2 + $0x28] sm:$0xff] %vm9186_vm5, %v9827_v60  ;;  %14228 = vmatprep.mubr.msk.f32.mxu0 %vm9304_vm7, %v9268_v62  ;;  %v7936_v54 = vld [vmem:[%s19537_s0 + $0x168] sm:$0xff] }
 0x315   :  { %9882 = vst.msk [vmem:[#allocation2 + $0x20] sm:$0xff] %vm9186_vm5, %v9826_v0  ;;  %8330 = vrot.lane.b32.xlu1 %v8001_v2, %s14642_s18 }
 0x316   :  { %v18024_v5 = vpop.permute.xlu0 %8284 }
 0x317   :  { %v8983_v16 = vpop.permute.xlu1 %8982  ;;  %v9099_v6 = vsel %vm9072_vm3, %v7922_v55, %v18024_v5  ;;  %v8004_v5 = vld [vmem:[%s19537_s0 + $0x1d9] sm:$0xff] }
 0x318   :  { %8998 = vrot.lane.b32.xlu0 %v8167_v3, %s14644_s9  ;;  %v9283_v18 = vsel %vm9243_vm6, %v9226_v9, %v8983_v16  ;;  %v9113_v3 = vsel %vm9072_vm3, %v7936_v54, %v18022_v4 }
 0x319   :  { %8554 = vrot.lane.b32.xlu1 %v8057_v10, %s14641_s17  ;;  %14250 = vmatmul.mubr.msk.f32.gmra.mrb[6].mxu1 %vm9304_vm7, %v9283_v18 }
 0x31a   :  { %v8955_v17 = vpop.permute.xlu0 %8954 }
 0x31b   :  { %v9269_v19 = vsel %vm9243_vm6, %v9212_v15, %v8955_v17  ;;  %v18056_v25 = vpop.permute.xlu1 %8314  ;;  %v8170_v15 = vld [vmem:[%s19537_s0 + $0x1cc] sm:$0xff] }
 0x31c   :  { %8552 = vrot.lane.b32.xlu0 %v8056_v8, %s14641_s17  ;;  %v10104_v21 = vld [vmem:[#allocation2 + $0x12] ss:$2 sm:$0xff]  ;;  %14229 = vmatmul.mubr.msk.f32.gmra.mrb[24].mxu0 %vm9304_vm7, %v9269_v19  ;;  %v10200_v27 = vld [vmem:[#allocation2 + $0x13] ss:$2 sm:$0xff] }
 0x31d   :  { %v10166_v24 = vmax.f32 %v10070_v20, %v10104_v21  ;;  %8778 = vrot.lane.b32.xlu1 %v8113_v22, %s14643_s26  ;;  %v9946_v50 = vld [vmem:[#allocation2 + $0x20] ss:$2 sm:$0xff]  ;;  %v10010_v51 = vld [vmem:[#allocation2 + $0x21] ss:$2 sm:$0xff] }
 0x31e   :  { %v18058_v26 = vpop.permute.xlu0 %8286  ;;  %v10071_v58 = vmax.f32 %v9946_v50, %v10010_v51 }
 0x31f   :  { %v10262_v28 = vmax.f32 %v10166_v24, %v10200_v27  ;;  %v14203_v30 = vpop.f32.mrb[6].mxu0  ;;  %v8537_v37 = vpop.permute.xlu1 %8536  ;;  %v7923_v27 = vld [vmem:[%s19537_s0 + $0xf0] sm:$0xff] }
 0x320   :  { %8776 = vrot.lane.b32.xlu0 %v8112_v23, %s14643_s26  ;;  %v9579_v31 = vadd.f32 %v14203_v30, %v17865_v29  ;;  %v9573_v32 = vpop.f32.mrb[7].mxu0  ;;  %v9170_v14 = vsel %vm9129_vm4, %v9113_v3, %v8537_v37  ;;  %v7937_v30 = vld [vmem:[%s19537_s0 + $0x170] sm:$0xff]  ;;  %v9100_v37 = vsel %vm9072_vm3, %v7923_v27, %v18058_v26 }
 0x321   :  { %10294 = vst.msk [vmem:[#allocation3 + $0x8] sm:$0xff] %vm9186_vm5, %v10262_v28  ;;  %v9574_v36 = vadd.f32 %v9573_v32, %v17865_v29  ;;  %8332 = vrot.lane.b32.xlu1 %v8002_v33, %s14642_s18  ;;  %v8171_v32 = vld [vmem:[%s19537_s0 + $0x1d4] sm:$0xff] }
 0x322   :  { %v8509_v38 = vpop.permute.xlu0 %8508  ;;  %v9829_v39 = vmax.f32 %v9579_v31, 0.0  ;;  %v8005_v31 = vld [vmem:[%s19537_s0 + $0x1e1] sm:$0xff] }
 0x323   :  { %v9828_v43 = vmax.f32 %v9574_v36, 0.0  ;;  %v18081_v46 = vpop.permute.xlu1 %8538  ;;  %v9156_v8 = vsel %vm9129_vm4, %v9099_v6, %v8509_v38  ;;  %v9114_v36 = vsel %vm9072_vm3, %v7937_v30, %v18056_v25  ;;  %v8060_v25 = vld [vmem:[%s19537_s0 + $0x1da] sm:$0xff]  ;;  %v8118_v30 = vld [vmem:[%s19537_s0 + $0x1eb] sm:$0xff] }
 0x324   :  { %9000 = vrot.lane.b32.xlu0 %v8168_v34, %s14644_s9  ;;  %9885 = vst.msk [vmem:[#allocation2 + $0x40] sm:$0xff] %vm9186_vm5, %v9829_v39  ;;  %v9171_v38 = vsel %vm9129_vm4, %v9114_v36, %v18081_v46 }
 0x325   :  { %9884 = vst.msk [vmem:[#allocation2 + $0x30] sm:$0xff] %vm9186_vm5, %v9828_v43  ;;  %8334 = vrot.lane.b32.xlu1 %v8003_v44, %s14642_s18  ;;  %v8061_v43 = vld [vmem:[%s19537_s0 + $0x1e2] sm:$0xff] }
 0x326   :  { %v18083_v47 = vpop.permute.xlu0 %8510 }
 0x327   :  { %v8761_v52 = vpop.permute.xlu1 %8760  ;;  %v9157_v39 = vsel %vm9129_vm4, %v9100_v37, %v18083_v47  ;;  %v8117_v47 = vld [vmem:[%s19537_s0 + $0x1e3] sm:$0xff] }
 0x328   :  { %9002 = vrot.lane.b32.xlu0 %v8169_v45, %s14644_s9  ;;  %v9227_v17 = vsel %vm9186_vm5, %v9170_v14, %v8761_v52  ;;  %v8116_v52 = vld [vmem:[%s19537_s0 + $0x1db] sm:$0xff] }
 0x329   :  { %8558 = vrot.lane.b32.xlu1 %v8059_v48, %s14641_s17  ;;  %v10929_v14 = vld [vmem:[%s19539_s2] sm:$0xff] }
 0x32a   :  { %v8733_v53 = vpop.permute.xlu0 %8732 }
 0x32b   :  { %v8763_v63 = vpop.permute.xlu1 %8762  ;;  %v9213_v18 = vsel %vm9186_vm5, %v9156_v8, %v8733_v53  ;;  %v10930_v8 = vld [vmem:[%s19539_s2 + $0x8] sm:$0xff] }
 0x32c   :  { %8556 = vrot.lane.b32.xlu0 %v8058_v49, %s14641_s17  ;;  %v9948_v59 = vld [vmem:[#allocation2 + $0x30] ss:$2 sm:$0xf]  ;;  %v10012_v60 = vld [vmem:[#allocation2 + $0x31] ss:$2 sm:$0xf]  ;;  %v9228_v26 = vsel %vm9186_vm5, %v9171_v38, %v8763_v63 }
 0x32d   :  { %v10072_v61 = vmax.f32 %v9948_v59, %v10012_v60  ;;  %v10106_v62 = vld [vmem:[#allocation2 + $0x22] ss:$2 sm:$0xff]  ;;  %v10108_v1 = vld [vmem:[#allocation2 + $0x32] ss:$2 sm:$0xf]  ;;  %8782 = vrot.lane.b32.xlu1 %v8115_v56, %s14643_s26 }
 0x32e   :  { %v8735_v0 = vpop.permute.xlu0 %8734  ;;  %v10167_v2 = vmax.f32 %v10071_v58, %v10106_v62  ;;  %v10202_v10 = vld [vmem:[#allocation2 + $0x23] ss:$2 sm:$0xff]  ;;  %v10204_v12 = vld [vmem:[#allocation2 + $0x33] ss:$2 sm:$0xf] }
 0x32f   :  { %v10168_v7 = vmax.f32 %v10072_v61, %v10108_v1  ;;  %v14206_v11 = vpop.f32.mrb[8].mxu0  ;;  %v8985_v20 = vpop.permute.xlu1 %8984  ;;  %v9214_v44 = vsel %vm9186_vm5, %v9157_v39, %v8735_v0  ;;  %v8006_v62 = vld [vmem:[%s19537_s0 + $0x1e9] sm:$0xff]  ;;  %v8172_v63 = vld [vmem:[%s19537_s0 + $0x1dc] sm:$0xff] }
 0x330   :  { %8780 = vrot.lane.b32.xlu0 %v8114_v57, %s14643_s26  ;;  %v10263_v13 = vmax.f32 %v10167_v2, %v10202_v10  ;;  %v9589_v9 = vadd.f32 %v14206_v11, %v17865_v29  ;;  %v9583_v4 = vpop.f32.mrb[9].mxu0  ;;  %v9284_v23 = vsel %vm9243_vm6, %v9227_v17, %v8985_v20  ;;  %v8007_v10 = vld [vmem:[%s19537_s0 + $0x1f1] sm:$0xff]  ;;  %v8173_v11 = vld [vmem:[%s19537_s0 + $0x1e4] sm:$0xff] }
 0x331   :  { %v10264_v16 = vmax.f32 %v10168_v7, %v10204_v12  ;;  %v9584_v19 = vadd.f32 %v9583_v4, %v17865_v29  ;;  %8336 = vrot.lane.b32.xlu1 %v8004_v5, %s14642_s18  ;;  %14252 = vmatprep.mubr.msk.f32.mxu1 %vm9304_vm7, %v9284_v23  ;;  %v10931_v4 = vld [vmem:[%s19539_s2 + $0x10] sm:$0xff]  ;;  %v10932_v5 = vld [vmem:[%s19539_s2 + $0x18] sm:$0xff]  ;;  %v7924_v20 = vld [vmem:[%s19537_s0 + $0x100] sm:$0xff] }
 0x332   :  { %v8957_v21 = vpop.permute.xlu0 %8956  ;;  %10295 = vst.msk [vmem:[#allocation3 + $0x10] sm:$0xff] %vm9186_vm5, %v10263_v13  ;;  %v9831_v22 = vmax.f32 %v9589_v9, 0.0  ;;  %v14379_v9 = vpack.c.bf16 %v10930_v8, %v10929_v14  ;;  %v14383_v17 = vpack.c.bf16 %v10932_v5, %v10931_v4  ;;  %v7938_v23 = vld [vmem:[%s19537_s0 + $0x180] sm:$0xff] }
 0x333   :  { %v9270_v24 = vsel %vm9243_vm6, %v9213_v18, %v8957_v21  ;;  %v9830_v28 = vmax.f32 %v9584_v19, 0.0  ;;  %10297 = vst.msk [vmem:[#allocation3 + $0x18] sm:$0xf] %vm10296_vm8, %v10264_v16  ;;  %v18147_v33 = vpop.permute.xlu1 %8316  ;;  %v8062_v16 = vld [vmem:[%s19537_s0 + $0x1ea] sm:$0xff]  ;;  %v10933_v21 = vld [vmem:[%s19539_s2 + $0x20] sm:$0xff] }
 0x334   :  { %9004 = vrot.lane.b32.xlu0 %v8170_v15, %s14644_s9  ;;  %9887 = vst.msk [vmem:[#allocation2 + $0x50] sm:$0xff] %vm9186_vm5, %v9831_v22  ;;  %14231 = vmatprep.mubr.msk.f32.mxu0 %vm9304_vm7, %v9270_v24  ;;  %v8063_v15 = vld [vmem:[%s19537_s0 + $0x1f2] sm:$0xff]  ;;  %v10934_v22 = vld [vmem:[%s19539_s2 + $0x28] sm:$0xff]  ;;  %v9115_v39 = vsel %vm9072_vm3, %v7938_v23, %v18147_v33 }
 0x335   :  { %9886 = vst.msk [vmem:[#allocation2 + $0x48] sm:$0xff] %vm9186_vm5, %v9830_v28  ;;  %8338 = vrot.lane.b32.xlu1 %v8005_v31, %s14642_s18  ;;  %14380 = vmatprep.subr.bf16.mxu1 %v14379_v9  ;;  %v8119_v24 = vld [vmem:[%s19537_s0 + $0x1f3] sm:$0xff]  ;;  %v14387_v31 = vpack.c.bf16 %v10934_v22, %v10933_v21 }
 0x336   :  { %v18149_v34 = vpop.permute.xlu0 %8288  ;;  %14382 = vmatpush3.bf16.msra.mxu1 %v14379_v9  ;;  %v8175_v33 = vld [vmem:[%s19537_s0 + $0x1f4] sm:$0xff] }
 0x337   :  { %v8987_v45 = vpop.permute.xlu1 %8986  ;;  %14384 = vmatprep.subr.bf16.mxu1 %v14383_v17 }
 0x338   :  { %9006 = vrot.lane.b32.xlu0 %v8171_v32, %s14644_s9  ;;  %v9285_v49 = vsel %vm9243_vm6, %v9228_v26, %v8987_v45 }
 0x339   :  { %8562 = vrot.lane.b32.xlu1 %v8061_v43, %s14641_s17  ;;  %14253 = vmatmul.mubr.msk.f32.gmra.mrb[8].mxu1 %vm9304_vm7, %v9285_v49  ;;  %v9101_v43 = vsel %vm9072_vm3, %v7924_v20, %v18149_v34  ;;  %v8174_v34 = vld [vmem:[%s19537_s0 + $0x1ec] sm:$0xff]  ;;  %v10374_v20 = vld [vmem:[#allocation3 + $0x2] sm:$0xff] }
 0x33a   :  { %v8959_v48 = vpop.permute.xlu0 %8958  ;;  %14386 = vmatpush3.bf16.msra.mxu1 %v14383_v17 }
 0x33b   :  { %v9271_v46 = vsel %vm9243_vm6, %v9214_v44, %v8959_v48  ;;  %v18181_v54 = vpop.permute.xlu1 %8318  ;;  %14388 = vmatprep.subr.bf16.mxu1 %v14387_v31 }
 0x33c   :  { %8560 = vrot.lane.b32.xlu0 %v8060_v25, %s14641_s17  ;;  %v9950_v50 = vld [vmem:[#allocation2 + $0x40] ss:$2 sm:$0xff]  ;;  %v10014_v51 = vld [vmem:[#allocation2 + $0x41] ss:$2 sm:$0xff]  ;;  %14232 = vmatmul.mubr.msk.f32.gmra.mrb[26].mxu0 %vm9304_vm7, %v9271_v46 }
 0x33d   :  { %v10073_v53 = vmax.f32 %v9950_v50, %v10014_v51  ;;  %v10110_v56 = vld [vmem:[#allocation2 + $0x42] ss:$2 sm:$0xff]  ;;  %8786 = vrot.lane.b32.xlu1 %v8117_v47, %s14643_s26  ;;  %v10206_v59 = vld [vmem:[#allocation2 + $0x43] ss:$2 sm:$0xff] }
 0x33e   :  { %v18183_v55 = vpop.permute.xlu0 %8290  ;;  %14390 = vmatpush3.bf16.msra.mxu1 %v14387_v31 }
 0x33f   :  { %v10169_v57 = vmax.f32 %v10073_v53, %v10110_v56  ;;  %v14209_v58 = vpop.f32.mrb[10].mxu0  ;;  %v8541_v2 = vpop.permute.xlu1 %8540 }
 0x340   :  { %8784 = vrot.lane.b32.xlu0 %v8116_v52, %s14643_s26  ;;  %v9599_v60 = vadd.f32 %v14209_v58, %v17865_v29  ;;  %v9593_v61 = vpop.f32.mrb[11].mxu0  ;;  %v9172_v45 = vsel %vm9129_vm4, %v9115_v39, %v8541_v2 }
 0x341   :  { %v10265_v0 = vmax.f32 %v10169_v57, %v10206_v59  ;;  %v9594_v1 = vadd.f32 %v9593_v61, %v17865_v29  ;;  %8340 = vrot.lane.b32.xlu1 %v8006_v62, %s14642_s18  ;;  %v10936_v61 = vld [vmem:[%s19539_s2 + $0x38] sm:$0xff] }
 0x342   :  { %v8513_v3 = vpop.permute.xlu0 %8512  ;;  %v9833_v6 = vmax.f32 %v9599_v60, 0.0  ;;  %v10935_v60 = vld [vmem:[%s19539_s2 + $0x30] sm:$0xff] }
 0x343   :  { %10298 = vst.msk [vmem:[#allocation3 + $0x20] sm:$0xff] %vm9186_vm5, %v10265_v0  ;;  %v9832_v7 = vmax.f32 %v9594_v1, 0.0  ;;  %v18206_v12 = vpop.permute.xlu1 %8542  ;;  %v9158_v48 = vsel %vm9129_vm4, %v9101_v43, %v8513_v3  ;;  %v7939_v0 = vld [vmem:[%s19537_s0 + $0x188] sm:$0xff] }
 0x344   :  { %9008 = vrot.lane.b32.xlu0 %v8172_v63, %s14644_s9  ;;  %9889 = vst.msk [vmem:[#allocation2 + $0x60] sm:$0xff] %vm9186_vm5, %v9833_v6  ;;  %v14391_v63 = vpack.c.bf16 %v10936_v61, %v10935_v60  ;;  %v7925_v1 = vld [vmem:[%s19537_s0 + $0x108] sm:$0xff]  ;;  %v9116_v14 = vsel %vm9072_vm3, %v7939_v0, %v18181_v54 }
 0x345   :  { %9888 = vst.msk [vmem:[#allocation2 + $0x58] sm:$0xff] %vm9186_vm5, %v9832_v7  ;;  %8342 = vrot.lane.b32.xlu1 %v8007_v10, %s14642_s18  ;;  %v10350_v6 = vld [vmem:[#allocation3 + $0x1] sm:$0xff]  ;;  %v10351_v7 = vld [vmem:[#allocation3 + $0x9] sm:$0xff]  ;;  %v9102_v8 = vsel %vm9072_vm3, %v7925_v1, %v18183_v55  ;;  %v9173_v4 = vsel %vm9129_vm4, %v9116_v14, %v18206_v12  ;;  %v10376_v1 = vld [vmem:[#allocation3 + $0x12] sm:$0xff] }
 0x346   :  { %v18208_v13 = vpop.permute.xlu0 %8514  ;;  %14392 = vmatprep.subr.bf16.mxu1 %v14391_v63  ;;  %v10937_v10 = vld [vmem:[%s19539_s2 + $0x40] sm:$0xff]  ;;  %v10423_v61 = vld [vmem:[#allocation3 + $0xc] sm:$0xff] }
 0x347   :  { %v8765_v18 = vpop.permute.xlu1 %8764  ;;  %14394 = vmatpush3.bf16.msra.mxu1 %v14391_v63  ;;  %v9159_v5 = vsel %vm9129_vm4, %v9102_v8, %v18208_v13 }
 0x348   :  { %9010 = vrot.lane.b32.xlu0 %v8173_v11, %s14644_s9  ;;  %v9229_v50 = vsel %vm9186_vm5, %v9172_v45, %v8765_v18  ;;  %v10938_v11 = vld [vmem:[%s19539_s2 + $0x48] sm:$0xff] }
 0x349   :  { %8566 = vrot.lane.b32.xlu1 %v8063_v15, %s14641_s17  ;;  %v14395_v9 = vpack.c.bf16 %v10938_v11, %v10937_v10 }
 0x34a   :  { %v8737_v19 = vpop.permute.xlu0 %8736 }
 0x34b   :  { %v8767_v36 = vpop.permute.xlu1 %8766  ;;  %v9215_v51 = vsel %vm9186_vm5, %v9158_v48, %v8737_v19  ;;  %14396 = vmatprep.subr.bf16.mxu1 %v14395_v9  ;;  %v10375_v19 = vld [vmem:[#allocation3 + $0xa] sm:$0xff] }
 0x34c   :  { %8564 = vrot.lane.b32.xlu0 %v8062_v16, %s14641_s17  ;;  %v9952_v27 = vld [vmem:[#allocation2 + $0x50] ss:$2 sm:$0xff]  ;;  %v10016_v28 = vld [vmem:[#allocation2 + $0x51] ss:$2 sm:$0xff]  ;;  %v9230_v15 = vsel %vm9186_vm5, %v9173_v4, %v8767_v36  ;;  %14398 = vmatpush3.bf16.msra.mxu1 %v14395_v9  ;;  %s14648_s17 = smov 54  }
 0x34d   :  { %v10074_v32 = vmax.f32 %v9952_v27, %v10016_v28  ;;  %v10112_v38 = vld [vmem:[#allocation2 + $0x52] ss:$2 sm:$0xff]  ;;  %8790 = vrot.lane.b32.xlu1 %v8119_v24, %s14643_s26  ;;  %v10208_v44 = vld [vmem:[#allocation2 + $0x53] ss:$2 sm:$0xff] }
 0x34e   :  { %v8739_v37 = vpop.permute.xlu0 %8738 }
 0x34f   :  { %v10170_v25 = vmax.f32 %v10074_v32, %v10112_v38  ;;  %v14212_v26 = vpop.f32.mrb[12].mxu0  ;;  %v8989_v53 = vpop.permute.xlu1 %8988  ;;  %v9216_v16 = vsel %vm9186_vm5, %v9159_v5, %v8739_v37  ;;  %v10399_v37 = vld [vmem:[#allocation3 + $0xb] sm:$0xff]  ;;  %v10400_v5 = vld [vmem:[#allocation3 + $0x13] sm:$0xff] }
 0x350   :  { %8788 = vrot.lane.b32.xlu0 %v8118_v30, %s14643_s26  ;;  %v9609_v49 = vadd.f32 %v14212_v26, %v17865_v29  ;;  %v9603_v46 = vpop.f32.mrb[13].mxu0  ;;  %v9286_v58 = vsel %vm9243_vm6, %v9229_v50, %v8989_v53  ;;  %v10398_v30 = vld [vmem:[#allocation3 + $0x3] sm:$0xff]  ;;  %v10939_v38 = vld [vmem:[%s19539_s2 + $0x50] sm:$0xff] }
 0x351   :  { %v10266_v47 = vmax.f32 %v10170_v25, %v10208_v44  ;;  %v9604_v52 = vadd.f32 %v9603_v46, %v17865_v29  ;;  %9014 = vrot.lane.b32.xlu1 %v8175_v33, %s14644_s9  ;;  %14255 = vmatprep.mubr.msk.f32.mxu1 %vm9304_vm7, %v9286_v58  ;;  %v10940_v25 = vld [vmem:[%s19539_s2 + $0x58] sm:$0x3]  ;;  %s14649_s2 = smov 72  }
 0x352   :  { %v8961_v56 = vpop.permute.xlu0 %8960  ;;  %v9835_v57 = vmax.f32 %v9609_v49, 0.0  ;;  %v14399_v50 = vpack.c.bf16 %v10940_v25, %v10939_v38 }
 0x353   :  { %v9272_v59 = vsel %vm9243_vm6, %v9215_v51, %v8961_v56  ;;  %10299 = vst.msk [vmem:[#allocation3 + $0x28] sm:$0xff] %vm9186_vm5, %v10266_v47  ;;  %v9834_v62 = vmax.f32 %v9604_v52, 0.0  ;;  %v18289_v2 = vpop.permute.xlu1 %8320  ;;  %v10352_v56 = vld [vmem:[#allocation3 + $0x11] sm:$0xff] }
 0x354   :  { %9012 = vrot.lane.b32.xlu0 %v8174_v34, %s14644_s9  ;;  %9891 = vst.msk [vmem:[#allocation2 + $0x70] sm:$0xff] %vm9186_vm5, %v9835_v57  ;;  %14234 = vmatprep.mubr.msk.f32.mxu0 %vm9304_vm7, %v9272_v59  ;;  %v10422_v57 = vld [vmem:[#allocation3 + $0x4] sm:$0xff] }
 0x355   :  { %9890 = vst.msk [vmem:[#allocation2 + $0x68] sm:$0xff] %vm9186_vm5, %v9834_v62  ;;  %10472 = vrot.lane.b32.xlu1 %v10351_v7, %s14643_s26  ;;  %14401 = vmatprep.subr.msk.bf16.mxu1 %vm18332_vm10, %v14399_v50  ;;  %v7926_v7 = vld [vmem:[%s19537_s0 + $0x110] sm:$0xff] }
 0x356   :  { %v18291_v3 = vpop.permute.xlu0 %8292  ;;  %14404 = vmatpush3.bf16.msk.msra.mxu1 %vm18332_vm10, %v14399_v50 }
 0x357   :  { %v8991_v17 = vpop.permute.xlu1 %8990  ;;  %v9103_v8 = vsel %vm9072_vm3, %v7926_v7, %v18291_v3 }
 0x358   :  { %10470 = vrot.lane.b32.xlu0 %v10350_v6, %s14643_s26  ;;  %v9287_v55 = vsel %vm9243_vm6, %v9230_v15, %v8991_v17  ;;  %v7940_v6 = vld [vmem:[%s19537_s0 + $0x190] sm:$0xff]  ;;  %v7927_v15 = vld [vmem:[%s19537_s0 + $0x118] sm:$0xff] }
 0x359   :  { %14256 = vmatmul.mubr.msk.f32.gmra.mrb[10].mxu1 %vm9304_vm7, %v9287_v55  ;;  %10568 = vrot.lane.b32.xlu1 %v10375_v19, %s14647_s23  ;;  %v9117_v14 = vsel %vm9072_vm3, %v7940_v6, %v18289_v2 }
 0x35a   :  { %v8963_v54 = vpop.permute.xlu0 %8962  ;;  %v10353_v60 = vld [vmem:[#allocation3 + $0x21] sm:$0xff] }
 0x35b   :  { %v9273_v18 = vsel %vm9243_vm6, %v9216_v16, %v8963_v54  ;;  %v9956_v21 = vld [vmem:[#allocation2 + $0x70] ss:$2 sm:$0xf]  ;;  %v10020_v22 = vld [vmem:[#allocation2 + $0x71] ss:$2 sm:$0xf]  ;;  %v18317_v27 = vpop.permute.xlu1 %8322 }
 0x35c   :  { %14235 = vmatmul.mubr.msk.f32.gmra.mrb[28].mxu0 %vm9304_vm7, %v9273_v18  ;;  %v10076_v12 = vmax.f32 %v9956_v21, %v10020_v22  ;;  %v10116_v13 = vld [vmem:[#allocation2 + $0x72] ss:$2 sm:$0xf]  ;;  %10566 = vrot.lane.b32.xlu0 %v10374_v20, %s14647_s23  ;;  %v9954_v23 = vld [vmem:[#allocation2 + $0x60] ss:$2 sm:$0xff] }
 0x35d   :  { %v10018_v24 = vld [vmem:[#allocation2 + $0x61] ss:$2 sm:$0xff]  ;;  %v10212_v32 = vld [vmem:[#allocation2 + $0x73] ss:$2 sm:$0xf]  ;;  %10664 = vrot.lane.b32.xlu1 %v10399_v37, %s14648_s17 }
 0x35e   :  { %v18319_v28 = vpop.permute.xlu0 %8294  ;;  %v10172_v31 = vmax.f32 %v10076_v12, %v10116_v13  ;;  %v10075_v36 = vmax.f32 %v9954_v23, %v10018_v24  ;;  %v10114_v39 = vld [vmem:[#allocation2 + $0x62] ss:$2 sm:$0xff]  ;;  %v10210_v46 = vld [vmem:[#allocation2 + $0x63] ss:$2 sm:$0xff] }
 0x35f   :  { %v14215_v43 = vpop.f32.mrb[14].mxu0  ;;  %v8545_v34 = vpop.permute.xlu1 %8544  ;;  %v10377_v0 = vld [vmem:[#allocation3 + $0x22] sm:$0xff]  ;;  %v9104_v13 = vsel %vm9072_vm3, %v7927_v15, %v18319_v28 }
 0x360   :  { %v10268_v26 = vmax.f32 %v10172_v31, %v10212_v32  ;;  %v10171_v44 = vmax.f32 %v10075_v36, %v10114_v39  ;;  %v9619_v45 = vadd.f32 %v14215_v43, %v17865_v29  ;;  %v9613_v48 = vpop.f32.mrb[15].mxu0  ;;  %10662 = vrot.lane.b32.xlu0 %v10398_v30, %s14648_s17  ;;  %v10401_v4 = vld [vmem:[#allocation3 + $0x23] sm:$0xff]  ;;  %v9174_v16 = vsel %vm9129_vm4, %v9117_v14, %v8545_v34  ;;  %v10424_v30 = vld [vmem:[#allocation3 + $0x14] sm:$0xff] }
 0x361   :  { %v9614_v33 = vadd.f32 %v9613_v48, %v17865_v29  ;;  %10474 = vrot.lane.b32.xlu1 %v10352_v56, %s14643_s26  ;;  %v10425_v43 = vld [vmem:[#allocation3 + $0x24] sm:$0xff] }
 0x362   :  { %v8517_v47 = vpop.permute.xlu0 %8516  ;;  %v10267_v51 = vmax.f32 %v10171_v44, %v10210_v46  ;;  %v9837_v52 = vmax.f32 %v9619_v45, 0.0  ;;  %10301 = vst.msk [vmem:[#allocation3 + $0x38] sm:$0xf] %vm10296_vm8, %v10268_v26 }
 0x363   :  { %v9836_v53 = vmax.f32 %v9614_v33, 0.0  ;;  %v8547_v58 = vpop.permute.xlu1 %8546  ;;  %v9160_v17 = vsel %vm9129_vm4, %v9103_v8, %v8517_v47 }
 0x364   :  { %10300 = vst.msk [vmem:[#allocation3 + $0x30] sm:$0xff] %vm9186_vm5, %v10267_v51  ;;  %9893 = vst.msk [vmem:[#allocation2 + $0x88] sm:$0xff] %vm9186_vm5, %v9837_v52  ;;  %10758 = vrot.lane.b32.xlu0 %v10422_v57, %s14649_s2 }
 0x365   :  { %9892 = vst.msk [vmem:[#allocation2 + $0x80] sm:$0xff] %vm9186_vm5, %v9836_v53  ;;  %10476 = vrot.lane.b32.xlu1 %v10353_v60, %s14643_s26 }
 0x366   :  { %v8519_v59 = vpop.permute.xlu0 %8518 }
 0x367   :  { %v8769_v62 = vpop.permute.xlu1 %8768  ;;  %v9161_v31 = vsel %vm9129_vm4, %v9104_v13, %v8519_v59  ;;  %v7942_v59 = vld [vmem:[%s19537_s0 + $0x1a0] sm:$0xff] }
 0x368   :  { %10760 = vrot.lane.b32.xlu0 %v10423_v61, %s14649_s2  ;;  %v9231_v2 = vsel %vm9186_vm5, %v9174_v16, %v8769_v62 }
 0x369   :  { %10572 = vrot.lane.b32.xlu1 %v10377_v0, %s14647_s23  ;;  %v7943_v0 = vld [vmem:[%s19537_s0 + $0x1a8] sm:$0xff] }
 0x36a   :  { %v8741_v63 = vpop.permute.xlu0 %8740 }
 0x36b   :  { %v8771_v10 = vpop.permute.xlu1 %8770  ;;  %v9217_v3 = vsel %vm9186_vm5, %v9160_v17, %v8741_v63  ;;  %v10354_v24 = vld [vmem:[#allocation3 + $0x29] sm:$0xff]  ;;  %v10355_v39 = vld [vmem:[#allocation3 + $0x31] sm:$0xff] }
 0x36c   :  { %10570 = vrot.lane.b32.xlu0 %v10376_v1, %s14647_s23  ;;  %v14218_v9 = vpop.f32.mrb[16].mxu0  ;;  %v9958_v25 = vld [vmem:[#allocation2 + $0x80] ss:$2 sm:$0xff]  ;;  %v10022_v26 = vld [vmem:[#allocation2 + $0x81] ss:$2 sm:$0xff]  ;;  %v10403_v57 = vld [vmem:[#allocation3 + $0x33] sm:$0xff] }
 0x36d   :  { %v9629_v54 = vadd.f32 %v14218_v9, %v17865_v29  ;;  %v9623_v55 = vpop.f32.mrb[17].mxu0  ;;  %10668 = vrot.lane.b32.xlu1 %v10401_v4, %s14648_s17  ;;  %v10077_v33 = vmax.f32 %v9958_v25, %v10022_v26  ;;  %v10378_v34 = vld [vmem:[#allocation3 + $0x2a] sm:$0xff]  ;;  %v10427_v8 = vld [vmem:[#allocation3 + $0x34] sm:$0xff] }
 0x36e   :  { %v8743_v11 = vpop.permute.xlu0 %8742  ;;  %v9624_v18 = vadd.f32 %v9623_v55, %v17865_v29  ;;  %v7941_v29 = vld [vmem:[%s19537_s0 + $0x198] sm:$0xff]  ;;  %v10426_v63 = vld [vmem:[#allocation3 + $0x2c] sm:$0xff] }
 0x36f   :  { %v8993_v19 = vpop.permute.xlu1 %8992  ;;  %v9839_v21 = vmax.f32 %v9629_v54, 0.0  ;;  %v9218_v28 = vsel %vm9186_vm5, %v9161_v31, %v8743_v11  ;;  %v9118_v38 = vsel %vm9072_vm3, %v7941_v29, %v18317_v27  ;;  %v10379_v27 = vld [vmem:[#allocation3 + $0x32] sm:$0xff] }
 0x370   :  { %10666 = vrot.lane.b32.xlu0 %v10400_v5, %s14648_s17  ;;  %v9288_v22 = vsel %vm9243_vm6, %v9231_v2, %v8993_v19  ;;  %v9838_v23 = vmax.f32 %v9624_v18, 0.0  ;;  %v9175_v44 = vsel %vm9129_vm4, %v9118_v38, %v8547_v58  ;;  %v10402_v58 = vld [vmem:[#allocation3 + $0x2b] sm:$0xff]  ;;  %v18426_v18 = vld [vmem:[%s19541_s4] ss:$0 sm:$0xff] }
 0x371   :  { %14258 = vmatprep.mubr.msk.f32.mxu1 %vm9304_vm7, %v9288_v22  ;;  %9895 = vst.msk [vmem:[#allocation2 + $0x98] sm:$0xff] %vm9186_vm5, %v9839_v21  ;;  %10478 = vrot.lane.b32.xlu1 %v10354_v24, %s14643_s26  ;;  %v9232_v45 = vsel %vm9186_vm5, %v9175_v44, %v8771_v10 }
 0x372   :  { %v8965_v20 = vpop.permute.xlu0 %8964  ;;  %9894 = vst.msk [vmem:[#allocation2 + $0x90] sm:$0xff] %vm9186_vm5, %v9838_v23 }
 0x373   :  { %v9274_v12 = vsel %vm9243_vm6, %v9217_v3, %v8965_v20  ;;  %v8967_v32 = vpop.permute.xlu1 %8966  ;;  %v7944_v3 = vld [vmem:[%s19537_s0 + $0x1b0] sm:$0xff] }
 0x374   :  { %14237 = vmatprep.mubr.msk.f32.mxu0 %vm9304_vm7, %v9274_v12  ;;  %10762 = vrot.lane.b32.xlu0 %v10424_v30, %s14649_s2  ;;  %v9275_v37 = vsel %vm9243_vm6, %v9218_v28, %v8967_v32 }
 0x375   :  { %14238 = vmatmul.mubr.msk.f32.gmra.mrb[30].mxu0 %vm9304_vm7, %v9275_v37  ;;  %10480 = vrot.lane.b32.xlu1 %v10355_v39, %s14643_s26 }
 0x376   :  { %v8325_v36 = vpop.permute.xlu0 %8324 }
 0x377   :  { %v8327_v48 = vpop.permute.xlu1 %8326  ;;  %v9119_v62 = vsel %vm9072_vm3, %v7942_v59, %v8325_v36  ;;  %v7945_v36 = vld [vmem:[%s19537_s0 + $0x1c0] sm:$0xff] }
 0x378   :  { %10764 = vrot.lane.b32.xlu0 %v10425_v43, %s14649_s2  ;;  %v9120_v14 = vsel %vm9072_vm3, %v7943_v0, %v8327_v48 }
 0x379   :  { %v10118_v47 = vld [vmem:[#allocation2 + $0x82] ss:$2 sm:$0xff]  ;;  %10576 = vrot.lane.b32.xlu1 %v10379_v27, %s14647_s23  ;;  %v10214_v53 = vld [vmem:[#allocation2 + $0x83] ss:$2 sm:$0xff] }
 0x37a   :  { %v8995_v49 = vpop.permute.xlu0 %8994  ;;  %v10173_v50 = vmax.f32 %v10077_v33, %v10118_v47  ;;  %v9960_v44 = vld [vmem:[#allocation2 + $0x90] ss:$2 sm:$0xff] }
 0x37b   :  { %v9289_v46 = vsel %vm9243_vm6, %v9232_v45, %v8995_v49  ;;  %v8551_v51 = vpop.permute.xlu1 %8550  ;;  %v10024_v45 = vld [vmem:[#allocation2 + $0x91] ss:$2 sm:$0xff] }
 0x37c   :  { %14259 = vmatmul.mubr.msk.f32.gmra.mrb[12].mxu1 %vm9304_vm7, %v9289_v46  ;;  %10574 = vrot.lane.b32.xlu0 %v10378_v34, %s14647_s23  ;;  %v10269_v56 = vmax.f32 %v10173_v50, %v10214_v53  ;;  %v9177_v9 = vsel %vm9129_vm4, %v9120_v14, %v8551_v51  ;;  %v10078_v34 = vmax.f32 %v9960_v44, %v10024_v45 }
 0x37d   :  { %10672 = vrot.lane.b32.xlu1 %v10403_v57, %s14648_s17  ;;  %v7946_v57 = vld [vmem:[%s19537_s0 + $0x1c8] sm:$0xff] }
 0x37e   :  { %v8549_v52 = vpop.permute.xlu0 %8548  ;;  %10302 = vst.msk [vmem:[#allocation3 + $0x40] sm:$0xff] %vm9186_vm5, %v10269_v56 }
 0x37f   :  { %v8775_v60 = vpop.permute.xlu1 %8774  ;;  %v9176_v1 = vsel %vm9129_vm4, %v9119_v62, %v8549_v52 }
 0x380   :  { %10670 = vrot.lane.b32.xlu0 %v10402_v58, %s14648_s17  ;;  %v9234_v4 = vsel %vm9186_vm5, %v9177_v9, %v8775_v60 }
 0x382   :  { %v8773_v61 = vpop.permute.xlu0 %8772 }
 0x383   :  { %v9233_v6 = vsel %vm9186_vm5, %v9176_v1, %v8773_v61  ;;  %v8329_v7 = vpop.permute.xlu1 %8328  ;;  %v7947_v61 = vld [vmem:[%s19537_s0 + $0x1d0] sm:$0xff] }
 0x384   :  { %10766 = vrot.lane.b32.xlu0 %v10426_v63, %s14649_s2  ;;  %v9121_v31 = vsel %vm9072_vm3, %v7944_v3, %v8329_v7 }
 0x386   :  { %v8997_v10 = vpop.permute.xlu0 %8996 }
 0x387   :  { %v9290_v11 = vsel %vm9243_vm6, %v9233_v6, %v8997_v10  ;;  %v8331_v5 = vpop.permute.xlu1 %8330 }
 0x388   :  { %14261 = vmatprep.mubr.msk.f32.mxu1 %vm9304_vm7, %v9290_v11  ;;  %10768 = vrot.lane.b32.xlu0 %v10427_v8, %s14649_s2  ;;  %v9122_v26 = vsel %vm9072_vm3, %v7945_v36, %v8331_v5  ;;  %v7949_v36 = vld [vmem:[%s19537_s0 + $0x1e0] sm:$0xff] }
 0x38a   :  { %v8999_v15 = vpop.permute.xlu0 %8998 }
 0x38b   :  { %v9291_v16 = vsel %vm9243_vm6, %v9234_v4, %v8999_v15  ;;  %v8555_v17 = vpop.permute.xlu1 %8554 }
 0x38c   :  { %14262 = vmatmul.mubr.msk.f32.gmra.mrb[14].mxu1 %vm9304_vm7, %v9291_v16  ;;  %v14242_v2 = vpop.f32.mrb[0].mxu1  ;;  %v9179_v48 = vsel %vm9129_vm4, %v9122_v26, %v8555_v17 }
 0x38d   :  { %v9709_v20 = vadd.f32 %v18426_v18, %v14242_v2  ;;  %v9703_v22 = vpop.f32.mrb[1].mxu1  ;;  %v7948_v2 = vld [vmem:[%s19537_s0 + $0x1d8] sm:$0xff] }
 0x38e   :  { %v8553_v54 = vpop.permute.xlu0 %8552  ;;  %v9704_v13 = vadd.f32 %v18426_v18, %v9703_v22 }
 0x38f   :  { %v14221_v55 = vpop.f32.mrb[18].mxu0  ;;  %v8779_v23 = vpop.permute.xlu1 %8778  ;;  %v9855_v29 = vmax.f32 %v9709_v20, 0.0  ;;  %v9178_v37 = vsel %vm9129_vm4, %v9121_v31, %v8553_v54 }
 0x390   :  { %v9639_v19 = vadd.f32 %v18426_v18, %v14221_v55  ;;  %v9633_v21 = vpop.f32.mrb[19].mxu0  ;;  %v9854_v32 = vmax.f32 %v9704_v13, 0.0  ;;  %v9236_v49 = vsel %vm9186_vm5, %v9179_v48, %v8779_v23 }
 0x391   :  { %v9634_v12 = vadd.f32 %v18426_v18, %v9633_v21  ;;  %9911 = vst.msk [vmem:[#allocation2 + $0x128] sm:$0xff] %vm9186_vm5, %v9855_v29 }
 0x392   :  { %v8777_v24 = vpop.permute.xlu0 %8776  ;;  %v9841_v30 = vmax.f32 %v9639_v19, 0.0  ;;  %9910 = vst.msk [vmem:[#allocation2 + $0x120] sm:$0xff] %vm9186_vm5, %v9854_v32 }
 0x393   :  { %v9840_v28 = vmax.f32 %v9634_v12, 0.0  ;;  %v9235_v38 = vsel %vm9186_vm5, %v9178_v37, %v8777_v24  ;;  %v8333_v39 = vpop.permute.xlu1 %8332 }
 0x394   :  { %9897 = vst.msk [vmem:[#allocation2 + $0xa8] sm:$0xff] %vm9186_vm5, %v9841_v30  ;;  %v9123_v60 = vsel %vm9072_vm3, %v7946_v57, %v8333_v39 }
 0x395   :  { %9896 = vst.msk [vmem:[#allocation2 + $0xa0] sm:$0xff] %vm9186_vm5, %v9840_v28 }
 0x396   :  { %v9001_v43 = vpop.permute.xlu0 %9000 }
 0x397   :  { %v9292_v25 = vsel %vm9243_vm6, %v9235_v38, %v9001_v43  ;;  %v8335_v46 = vpop.permute.xlu1 %8334 }
 0x398   :  { %14264 = vmatprep.mubr.msk.f32.mxu1 %vm9304_vm7, %v9292_v25  ;;  %v9124_v7 = vsel %vm9072_vm3, %v7947_v61, %v8335_v46 }
 0x39a   :  { %v9003_v33 = vpop.permute.xlu0 %9002 }
 0x39b   :  { %v9293_v27 = vsel %vm9243_vm6, %v9236_v49, %v9003_v33  ;;  %v8559_v51 = vpop.permute.xlu1 %8558 }
 0x39c   :  { %14265 = vmatmul.mubr.msk.f32.gmra.mrb[16].mxu1 %vm9304_vm7, %v9293_v27  ;;  %v10120_v47 = vld [vmem:[#allocation2 + $0x92] ss:$2 sm:$0xff]  ;;  %v10216_v53 = vld [vmem:[#allocation2 + $0x93] ss:$2 sm:$0xff]  ;;  %v9181_v10 = vsel %vm9129_vm4, %v9124_v7, %v8559_v51 }
 0x39d   :  { %v10174_v50 = vmax.f32 %v10078_v34, %v10120_v47  ;;  %v9962_v45 = vld [vmem:[#allocation2 + $0xa0] ss:$2 sm:$0xff]  ;;  %v10026_v48 = vld [vmem:[#allocation2 + $0xa1] ss:$2 sm:$0xff] }
 0x39e   :  { %v8557_v52 = vpop.permute.xlu0 %8556  ;;  %v9978_v34 = vld [vmem:[#allocation2 + $0x120] ss:$2 sm:$0xff]  ;;  %v10042_v47 = vld [vmem:[#allocation2 + $0x121] ss:$2 sm:$0xff] }
 0x39f   :  { %v10270_v56 = vmax.f32 %v10174_v50, %v10216_v53  ;;  %v8783_v58 = vpop.permute.xlu1 %8782  ;;  %v9180_v62 = vsel %vm9129_vm4, %v9123_v60, %v8557_v52  ;;  %v10079_v50 = vmax.f32 %v9962_v45, %v10026_v48 }
 0x3a0   :  { %v9238_v8 = vsel %vm9186_vm5, %v9181_v10, %v8783_v58 }
 0x3a1   :  { %10303 = vst.msk [vmem:[#allocation3 + $0x48] sm:$0xff] %vm9186_vm5, %v10270_v56 }
 0x3a2   :  { %v8781_v59 = vpop.permute.xlu0 %8780 }
 0x3a3   :  { %v9237_v63 = vsel %vm9186_vm5, %v9180_v62, %v8781_v59  ;;  %v8337_v0 = vpop.permute.xlu1 %8336  ;;  %v7950_v62 = vld [vmem:[%s19537_s0 + $0x1e8] sm:$0xff] }
 0x3a4   :  { %v9125_v31 = vsel %vm9072_vm3, %v7948_v2, %v8337_v0 }
 0x3a6   :  { %v9005_v1 = vpop.permute.xlu0 %9004 }
 0x3a7   :  { %v9294_v6 = vsel %vm9243_vm6, %v9237_v63, %v9005_v1  ;;  %v8339_v9 = vpop.permute.xlu1 %8338  ;;  %v10087_v63 = vmax.f32 %v9978_v34, %v10042_v47 }
 0x3a8   :  { %14267 = vmatprep.mubr.msk.f32.mxu1 %vm9304_vm7, %v9294_v6  ;;  %v10356_v11 = vld [vmem:[#allocation3 + $0x41] sm:$0xff]  ;;  %v9126_v26 = vsel %vm9072_vm3, %v7949_v36, %v8339_v9 }
 0x3a9   :  { %v10380_v14 = vld [vmem:[#allocation3 + $0x42] sm:$0xff]  ;;  %10482 = vrot.lane.b32.xlu1 %v10356_v11, %s14643_s26 }
 0x3aa   :  { %10578 = vrot.lane.b32.xlu0 %v10380_v14, %s14647_s23  ;;  %v9007_v4 = vpop.permute.xlu0 %9006  ;;  %v10404_v15 = vld [vmem:[#allocation3 + $0x43] sm:$0xff] }
 0x3ab   :  { %v9295_v5 = vsel %vm9243_vm6, %v9238_v8, %v9007_v4  ;;  %v8563_v16 = vpop.permute.xlu1 %8562  ;;  %v10428_v22 = vld [vmem:[#allocation3 + $0x44] sm:$0xff]  ;;  %v7951_v8 = vld [vmem:[%s19537_s0 + $0x1f0] sm:$0xff] }
 0x3ac   :  { %14268 = vmatmul.mubr.msk.f32.gmra.mrb[18].mxu1 %vm9304_vm7, %v9295_v5  ;;  %v14245_v55 = vpop.f32.mrb[2].mxu1  ;;  %v9183_v44 = vsel %vm9129_vm4, %v9126_v26, %v8563_v16 }
 0x3ad   :  { %v9719_v19 = vadd.f32 %v18426_v18, %v14245_v55  ;;  %v9713_v21 = vpop.f32.mrb[3].mxu1 }
 0x3ae   :  { %10674 = vrot.lane.b32.xlu0 %v10404_v15, %s14648_s17  ;;  %v8561_v17 = vpop.permute.xlu0 %8560  ;;  %v9714_v13 = vadd.f32 %v18426_v18, %v9713_v21 }
 0x3af   :  { %v14224_v54 = vpop.f32.mrb[20].mxu0  ;;  %v8787_v23 = vpop.permute.xlu1 %8786  ;;  %v9857_v29 = vmax.f32 %v9719_v19, 0.0  ;;  %v9182_v37 = vsel %vm9129_vm4, %v9125_v31, %v8561_v17 }
 0x3b0   :  { %v9649_v3 = vadd.f32 %v18426_v18, %v14224_v54  ;;  %v9643_v20 = vpop.f32.mrb[21].mxu0  ;;  %v9856_v32 = vmax.f32 %v9714_v13, 0.0  ;;  %v9240_v49 = vsel %vm9186_vm5, %v9183_v44, %v8787_v23 }
 0x3b1   :  { %v9644_v12 = vadd.f32 %v18426_v18, %v9643_v20  ;;  %9913 = vst.msk [vmem:[#allocation2 + $0x140] sm:$0xff] %vm9186_vm5, %v9857_v29 }
 0x3b2   :  { %10770 = vrot.lane.b32.xlu0 %v10428_v22, %s14649_s2  ;;  %v8785_v24 = vpop.permute.xlu0 %8784  ;;  %v9843_v30 = vmax.f32 %v9649_v3, 0.0  ;;  %9912 = vst.msk [vmem:[#allocation2 + $0x130] sm:$0xff] %vm9186_vm5, %v9856_v32 }
 0x3b3   :  { %v9842_v28 = vmax.f32 %v9644_v12, 0.0  ;;  %v9239_v38 = vsel %vm9186_vm5, %v9182_v37, %v8785_v24  ;;  %v8341_v39 = vpop.permute.xlu1 %8340 }
 0x3b4   :  { %9899 = vst.msk [vmem:[#allocation2 + $0xc0] sm:$0xff] %vm9186_vm5, %v9843_v30  ;;  %v9127_v3 = vsel %vm9072_vm3, %v7950_v62, %v8341_v39 }
 0x3b5   :  { %9898 = vst.msk [vmem:[#allocation2 + $0xb0] sm:$0xff] %vm9186_vm5, %v9842_v28 }
 0x3b6   :  { %v9009_v43 = vpop.permute.xlu0 %9008 }
 0x3b7   :  { %v9296_v25 = vsel %vm9243_vm6, %v9239_v38, %v9009_v43  ;;  %v8343_v46 = vpop.permute.xlu1 %8342 }
 0x3b8   :  { %14270 = vmatprep.mubr.msk.f32.mxu1 %vm9304_vm7, %v9296_v25  ;;  %v9128_v19 = vsel %vm9072_vm3, %v7951_v8, %v8343_v46 }
 0x3b9   :  { %v9980_v1 = vld [vmem:[#allocation2 + $0x130] ss:$2 sm:$0xf]  ;;  %v10044_v6 = vld [vmem:[#allocation2 + $0x131] ss:$2 sm:$0xf] }
 0x3ba   :  { %v9011_v33 = vpop.permute.xlu0 %9010  ;;  %v10088_v11 = vmax.f32 %v9980_v1, %v10044_v6  ;;  %v10138_v14 = vld [vmem:[#allocation2 + $0x122] ss:$2 sm:$0xff]  ;;  %v10140_v4 = vld [vmem:[#allocation2 + $0x132] ss:$2 sm:$0xf] }
 0x3bb   :  { %v9297_v27 = vsel %vm9243_vm6, %v9240_v49, %v9011_v33  ;;  %v8567_v57 = vpop.permute.xlu1 %8566  ;;  %v10183_v5 = vmax.f32 %v10087_v63, %v10138_v14  ;;  %v10234_v54 = vld [vmem:[#allocation2 + $0x123] ss:$2 sm:$0xff]  ;;  %v10236_v55 = vld [vmem:[#allocation2 + $0x133] ss:$2 sm:$0xf] }
 0x3bc   :  { %14271 = vmatmul.mubr.msk.f32.gmra.mrb[20].mxu1 %vm9304_vm7, %v9297_v27  ;;  %v9964_v51 = vld [vmem:[#allocation2 + $0xb0] ss:$2 sm:$0xf]  ;;  %v10028_v52 = vld [vmem:[#allocation2 + $0xb1] ss:$2 sm:$0xf]  ;;  %v10184_v17 = vmax.f32 %v10088_v11, %v10140_v4  ;;  %v9185_v21 = vsel %vm9129_vm4, %v9128_v19, %v8567_v57 }
 0x3bd   :  { %v10080_v53 = vmax.f32 %v9964_v51, %v10028_v52  ;;  %v10122_v56 = vld [vmem:[#allocation2 + $0xa2] ss:$2 sm:$0xff]  ;;  %v10124_v59 = vld [vmem:[#allocation2 + $0xb2] ss:$2 sm:$0xf]  ;;  %v10279_v2 = vmax.f32 %v10183_v5, %v10234_v54 }
 0x3be   :  { %v8565_v58 = vpop.permute.xlu0 %8564  ;;  %v10175_v60 = vmax.f32 %v10079_v50, %v10122_v56  ;;  %v10218_v61 = vld [vmem:[#allocation2 + $0xa3] ss:$2 sm:$0xff]  ;;  %v10220_v7 = vld [vmem:[#allocation2 + $0xb3] ss:$2 sm:$0xf]  ;;  %v10280_v20 = vmax.f32 %v10184_v17, %v10236_v55 }
 0x3bf   :  { %v10176_v0 = vmax.f32 %v10080_v53, %v10124_v59  ;;  %v8791_v15 = vpop.permute.xlu1 %8790  ;;  %v9184_v22 = vsel %vm9129_vm4, %v9127_v3, %v8565_v58  ;;  %10312 = vst.msk [vmem:[#allocation3 + $0x90] sm:$0xff] %vm9186_vm5, %v10279_v2  ;;  %v10326_v53 = vld [vmem:[#allocation3] sm:$0xff]  ;;  %v10327_v1 = vld [vmem:[#allocation3 + $0x8] sm:$0xff] }
 0x3c0   :  { %v10271_v10 = vmax.f32 %v10175_v60, %v10218_v61  ;;  %v9242_v12 = vsel %vm9186_vm5, %v9185_v21, %v8791_v15  ;;  %10313 = vst.msk [vmem:[#allocation3 + $0x98] sm:$0xf] %vm10296_vm8, %v10280_v20 }
 0x3c1   :  { %v10272_v9 = vmax.f32 %v10176_v0, %v10220_v7 }
 0x3c2   :  { %v8789_v16 = vpop.permute.xlu0 %8788  ;;  %10304 = vst.msk [vmem:[#allocation3 + $0x50] sm:$0xff] %vm9186_vm5, %v10271_v10 }
 0x3c3   :  { %10305 = vst.msk [vmem:[#allocation3 + $0x58] sm:$0xf] %vm10296_vm8, %v10272_v9  ;;  %v9241_v13 = vsel %vm9186_vm5, %v9184_v22, %v8789_v16  ;;  %v9015_v23 = vpop.permute.xlu1 %9014 }
 0x3c4   :  { %v9299_v30 = vsel %vm9243_vm6, %v9242_v12, %v9015_v23 }
 0x3c6   :  { %v9013_v24 = vpop.permute.xlu0 %9012 }
 0x3c7   :  { %v9298_v29 = vsel %vm9243_vm6, %v9241_v13, %v9013_v24  ;;  %v10473_v32 = vpop.permute.xlu1 %10472 }
 0x3c8   :  { %14273 = vmatprep.mubr.msk.f32.mxu1 %vm9304_vm7, %v9298_v29  ;;  %v10831_v7 = vsel %vm9186_vm5, %v10327_v1, %v10473_v32  ;;  %v10328_v29 = vld [vmem:[#allocation3 + $0x10] sm:$0xff] }
 0x3c9   :  { %14274 = vmatmul.mubr.msk.f32.gmra.mrb[22].mxu1 %vm9304_vm7, %v9299_v30  ;;  %v10357_v31 = vld [vmem:[#allocation3 + $0x49] sm:$0xff]  ;;  %vm11859_vm7 = vcmask 556032  }
 0x3ca   :  { %v10429_v28 = vld [vmem:[#allocation3 + $0x4c] sm:$0xff]  ;;  %v10471_v36 = vpop.permute.xlu0 %10470  ;;  %10484 = vrot.lane.b32.xlu1 %v10357_v31, %s14643_s26  ;;  %v10430_v61 = vld [vmem:[#allocation3 + $0x54] sm:$0xff] }
 0x3cb   :  { %10772 = vrot.lane.b32.xlu0 %v10429_v28, %s14649_s2  ;;  %v10381_v37 = vld [vmem:[#allocation3 + $0x4a] sm:$0xff]  ;;  %v10382_v38 = vld [vmem:[#allocation3 + $0x52] sm:$0xff]  ;;  %v10569_v39 = vpop.permute.xlu1 %10568  ;;  %v10830_v58 = vsel %vm9186_vm5, %v10326_v53, %v10471_v36 }
 0x3cc   :  { %v14248_v26 = vpop.f32.mrb[4].mxu1  ;;  %v10405_v27 = vld [vmem:[#allocation3 + $0x4b] sm:$0xff]  ;;  %v10406_v34 = vld [vmem:[#allocation3 + $0x53] sm:$0xff]  ;;  %v10856_v10 = vsel %vm10854_vm11, %v10831_v7, %v10569_v39 }
 0x3cd   :  { %v9729_v45 = vadd.f32 %v18426_v18, %v14248_v26  ;;  %v9723_v49 = vpop.f32.mrb[5].mxu1  ;;  %v10358_v60 = vld [vmem:[#allocation3 + $0x51] sm:$0xff] }
 0x3ce   :  { %10580 = vrot.lane.b32.xlu1 %v10381_v37, %s14647_s23  ;;  %v10567_v43 = vpop.permute.xlu0 %10566  ;;  %v9724_v33 = vadd.f32 %v18426_v18, %v9723_v49 }
 0x3cf   :  { %10582 = vrot.lane.b32.xlu0 %v10382_v38, %s14647_s23  ;;  %v14227_v25 = vpop.f32.mrb[22].mxu0  ;;  %v9859_v50 = vmax.f32 %v9729_v45, 0.0  ;;  %v10665_v51 = vpop.permute.xlu1 %10664  ;;  %v10855_v59 = vsel %vm10854_vm11, %v10830_v58, %v10567_v43  ;;  %v10329_v38 = vld [vmem:[#allocation3 + $0x20] sm:$0xff] }
 0x3d0   :  { %v9659_v44 = vadd.f32 %v18426_v18, %v14227_v25  ;;  %v9653_v48 = vpop.f32.mrb[23].mxu0  ;;  %v9858_v57 = vmax.f32 %v9724_v33, 0.0  ;;  %v10881_v11 = vsel %vm10879_vm12, %v10856_v10, %v10665_v51 }
 0x3d1   :  { %v9654_v46 = vadd.f32 %v18426_v18, %v9653_v48  ;;  %9915 = vst.msk [vmem:[#allocation2 + $0x150] sm:$0xff] %vm9186_vm5, %v9859_v50 }
 0x3d2   :  { %v9845_v47 = vmax.f32 %v9659_v44, 0.0  ;;  %10676 = vrot.lane.b32.xlu1 %v10405_v27, %s14648_s17  ;;  %v10663_v52 = vpop.permute.xlu0 %10662  ;;  %9914 = vst.msk [vmem:[#allocation2 + $0x148] sm:$0xff] %vm9186_vm5, %v9858_v57 }
 0x3d3   :  { %10678 = vrot.lane.b32.xlu0 %v10406_v34, %s14648_s17  ;;  %v9844_v56 = vmax.f32 %v9654_v46, 0.0  ;;  %v10880_v62 = vsel %vm10879_vm12, %v10855_v59, %v10663_v52  ;;  %v10475_v63 = vpop.permute.xlu1 %10474  ;;  %v10330_v59 = vld [vmem:[#allocation3 + $0x28] sm:$0xff] }
 0x3d4   :  { %9901 = vst.msk [vmem:[#allocation2 + $0xd0] sm:$0xff] %vm9186_vm5, %v9845_v47  ;;  %v10832_v31 = vsel %vm9186_vm5, %v10328_v29, %v10475_v63 }
 0x3d5   :  { %9900 = vst.msk [vmem:[#allocation2 + $0xc8] sm:$0xff] %vm9186_vm5, %v9844_v56 }
 0x3d6   :  { %10486 = vrot.lane.b32.xlu1 %v10358_v60, %s14643_s26  ;;  %v10759_v0 = vpop.permute.xlu0 %10758 }
 0x3d7   :  { %10774 = vrot.lane.b32.xlu0 %v10430_v61, %s14649_s2  ;;  %v10905_v6 = vsel %vm10904_vm13, %v10880_v62, %v10759_v0  ;;  %v10477_v14 = vpop.permute.xlu1 %10476 }
 0x3d8   :  { %14300 = vmatprep.mubr.msk.f32.mxu1 %vm10941_vm14, %v10905_v6  ;;  %v10833_v43 = vsel %vm9186_vm5, %v10329_v38, %v10477_v14  ;;  %v10331_v6 = vld [vmem:[#allocation3 + $0x30] sm:$0xff] }
 0x3d9   :  { %v9982_v16 = vld [vmem:[#allocation2 + $0x140] ss:$2 sm:$0xff]  ;;  %v10046_v17 = vld [vmem:[#allocation2 + $0x141] ss:$2 sm:$0xff] }
 0x3da   :  { %v10761_v8 = vpop.permute.xlu0 %10760  ;;  %v10089_v55 = vmax.f32 %v9982_v16, %v10046_v17  ;;  %v10142_v20 = vld [vmem:[#allocation2 + $0x142] ss:$2 sm:$0xff]  ;;  %v10238_v13 = vld [vmem:[#allocation2 + $0x143] ss:$2 sm:$0xff] }
 0x3db   :  { %v10906_v9 = vsel %vm10904_vm13, %v10881_v11, %v10761_v8  ;;  %v10573_v2 = vpop.permute.xlu1 %10572 }
 0x3dc   :  { %v9966_v4 = vld [vmem:[#allocation2 + $0xc0] ss:$2 sm:$0xff]  ;;  %v10030_v5 = vld [vmem:[#allocation2 + $0xc1] ss:$2 sm:$0xff]  ;;  %14301 = vmatmul.mubr.msk.f32.vlgmr.msra.gmra.mrb[24].mxu1 %vm10941_vm14, %v10906_v9  ;;  %v10185_v22 = vmax.f32 %v10089_v55, %v10142_v20  ;;  %v10858_v25 = vsel %vm10854_vm11, %v10833_v43, %v10573_v2 }
 0x3dd   :  { %v10081_v15 = vmax.f32 %v9966_v4, %v10030_v5  ;;  %v10126_v54 = vld [vmem:[#allocation2 + $0xc2] ss:$2 sm:$0xff]  ;;  %v10222_v21 = vld [vmem:[#allocation2 + $0xc3] ss:$2 sm:$0xff] }
 0x3de   :  { %v10571_v3 = vpop.permute.xlu0 %10570  ;;  %v10281_v23 = vmax.f32 %v10185_v22, %v10238_v13 }
 0x3df   :  { %v10177_v19 = vmax.f32 %v10081_v15, %v10126_v54  ;;  %v10669_v24 = vpop.permute.xlu1 %10668  ;;  %v10857_v28 = vsel %vm10854_vm11, %v10832_v31, %v10571_v3 }
 0x3e0   :  { %10314 = vst.msk [vmem:[#allocation3 + $0xa0] sm:$0xff] %vm9186_vm5, %v10281_v23  ;;  %v10883_v26 = vsel %vm10879_vm12, %v10858_v25, %v10669_v24 }
 0x3e1   :  { %v10273_v12 = vmax.f32 %v10177_v19, %v10222_v21 }
 0x3e2   :  { %v10667_v30 = vpop.permute.xlu0 %10666 }
 0x3e3   :  { %10306 = vst.msk [vmem:[#allocation3 + $0x60] sm:$0xff] %vm9186_vm5, %v10273_v12  ;;  %v10882_v32 = vsel %vm10879_vm12, %v10857_v28, %v10667_v30  ;;  %v10479_v36 = vpop.permute.xlu1 %10478 }
 0x3e4   :  { %v10834_v62 = vsel %vm9186_vm5, %v10330_v59, %v10479_v36 }
 0x3e6   :  { %v10763_v37 = vpop.permute.xlu0 %10762 }
 0x3e7   :  { %v10907_v39 = vsel %vm10904_vm13, %v10882_v32, %v10763_v37  ;;  %v10481_v45 = vpop.permute.xlu1 %10480 }
 0x3e8   :  { %14303 = vmatprep.mubr.msk.f32.mxu1 %vm10941_vm14, %v10907_v39  ;;  %v10835_v11 = vsel %vm9186_vm5, %v10331_v6, %v10481_v45 }
 0x3ea   :  { %v10765_v44 = vpop.permute.xlu0 %10764 }
 0x3eb   :  { %v10908_v48 = vsel %vm10904_vm13, %v10883_v26, %v10765_v44  ;;  %v10577_v51 = vpop.permute.xlu1 %10576 }
 0x3ec   :  { %14304 = vmatmul.mubr.msk.f32.gmra.mrb[26].mxu1 %vm10941_vm14, %v10908_v48  ;;  %v14251_v33 = vpop.f32.mrb[6].mxu1  ;;  %v10860_v14 = vsel %vm10854_vm11, %v10835_v11, %v10577_v51 }
 0x3ed   :  { %v9739_v34 = vadd.f32 %v18426_v18, %v14251_v33  ;;  %v9733_v50 = vpop.f32.mrb[7].mxu1 }
 0x3ee   :  { %v10575_v49 = vpop.permute.xlu0 %10574  ;;  %v9734_v53 = vadd.f32 %v18426_v18, %v9733_v50 }
 0x3ef   :  { %v14230_v46 = vpop.f32.mrb[24].mxu0  ;;  %v9861_v57 = vmax.f32 %v9739_v34, 0.0  ;;  %v10859_v63 = vsel %vm10854_vm11, %v10834_v62, %v10575_v49  ;;  %v10673_v7 = vpop.permute.xlu1 %10672  ;;  %v10332_v34 = vld [vmem:[#allocation3 + $0x40] sm:$0xff] }
 0x3f0   :  { %v9669_v27 = vadd.f32 %v18426_v18, %v14230_v46  ;;  %v9663_v47 = vpop.f32.mrb[25].mxu0  ;;  %v9860_v61 = vmax.f32 %v9734_v53, 0.0  ;;  %v10885_v8 = vsel %vm10879_vm12, %v10860_v14, %v10673_v7 }
 0x3f1   :  { %v9664_v52 = vadd.f32 %v18426_v18, %v9663_v47  ;;  %9917 = vst.msk [vmem:[#allocation2 + $0x160] sm:$0xff] %vm9186_vm5, %v9861_v57 }
 0x3f2   :  { %v9847_v56 = vmax.f32 %v9669_v27, 0.0  ;;  %v10671_v58 = vpop.permute.xlu0 %10670  ;;  %9916 = vst.msk [vmem:[#allocation2 + $0x158] sm:$0xff] %vm9186_vm5, %v9860_v61 }
 0x3f3   :  { %v9846_v60 = vmax.f32 %v9664_v52, 0.0  ;;  %v10884_v0 = vsel %vm10879_vm12, %v10859_v63, %v10671_v58 }
 0x3f4   :  { %9903 = vst.msk [vmem:[#allocation2 + $0xe0] sm:$0xff] %vm9186_vm5, %v9847_v56 }
 0x3f5   :  { %9902 = vst.msk [vmem:[#allocation2 + $0xd8] sm:$0xff] %vm9186_vm5, %v9846_v60 }
 0x3f6   :  { %v10767_v1 = vpop.permute.xlu0 %10766 }
 0x3f7   :  { %v10909_v10 = vsel %vm10904_vm13, %v10884_v0, %v10767_v1 }
 0x3f8   :  { %14306 = vmatprep.mubr.msk.f32.mxu1 %vm10941_vm14, %v10909_v10 }
 0x3f9   :  { %v9984_v17 = vld [vmem:[#allocation2 + $0x150] ss:$2 sm:$0xff]  ;;  %v10048_v54 = vld [vmem:[#allocation2 + $0x151] ss:$2 sm:$0xff] }
 0x3fa   :  { %v10769_v9 = vpop.permute.xlu0 %10768  ;;  %v10090_v2 = vmax.f32 %v9984_v17, %v10048_v54  ;;  %v10144_v19 = vld [vmem:[#allocation2 + $0x152] ss:$2 sm:$0xff]  ;;  %v10240_v12 = vld [vmem:[#allocation2 + $0x153] ss:$2 sm:$0xff] }
 0x3fb   :  { %v10910_v4 = vsel %vm10904_vm13, %v10885_v8, %v10769_v9 }
 0x3fc   :  { %v9968_v5 = vld [vmem:[#allocation2 + $0xd0] ss:$2 sm:$0xff]  ;;  %v10032_v15 = vld [vmem:[#allocation2 + $0xd1] ss:$2 sm:$0xff]  ;;  %14307 = vmatmul.mubr.msk.f32.gmra.mrb[28].mxu1 %vm10941_vm14, %v10910_v4  ;;  %v10186_v21 = vmax.f32 %v10090_v2, %v10144_v19 }
 0x3fd   :  { %v10082_v16 = vmax.f32 %v9968_v5, %v10032_v15  ;;  %v10128_v55 = vld [vmem:[#allocation2 + $0xd2] ss:$2 sm:$0xff]  ;;  %v10224_v20 = vld [vmem:[#allocation2 + $0xd3] ss:$2 sm:$0xff] }
 0x3fe   :  { %v10282_v13 = vmax.f32 %v10186_v21, %v10240_v12 }
 0x3ff   :  { %v10178_v3 = vmax.f32 %v10082_v16, %v10128_v55 }
 0x400   :  { %10315 = vst.msk [vmem:[#allocation3 + $0xa8] sm:$0xff] %vm9186_vm5, %v10282_v13 }
 0x401   :  { %v10274_v22 = vmax.f32 %v10178_v3, %v10224_v20 }
 0x403   :  { %10307 = vst.msk [vmem:[#allocation3 + $0x68] sm:$0xff] %vm9186_vm5, %v10274_v22 }
 0x40a   :  { %v10359_v23 = vld [vmem:[#allocation3 + $0x61] sm:$0xff] }
 0x40b   :  { %v10431_v24 = vld [vmem:[#allocation3 + $0x64] sm:$0xff]  ;;  %10488 = vrot.lane.b32.xlu1 %v10359_v23, %s14643_s26 }
 0x40c   :  { %10776 = vrot.lane.b32.xlu0 %v10431_v24, %s14649_s2  ;;  %v10383_v30 = vld [vmem:[#allocation3 + $0x62] sm:$0xff]  ;;  %v14254_v31 = vpop.f32.mrb[8].mxu1 }
 0x40d   :  { %v9749_v32 = vadd.f32 %v18426_v18, %v14254_v31  ;;  %v9743_v37 = vpop.f32.mrb[9].mxu1  ;;  %v10407_v26 = vld [vmem:[#allocation3 + $0x63] sm:$0xff] }
 0x40e   :  { %v9744_v39 = vadd.f32 %v18426_v18, %v9743_v37 }
 0x40f   :  { %v14233_v29 = vpop.f32.mrb[26].mxu0  ;;  %10584 = vrot.lane.b32.xlu1 %v10383_v30, %s14647_s23  ;;  %v9863_v25 = vmax.f32 %v9749_v32, 0.0 }
 0x410   :  { %v9679_v28 = vadd.f32 %v18426_v18, %v14233_v29  ;;  %v9673_v36 = vpop.f32.mrb[27].mxu0  ;;  %v9862_v45 = vmax.f32 %v9744_v39, 0.0 }
 0x411   :  { %v9674_v38 = vadd.f32 %v18426_v18, %v9673_v36  ;;  %9919 = vst.msk [vmem:[#allocation2 + $0x170] sm:$0xff] %vm9186_vm5, %v9863_v25 }
 0x412   :  { %v9849_v43 = vmax.f32 %v9679_v28, 0.0  ;;  %9918 = vst.msk [vmem:[#allocation2 + $0x168] sm:$0xff] %vm9186_vm5, %v9862_v45 }
 0x413   :  { %v9848_v44 = vmax.f32 %v9674_v38, 0.0  ;;  %10680 = vrot.lane.b32.xlu1 %v10407_v26, %s14648_s17 }
 0x414   :  { %9905 = vst.msk [vmem:[#allocation2 + $0xf0] sm:$0xff] %vm9186_vm5, %v9849_v43 }
 0x415   :  { %9904 = vst.msk [vmem:[#allocation2 + $0xe8] sm:$0xff] %vm9186_vm5, %v9848_v44 }
 0x418   :  { %v9988_v50 = vld [vmem:[#allocation2 + $0x170] ss:$2 sm:$0xf]  ;;  %v10052_v51 = vld [vmem:[#allocation2 + $0x171] ss:$2 sm:$0xf] }
 0x419   :  { %v10092_v56 = vmax.f32 %v9988_v50, %v10052_v51  ;;  %v10148_v57 = vld [vmem:[#allocation2 + $0x172] ss:$2 sm:$0xf]  ;;  %v9986_v1 = vld [vmem:[#allocation2 + $0x160] ss:$2 sm:$0xff] }
 0x41a   :  { %v10050_v6 = vld [vmem:[#allocation2 + $0x161] ss:$2 sm:$0xff]  ;;  %v10244_v7 = vld [vmem:[#allocation2 + $0x173] ss:$2 sm:$0xf] }
 0x41b   :  { %v9972_v48 = vld [vmem:[#allocation2 + $0xf0] ss:$2 sm:$0xf]  ;;  %v10036_v49 = vld [vmem:[#allocation2 + $0xf1] ss:$2 sm:$0xf]  ;;  %v10483_v47 = vpop.permute.xlu1 %10482  ;;  %v10188_v63 = vmax.f32 %v10092_v56, %v10148_v57  ;;  %v10091_v11 = vmax.f32 %v9986_v1, %v10050_v6 }
 0x41c   :  { %v10579_v46 = vpop.permute.xlu0 %10578  ;;  %v10084_v33 = vmax.f32 %v9972_v48, %v10036_v49  ;;  %v10132_v27 = vld [vmem:[#allocation2 + $0xf2] ss:$2 sm:$0xf]  ;;  %v10228_v53 = vld [vmem:[#allocation2 + $0xf3] ss:$2 sm:$0xf]  ;;  %v10836_v60 = vsel %vm9186_vm5, %v10332_v34, %v10483_v47 }
 0x41d   :  { %v9970_v58 = vld [vmem:[#allocation2 + $0xe0] ss:$2 sm:$0xff]  ;;  %v10034_v59 = vld [vmem:[#allocation2 + $0xe1] ss:$2 sm:$0xff]  ;;  %v10284_v14 = vmax.f32 %v10188_v63, %v10244_v7  ;;  %v10861_v4 = vsel %vm10854_vm11, %v10836_v60, %v10579_v46 }
 0x41e   :  { %v10180_v52 = vmax.f32 %v10084_v33, %v10132_v27  ;;  %v10083_v0 = vmax.f32 %v9970_v58, %v10034_v59  ;;  %v10130_v10 = vld [vmem:[#allocation2 + $0xe2] ss:$2 sm:$0xff]  ;;  %v10226_v5 = vld [vmem:[#allocation2 + $0xe3] ss:$2 sm:$0xff] }
 0x41f   :  { %v10146_v9 = vld [vmem:[#allocation2 + $0x162] ss:$2 sm:$0xff]  ;;  %10317 = vst.msk [vmem:[#allocation3 + $0xb8] sm:$0xf] %vm10296_vm8, %v10284_v14  ;;  %v10242_v55 = vld [vmem:[#allocation2 + $0x163] ss:$2 sm:$0xff] }
 0x420   :  { %v10675_v61 = vpop.permute.xlu0 %10674  ;;  %v10276_v62 = vmax.f32 %v10180_v52, %v10228_v53  ;;  %v10179_v8 = vmax.f32 %v10083_v0, %v10130_v10  ;;  %v10187_v15 = vmax.f32 %v10091_v11, %v10146_v9  ;;  %v10333_v46 = vld [vmem:[#allocation3 + $0x48] sm:$0xff]  ;;  %v10334_v52 = vld [vmem:[#allocation3 + $0x50] sm:$0xff] }
 0x421   :  { %v10886_v16 = vsel %vm10879_vm12, %v10861_v4, %v10675_v61 }
 0x422   :  { %10309 = vst.msk [vmem:[#allocation3 + $0x78] sm:$0xf] %vm10296_vm8, %v10276_v62  ;;  %v10275_v54 = vmax.f32 %v10179_v8, %v10226_v5  ;;  %v10283_v3 = vmax.f32 %v10187_v15, %v10242_v55 }
 0x424   :  { %v10771_v17 = vpop.permute.xlu0 %10770  ;;  %10308 = vst.msk [vmem:[#allocation3 + $0x70] sm:$0xff] %vm9186_vm5, %v10275_v54  ;;  %10316 = vst.msk [vmem:[#allocation3 + $0xb0] sm:$0xff] %vm9186_vm5, %v10283_v3 }
 0x425   :  { %v10911_v2 = vsel %vm10904_vm13, %v10886_v16, %v10771_v17 }
 0x426   :  { %14309 = vmatprep.mubr.msk.f32.mxu1 %vm10941_vm14, %v10911_v2 }
 0x42b   :  { %v10360_v19 = vld [vmem:[#allocation3 + $0x69] sm:$0xff]  ;;  %v10361_v32 = vld [vmem:[#allocation3 + $0x71] sm:$0xff] }
 0x42c   :  { %v10384_v20 = vld [vmem:[#allocation3 + $0x6a] sm:$0xff]  ;;  %10490 = vrot.lane.b32.xlu1 %v10360_v19, %s14643_s26  ;;  %v14257_v22 = vpop.f32.mrb[10].mxu1  ;;  %v10385_v39 = vld [vmem:[#allocation3 + $0x72] sm:$0xff] }
 0x42d   :  { %10586 = vrot.lane.b32.xlu0 %v10384_v20, %s14647_s23  ;;  %v9759_v13 = vadd.f32 %v18426_v18, %v14257_v22  ;;  %v9753_v24 = vpop.f32.mrb[11].mxu1  ;;  %v10408_v36 = vld [vmem:[#allocation3 + $0x6b] sm:$0xff]  ;;  %v10409_v25 = vld [vmem:[#allocation3 + $0x73] sm:$0xff] }
 0x42e   :  { %v9754_v29 = vadd.f32 %v18426_v18, %v9753_v24  ;;  %v10432_v43 = vld [vmem:[#allocation3 + $0x6c] sm:$0xff]  ;;  %v10433_v26 = vld [vmem:[#allocation3 + $0x74] sm:$0xff] }
 0x42f   :  { %v14236_v21 = vpop.f32.mrb[28].mxu0  ;;  %v9865_v28 = vmax.f32 %v9759_v13, 0.0 }
 0x430   :  { %v9689_v12 = vadd.f32 %v18426_v18, %v14236_v21  ;;  %v9683_v23 = vpop.f32.mrb[29].mxu0  ;;  %10492 = vrot.lane.b32.xlu1 %v10361_v32, %s14643_s26  ;;  %v9864_v38 = vmax.f32 %v9754_v29, 0.0 }
 0x431   :  { %v9684_v30 = vadd.f32 %v18426_v18, %v9683_v23  ;;  %10682 = vrot.lane.b32.xlu0 %v10408_v36, %s14648_s17  ;;  %9921 = vst.msk [vmem:[#allocation2 + $0x188] sm:$0xff] %vm9186_vm5, %v9865_v28 }
 0x432   :  { %v9851_v31 = vmax.f32 %v9689_v12, 0.0  ;;  %9920 = vst.msk [vmem:[#allocation2 + $0x180] sm:$0xff] %vm9186_vm5, %v9864_v38 }
 0x433   :  { %v9850_v37 = vmax.f32 %v9684_v30, 0.0 }
 0x434   :  { %9907 = vst.msk [vmem:[#allocation2 + $0x108] sm:$0xff] %vm9186_vm5, %v9851_v31  ;;  %10588 = vrot.lane.b32.xlu1 %v10385_v39, %s14647_s23 }
 0x435   :  { %9906 = vst.msk [vmem:[#allocation2 + $0x100] sm:$0xff] %vm9186_vm5, %v9850_v37  ;;  %10778 = vrot.lane.b32.xlu0 %v10432_v43, %s14649_s2 }
 0x438   :  { %10684 = vrot.lane.b32.xlu1 %v10409_v25, %s14648_s17 }
 0x439   :  { %10780 = vrot.lane.b32.xlu0 %v10433_v26, %s14649_s2  ;;  %v9990_v16 = vld [vmem:[#allocation2 + $0x180] ss:$2 sm:$0xff]  ;;  %v10054_v17 = vld [vmem:[#allocation2 + $0x181] ss:$2 sm:$0xff] }
 0x43a   :  { %v10093_v22 = vmax.f32 %v9990_v16, %v10054_v17  ;;  %v10436_v16 = vld [vmem:[#allocation3 + $0x94] sm:$0xff] }
 0x43c   :  { %v10485_v44 = vpop.permute.xlu1 %10484  ;;  %v9974_v4 = vld [vmem:[#allocation2 + $0x100] ss:$2 sm:$0xff]  ;;  %v10038_v5 = vld [vmem:[#allocation2 + $0x101] ss:$2 sm:$0xff] }
 0x43d   :  { %v10773_v45 = vpop.permute.xlu0 %10772  ;;  %v10837_v33 = vsel %vm9186_vm5, %v10333_v46, %v10485_v44  ;;  %v10085_v15 = vmax.f32 %v9974_v4, %v10038_v5 }
 0x440   :  { %v10581_v48 = vpop.permute.xlu1 %10580 }
 0x441   :  { %v10583_v49 = vpop.permute.xlu0 %10582  ;;  %v10862_v27 = vsel %vm10854_vm11, %v10837_v33, %v10581_v48 }
 0x444   :  { %v10677_v34 = vpop.permute.xlu1 %10676 }
 0x445   :  { %v10887_v47 = vsel %vm10879_vm12, %v10862_v27, %v10677_v34  ;;  %v10679_v50 = vpop.permute.xlu0 %10678 }
 0x446   :  { %v10912_v51 = vsel %vm10904_vm13, %v10887_v47, %v10773_v45 }
 0x447   :  { %14310 = vmatmul.mubr.msk.f32.gmra.mrb[30].mxu1 %vm10941_vm14, %v10912_v51 }
 0x448   :  { %v10487_v53 = vpop.permute.xlu1 %10486  ;;  %v14239_v58 = vpop.f32.mrb[30].mxu0 }
 0x449   :  { %v10838_v56 = vsel %vm9186_vm5, %v10334_v52, %v10487_v53  ;;  %v10775_v60 = vpop.permute.xlu0 %10774  ;;  %v9699_v61 = vadd.f32 %v18426_v18, %v14239_v58  ;;  %v9693_v62 = vpop.f32.mrb[31].mxu0 }
 0x44a   :  { %v10863_v57 = vsel %vm10854_vm11, %v10838_v56, %v10583_v49  ;;  %v9694_v0 = vadd.f32 %v18426_v18, %v9693_v62  ;;  %v10364_v62 = vld [vmem:[#allocation3 + $0x91] sm:$0xff] }
 0x44b   :  { %v10888_v59 = vsel %vm10879_vm12, %v10863_v57, %v10679_v50  ;;  %v9853_v1 = vmax.f32 %v9699_v61, 0.0 }
 0x44c   :  { %v10913_v63 = vsel %vm10904_vm13, %v10888_v59, %v10775_v60  ;;  %v9852_v6 = vmax.f32 %v9694_v0, 0.0 }
 0x44d   :  { %14312 = vmatprep.mubr.msk.f32.mxu1 %vm10941_vm14, %v10913_v63  ;;  %9909 = vst.msk [vmem:[#allocation2 + $0x118] sm:$0xff] %vm9186_vm5, %v9853_v1  ;;  %v10388_v63 = vld [vmem:[#allocation3 + $0x92] sm:$0xff]  ;;  %v10365_v1 = vld [vmem:[#allocation3 + $0xa1] sm:$0xff] }
 0x44e   :  { %9908 = vst.msk [vmem:[#allocation2 + $0x110] sm:$0xff] %vm9186_vm5, %v9852_v6  ;;  %v10412_v6 = vld [vmem:[#allocation3 + $0x93] sm:$0xff] }
 0x44f   :  { %v14260_v7 = vpop.f32.mrb[12].mxu1 }
 0x450   :  { %v9769_v10 = vadd.f32 %v18426_v18, %v14260_v7  ;;  %v9763_v11 = vpop.f32.mrb[13].mxu1 }
 0x451   :  { %v9764_v14 = vadd.f32 %v18426_v18, %v9763_v11 }
 0x452   :  { %v9867_v8 = vmax.f32 %v9769_v10, 0.0 }
 0x453   :  { %v9866_v9 = vmax.f32 %v9764_v14, 0.0 }
 0x454   :  { %9923 = vst.msk [vmem:[#allocation2 + $0x198] sm:$0xff] %vm9186_vm5, %v9867_v8 }
 0x455   :  { %9922 = vst.msk [vmem:[#allocation2 + $0x190] sm:$0xff] %vm9186_vm5, %v9866_v9  ;;  %v9976_v54 = vld [vmem:[#allocation2 + $0x110] ss:$2 sm:$0xff]  ;;  %v10040_v55 = vld [vmem:[#allocation2 + $0x111] ss:$2 sm:$0xff] }
 0x456   :  { %v10134_v2 = vld [vmem:[#allocation2 + $0x102] ss:$2 sm:$0xff]  ;;  %v10086_v3 = vmax.f32 %v9976_v54, %v10040_v55  ;;  %v10136_v20 = vld [vmem:[#allocation2 + $0x112] ss:$2 sm:$0xff]  ;;  %v10230_v21 = vld [vmem:[#allocation2 + $0x103] ss:$2 sm:$0xff] }
 0x457   :  { %v10181_v19 = vmax.f32 %v10085_v15, %v10134_v2  ;;  %v10232_v23 = vld [vmem:[#allocation2 + $0x113] ss:$2 sm:$0xff]  ;;  %v10389_v15 = vld [vmem:[#allocation3 + $0xa2] sm:$0xff] }
 0x458   :  { %v10182_v12 = vmax.f32 %v10086_v3, %v10136_v20 }
 0x459   :  { %v10277_v13 = vmax.f32 %v10181_v19, %v10230_v21  ;;  %v18656_v19 = vld [vmem:[%s19541_s4] ss:$0 sm:$0xff] }
 0x45a   :  { %v10278_v30 = vmax.f32 %v10182_v12, %v10232_v23 }
 0x45b   :  { %10310 = vst.msk [vmem:[#allocation3 + $0x80] sm:$0xff] %vm9186_vm5, %v10277_v13 }
 0x45c   :  { %v10150_v24 = vld [vmem:[#allocation2 + $0x182] ss:$2 sm:$0xff]  ;;  %v10246_v31 = vld [vmem:[#allocation2 + $0x183] ss:$2 sm:$0xff]  ;;  %10311 = vst.msk [vmem:[#allocation3 + $0x88] sm:$0xff] %vm9186_vm5, %v10278_v30 }
 0x45d   :  { %v10189_v29 = vmax.f32 %v10093_v22, %v10150_v24  ;;  %v9992_v44 = vld [vmem:[#allocation2 + $0x190] ss:$2 sm:$0xff]  ;;  %v10056_v45 = vld [vmem:[#allocation2 + $0x191] ss:$2 sm:$0xff]  ;;  %v10413_v24 = vld [vmem:[#allocation3 + $0xa3] sm:$0xff] }
 0x45e   :  { %v10094_v46 = vmax.f32 %v9992_v44, %v10056_v45  ;;  %v10437_v30 = vld [vmem:[#allocation3 + $0xa4] sm:$0xff] }
 0x45f   :  { %v10285_v28 = vmax.f32 %v10189_v29, %v10246_v31  ;;  %v14263_v32 = vpop.f32.mrb[14].mxu1  ;;  %v10335_v31 = vld [vmem:[#allocation3 + $0x60] sm:$0xff]  ;;  %v10414_v44 = vld [vmem:[#allocation3 + $0xab] sm:$0xff] }
 0x460   :  { %v9779_v36 = vadd.f32 %v18426_v18, %v14263_v32  ;;  %v9773_v37 = vpop.f32.mrb[15].mxu1 }
 0x461   :  { %10318 = vst.msk [vmem:[#allocation3 + $0xc0] sm:$0xff] %vm9186_vm5, %v10285_v28  ;;  %v9774_v38 = vadd.f32 %v18426_v18, %v9773_v37  ;;  %v10366_v37 = vld [vmem:[#allocation3 + $0xa9] sm:$0xff] }
 0x462   :  { %v9869_v39 = vmax.f32 %v9779_v36, 0.0 }
 0x463   :  { %v9868_v43 = vmax.f32 %v9774_v38, 0.0  ;;  %v10362_v25 = vld [vmem:[#allocation3 + $0x81] sm:$0xff]  ;;  %v10363_v48 = vld [vmem:[#allocation3 + $0x89] sm:$0xff] }
 0x464   :  { %9925 = vst.msk [vmem:[#allocation2 + $0x1a8] sm:$0xff] %vm9186_vm5, %v9869_v39  ;;  %v10386_v26 = vld [vmem:[#allocation3 + $0x82] sm:$0xff]  ;;  %10494 = vrot.lane.b32.xlu1 %v10362_v25, %s14643_s26  ;;  %v10387_v47 = vld [vmem:[#allocation3 + $0x8a] sm:$0xff] }
 0x465   :  { %9924 = vst.msk [vmem:[#allocation2 + $0x1a0] sm:$0xff] %vm9186_vm5, %v9868_v43  ;;  %10590 = vrot.lane.b32.xlu0 %v10386_v26, %s14647_s23  ;;  %v10410_v49 = vld [vmem:[#allocation3 + $0x83] sm:$0xff]  ;;  %v10411_v59 = vld [vmem:[#allocation3 + $0x8b] sm:$0xff] }
 0x466   :  { %v10434_v50 = vld [vmem:[#allocation3 + $0x84] sm:$0xff]  ;;  %v10435_v60 = vld [vmem:[#allocation3 + $0x8c] sm:$0xff] }
 0x467   :  { %v10390_v38 = vld [vmem:[#allocation3 + $0xaa] sm:$0xff] }
 0x468   :  { %10496 = vrot.lane.b32.xlu1 %v10363_v48, %s14643_s26  ;;  %v10367_v26 = vld [vmem:[#allocation3 + $0xb1] sm:$0xff] }
 0x469   :  { %10686 = vrot.lane.b32.xlu0 %v10410_v49, %s14648_s17 }
 0x46c   :  { %v10152_v33 = vld [vmem:[#allocation2 + $0x192] ss:$2 sm:$0xff]  ;;  %v10248_v34 = vld [vmem:[#allocation2 + $0x193] ss:$2 sm:$0xff]  ;;  %10592 = vrot.lane.b32.xlu1 %v10387_v47, %s14647_s23 }
 0x46d   :  { %v10190_v27 = vmax.f32 %v10094_v46, %v10152_v33  ;;  %10782 = vrot.lane.b32.xlu0 %v10434_v50, %s14649_s2  ;;  %v9994_v0 = vld [vmem:[#allocation2 + $0x1a0] ss:$2 sm:$0xff]  ;;  %v10391_v33 = vld [vmem:[#allocation3 + $0xb2] sm:$0xff] }
 0x46f   :  { %v10286_v51 = vmax.f32 %v10190_v27, %v10248_v34  ;;  %v14266_v52 = vpop.f32.mrb[16].mxu1  ;;  %v10438_v27 = vld [vmem:[#allocation3 + $0xac] sm:$0xff] }
 0x470   :  { %v9789_v53 = vadd.f32 %v18426_v18, %v14266_v52  ;;  %v9783_v56 = vpop.f32.mrb[17].mxu1  ;;  %10688 = vrot.lane.b32.xlu1 %v10411_v59, %s14648_s17  ;;  %v10439_v59 = vld [vmem:[#allocation3 + $0xb4] sm:$0xff] }
 0x471   :  { %10319 = vst.msk [vmem:[#allocation3 + $0xc8] sm:$0xff] %vm9186_vm5, %v10286_v51  ;;  %v9784_v57 = vadd.f32 %v18426_v18, %v9783_v56  ;;  %10784 = vrot.lane.b32.xlu0 %v10435_v60, %s14649_s2  ;;  %v10058_v18 = vld [vmem:[#allocation2 + $0x1a1] ss:$2 sm:$0xff] }
 0x472   :  { %v9871_v58 = vmax.f32 %v9789_v53, 0.0  ;;  %v10095_v7 = vmax.f32 %v9994_v0, %v10058_v18 }
 0x473   :  { %v9870_v61 = vmax.f32 %v9784_v57, 0.0 }
 0x474   :  { %9927 = vst.msk [vmem:[#allocation2 + $0x1c0] sm:$0xff] %vm9186_vm5, %v9871_v58  ;;  %10498 = vrot.lane.b32.xlu1 %v10364_v62, %s14643_s26  ;;  %v10415_v58 = vld [vmem:[#allocation3 + $0xb3] sm:$0xff] }
 0x475   :  { %9926 = vst.msk [vmem:[#allocation2 + $0x1b0] sm:$0xff] %vm9186_vm5, %v9870_v61  ;;  %10594 = vrot.lane.b32.xlu0 %v10388_v63, %s14647_s23 }
 0x478   :  { %10500 = vrot.lane.b32.xlu1 %v10365_v1, %s14643_s26  ;;  %v10368_v61 = vld [vmem:[#allocation3 + $0xc1] sm:$0xff] }
 0x479   :  { %10690 = vrot.lane.b32.xlu0 %v10412_v6, %s14648_s17  ;;  %v10392_v62 = vld [vmem:[#allocation3 + $0xc2] sm:$0xff] }
 0x47a   :  { %v10416_v0 = vld [vmem:[#allocation3 + $0xc3] sm:$0xff] }
 0x47c   :  { %v9996_v10 = vld [vmem:[#allocation2 + $0x1b0] ss:$2 sm:$0xf]  ;;  %v10060_v11 = vld [vmem:[#allocation2 + $0x1b1] ss:$2 sm:$0xf]  ;;  %10596 = vrot.lane.b32.xlu1 %v10389_v15, %s14647_s23 }
 0x47d   :  { %v10096_v14 = vmax.f32 %v9996_v10, %v10060_v11  ;;  %v10154_v8 = vld [vmem:[#allocation2 + $0x1a2] ss:$2 sm:$0xff]  ;;  %v10156_v9 = vld [vmem:[#allocation2 + $0x1b2] ss:$2 sm:$0xf]  ;;  %v10489_v5 = vpop.permute.xlu1 %10488  ;;  %10786 = vrot.lane.b32.xlu0 %v10436_v16, %s14649_s2 }
 0x47e   :  { %v10191_v4 = vmax.f32 %v10095_v7, %v10154_v8  ;;  %v10250_v54 = vld [vmem:[#allocation2 + $0x1a3] ss:$2 sm:$0xff]  ;;  %v10252_v2 = vld [vmem:[#allocation2 + $0x1b3] ss:$2 sm:$0xf]  ;;  %v10839_v28 = vsel %vm9186_vm5, %v10335_v31, %v10489_v5  ;;  %v10777_v39 = vpop.permute.xlu0 %10776 }
 0x47f   :  { %v10192_v17 = vmax.f32 %v10096_v14, %v10156_v9  ;;  %v14269_v55 = vpop.f32.mrb[18].mxu1  ;;  %v10440_v9 = vld [vmem:[#allocation3 + $0xc4] sm:$0xff] }
 0x480   :  { %v10287_v3 = vmax.f32 %v10191_v4, %v10250_v54  ;;  %v9799_v20 = vadd.f32 %v18656_v19, %v14269_v55  ;;  %v9793_v21 = vpop.f32.mrb[19].mxu1  ;;  %10692 = vrot.lane.b32.xlu1 %v10413_v24, %s14648_s17 }
 0x481   :  { %v10288_v22 = vmax.f32 %v10192_v17, %v10252_v2  ;;  %v9794_v12 = vadd.f32 %v18656_v19, %v9793_v21  ;;  %v10585_v23 = vpop.permute.xlu1 %10584  ;;  %10788 = vrot.lane.b32.xlu0 %v10437_v30, %s14649_s2 }
 0x482   :  { %10320 = vst.msk [vmem:[#allocation3 + $0xd0] sm:$0xff] %vm9186_vm5, %v10287_v3  ;;  %v9873_v13 = vmax.f32 %v9799_v20, 0.0  ;;  %v10864_v32 = vsel %vm10854_vm11, %v10839_v28, %v10585_v23 }
 0x483   :  { %10321 = vst.msk [vmem:[#allocation3 + $0xd8] sm:$0xf] %vm10296_vm8, %v10288_v22  ;;  %v9872_v29 = vmax.f32 %v9794_v12, 0.0 }
 0x484   :  { %9929 = vst.msk [vmem:[#allocation2 + $0x1d0] sm:$0xff] %vm9186_vm5, %v9873_v13  ;;  %10502 = vrot.lane.b32.xlu1 %v10366_v37, %s14643_s26 }
 0x485   :  { %9928 = vst.msk [vmem:[#allocation2 + $0x1c8] sm:$0xff] %vm9186_vm5, %v9872_v29  ;;  %v10681_v36 = vpop.permute.xlu1 %10680  ;;  %10598 = vrot.lane.b32.xlu0 %v10390_v38, %s14647_s23 }
 0x486   :  { %v10889_v43 = vsel %vm10879_vm12, %v10864_v32, %v10681_v36 }
 0x487   :  { %v10914_v25 = vsel %vm10904_vm13, %v10889_v43, %v10777_v39 }
 0x488   :  { %14313 = vmatmul.mubr.msk.f32.gmra.mrb[32].mxu1 %vm10941_vm14, %v10914_v25  ;;  %10504 = vrot.lane.b32.xlu1 %v10367_v26, %s14643_s26  ;;  %v10337_v26 = vld [vmem:[#allocation3 + $0x70] sm:$0xff] }
 0x489   :  { %10694 = vrot.lane.b32.xlu0 %v10414_v44, %s14648_s17  ;;  %v10369_v63 = vld [vmem:[#allocation3 + $0xc9] sm:$0xff] }
 0x48a   :  { %v10393_v8 = vld [vmem:[#allocation3 + $0xca] sm:$0xff]  ;;  %v10394_v23 = vld [vmem:[#allocation3 + $0xd2] sm:$0xff] }
 0x48b   :  { %v10417_v3 = vld [vmem:[#allocation3 + $0xcb] sm:$0xff]  ;;  %v10418_v39 = vld [vmem:[#allocation3 + $0xd3] sm:$0xff] }
 0x48c   :  { %v9998_v45 = vld [vmem:[#allocation2 + $0x1c0] ss:$2 sm:$0xff]  ;;  %v10062_v48 = vld [vmem:[#allocation2 + $0x1c1] ss:$2 sm:$0xff]  ;;  %10600 = vrot.lane.b32.xlu1 %v10391_v33, %s14647_s23  ;;  %v10370_v13 = vld [vmem:[#allocation3 + $0xd1] sm:$0xff] }
 0x48d   :  { %v10097_v49 = vmax.f32 %v9998_v45, %v10062_v48  ;;  %v10158_v46 = vld [vmem:[#allocation2 + $0x1c2] ss:$2 sm:$0xff]  ;;  %10790 = vrot.lane.b32.xlu0 %v10438_v27, %s14649_s2  ;;  %v10254_v50 = vld [vmem:[#allocation2 + $0x1c3] ss:$2 sm:$0xff]  ;;  %v18709_v33 = vld [vmem:[%s19541_s4 + $0x1] ss:$0 sm:$0xff] }
 0x48e   :  { %v10441_v20 = vld [vmem:[#allocation3 + $0xcc] sm:$0xff] }
 0x48f   :  { %v10193_v34 = vmax.f32 %v10097_v49, %v10158_v46  ;;  %v14272_v47 = vpop.f32.mrb[20].mxu1  ;;  %v10442_v46 = vld [vmem:[#allocation3 + $0xd4] sm:$0xff] }
 0x490   :  { %v9809_v51 = vadd.f32 %v18656_v19, %v14272_v47  ;;  %v9803_v52 = vpop.f32.mrb[21].mxu1  ;;  %10696 = vrot.lane.b32.xlu1 %v10415_v58, %s14648_s17  ;;  %v11551_v58 = vld [vmem:[%s19540_s3 + $0x18] sm:$0xff] }
 0x491   :  { %v10289_v53 = vmax.f32 %v10193_v34, %v10254_v50  ;;  %v9804_v56 = vadd.f32 %v18656_v19, %v9803_v52  ;;  %10792 = vrot.lane.b32.xlu0 %v10439_v59, %s14649_s2  ;;  %v11549_v52 = vld [vmem:[%s19540_s3 + $0x8] sm:$0xff]  ;;  %v11548_v59 = vld [vmem:[%s19540_s3] sm:$0xff] }
 0x492   :  { %v9875_v57 = vmax.f32 %v9809_v51, 0.0 }
 0x493   :  { %10322 = vst.msk [vmem:[#allocation3 + $0xe0] sm:$0xff] %vm9186_vm5, %v10289_v53  ;;  %v9874_v60 = vmax.f32 %v9804_v56, 0.0 }
 0x494   :  { %9931 = vst.msk [vmem:[#allocation2 + $0x1e0] sm:$0xff] %vm9186_vm5, %v9875_v57  ;;  %10506 = vrot.lane.b32.xlu1 %v10368_v61, %s14643_s26 }
 0x495   :  { %9930 = vst.msk [vmem:[#allocation2 + $0x1d8] sm:$0xff] %vm9186_vm5, %v9874_v60  ;;  %10602 = vrot.lane.b32.xlu0 %v10392_v62, %s14647_s23  ;;  %v11550_v60 = vld [vmem:[%s19540_s3 + $0x10] sm:$0xff] }
 0x498   :  { %10508 = vrot.lane.b32.xlu1 %v10369_v63, %s14643_s26  ;;  %v14405_v63 = vpack.c.bf16 %v11551_v58, %v11549_v52  ;;  %v11573_v52 = vld [vmem:[%s19540_s3 + $0xc8] sm:$0xff] }
 0x499   :  { %10698 = vrot.lane.b32.xlu0 %v10416_v0, %s14648_s17  ;;  %v14407_v0 = vpack.c.bf16 %v11550_v60, %v11548_v59 }
 0x49a   :  { %14406 = vmatprep.subr.bf16.mxu1 %v14405_v63 }
 0x49b   :  { %14408 = vmatpush1.bf16.msra.mxu1 %v14407_v0  ;;  %v11577_v0 = vld [vmem:[%s19540_s3 + $0xe8] sm:$0xff] }
 0x49c   :  { %v10000_v18 = vld [vmem:[#allocation2 + $0x1d0] ss:$2 sm:$0xff]  ;;  %v10064_v1 = vld [vmem:[#allocation2 + $0x1d1] ss:$2 sm:$0xff]  ;;  %v14275_v7 = vpop.f32.mrb[22].mxu1  ;;  %10604 = vrot.lane.b32.xlu1 %v10393_v8, %s14647_s23 }
 0x49d   :  { %v10098_v6 = vmax.f32 %v10000_v18, %v10064_v1  ;;  %v10160_v10 = vld [vmem:[#allocation2 + $0x1d2] ss:$2 sm:$0xff]  ;;  %v9819_v11 = vadd.f32 %v18656_v19, %v14275_v7  ;;  %v9813_v14 = vpop.f32.mrb[23].mxu1  ;;  %10794 = vrot.lane.b32.xlu0 %v10440_v9, %s14649_s2  ;;  %v10256_v15 = vld [vmem:[#allocation2 + $0x1d3] ss:$2 sm:$0xff]  ;;  %v11553_v18 = vld [vmem:[%s19540_s3 + $0x28] sm:$0xff] }
 0x49e   :  { %v9814_v5 = vadd.f32 %v18656_v19, %v9813_v14  ;;  %v10491_v55 = vpop.permute.xlu1 %10490  ;;  %v10336_v19 = vld [vmem:[#allocation3 + $0x68] sm:$0xff]  ;;  %v11555_v1 = vld [vmem:[%s19540_s3 + $0x38] sm:$0xff]  ;;  %v11552_v14 = vld [vmem:[%s19540_s3 + $0x20] sm:$0xff] }
 0x49f   :  { %v10194_v4 = vmax.f32 %v10098_v6, %v10160_v10  ;;  %v9877_v16 = vmax.f32 %v9819_v11, 0.0  ;;  %v10587_v2 = vpop.permute.xlu0 %10586  ;;  %v10840_v21 = vsel %vm9186_vm5, %v10336_v19, %v10491_v55  ;;  %v14409_v11 = vpack.c.bf16 %v11555_v1, %v11553_v18  ;;  %v11554_v8 = vld [vmem:[%s19540_s3 + $0x30] sm:$0xff]  ;;  %v11556_v19 = vld [vmem:[%s19540_s3 + $0x40] sm:$0xff]  ;;  %v11579_v18 = vld [vmem:[%s19540_s3 + $0xf8] sm:$0xff] }
 0x4a0   :  { %v9876_v54 = vmax.f32 %v9814_v5, 0.0  ;;  %10700 = vrot.lane.b32.xlu1 %v10417_v3, %s14648_s17  ;;  %v10865_v24 = vsel %vm10854_vm11, %v10840_v21, %v10587_v2  ;;  %v11557_v5 = vld [vmem:[%s19540_s3 + $0x48] sm:$0xff]  ;;  %v11558_v21 = vld [vmem:[%s19540_s3 + $0x50] sm:$0xff] }
 0x4a1   :  { %v10290_v17 = vmax.f32 %v10194_v4, %v10256_v15  ;;  %9933 = vst.msk [vmem:[#allocation2 + $0x1f0] sm:$0xff] %vm9186_vm5, %v9877_v16  ;;  %10796 = vrot.lane.b32.xlu0 %v10441_v20, %s14649_s2  ;;  %v11559_v15 = vld [vmem:[%s19540_s3 + $0x58] sm:$0xff]  ;;  %14410 = vmatprep.subr.bf16.mxu1 %v14409_v11 }
 0x4a2   :  { %9932 = vst.msk [vmem:[#allocation2 + $0x1e8] sm:$0xff] %vm9186_vm5, %v9876_v54  ;;  %v10493_v22 = vpop.permute.xlu1 %10492  ;;  %v14411_v54 = vpack.c.bf16 %v11554_v8, %v11552_v14  ;;  %v14413_v2 = vpack.c.bf16 %v11559_v15, %v11557_v5  ;;  %v11581_v14 = vld [vmem:[%s19540_s3 + $0x108] sm:$0xff]  ;;  %v11583_v8 = vld [vmem:[%s19540_s3 + $0x118] sm:$0xff]  ;;  %v11580_v15 = vld [vmem:[%s19540_s3 + $0x100] sm:$0xff] }
 0x4a3   :  { %10323 = vst.msk [vmem:[#allocation3 + $0xe8] sm:$0xff] %vm9186_vm5, %v10290_v17  ;;  %v10683_v12 = vpop.permute.xlu0 %10682  ;;  %v10841_v48 = vsel %vm9186_vm5, %v10337_v26, %v10493_v22  ;;  %v11561_v22 = vld [vmem:[%s19540_s3 + $0x68] sm:$0xff] }
 0x4a4   :  { %10510 = vrot.lane.b32.xlu1 %v10370_v13, %s14643_s26  ;;  %v10890_v31 = vsel %vm10879_vm12, %v10865_v24, %v10683_v12  ;;  %v11563_v12 = vld [vmem:[%s19540_s3 + $0x78] sm:$0xff]  ;;  %14412 = vmatpush1.bf16.msra.mxu1 %v14411_v54  ;;  %v14415_v13 = vpack.c.bf16 %v11558_v21, %v11556_v19  ;;  %v11560_v24 = vld [vmem:[%s19540_s3 + $0x60] sm:$0xff]  ;;  %v11569_v26 = vld [vmem:[%s19540_s3 + $0xa8] sm:$0xff] }
 0x4a5   :  { %10606 = vrot.lane.b32.xlu0 %v10394_v23, %s14647_s23  ;;  %14414 = vmatprep.subr.bf16.mxu1 %v14413_v2  ;;  %v14417_v23 = vpack.c.bf16 %v11563_v12, %v11561_v22  ;;  %v11585_v54 = vld [vmem:[%s19540_s3 + $0x128] sm:$0xff] }
 0x4a6   :  { %v10589_v28 = vpop.permute.xlu1 %10588 }
 0x4a7   :  { %v10779_v32 = vpop.permute.xlu0 %10778  ;;  %v10866_v47 = vsel %vm10854_vm11, %v10841_v48, %v10589_v28 }
 0x4a8   :  { %v10004_v30 = vld [vmem:[#allocation2 + $0x1f0] ss:$2 sm:$0xf]  ;;  %v10068_v29 = vld [vmem:[#allocation2 + $0x1f1] ss:$2 sm:$0xf]  ;;  %v10915_v38 = vsel %vm10904_vm13, %v10890_v31, %v10779_v32  ;;  %14416 = vmatpush1.bf16.msra.mxu1 %v14415_v13 }
 0x4a9   :  { %v10100_v36 = vmax.f32 %v10004_v30, %v10068_v29  ;;  %v10164_v37 = vld [vmem:[#allocation2 + $0x1f2] ss:$2 sm:$0xf]  ;;  %v10002_v43 = vld [vmem:[#allocation2 + $0x1e0] ss:$2 sm:$0xff]  ;;  %14315 = vmatprep.mubr.msk.f32.mxu1 %vm10941_vm14, %v10915_v38  ;;  %10702 = vrot.lane.b32.xlu0 %v10418_v39, %s14648_s17 }
 0x4aa   :  { %v10066_v25 = vld [vmem:[#allocation2 + $0x1e1] ss:$2 sm:$0xff]  ;;  %v10260_v27 = vld [vmem:[#allocation2 + $0x1f3] ss:$2 sm:$0xf]  ;;  %v10685_v50 = vpop.permute.xlu1 %10684  ;;  %14418 = vmatprep.subr.bf16.mxu1 %v14417_v23 }
 0x4ab   :  { %v10196_v44 = vmax.f32 %v10100_v36, %v10164_v37  ;;  %v10099_v45 = vmax.f32 %v10002_v43, %v10066_v25  ;;  %v10371_v49 = vld [vmem:[#allocation3 + $0xe1] sm:$0xff]  ;;  %v10781_v51 = vpop.permute.xlu0 %10780  ;;  %v10891_v57 = vsel %vm10879_vm12, %v10866_v47, %v10685_v50  ;;  %v11562_v30 = vld [vmem:[%s19540_s3 + $0x70] sm:$0xff]  ;;  %v11567_v36 = vld [vmem:[%s19540_s3 + $0x98] sm:$0xff] }
 0x4ac   :  { %v10162_v34 = vld [vmem:[#allocation2 + $0x1e2] ss:$2 sm:$0xff]  ;;  %10512 = vrot.lane.b32.xlu1 %v10371_v49, %s14643_s26  ;;  %v10258_v61 = vld [vmem:[#allocation2 + $0x1e3] ss:$2 sm:$0xff]  ;;  %v10916_v62 = vsel %vm10904_vm13, %v10891_v57, %v10781_v51  ;;  %v14419_v28 = vpack.c.bf16 %v11562_v30, %v11560_v24 }
 0x4ad   :  { %v10292_v53 = vmax.f32 %v10196_v44, %v10260_v27  ;;  %v10195_v56 = vmax.f32 %v10099_v45, %v10162_v34  ;;  %10798 = vrot.lane.b32.xlu0 %v10442_v46, %s14649_s2  ;;  %14316 = vmatmul.mubr.msk.f32.gmra.mrb[34].mxu1 %vm10941_vm14, %v10916_v62  ;;  %v10395_v7 = vld [vmem:[#allocation3 + $0xe2] sm:$0xff]  ;;  %v11566_v25 = vld [vmem:[%s19540_s3 + $0x90] sm:$0xff]  ;;  %v11571_v44 = vld [vmem:[%s19540_s3 + $0xb8] sm:$0xff] }
 0x4ae   :  { %v10443_v17 = vld [vmem:[#allocation3 + $0xe4] sm:$0xff]  ;;  %14420 = vmatpush1.bf16.msra.mxu1 %v14419_v28  ;;  %v14425_v46 = vpack.c.bf16 %v11571_v44, %v11569_v26  ;;  %v11570_v34 = vld [vmem:[%s19540_s3 + $0xb0] sm:$0xff] }
 0x4af   :  { %10325 = vst.msk [vmem:[#allocation3 + $0xf8] sm:$0xf] %vm10296_vm8, %v10292_v53  ;;  %v10291_v6 = vmax.f32 %v10195_v56, %v10258_v61  ;;  %v14302_v10 = vpop.f32.mrb[24].mxu1  ;;  %v10419_v20 = vld [vmem:[#allocation3 + $0xe3] sm:$0xff]  ;;  %v11575_v53 = vld [vmem:[%s19540_s3 + $0xd8] sm:$0xff]  ;;  %v11574_v62 = vld [vmem:[%s19540_s3 + $0xd0] sm:$0xff] }
 0x4b0   :  { %10608 = vrot.lane.b32.xlu1 %v10395_v7, %s14647_s23  ;;  %v11090_v9 = vadd.f32 %v14302_v10, %v18709_v33  ;;  %v11084_v4 = vpop.f32.mrb[25].mxu1  ;;  %v11565_v32 = vld [vmem:[%s19540_s3 + $0x88] sm:$0xff]  ;;  %v11564_v37 = vld [vmem:[%s19540_s3 + $0x80] sm:$0xff]  ;;  %v14429_v60 = vpack.c.bf16 %v11575_v53, %v11573_v52  ;;  %v11578_v10 = vld [vmem:[%s19540_s3 + $0xf0] sm:$0xff] }
 0x4b1   :  { %10324 = vst.msk [vmem:[#allocation3 + $0xf0] sm:$0xff] %vm9186_vm5, %v10291_v6  ;;  %v11085_v16 = vadd.f32 %v11084_v4, %v18709_v33  ;;  %10800 = vrot.lane.b32.xlu0 %v10443_v17, %s14649_s2  ;;  %v14421_v43 = vpack.c.bf16 %v11567_v36, %v11565_v32  ;;  %v14423_v45 = vpack.c.bf16 %v11566_v25, %v11564_v37  ;;  %v11568_v27 = vld [vmem:[%s19540_s3 + $0xa0] sm:$0xff]  ;;  %v11582_v17 = vld [vmem:[%s19540_s3 + $0x110] sm:$0xff] }
 0x4b2   :  { %v11204_v55 = vmax.f32 %v11090_v9, 0.0  ;;  %v14427_v58 = vpack.c.bf16 %v11570_v34, %v11568_v27  ;;  %v11572_v61 = vld [vmem:[%s19540_s3 + $0xc0] sm:$0xff]  ;;  %v14433_v6 = vpack.c.bf16 %v11579_v18, %v11577_v0  ;;  %v14439_v13 = vpack.c.bf16 %v11582_v17, %v11580_v15  ;;  %v11586_v28 = vld [vmem:[%s19540_s3 + $0x130] sm:$0xff] }
 0x4b3   :  { %v11203_v3 = vmax.f32 %v11085_v16, 0.0  ;;  %14422 = vmatprep.subr.bf16.mxu1 %v14421_v43  ;;  %v14431_v1 = vpack.c.bf16 %v11574_v62, %v11572_v61  ;;  %v11576_v7 = vld [vmem:[%s19540_s3 + $0xe0] sm:$0xff]  ;;  %v14437_v16 = vpack.c.bf16 %v11583_v8, %v11581_v14 }
 0x4b4   :  { %11228 = vst.msk [vmem:[#allocation4 + $0x8] sm:$0xff] %vm10879_vm12, %v11204_v55  ;;  %10704 = vrot.lane.b32.xlu1 %v10419_v20, %s14648_s17  ;;  %14424 = vmatpush1.bf16.msra.mxu1 %v14423_v45  ;;  %v14435_v5 = vpack.c.bf16 %v11578_v10, %v11576_v7  ;;  %v11587_v55 = vld [vmem:[%s19540_s3 + $0x138] sm:$0xff]  ;;  %v11589_v45 = vld [vmem:[%s19540_s3 + $0x148] sm:$0x3]  ;;  %v10338_v27 = vld [vmem:[#allocation3 + $0x80] sm:$0xff] }
 0x4b5   :  { %11227 = vst.msk [vmem:[#allocation4] sm:$0xff] %vm10879_vm12, %v11203_v3  ;;  %14426 = vmatprep.subr.bf16.mxu1 %v14425_v46 }
 0x4b8   :  { %v10372_v29 = vld [vmem:[#allocation3 + $0xe9] sm:$0xff]  ;;  %v10373_v38 = vld [vmem:[#allocation3 + $0xf1] sm:$0xff]  ;;  %14428 = vmatpush1.bf16.msra.mxu1 %v14427_v58 }
 0x4b9   :  { %v10396_v31 = vld [vmem:[#allocation3 + $0xea] sm:$0xff]  ;;  %10514 = vrot.lane.b32.xlu1 %v10372_v29, %s14643_s26  ;;  %v10397_v49 = vld [vmem:[#allocation3 + $0xf2] sm:$0xff]  ;;  %14430 = vmatprep.subr.bf16.mxu1 %v14429_v60  ;;  %v14441_v29 = vpack.c.bf16 %v11587_v55, %v11585_v54 }
 0x4ba   :  { %10610 = vrot.lane.b32.xlu0 %v10396_v31, %s14647_s23  ;;  %v10420_v39 = vld [vmem:[#allocation3 + $0xeb] sm:$0xff]  ;;  %v10421_v63 = vld [vmem:[#allocation3 + $0xf3] sm:$0xff]  ;;  %v11584_v31 = vld [vmem:[%s19540_s3 + $0x120] sm:$0xff] }
 0x4bb   :  { %v10444_v50 = vld [vmem:[#allocation3 + $0xec] sm:$0xff]  ;;  %v10445_v11 = vld [vmem:[#allocation3 + $0xf4] sm:$0xff]  ;;  %v14443_v26 = vpack.c.bf16 %v11586_v28, %v11584_v31  ;;  %v10341_v28 = vld [vmem:[#allocation3 + $0xa0] sm:$0xff] }
 0x4bc   :  { %v11251_v9 = vld [vmem:[#allocation4] ss:$2 sm:$0xff]  ;;  %v11283_v4 = vld [vmem:[#allocation4 + $0x1] ss:$2 sm:$0xff]  ;;  %14432 = vmatpush1.bf16.msra.mxu1 %v14431_v1 }
 0x4bd   :  { %10516 = vrot.lane.b32.xlu1 %v10373_v38, %s14643_s26  ;;  %14434 = vmatprep.subr.bf16.mxu1 %v14433_v6  ;;  %v11314_v2 = vmax.f32 %v11251_v9, %v11283_v4  ;;  %v10339_v4 = vld [vmem:[#allocation3 + $0x88] sm:$0xff]  ;;  %s14656_s26 = smov 76  }
 0x4be   :  { %10706 = vrot.lane.b32.xlu0 %v10420_v39, %s14648_s17 }
 0x4bf   :  { %v14305_v48 = vpop.f32.mrb[26].mxu1 }
 0x4c0   :  { %v11100_v47 = vadd.f32 %v14305_v48, %v18709_v33  ;;  %v11094_v51 = vpop.f32.mrb[27].mxu1  ;;  %14436 = vmatpush1.bf16.msra.mxu1 %v14435_v5  ;;  %v11588_v48 = vld [vmem:[%s19540_s3 + $0x140] sm:$0x3] }
 0x4c1   :  { %10612 = vrot.lane.b32.xlu1 %v10397_v49, %s14647_s23  ;;  %v11095_v56 = vadd.f32 %v11094_v51, %v18709_v33  ;;  %14438 = vmatprep.subr.bf16.mxu1 %v14437_v16  ;;  %s14668_s23 = smov 40  }
 0x4c2   :  { %10802 = vrot.lane.b32.xlu0 %v10444_v50, %s14649_s2  ;;  %v11206_v57 = vmax.f32 %v11100_v47, 0.0 }
 0x4c3   :  { %v11205_v59 = vmax.f32 %v11095_v56, 0.0 }
 0x4c4   :  { %11230 = vst.msk [vmem:[#allocation4 + $0x18] sm:$0xff] %vm10879_vm12, %v11206_v57  ;;  %14440 = vmatpush1.bf16.msra.mxu1 %v14439_v13 }
 0x4c5   :  { %11229 = vst.msk [vmem:[#allocation4 + $0x10] sm:$0xff] %vm10879_vm12, %v11205_v59  ;;  %10708 = vrot.lane.b32.xlu1 %v10421_v63, %s14648_s17  ;;  %14442 = vmatprep.subr.bf16.mxu1 %v14441_v29 }
 0x4c8   :  { %14444 = vmatpush1.bf16.msra.mxu1 %v14443_v26 }
 0x4c9   :  { %10804 = vrot.lane.b32.xlu1 %v10445_v11, %s14649_s2  ;;  %14057 = vmatprep.subr.msk.mxu1 %vm11014_vm9, %v11589_v45  ;;  %s14665_s2 = smov 126  }
 0x4cc   :  { %v11253_v3 = vld [vmem:[#allocation4 + $0x10] ss:$2 sm:$0x3]  ;;  %v11285_v20 = vld [vmem:[#allocation4 + $0x11] ss:$2 sm:$0x3]  ;;  %14058 = vmatpush1.msk.msra.mxu1 %vm11014_vm9, %v11588_v48 }
 0x4cd   :  { %v11315_v19 = vmax.f32 %v11253_v3, %v11285_v20  ;;  %v11331_v21 = vld [vmem:[#allocation4 + $0x2] ss:$2 sm:$0xff]  ;;  %v11333_v22 = vld [vmem:[#allocation4 + $0x12] ss:$2 sm:$0x3] }
 0x4ce   :  { %v11362_v12 = vmax.f32 %v11314_v2, %v11331_v21  ;;  %v11379_v24 = vld [vmem:[#allocation4 + $0x3] ss:$2 sm:$0xff]  ;;  %v11381_v32 = vld [vmem:[#allocation4 + $0x13] ss:$2 sm:$0x3] }
 0x4cf   :  { %v11363_v23 = vmax.f32 %v11315_v19, %v11333_v22  ;;  %v14308_v30 = vpop.f32.mrb[28].mxu1  ;;  %v10340_v20 = vld [vmem:[#allocation3 + $0x90] sm:$0xff] }
 0x4d0   :  { %v11410_v36 = vmax.f32 %v11362_v12, %v11379_v24  ;;  %v11110_v37 = vadd.f32 %v14308_v30, %v18709_v33  ;;  %v11104_v38 = vpop.f32.mrb[29].mxu1 }
 0x4d1   :  { %v11411_v39 = vmax.f32 %v11363_v23, %v11381_v32  ;;  %v11105_v43 = vadd.f32 %v11104_v38, %v18709_v33 }
 0x4d2   :  { %11426 = vst.msk [vmem:[#allocation5] sm:$0xff] %vm10879_vm12, %v11410_v36  ;;  %v11208_v25 = vmax.f32 %v11110_v37, 0.0 }
 0x4d3   :  { %v11207_v44 = vmax.f32 %v11105_v43, 0.0  ;;  %11428 = vst.msk [vmem:[#allocation5 + $0x8] sm:$0x3] %vm11427_vm15, %v11411_v39 }
 0x4d4   :  { %11232 = vst.msk [vmem:[#allocation4 + $0x28] sm:$0xff] %vm10879_vm12, %v11208_v25 }
 0x4d5   :  { %11231 = vst.msk [vmem:[#allocation4 + $0x20] sm:$0xff] %vm10879_vm12, %v11207_v44  ;;  %v10342_v44 = vld [vmem:[#allocation3 + $0xa8] sm:$0xff] }
 0x4d6   :  { %v10495_v49 = vpop.permute.xlu1 %10494 }
 0x4d7   :  { %v10591_v46 = vpop.permute.xlu0 %10590  ;;  %v10842_v56 = vsel %vm9186_vm5, %v10338_v27, %v10495_v49 }
 0x4d8   :  { %v10867_v18 = vsel %vm10854_vm11, %v10842_v56, %v10591_v46 }
 0x4da   :  { %v11459_v34 = vld [vmem:[#allocation5 + $0x2] sm:$0xff]  ;;  %v10497_v57 = vpop.permute.xlu1 %10496 }
 0x4db   :  { %v11451_v47 = vld [vmem:[#allocation5 + $0x1] sm:$0xff]  ;;  %v11289_v51 = vld [vmem:[#allocation4 + $0x29] ss:$2 sm:$0x3]  ;;  %11507 = vrot.lane.b32.xlu1 %v11459_v34, %s14650_s21  ;;  %v10687_v58 = vpop.permute.xlu0 %10686  ;;  %v10843_v5 = vsel %vm9186_vm5, %v10339_v4, %v10497_v57 }
 0x4dc   :  { %v11257_v50 = vld [vmem:[#allocation4 + $0x28] ss:$2 sm:$0x3]  ;;  %11475 = vrot.lane.b32.xlu0 %v11451_v47, %s14648_s17  ;;  %v11255_v59 = vld [vmem:[#allocation4 + $0x18] ss:$2 sm:$0xff]  ;;  %v10892_v7 = vsel %vm10879_vm12, %v10867_v18, %v10687_v58 }
 0x4dd   :  { %v11317_v52 = vmax.f32 %v11257_v50, %v11289_v51  ;;  %v11337_v53 = vld [vmem:[#allocation4 + $0x2a] ss:$2 sm:$0x3]  ;;  %v11287_v60 = vld [vmem:[#allocation4 + $0x19] ss:$2 sm:$0xff]  ;;  %v10343_v51 = vld [vmem:[#allocation3 + $0xb0] sm:$0xff] }
 0x4de   :  { %v11316_v62 = vmax.f32 %v11255_v59, %v11287_v60  ;;  %v11385_v63 = vld [vmem:[#allocation4 + $0x2b] ss:$2 sm:$0x3]  ;;  %v11335_v0 = vld [vmem:[#allocation4 + $0x1a] ss:$2 sm:$0xff]  ;;  %v10593_v10 = vpop.permute.xlu1 %10592 }
 0x4df   :  { %v11365_v61 = vmax.f32 %v11317_v52, %v11337_v53  ;;  %v10783_v11 = vpop.permute.xlu0 %10782  ;;  %v11383_v14 = vld [vmem:[#allocation4 + $0x1b] ss:$2 sm:$0xff]  ;;  %v10868_v15 = vsel %vm10854_vm11, %v10843_v5, %v10593_v10 }
 0x4e0   :  { %v11364_v6 = vmax.f32 %v11316_v62, %v11335_v0  ;;  %v10917_v8 = vsel %vm10904_vm13, %v10892_v7, %v10783_v11  ;;  %v10344_v62 = vld [vmem:[#allocation3 + $0xc0] sm:$0xff] }
 0x4e1   :  { %v11413_v1 = vmax.f32 %v11365_v61, %v11385_v63  ;;  %14318 = vmatprep.mubr.msk.f32.mxu1 %vm10941_vm14, %v10917_v8 }
 0x4e2   :  { %v11412_v9 = vmax.f32 %v11364_v6, %v11383_v14  ;;  %v10689_v16 = vpop.permute.xlu1 %10688  ;;  %v10345_v14 = vld [vmem:[#allocation3 + $0xc8] sm:$0xff] }
 0x4e3   :  { %11430 = vst.msk [vmem:[#allocation5 + $0x18] sm:$0x3] %vm11427_vm15, %v11413_v1  ;;  %v10785_v17 = vpop.permute.xlu0 %10784  ;;  %v10893_v54 = vsel %vm10879_vm12, %v10868_v15, %v10689_v16 }
 0x4e4   :  { %11429 = vst.msk [vmem:[#allocation5 + $0x10] sm:$0xff] %vm10879_vm12, %v11412_v9  ;;  %v10918_v55 = vsel %vm10904_vm13, %v10893_v54, %v10785_v17 }
 0x4e5   :  { %14319 = vmatmul.mubr.msk.f32.gmra.mrb[36].mxu1 %vm10941_vm14, %v10918_v55 }
 0x4e6   :  { %v10499_v2 = vpop.permute.xlu1 %10498 }
 0x4e7   :  { %v10595_v3 = vpop.permute.xlu0 %10594  ;;  %v10844_v22 = vsel %vm9186_vm5, %v10340_v20, %v10499_v2  ;;  %v10346_v2 = vld [vmem:[#allocation3 + $0xd0] sm:$0xff] }
 0x4e8   :  { %v10869_v23 = vsel %vm10854_vm11, %v10844_v22, %v10595_v3 }
 0x4ea   :  { %v10501_v12 = vpop.permute.xlu1 %10500 }
 0x4eb   :  { %v11460_v19 = vld [vmem:[#allocation5 + $0x12] sm:$0xff]  ;;  %v10691_v13 = vpop.permute.xlu0 %10690  ;;  %v10845_v32 = vsel %vm9186_vm5, %v10341_v28, %v10501_v12 }
 0x4ec   :  { %v11452_v21 = vld [vmem:[#allocation5 + $0x11] sm:$0xff]  ;;  %11509 = vrot.lane.b32.xlu1 %v11460_v19, %s14650_s21  ;;  %v10894_v24 = vsel %vm10879_vm12, %v10869_v23, %v10691_v13 }
 0x4ed   :  { %11477 = vrot.lane.b32.xlu0 %v11452_v21, %s14648_s17 }
 0x4ee   :  { %v10597_v30 = vpop.permute.xlu1 %10596 }
 0x4ef   :  { %v10787_v29 = vpop.permute.xlu0 %10786  ;;  %v10870_v36 = vsel %vm10854_vm11, %v10845_v32, %v10597_v30  ;;  %v10347_v32 = vld [vmem:[#allocation3 + $0xe0] sm:$0xff] }
 0x4f0   :  { %v10919_v31 = vsel %vm10904_vm13, %v10894_v24, %v10787_v29 }
 0x4f1   :  { %14321 = vmatprep.mubr.msk.f32.mxu1 %vm10941_vm14, %v10919_v31 }
 0x4f2   :  { %v10693_v37 = vpop.permute.xlu1 %10692 }
 0x4f3   :  { %v10789_v38 = vpop.permute.xlu0 %10788  ;;  %v10895_v39 = vsel %vm10879_vm12, %v10870_v36, %v10693_v37 }
 0x4f4   :  { %v10920_v43 = vsel %vm10904_vm13, %v10895_v39, %v10789_v38 }
 0x4f5   :  { %14322 = vmatmul.mubr.msk.f32.gmra.mrb[38].mxu1 %vm10941_vm14, %v10920_v43 }
 0x4f6   :  { %v10503_v25 = vpop.permute.xlu1 %10502 }
 0x4f7   :  { %v10599_v26 = vpop.permute.xlu0 %10598  ;;  %v10846_v45 = vsel %vm9186_vm5, %v10342_v44, %v10503_v25 }
 0x4f8   :  { %v10871_v46 = vsel %vm10854_vm11, %v10846_v45, %v10599_v26  ;;  %v10348_v45 = vld [vmem:[#allocation3 + $0xe8] sm:$0xff] }
 0x4fa   :  { %v10505_v48 = vpop.permute.xlu1 %10504 }
 0x4fb   :  { %v10695_v49 = vpop.permute.xlu0 %10694  ;;  %v10847_v52 = vsel %vm9186_vm5, %v10343_v51, %v10505_v48 }
 0x4fc   :  { %v10896_v27 = vsel %vm10879_vm12, %v10871_v46, %v10695_v49 }
 0x4fe   :  { %v10601_v34 = vpop.permute.xlu1 %10600 }
 0x4ff   :  { %v10791_v47 = vpop.permute.xlu0 %10790  ;;  %v10872_v53 = vsel %vm10854_vm11, %v10847_v52, %v10601_v34 }
 0x500   :  { %v10921_v50 = vsel %vm10904_vm13, %v10896_v27, %v10791_v47 }
 0x501   :  { %14324 = vmatprep.mubr.msk.f32.mxu1 %vm10941_vm14, %v10921_v50 }
 0x502   :  { %v10697_v56 = vpop.permute.xlu1 %10696 }
 0x503   :  { %v10793_v57 = vpop.permute.xlu0 %10792  ;;  %v10897_v58 = vsel %vm10879_vm12, %v10872_v53, %v10697_v56  ;;  %v10349_v53 = vld [vmem:[#allocation3 + $0xf0] sm:$0xff] }
 0x504   :  { %v10922_v59 = vsel %vm10904_vm13, %v10897_v58, %v10793_v57 }
 0x505   :  { %14325 = vmatmul.mubr.msk.f32.gmra.mrb[40].mxu1 %vm10941_vm14, %v10922_v59 }
 0x506   :  { %v10507_v60 = vpop.permute.xlu1 %10506 }
 0x507   :  { %v10603_v61 = vpop.permute.xlu0 %10602  ;;  %v10848_v63 = vsel %vm9186_vm5, %v10344_v62, %v10507_v60 }
 0x508   :  { %v10873_v1 = vsel %vm10854_vm11, %v10848_v63, %v10603_v61  ;;  %v11443_v63 = vld [vmem:[#allocation5] sm:$0xff] }
 0x50a   :  { %v10509_v0 = vpop.permute.xlu1 %10508 }
 0x50b   :  { %v10699_v18 = vpop.permute.xlu0 %10698  ;;  %v10849_v8 = vsel %vm9186_vm5, %v10345_v14, %v10509_v0 }
 0x50c   :  { %v10898_v6 = vsel %vm10879_vm12, %v10873_v1, %v10699_v18 }
 0x50e   :  { %v10605_v7 = vpop.permute.xlu1 %10604 }
 0x50f   :  { %v10795_v10 = vpop.permute.xlu0 %10794  ;;  %v10874_v9 = vsel %vm10854_vm11, %v10849_v8, %v10605_v7  ;;  %v11444_v8 = vld [vmem:[#allocation5 + $0x10] sm:$0xff] }
 0x510   :  { %v10923_v11 = vsel %vm10904_vm13, %v10898_v6, %v10795_v10 }
 0x511   :  { %14327 = vmatprep.mubr.msk.f32.mxu1 %vm10941_vm14, %v10923_v11 }
 0x512   :  { %v10701_v4 = vpop.permute.xlu1 %10700 }
 0x513   :  { %v10797_v5 = vpop.permute.xlu0 %10796  ;;  %v10899_v15 = vsel %vm10879_vm12, %v10874_v9, %v10701_v4 }
 0x514   :  { %v10924_v16 = vsel %vm10904_vm13, %v10899_v15, %v10797_v5 }
 0x515   :  { %14328 = vmatmul.mubr.msk.f32.gmra.mrb[42].mxu1 %vm10941_vm14, %v10924_v16 }
 0x516   :  { %v10511_v17 = vpop.permute.xlu1 %10510 }
 0x517   :  { %v10607_v54 = vpop.permute.xlu0 %10606  ;;  %v10850_v19 = vsel %vm9186_vm5, %v10346_v2, %v10511_v17 }
 0x518   :  { %v10875_v24 = vsel %vm10854_vm11, %v10850_v19, %v10607_v54 }
 0x51a   :  { %v14311_v55 = vpop.f32.mrb[30].mxu1 }
 0x51b   :  { %v11120_v3 = vadd.f32 %v14311_v55, %v18709_v33  ;;  %v11114_v20 = vpop.f32.mrb[31].mxu1  ;;  %v10703_v22 = vpop.permute.xlu0 %10702 }
 0x51c   :  { %v11115_v21 = vadd.f32 %v11114_v20, %v18709_v33  ;;  %v10900_v30 = vsel %vm10879_vm12, %v10875_v24, %v10703_v22 }
 0x51d   :  { %v11210_v12 = vmax.f32 %v11120_v3, 0.0 }
 0x51e   :  { %v11209_v13 = vmax.f32 %v11115_v21, 0.0  ;;  %v10513_v23 = vpop.permute.xlu1 %10512 }
 0x51f   :  { %11234 = vst.msk [vmem:[#allocation4 + $0x38] sm:$0xff] %vm10879_vm12, %v11210_v12  ;;  %v10799_v29 = vpop.permute.xlu0 %10798  ;;  %v10851_v36 = vsel %vm9186_vm5, %v10347_v32, %v10513_v23 }
 0x520   :  { %11233 = vst.msk [vmem:[#allocation4 + $0x30] sm:$0xff] %vm10879_vm12, %v11209_v13  ;;  %v10925_v31 = vsel %vm10904_vm13, %v10900_v30, %v10799_v29 }
 0x521   :  { %14330 = vmatprep.mubr.msk.f32.mxu1 %vm10941_vm14, %v10925_v31 }
 0x522   :  { %v10609_v28 = vpop.permute.xlu1 %10608 }
 0x523   :  { %v10801_v37 = vpop.permute.xlu0 %10800  ;;  %v10876_v38 = vsel %vm10854_vm11, %v10851_v36, %v10609_v28 }
 0x526   :  { %v10705_v39 = vpop.permute.xlu1 %10704 }
 0x527   :  { %v10901_v43 = vsel %vm10879_vm12, %v10876_v38, %v10705_v39  ;;  %v11259_v16 = vld [vmem:[#allocation4 + $0x30] ss:$2 sm:$0xff]  ;;  %v11291_v17 = vld [vmem:[#allocation4 + $0x31] ss:$2 sm:$0xff] }
 0x528   :  { %v10926_v25 = vsel %vm10904_vm13, %v10901_v43, %v10801_v37  ;;  %v11318_v54 = vmax.f32 %v11259_v16, %v11291_v17 }
 0x529   :  { %14331 = vmatmul.mubr.msk.f32.gmra.mrb[44].mxu1 %vm10941_vm14, %v10926_v25 }
 0x52b   :  { %v10515_v26 = vpop.permute.xlu1 %10514 }
 0x52c   :  { %v10611_v44 = vpop.permute.xlu0 %10610  ;;  %v10852_v48 = vsel %vm9186_vm5, %v10348_v45, %v10515_v26 }
 0x52d   :  { %v10877_v27 = vsel %vm10854_vm11, %v10852_v48, %v10611_v44 }
 0x52f   :  { %v10517_v49 = vpop.permute.xlu1 %10516 }
 0x530   :  { %v10707_v46 = vpop.permute.xlu0 %10706  ;;  %v10853_v56 = vsel %vm9186_vm5, %v10349_v53, %v10517_v49 }
 0x531   :  { %v10902_v34 = vsel %vm10879_vm12, %v10877_v27, %v10707_v46 }
 0x533   :  { %v10613_v47 = vpop.permute.xlu1 %10612 }
 0x534   :  { %v10803_v50 = vpop.permute.xlu0 %10802  ;;  %v10878_v57 = vsel %vm10854_vm11, %v10853_v56, %v10613_v47 }
 0x535   :  { %v10927_v51 = vsel %vm10904_vm13, %v10902_v34, %v10803_v50 }
 0x536   :  { %14333 = vmatprep.mubr.msk.f32.mxu1 %vm10941_vm14, %v10927_v51 }
 0x537   :  { %v10709_v52 = vpop.permute.xlu1 %10708 }
 0x538   :  { %v10903_v58 = vsel %vm10879_vm12, %v10878_v57, %v10709_v52 }
 0x53b   :  { %v10805_v59 = vpop.permute.xlu1 %10804 }
 0x53c   :  { %v10928_v60 = vsel %vm10904_vm13, %v10903_v58, %v10805_v59 }
 0x53d   :  { %14334 = vmatmul.mubr.msk.f32.gmra.mrb[46].mxu1 %vm10941_vm14, %v10928_v60  ;;  %vm11901_vm14 = vcmask 64512  }
 0x54d   :  { %v11508_v61 = vpop.permute.xlu1 %11507 }
 0x54e   :  { %v11476_v62 = vpop.permute.xlu0 %11475  ;;  %14059 = vmatprep.mubr.msk.f32.mxu1 %vm11590_vm0, %v11508_v61 }
 0x54f   :  { %v11531_v0 = vsel %vm10879_vm12, %v11443_v63, %v11476_v62 }
 0x550   :  { %v11540_v18 = vsel %vm11539_vm1, %v11531_v0, %v11508_v61 }
 0x551   :  { %11678 = vmatmul.mubr.f32.vlgmr.msra.gmra.mrb[48].mxu1 %v11540_v18 }
 0x55b   :  { %v14314_v1 = vpop.f32.mrb[32].mxu1 }
 0x55c   :  { %v11130_v6 = vadd.f32 %v14314_v1, %v18709_v33  ;;  %v11124_v7 = vpop.f32.mrb[33].mxu1 }
 0x55d   :  { %v11125_v10 = vadd.f32 %v11124_v7, %v18709_v33 }
 0x55e   :  { %v11212_v11 = vmax.f32 %v11130_v6, 0.0  ;;  %v11510_v14 = vpop.permute.xlu1 %11509 }
 0x55f   :  { %v11478_v9 = vpop.permute.xlu0 %11477  ;;  %v11211_v4 = vmax.f32 %v11125_v10, 0.0  ;;  %14060 = vmatprep.mubr.msk.f32.mxu1 %vm11590_vm0, %v11510_v14 }
 0x560   :  { %v11532_v5 = vsel %vm10879_vm12, %v11444_v8, %v11478_v9  ;;  %11236 = vst.msk [vmem:[#allocation4 + $0x48] sm:$0xff] %vm10879_vm12, %v11212_v11 }
 0x561   :  { %v11541_v15 = vsel %vm11539_vm1, %v11532_v5, %v11510_v14  ;;  %11235 = vst.msk [vmem:[#allocation4 + $0x40] sm:$0xff] %vm10879_vm12, %v11211_v4 }
 0x562   :  { %11684 = vmatmul.mubr.f32.gmra.mrb[50].mxu1 %v11541_v15 }
 0x568   :  { %v11261_v55 = vld [vmem:[#allocation4 + $0x40] ss:$2 sm:$0x3]  ;;  %v11293_v2 = vld [vmem:[#allocation4 + $0x41] ss:$2 sm:$0x3] }
 0x569   :  { %v11319_v3 = vmax.f32 %v11261_v55, %v11293_v2  ;;  %v11339_v20 = vld [vmem:[#allocation4 + $0x32] ss:$2 sm:$0xff]  ;;  %v11341_v19 = vld [vmem:[#allocation4 + $0x42] ss:$2 sm:$0x3] }
 0x56a   :  { %v11366_v21 = vmax.f32 %v11318_v54, %v11339_v20  ;;  %v11387_v12 = vld [vmem:[#allocation4 + $0x33] ss:$2 sm:$0xff]  ;;  %v11389_v13 = vld [vmem:[#allocation4 + $0x43] ss:$2 sm:$0x3] }
 0x56b   :  { %v11367_v22 = vmax.f32 %v11319_v3, %v11341_v19 }
 0x56c   :  { %v11414_v23 = vmax.f32 %v11366_v21, %v11387_v12 }
 0x56d   :  { %v11415_v24 = vmax.f32 %v11367_v22, %v11389_v13 }
 0x56e   :  { %11431 = vst.msk [vmem:[#allocation5 + $0x20] sm:$0xff] %vm10879_vm12, %v11414_v23 }
 0x56f   :  { %11432 = vst.msk [vmem:[#allocation5 + $0x28] sm:$0x3] %vm11427_vm15, %v11415_v24 }
 0x576   :  { %v11461_v30 = vld [vmem:[#allocation5 + $0x22] sm:$0xff] }
 0x577   :  { %v11453_v29 = vld [vmem:[#allocation5 + $0x21] sm:$0xff]  ;;  %11511 = vrot.lane.b32.xlu1 %v11461_v30, %s14650_s21 }
 0x578   :  { %11479 = vrot.lane.b32.xlu0 %v11453_v29, %s14648_s17 }
 0x580   :  { %v14317_v31 = vpop.f32.mrb[34].mxu1 }
 0x581   :  { %v11140_v28 = vadd.f32 %v14317_v31, %v18709_v33  ;;  %v11134_v32 = vpop.f32.mrb[35].mxu1 }
 0x582   :  { %v11135_v36 = vadd.f32 %v11134_v32, %v18709_v33 }
 0x583   :  { %v11214_v37 = vmax.f32 %v11140_v28, 0.0 }
 0x584   :  { %v11213_v38 = vmax.f32 %v11135_v36, 0.0 }
 0x585   :  { %11238 = vst.msk [vmem:[#allocation4 + $0x58] sm:$0xff] %vm10879_vm12, %v11214_v37 }
 0x586   :  { %11237 = vst.msk [vmem:[#allocation4 + $0x50] sm:$0xff] %vm10879_vm12, %v11213_v38 }
 0x58c   :  { %v11265_v39 = vld [vmem:[#allocation4 + $0x58] ss:$2 sm:$0x3]  ;;  %v11297_v43 = vld [vmem:[#allocation4 + $0x59] ss:$2 sm:$0x3] }
 0x58d   :  { %v11321_v25 = vmax.f32 %v11265_v39, %v11297_v43  ;;  %v11345_v26 = vld [vmem:[#allocation4 + $0x5a] ss:$2 sm:$0x3]  ;;  %v11263_v44 = vld [vmem:[#allocation4 + $0x48] ss:$2 sm:$0xff]  ;;  %v11445_v39 = vld [vmem:[#allocation5 + $0x20] sm:$0xff] }
 0x58e   :  { %v11295_v45 = vld [vmem:[#allocation4 + $0x49] ss:$2 sm:$0xff]  ;;  %v11393_v46 = vld [vmem:[#allocation4 + $0x5b] ss:$2 sm:$0x3] }
 0x58f   :  { %v11369_v48 = vmax.f32 %v11321_v25, %v11345_v26  ;;  %v11320_v49 = vmax.f32 %v11263_v44, %v11295_v45  ;;  %v11343_v27 = vld [vmem:[#allocation4 + $0x4a] ss:$2 sm:$0xff]  ;;  %v11391_v50 = vld [vmem:[#allocation4 + $0x4b] ss:$2 sm:$0xff] }
 0x591   :  { %v11417_v34 = vmax.f32 %v11369_v48, %v11393_v46  ;;  %v11368_v47 = vmax.f32 %v11320_v49, %v11343_v27 }
 0x593   :  { %11434 = vst.msk [vmem:[#allocation5 + $0x38] sm:$0x3] %vm11427_vm15, %v11417_v34  ;;  %v11416_v51 = vmax.f32 %v11368_v47, %v11391_v50 }
 0x595   :  { %11433 = vst.msk [vmem:[#allocation5 + $0x30] sm:$0xff] %vm10879_vm12, %v11416_v51 }
 0x59c   :  { %v11462_v52 = vld [vmem:[#allocation5 + $0x32] sm:$0xff] }
 0x59d   :  { %v11454_v53 = vld [vmem:[#allocation5 + $0x31] sm:$0xff]  ;;  %11513 = vrot.lane.b32.xlu1 %v11462_v52, %s14650_s21 }
 0x59e   :  { %11481 = vrot.lane.b32.xlu0 %v11454_v53, %s14648_s17 }
 0x5b8   :  { %v14320_v56 = vpop.f32.mrb[36].mxu1 }
 0x5b9   :  { %v11150_v57 = vadd.f32 %v14320_v56, %v18709_v33  ;;  %v11144_v58 = vpop.f32.mrb[37].mxu1 }
 0x5ba   :  { %v11145_v59 = vadd.f32 %v11144_v58, %v18709_v33 }
 0x5bb   :  { %v11216_v60 = vmax.f32 %v11150_v57, 0.0 }
 0x5bc   :  { %v11215_v61 = vmax.f32 %v11145_v59, 0.0 }
 0x5bd   :  { %11240 = vst.msk [vmem:[#allocation4 + $0x68] sm:$0xff] %vm10879_vm12, %v11216_v60 }
 0x5be   :  { %11239 = vst.msk [vmem:[#allocation4 + $0x60] sm:$0xff] %vm10879_vm12, %v11215_v61 }
 0x5c5   :  { %v11267_v7 = vld [vmem:[#allocation4 + $0x60] ss:$2 sm:$0xff]  ;;  %v11299_v10 = vld [vmem:[#allocation4 + $0x61] ss:$2 sm:$0xff] }
 0x5c6   :  { %v11322_v11 = vmax.f32 %v11267_v7, %v11299_v10 }
 0x5c8   :  { %v14323_v62 = vpop.f32.mrb[38].mxu1 }
 0x5c9   :  { %v11160_v63 = vadd.f32 %v14323_v62, %v18709_v33  ;;  %v11154_v0 = vpop.f32.mrb[39].mxu1 }
 0x5ca   :  { %v11155_v18 = vadd.f32 %v11154_v0, %v18709_v33 }
 0x5cb   :  { %v11218_v1 = vmax.f32 %v11160_v63, 0.0 }
 0x5cc   :  { %v11217_v6 = vmax.f32 %v11155_v18, 0.0 }
 0x5cd   :  { %11242 = vst.msk [vmem:[#allocation4 + $0x78] sm:$0xff] %vm10879_vm12, %v11218_v1 }
 0x5ce   :  { %11241 = vst.msk [vmem:[#allocation4 + $0x70] sm:$0xff] %vm10879_vm12, %v11217_v6 }
 0x5d5   :  { %v11269_v14 = vld [vmem:[#allocation4 + $0x70] ss:$2 sm:$0x3]  ;;  %v11301_v8 = vld [vmem:[#allocation4 + $0x71] ss:$2 sm:$0x3] }
 0x5d6   :  { %v11323_v9 = vmax.f32 %v11269_v14, %v11301_v8  ;;  %v11347_v4 = vld [vmem:[#allocation4 + $0x62] ss:$2 sm:$0xff]  ;;  %v11349_v5 = vld [vmem:[#allocation4 + $0x72] ss:$2 sm:$0x3] }
 0x5d7   :  { %v11370_v15 = vmax.f32 %v11322_v11, %v11347_v4  ;;  %v11395_v17 = vld [vmem:[#allocation4 + $0x63] ss:$2 sm:$0xff]  ;;  %v11397_v55 = vld [vmem:[#allocation4 + $0x73] ss:$2 sm:$0x3] }
 0x5d8   :  { %v11371_v16 = vmax.f32 %v11323_v9, %v11349_v5  ;;  %v14326_v54 = vpop.f32.mrb[40].mxu1 }
 0x5d9   :  { %v11418_v2 = vmax.f32 %v11370_v15, %v11395_v17  ;;  %v11170_v3 = vadd.f32 %v14326_v54, %v18709_v33  ;;  %v11164_v20 = vpop.f32.mrb[41].mxu1 }
 0x5da   :  { %v11419_v19 = vmax.f32 %v11371_v16, %v11397_v55  ;;  %v11165_v21 = vadd.f32 %v11164_v20, %v18709_v33  ;;  %v11446_v55 = vld [vmem:[#allocation5 + $0x30] sm:$0xff] }
 0x5db   :  { %11435 = vst.msk [vmem:[#allocation5 + $0x40] sm:$0xff] %vm10879_vm12, %v11418_v2  ;;  %v11220_v22 = vmax.f32 %v11170_v3, 0.0 }
 0x5dc   :  { %11436 = vst.msk [vmem:[#allocation5 + $0x48] sm:$0x3] %vm11427_vm15, %v11419_v19  ;;  %v11219_v12 = vmax.f32 %v11165_v21, 0.0 }
 0x5dd   :  { %11244 = vst.msk [vmem:[#allocation4 + $0x88] sm:$0xff] %vm10879_vm12, %v11220_v22 }
 0x5de   :  { %11243 = vst.msk [vmem:[#allocation4 + $0x80] sm:$0xff] %vm10879_vm12, %v11219_v12 }
 0x5e3   :  { %v11463_v13 = vld [vmem:[#allocation5 + $0x42] sm:$0xff] }
 0x5e4   :  { %v11455_v23 = vld [vmem:[#allocation5 + $0x41] sm:$0xff]  ;;  %v11305_v30 = vld [vmem:[#allocation4 + $0x89] ss:$2 sm:$0x3]  ;;  %11515 = vrot.lane.b32.xlu1 %v11463_v13, %s14650_s21  ;;  %v11727_v13 = vlaneseq }
 0x5e5   :  { %v11273_v24 = vld [vmem:[#allocation4 + $0x88] ss:$2 sm:$0x3]  ;;  %11483 = vrot.lane.b32.xlu0 %v11455_v23, %s14648_s17  ;;  %v11271_v28 = vld [vmem:[#allocation4 + $0x78] ss:$2 sm:$0xff] }
 0x5e6   :  { %v11325_v29 = vmax.f32 %v11273_v24, %v11305_v30  ;;  %v11353_v31 = vld [vmem:[#allocation4 + $0x8a] ss:$2 sm:$0x3]  ;;  %v11303_v32 = vld [vmem:[#allocation4 + $0x79] ss:$2 sm:$0xff]  ;;  %vm11824_vm2 = vcmp.lt.s32.totalorder %v11727_v13, 162 }
 0x5e7   :  { %v11324_v37 = vmax.f32 %v11271_v28, %v11303_v32  ;;  %v11401_v25 = vld [vmem:[#allocation4 + $0x8b] ss:$2 sm:$0x3]  ;;  %v11351_v26 = vld [vmem:[#allocation4 + $0x7a] ss:$2 sm:$0xff]  ;;  %vm11842_vm4 = vcmp.ge.s32.totalorder %v11727_v13, 34 }
 0x5e8   :  { %v11373_v36 = vmax.f32 %v11325_v29, %v11353_v31  ;;  %v14329_v45 = vpop.f32.mrb[42].mxu1  ;;  %v11399_v47 = vld [vmem:[#allocation4 + $0x7b] ss:$2 sm:$0xff]  ;;  %v19005_v29 = vshrl.u32 %v11727_v13, 7  ;;  %vm11843_vm5 = vcmp.lt.s32.totalorder %v11727_v13, 196  ;;  %vm11862_vm8 = vcmp.ge.s32.totalorder %v11727_v13, 68 }
 0x5e9   :  { %v11512_v38 = vpop.permute.xlu1 %11511  ;;  %v11372_v49 = vmax.f32 %v11324_v37, %v11351_v26  ;;  %v11180_v46 = vadd.f32 %v14329_v45, %v18709_v33  ;;  %v11174_v27 = vpop.f32.mrb[43].mxu1  ;;  %vm11863_vm9 = vcmp.lt.s32.totalorder %v11727_v13, 230  ;;  %vm11844_vm10 = vmand %vm11842_vm4, %vm11843_vm5  ;;  %vm19071_vm13 = vcmp.lt.s32.totalorder %v11727_v13, 264 }
 0x5ea   :  { %v11480_v43 = vpop.permute.xlu0 %11479  ;;  %14061 = vmatprep.mubr.msk.f32.mxu1 %vm11590_vm0, %v11512_v38  ;;  %v11421_v48 = vmax.f32 %v11373_v36, %v11401_v25  ;;  %v11175_v50 = vadd.f32 %v11174_v27, %v18709_v33  ;;  %v19013_v31 = vsub.s32 0, %v19005_v29  ;;  %vm11864_vm11 = vmand %vm11862_vm8, %vm11863_vm9  ;;  %vm11881_vm4 = vcmask 834560  }
 0x5eb   :  { %v11533_v44 = vsel %vm10879_vm12, %v11445_v39, %v11480_v43  ;;  %v11420_v51 = vmax.f32 %v11372_v49, %v11399_v47  ;;  %v11222_v52 = vmax.f32 %v11180_v46, 0.0  ;;  %vm19094_vm8 = vcmp.ge.s32.totalorder %v11727_v13, 42 }
 0x5ec   :  { %v11542_v34 = vsel %vm11539_vm1, %v11533_v44, %v11512_v38  ;;  %11438 = vst.msk [vmem:[#allocation5 + $0x58] sm:$0x3] %vm11427_vm15, %v11421_v48  ;;  %v11221_v53 = vmax.f32 %v11175_v50, 0.0  ;;  %v19016_v38 = vsub.s32 1, %v19005_v29  ;;  %vm19099_vm9 = vcmp.lt.s32.totalorder %v11727_v13, 204 }
 0x5ed   :  { %11690 = vmatmul.mubr.f32.gmra.mrb[52].mxu1 %v11542_v34  ;;  %11437 = vst.msk [vmem:[#allocation5 + $0x50] sm:$0xff] %vm10879_vm12, %v11420_v51  ;;  %11246 = vst.msk [vmem:[#allocation4 + $0x98] sm:$0xff] %vm10879_vm12, %v11222_v52  ;;  %v13973_v44 = vld [vmem:[%s19541_s4 + $0x3] ss:$8 sm:$0x3] }
 0x5ee   :  { %11245 = vst.msk [vmem:[#allocation4 + $0x90] sm:$0xff] %vm10879_vm12, %v11221_v53  ;;  %v19028_v50 = vrot.slane %v13973_v44, %v19013_v31  ;;  %v19032_v53 = vrot.slane %v13973_v44, %v19016_v38 }
 0x5f4   :  { %v11464_v56 = vld [vmem:[#allocation5 + $0x52] sm:$0xff] }
 0x5f5   :  { %v11456_v57 = vld [vmem:[#allocation5 + $0x51] sm:$0xff]  ;;  %11517 = vrot.lane.b32.xlu1 %v11464_v56, %s14650_s21 }
 0x5f6   :  { %11485 = vrot.lane.b32.xlu0 %v11456_v57, %s14648_s17  ;;  %v11275_v0 = vld [vmem:[#allocation4 + $0x90] ss:$2 sm:$0xff]  ;;  %v11307_v18 = vld [vmem:[#allocation4 + $0x91] ss:$2 sm:$0xff] }
 0x5f7   :  { %v11326_v1 = vmax.f32 %v11275_v0, %v11307_v18 }
 0x5fc   :  { %v14332_v58 = vpop.f32.mrb[44].mxu1 }
 0x5fd   :  { %v11190_v59 = vadd.f32 %v14332_v58, %v18709_v33  ;;  %v11184_v60 = vpop.f32.mrb[45].mxu1 }
 0x5fe   :  { %v11185_v61 = vadd.f32 %v11184_v60, %v18709_v33 }
 0x5ff   :  { %v11224_v62 = vmax.f32 %v11190_v59, 0.0 }
 0x600   :  { %v11223_v63 = vmax.f32 %v11185_v61, 0.0 }
 0x601   :  { %11248 = vst.msk [vmem:[#allocation4 + $0xa8] sm:$0xff] %vm10879_vm12, %v11224_v62 }
 0x602   :  { %11247 = vst.msk [vmem:[#allocation4 + $0xa0] sm:$0xff] %vm10879_vm12, %v11223_v63 }
 0x609   :  { %v11277_v6 = vld [vmem:[#allocation4 + $0xa0] ss:$2 sm:$0x3]  ;;  %v11309_v7 = vld [vmem:[#allocation4 + $0xa1] ss:$2 sm:$0x3] }
 0x60a   :  { %v11327_v10 = vmax.f32 %v11277_v6, %v11309_v7  ;;  %v11355_v11 = vld [vmem:[#allocation4 + $0x92] ss:$2 sm:$0xff]  ;;  %v11357_v14 = vld [vmem:[#allocation4 + $0xa2] ss:$2 sm:$0x3] }
 0x60b   :  { %v11374_v8 = vmax.f32 %v11326_v1, %v11355_v11  ;;  %v11403_v4 = vld [vmem:[#allocation4 + $0x93] ss:$2 sm:$0xff]  ;;  %v11405_v5 = vld [vmem:[#allocation4 + $0xa3] ss:$2 sm:$0x3] }
 0x60c   :  { %v11375_v9 = vmax.f32 %v11327_v10, %v11357_v14 }
 0x60d   :  { %v11422_v15 = vmax.f32 %v11374_v8, %v11403_v4 }
 0x60e   :  { %v11423_v16 = vmax.f32 %v11375_v9, %v11405_v5 }
 0x60f   :  { %11439 = vst.msk [vmem:[#allocation5 + $0x60] sm:$0xff] %vm10879_vm12, %v11422_v15  ;;  %v11514_v54 = vpop.permute.xlu1 %11513 }
 0x610   :  { %11440 = vst.msk [vmem:[#allocation5 + $0x68] sm:$0x3] %vm11427_vm15, %v11423_v16  ;;  %v14335_v17 = vpop.f32.mrb[46].mxu1  ;;  %v11482_v2 = vpop.permute.xlu0 %11481  ;;  %14062 = vmatprep.mubr.msk.f32.mxu1 %vm11590_vm0, %v11514_v54 }
 0x611   :  { %v11200_v3 = vadd.f32 %v14335_v17, %v18709_v33  ;;  %v11534_v20 = vsel %vm10879_vm12, %v11446_v55, %v11482_v2  ;;  %v11194_v19 = vpop.f32.mrb[47].mxu1 }
 0x612   :  { %v11195_v22 = vadd.f32 %v11194_v19, %v18709_v33  ;;  %v11543_v12 = vsel %vm11539_vm1, %v11534_v20, %v11514_v54  ;;  %v13972_v33 = vld [vmem:[%s19541_s4 + $0x2] ss:$8 sm:$0x3]  ;;  %s14651_s4 = smov 68  }
 0x613   :  { %v11226_v21 = vmax.f32 %v11200_v3, 0.0  ;;  %11696 = vmatmul.mubr.f32.gmra.mrb[54].mxu1 %v11543_v12  ;;  %v19022_v49 = vrot.slane %v13972_v33, %v19013_v31  ;;  %v19025_v34 = vrot.slane %v13972_v33, %v19016_v38 }
 0x614   :  { %v11225_v23 = vmax.f32 %v11195_v22, 0.0 }
 0x615   :  { %11250 = vst.msk [vmem:[#allocation4 + $0xb8] sm:$0xff] %vm10879_vm12, %v11226_v21 }
 0x616   :  { %11249 = vst.msk [vmem:[#allocation4 + $0xb0] sm:$0xff] %vm10879_vm12, %v11225_v23 }
 0x617   :  { %v11465_v24 = vld [vmem:[#allocation5 + $0x62] sm:$0xff] }
 0x618   :  { %v11457_v30 = vld [vmem:[#allocation5 + $0x61] sm:$0xff]  ;;  %11519 = vrot.lane.b32.xlu1 %v11465_v24, %s14650_s21 }
 0x619   :  { %11487 = vrot.lane.b32.xlu0 %v11457_v30, %s14648_s17 }
 0x61c   :  { %v11281_v28 = vld [vmem:[#allocation4 + $0xb8] ss:$2 sm:$0x3]  ;;  %v11313_v32 = vld [vmem:[#allocation4 + $0xb9] ss:$2 sm:$0x3] }
 0x61d   :  { %v11329_v36 = vmax.f32 %v11281_v28, %v11313_v32  ;;  %v11361_v37 = vld [vmem:[#allocation4 + $0xba] ss:$2 sm:$0x3]  ;;  %v11279_v39 = vld [vmem:[#allocation4 + $0xa8] ss:$2 sm:$0xff] }
 0x61e   :  { %v11311_v43 = vld [vmem:[#allocation4 + $0xa9] ss:$2 sm:$0xff]  ;;  %v11409_v45 = vld [vmem:[#allocation4 + $0xbb] ss:$2 sm:$0x3] }
 0x61f   :  { %v11377_v25 = vmax.f32 %v11329_v36, %v11361_v37  ;;  %v11328_v26 = vmax.f32 %v11279_v39, %v11311_v43  ;;  %v11359_v48 = vld [vmem:[#allocation4 + $0xaa] ss:$2 sm:$0xff]  ;;  %v11407_v47 = vld [vmem:[#allocation4 + $0xab] ss:$2 sm:$0xff] }
 0x621   :  { %v11425_v46 = vmax.f32 %v11377_v25, %v11409_v45  ;;  %v11376_v27 = vmax.f32 %v11328_v26, %v11359_v48 }
 0x623   :  { %11442 = vst.msk [vmem:[#allocation5 + $0x78] sm:$0x3] %vm11427_vm15, %v11425_v46  ;;  %v11424_v51 = vmax.f32 %v11376_v27, %v11407_v47  ;;  %vm19076_vm15 = vcmp.ge.s32.totalorder %v11727_v13, 8 }
 0x624   :  { %v11679_v52 = vpop.f32.mrb[48].mxu1 }
 0x625   :  { %v11737_v56 = vmul.f32 %v19022_v49, %v11679_v52  ;;  %v11681_v57 = vpop.f32.mrb[49].mxu1  ;;  %11441 = vst.msk [vmem:[#allocation5 + $0x70] sm:$0xff] %vm10879_vm12, %v11424_v51 }
 0x626   :  { %v11738_v58 = vmul.f32 %v19025_v34, %v11681_v57 }
 0x627   :  { %v11764_v59 = vadd.f32 %v19028_v50, %v11737_v56 }
 0x628   :  { %v11765_v60 = vadd.f32 %v19032_v53, %v11738_v58 }
 0x629   :  { %v11780_v61 = vmax.f32 %v11764_v59, 0.0 }
 0x62a   :  { %v11781_v62 = vmax.f32 %v11765_v60, 0.0 }
 0x62b   :  { %11796 = vst [vmem:[#allocation6] sm:$0xff] %v11780_v61 }
 0x62c   :  { %11797 = vst.msk [vmem:[#allocation6 + $0x8] sm:$0xff] %vm11590_vm0, %v11781_v62  ;;  %v11466_v63 = vld [vmem:[#allocation5 + $0x72] sm:$0xff] }
 0x62d   :  { %v11458_v0 = vld [vmem:[#allocation5 + $0x71] sm:$0xff]  ;;  %11521 = vrot.lane.b32.xlu1 %v11466_v63, %s14650_s21 }
 0x62e   :  { %11489 = vrot.lane.b32.xlu0 %v11458_v0, %s14648_s17  ;;  %s14652_s17 = smov 34   ;;  %v11447_v0 = vld [vmem:[#allocation5 + $0x40] sm:$0xff] }
 0x633   :  { %v11846_v18 = vld [vmem:[#allocation6 + $0x4] ss:$8 sm:$0x3]  ;;  %v11847_v1 = vld [vmem:[#allocation6 + $0x5] ss:$8 sm:$0x3] }
 0x634   :  { %v11848_v6 = vmax.f32 %v11846_v18, %v11847_v1  ;;  %v11850_v7 = vld [vmem:[#allocation6 + $0x6] ss:$8 sm:$0x3]  ;;  %v11852_v10 = vld [vmem:[#allocation6 + $0x7] ss:$8 sm:$0x3] }
 0x635   :  { %v11685_v11 = vpop.f32.mrb[50].mxu1  ;;  %v11853_v14 = vmax.f32 %v11850_v7, %v11852_v10  ;;  %v11827_v8 = vld [vmem:[#allocation6 + $0x2] ss:$8 sm:$0x3]  ;;  %v11448_v10 = vld [vmem:[#allocation5 + $0x50] sm:$0xff] }
 0x636   :  { %v11739_v9 = vmul.f32 %v19022_v49, %v11685_v11  ;;  %v11687_v4 = vpop.f32.mrb[51].mxu1  ;;  %v11828_v5 = vld [vmem:[#allocation6 + $0x3] ss:$8 sm:$0x3] }
 0x637   :  { %v11740_v15 = vmul.f32 %v19025_v34, %v11687_v4  ;;  %v11854_v16 = vmax.f32 %v11848_v6, %v11853_v14  ;;  %v11829_v17 = vmax.f32 %v11827_v8, %v11828_v5  ;;  %v11831_v54 = vld [vmem:[#allocation6 + $0x4] ss:$8 sm:$0x3]  ;;  %v11833_v55 = vld [vmem:[#allocation6 + $0x5] ss:$8 sm:$0x3] }
 0x638   :  { %v11766_v2 = vadd.f32 %v19028_v50, %v11739_v9  ;;  %v11834_v3 = vmax.f32 %v11831_v54, %v11833_v55  ;;  %v11812_v20 = vld [vmem:[#allocation6] ss:$8 sm:$0x3]  ;;  %v11814_v19 = vld [vmem:[#allocation6 + $0x1] ss:$8 sm:$0x3] }
 0x639   :  { %v11767_v21 = vadd.f32 %v19032_v53, %v11740_v15  ;;  %11856 = vrot.lane.b32.xlu1 %v11854_v16, %s14651_s4  ;;  %v11815_v22 = vmax.f32 %v11812_v20, %v11814_v19  ;;  %v11817_v12 = vld [vmem:[#allocation6 + $0x2] ss:$8 sm:$0x3]  ;;  %v11819_v23 = vld [vmem:[#allocation6 + $0x3] ss:$8 sm:$0x3] }
 0x63a   :  { %v11782_v24 = vmax.f32 %v11766_v2, 0.0  ;;  %v11835_v30 = vmax.f32 %v11829_v17, %v11834_v3  ;;  %v11820_v33 = vmax.f32 %v11817_v12, %v11819_v23  ;;  %v11449_v4 = vld [vmem:[#allocation5 + $0x60] sm:$0xff]  ;;  %v11450_v54 = vld [vmem:[#allocation5 + $0x70] sm:$0xff] }
 0x63b   :  { %v11783_v28 = vmax.f32 %v11767_v21, 0.0 }
 0x63c   :  { %11798 = vst [vmem:[#allocation6 + $0x10] sm:$0xff] %v11782_v24  ;;  %11837 = vrot.lane.b32.xlu0 %v11835_v30, %s14652_s17  ;;  %v11821_v32 = vmax.f32 %v11815_v22, %v11820_v33 }
 0x63d   :  { %11799 = vst.msk [vmem:[#allocation6 + $0x18] sm:$0xff] %vm11590_vm0, %v11783_v28 }
 0x63e   :  { %11826 = vst.msk [vmem:[#allocation7] sm:$0x3] %vm11824_vm2, %v11821_v32  ;;  %vm19081_vm2 = vcmp.lt.s32.totalorder %v11727_v13, 170 }
 0x644   :  { %v11888_v36 = vld [vmem:[#allocation6 + $0x12] ss:$8 sm:$0x3]  ;;  %v11889_v37 = vld [vmem:[#allocation6 + $0x13] ss:$8 sm:$0x3] }
 0x645   :  { %v11890_v39 = vmax.f32 %v11888_v36, %v11889_v37  ;;  %v11892_v43 = vld [vmem:[#allocation6 + $0x14] ss:$8 sm:$0x3]  ;;  %v11894_v25 = vld [vmem:[#allocation6 + $0x15] ss:$8 sm:$0x3] }
 0x646   :  { %v11895_v26 = vmax.f32 %v11892_v43, %v11894_v25  ;;  %v11867_v44 = vld [vmem:[#allocation6 + $0x10] ss:$8 sm:$0x3]  ;;  %v11869_v45 = vld [vmem:[#allocation6 + $0x11] ss:$8 sm:$0x3] }
 0x647   :  { %v11870_v48 = vmax.f32 %v11867_v44, %v11869_v45  ;;  %v11872_v46 = vld [vmem:[#allocation6 + $0x12] ss:$8 sm:$0x3]  ;;  %v11874_v27 = vld [vmem:[#allocation6 + $0x13] ss:$8 sm:$0x3] }
 0x648   :  { %v11896_v47 = vmax.f32 %v11890_v39, %v11895_v26  ;;  %v11875_v51 = vmax.f32 %v11872_v46, %v11874_v27  ;;  %v11908_v52 = vld [vmem:[#allocation6 + $0x14] ss:$8 sm:$0x3]  ;;  %v11909_v56 = vld [vmem:[#allocation6 + $0x15] ss:$8 sm:$0x3] }
 0x649   :  { %v11912_v57 = vld [vmem:[#allocation6 + $0x16] ss:$8 sm:$0x3]  ;;  %v11914_v58 = vld [vmem:[#allocation6 + $0x17] ss:$8 sm:$0x3]  ;;  %v11910_v60 = vmax.f32 %v11908_v52, %v11909_v56 }
 0x64a   :  { %11898 = vrot.lane.b32.xlu1 %v11896_v47, %s14653_s1  ;;  %v11876_v59 = vmax.f32 %v11870_v48, %v11875_v51  ;;  %v11915_v61 = vmax.f32 %v11912_v57, %v11914_v58 }
 0x64c   :  { %11878 = vrot.lane.b32.xlu0 %v11876_v59, %s14654_s27  ;;  %v11916_v62 = vmax.f32 %v11910_v60, %v11915_v61 }
 0x650   :  { %11918 = vrot.lane.b32.xlu0 %v11916_v62, %s14655_s28 }
 0x656   :  { %v11516_v63 = vpop.permute.xlu1 %11515 }
 0x657   :  { %v11484_v18 = vpop.permute.xlu0 %11483  ;;  %14063 = vmatprep.mubr.msk.f32.mxu1 %vm11590_vm0, %v11516_v63 }
 0x658   :  { %v11535_v1 = vsel %vm10879_vm12, %v11447_v0, %v11484_v18 }
 0x659   :  { %v11544_v6 = vsel %vm11539_vm1, %v11535_v1, %v11516_v63 }
 0x65a   :  { %11702 = vmatmul.mubr.f32.gmra.mrb[56].mxu1 %v11544_v6 }
 0x667   :  { %v11518_v7 = vpop.permute.xlu1 %11517 }
 0x668   :  { %v11486_v11 = vpop.permute.xlu0 %11485  ;;  %14064 = vmatprep.mubr.msk.f32.mxu1 %vm11590_vm0, %v11518_v7 }
 0x669   :  { %v11536_v14 = vsel %vm10879_vm12, %v11448_v10, %v11486_v11 }
 0x66a   :  { %v11545_v8 = vsel %vm11539_vm1, %v11536_v14, %v11518_v7 }
 0x66b   :  { %11708 = vmatmul.mubr.f32.gmra.mrb[58].mxu1 %v11545_v8 }
 0x68a   :  { %v11520_v9 = vpop.permute.xlu1 %11519 }
 0x68b   :  { %v11488_v5 = vpop.permute.xlu0 %11487  ;;  %14065 = vmatprep.mubr.msk.f32.mxu1 %vm11590_vm0, %v11520_v9 }
 0x68c   :  { %v11537_v15 = vsel %vm10879_vm12, %v11449_v4, %v11488_v5 }
 0x68d   :  { %v11546_v16 = vsel %vm11539_vm1, %v11537_v15, %v11520_v9 }
 0x68e   :  { %11714 = vmatmul.mubr.f32.gmra.mrb[60].mxu1 %v11546_v16 }
 0x69f   :  { %v11522_v17 = vpop.permute.xlu1 %11521 }
 0x6a0   :  { %v11490_v55 = vpop.permute.xlu0 %11489  ;;  %14066 = vmatprep.mubr.msk.f32.mxu1 %vm11590_vm0, %v11522_v17 }
 0x6a1   :  { %v11538_v2 = vsel %vm10879_vm12, %v11450_v54, %v11490_v55  ;;  %vm19066_vm12 = vcmp.ge.s32.totalorder %v11727_v13, 102 }
 0x6a2   :  { %v11547_v3 = vsel %vm11539_vm1, %v11538_v2, %v11522_v17  ;;  %vm11886_vm5 = vmand %vm19066_vm12, %vm19071_vm13  ;;  %vm19124_vm12 = vcmp.ge.s32.totalorder %v11727_v13, 76  ;;  %vm19133_vm13 = vcmp.lt.s32.totalorder %v11727_v13, 238 }
 0x6a3   :  { %11720 = vmatmul.mubr.f32.gmra.mrb[62].mxu1 %v11547_v3 }
 0x6ab   :  { %v11857_v20 = vpop.permute.xlu1 %11856 }
 0x6ac   :  { %v11858_v19 = vrot.slane %v11857_v20, 7 }
 0x6ae   :  { %v11838_v21 = vpop.permute.xlu0 %11837  ;;  %v11860_v12 = vsel %vm11859_vm7, %v11858_v19, %v11857_v20  ;;  %vm11906_vm7 = vmand %vm19076_vm15, %vm19081_vm2  ;;  %vm19138_vm15 = vcmp.ge.s32.totalorder %v11727_v13, 110  ;;  %vm19143_vm2 = vcmp.lt.s32.totalorder %v11727_v13, 272 }
 0x6af   :  { %v11839_v22 = vrot.slane %v11838_v21, 7 }
 0x6b1   :  { %v11840_v23 = vsel %vm11590_vm0, %v11839_v22, %v11838_v21 }
 0x6b2   :  { %11845 = vst.msk [vmem:[#allocation7 + $0x1] sm:$0x3] %vm11844_vm10, %v11840_v23  ;;  %vm11921_vm10 = vcmask 343040  }
 0x6b3   :  { %11865 = vst.msk [vmem:[#allocation7 + $0x2] sm:$0x3] %vm11864_vm11, %v11860_v12  ;;  %vm11926_vm11 = vmand %vm19094_vm8, %vm19099_vm9  ;;  %vm11987_vm8 = vcmp.lt.s32.totalorder %v11727_v13, 178 }
 0x6b4   :  { %vm11968_vm9 = vmand %vm19138_vm15, %vm19143_vm2  ;;  %vm19169_vm15 = vcmp.lt.s32.totalorder %v11727_v13, 212  ;;  %vm19174_vm2 = vcmp.ge.s32.totalorder %v11727_v13, 84 }
 0x6bc   :  { %v11899_v24 = vpop.permute.xlu1 %11898 }
 0x6bd   :  { %v11900_v28 = vrot.slane %v11899_v24, 7 }
 0x6be   :  { %v11879_v37 = vpop.permute.xlu0 %11878 }
 0x6bf   :  { %v11880_v39 = vrot.slane %v11879_v37, 7  ;;  %v11902_v43 = vsel %vm11901_vm14, %v11900_v28, %v11899_v24  ;;  %vm11943_vm14 = vcmask 621568  }
 0x6c0   :  { %v11691_v44 = vpop.f32.mrb[52].mxu1 }
 0x6c1   :  { %v11882_v45 = vsel %vm11881_vm4, %v11880_v39, %v11879_v37  ;;  %v11741_v48 = vmul.f32 %v19022_v49, %v11691_v44  ;;  %v11693_v46 = vpop.f32.mrb[53].mxu1  ;;  %vm11948_vm4 = vmand %vm19124_vm12, %vm19133_vm13  ;;  %vm12025_vm12 = vcmask 687104   ;;  %vm12005_vm13 = vcmask 408576  }
 0x6c2   :  { %11887 = vst.msk [vmem:[#allocation7 + $0x3] sm:$0x7] %vm11886_vm5, %v11882_v45  ;;  %v11919_v27 = vpop.permute.xlu0 %11918  ;;  %v11742_v47 = vmul.f32 %v19025_v34, %v11693_v46  ;;  %vm11963_vm5 = vcmask 900096  }
 0x6c3   :  { %11907 = vst.msk [vmem:[#allocation7 + $0x5] sm:$0x3] %vm11906_vm7, %v11902_v43  ;;  %v11920_v51 = vrot.slane %v11919_v27, 7  ;;  %v11768_v52 = vadd.f32 %v19028_v50, %v11741_v48  ;;  %vm11986_vm7 = vcmp.ge.s32.totalorder %v11727_v13, 16 }
 0x6c4   :  { %v11769_v56 = vadd.f32 %v19032_v53, %v11742_v47 }
 0x6c5   :  { %v11922_v57 = vsel %vm11921_vm10, %v11920_v51, %v11919_v27  ;;  %v11784_v58 = vmax.f32 %v11768_v52, 0.0  ;;  %vm11983_vm10 = vcmask 130048  }
 0x6c6   :  { %11927 = vst.msk [vmem:[#allocation7 + $0x6] sm:$0x3] %vm11926_vm11, %v11922_v57  ;;  %v11785_v59 = vmax.f32 %v11769_v56, 0.0  ;;  %vm11988_vm11 = vmand %vm11986_vm7, %vm11987_vm8  ;;  %vm19184_vm7 = vcmp.ge.s32.totalorder %v11727_v13, 118 }
 0x6c7   :  { %11800 = vst [vmem:[#allocation6 + $0x20] sm:$0xff] %v11784_v58 }
 0x6c8   :  { %11801 = vst.msk [vmem:[#allocation6 + $0x28] sm:$0xff] %vm11590_vm0, %v11785_v59 }
 0x6cf   :  { %v11929_v60 = vld [vmem:[#allocation6 + $0x20] ss:$8 sm:$0x3]  ;;  %v11931_v61 = vld [vmem:[#allocation6 + $0x21] ss:$8 sm:$0x3] }
 0x6d0   :  { %v11932_v62 = vmax.f32 %v11929_v60, %v11931_v61  ;;  %v11934_v63 = vld [vmem:[#allocation6 + $0x22] ss:$8 sm:$0x3]  ;;  %v11936_v0 = vld [vmem:[#allocation6 + $0x23] ss:$8 sm:$0x3] }
 0x6d1   :  { %v11937_v18 = vmax.f32 %v11934_v63, %v11936_v0  ;;  %v11950_v1 = vld [vmem:[#allocation6 + $0x22] ss:$8 sm:$0x3]  ;;  %v11951_v6 = vld [vmem:[#allocation6 + $0x23] ss:$8 sm:$0x3] }
 0x6d2   :  { %v11952_v7 = vmax.f32 %v11950_v1, %v11951_v6  ;;  %v11954_v10 = vld [vmem:[#allocation6 + $0x24] ss:$8 sm:$0x3]  ;;  %v11956_v11 = vld [vmem:[#allocation6 + $0x25] ss:$8 sm:$0x3] }
 0x6d3   :  { %v11938_v14 = vmax.f32 %v11932_v62, %v11937_v18  ;;  %v11957_v8 = vmax.f32 %v11954_v10, %v11956_v11  ;;  %v11970_v9 = vld [vmem:[#allocation6 + $0x24] ss:$8 sm:$0x3]  ;;  %v11971_v4 = vld [vmem:[#allocation6 + $0x25] ss:$8 sm:$0x3] }
 0x6d4   :  { %v11972_v5 = vmax.f32 %v11970_v9, %v11971_v4  ;;  %v11974_v15 = vld [vmem:[#allocation6 + $0x26] ss:$8 sm:$0x3]  ;;  %v11976_v16 = vld [vmem:[#allocation6 + $0x27] ss:$8 sm:$0x3] }
 0x6d5   :  { %11940 = vrot.lane.b32.xlu1 %v11938_v14, %s14656_s26  ;;  %v11958_v17 = vmax.f32 %v11952_v7, %v11957_v8  ;;  %v11977_v54 = vmax.f32 %v11974_v15, %v11976_v16 }
 0x6d7   :  { %11960 = vrot.lane.b32.xlu0 %v11958_v17, %s14657_s29  ;;  %v11978_v55 = vmax.f32 %v11972_v5, %v11977_v54 }
 0x6d9   :  { %11980 = vrot.lane.b32.xlu1 %v11978_v55, %s14658_s30 }
 0x6e6   :  { %v11697_v2 = vpop.f32.mrb[54].mxu1 }
 0x6e7   :  { %v11743_v3 = vmul.f32 %v19022_v49, %v11697_v2  ;;  %v11699_v20 = vpop.f32.mrb[55].mxu1 }
 0x6e8   :  { %v11744_v19 = vmul.f32 %v19025_v34, %v11699_v20 }
 0x6e9   :  { %v11770_v21 = vadd.f32 %v19028_v50, %v11743_v3 }
 0x6ea   :  { %v11771_v22 = vadd.f32 %v19032_v53, %v11744_v19 }
 0x6eb   :  { %v11786_v12 = vmax.f32 %v11770_v21, 0.0 }
 0x6ec   :  { %v11787_v23 = vmax.f32 %v11771_v22, 0.0 }
 0x6ed   :  { %11802 = vst [vmem:[#allocation6 + $0x30] sm:$0xff] %v11786_v12 }
 0x6ee   :  { %11803 = vst.msk [vmem:[#allocation6 + $0x38] sm:$0xff] %vm11590_vm0, %v11787_v23 }
 0x6f5   :  { %v12012_v24 = vld [vmem:[#allocation6 + $0x32] ss:$8 sm:$0x3]  ;;  %v12013_v30 = vld [vmem:[#allocation6 + $0x33] ss:$8 sm:$0x3] }
 0x6f6   :  { %v12014_v33 = vmax.f32 %v12012_v24, %v12013_v30  ;;  %v12016_v28 = vld [vmem:[#allocation6 + $0x34] ss:$8 sm:$0x3]  ;;  %v12018_v32 = vld [vmem:[#allocation6 + $0x35] ss:$8 sm:$0x3] }
 0x6f7   :  { %v12019_v36 = vmax.f32 %v12016_v28, %v12018_v32  ;;  %v11991_v37 = vld [vmem:[#allocation6 + $0x30] ss:$8 sm:$0x3]  ;;  %v11993_v39 = vld [vmem:[#allocation6 + $0x31] ss:$8 sm:$0x3] }
 0x6f8   :  { %v11994_v43 = vmax.f32 %v11991_v37, %v11993_v39  ;;  %v11996_v25 = vld [vmem:[#allocation6 + $0x32] ss:$8 sm:$0x3]  ;;  %v11998_v26 = vld [vmem:[#allocation6 + $0x33] ss:$8 sm:$0x3] }
 0x6f9   :  { %v12020_v44 = vmax.f32 %v12014_v33, %v12019_v36  ;;  %v11999_v45 = vmax.f32 %v11996_v25, %v11998_v26  ;;  %v12032_v48 = vld [vmem:[#allocation6 + $0x34] ss:$8 sm:$0x3]  ;;  %v12033_v46 = vld [vmem:[#allocation6 + $0x35] ss:$8 sm:$0x3] }
 0x6fa   :  { %v12036_v27 = vld [vmem:[#allocation6 + $0x36] ss:$8 sm:$0x3]  ;;  %v12038_v47 = vld [vmem:[#allocation6 + $0x37] ss:$8 sm:$0x3]  ;;  %v12034_v52 = vmax.f32 %v12032_v48, %v12033_v46 }
 0x6fb   :  { %12022 = vrot.lane.b32.xlu1 %v12020_v44, %s14659_s10  ;;  %v12000_v51 = vmax.f32 %v11994_v43, %v11999_v45  ;;  %v12039_v56 = vmax.f32 %v12036_v27, %v12038_v47 }
 0x6fd   :  { %12002 = vrot.lane.b32.xlu0 %v12000_v51, %s14660_s11  ;;  %v12040_v57 = vmax.f32 %v12034_v52, %v12039_v56 }
 0x701   :  { %12042 = vrot.lane.b32.xlu0 %v12040_v57, %s14661_s12 }
 0x72d   :  { %v11703_v58 = vpop.f32.mrb[56].mxu1 }
 0x72e   :  { %v11745_v59 = vmul.f32 %v19022_v49, %v11703_v58  ;;  %v11705_v60 = vpop.f32.mrb[57].mxu1 }
 0x72f   :  { %v11746_v61 = vmul.f32 %v19025_v34, %v11705_v60 }
 0x730   :  { %v11772_v62 = vadd.f32 %v19028_v50, %v11745_v59 }
 0x731   :  { %v11773_v63 = vadd.f32 %v19032_v53, %v11746_v61 }
 0x732   :  { %v11788_v0 = vmax.f32 %v11772_v62, 0.0 }
 0x733   :  { %v11789_v18 = vmax.f32 %v11773_v63, 0.0 }
 0x734   :  { %11804 = vst [vmem:[#allocation6 + $0x40] sm:$0xff] %v11788_v0 }
 0x735   :  { %11805 = vst.msk [vmem:[#allocation6 + $0x48] sm:$0xff] %vm11590_vm0, %v11789_v18 }
 0x73c   :  { %v12053_v1 = vld [vmem:[#allocation6 + $0x40] ss:$8 sm:$0x3]  ;;  %v12055_v6 = vld [vmem:[#allocation6 + $0x41] ss:$8 sm:$0x3] }
 0x73d   :  { %v12056_v7 = vmax.f32 %v12053_v1, %v12055_v6  ;;  %v12058_v10 = vld [vmem:[#allocation6 + $0x42] ss:$8 sm:$0x3]  ;;  %v12060_v11 = vld [vmem:[#allocation6 + $0x43] ss:$8 sm:$0x3] }
 0x73e   :  { %v11709_v14 = vpop.f32.mrb[58].mxu1  ;;  %v12061_v8 = vmax.f32 %v12058_v10, %v12060_v11  ;;  %v12073_v9 = vld [vmem:[#allocation6 + $0x42] ss:$8 sm:$0x3] }
 0x73f   :  { %v11747_v4 = vmul.f32 %v19022_v49, %v11709_v14  ;;  %v11711_v5 = vpop.f32.mrb[59].mxu1  ;;  %v12074_v15 = vld [vmem:[#allocation6 + $0x43] ss:$8 sm:$0x3] }
 0x740   :  { %v11748_v17 = vmul.f32 %v19025_v34, %v11711_v5  ;;  %v12062_v54 = vmax.f32 %v12056_v7, %v12061_v8  ;;  %v12075_v55 = vmax.f32 %v12073_v9, %v12074_v15  ;;  %v12077_v2 = vld [vmem:[#allocation6 + $0x44] ss:$8 sm:$0x3]  ;;  %v12079_v3 = vld [vmem:[#allocation6 + $0x45] ss:$8 sm:$0x3] }
 0x741   :  { %v11774_v20 = vadd.f32 %v19028_v50, %v11747_v4  ;;  %v12080_v19 = vmax.f32 %v12077_v2, %v12079_v3  ;;  %v12093_v21 = vld [vmem:[#allocation6 + $0x44] ss:$8 sm:$0x3]  ;;  %v12094_v22 = vld [vmem:[#allocation6 + $0x45] ss:$8 sm:$0x3] }
 0x742   :  { %v11775_v12 = vadd.f32 %v19032_v53, %v11748_v17  ;;  %12064 = vrot.lane.b32.xlu1 %v12062_v54, %s14644_s9  ;;  %v12095_v23 = vmax.f32 %v12093_v21, %v12094_v22  ;;  %v12097_v24 = vld [vmem:[#allocation6 + $0x46] ss:$8 sm:$0x3]  ;;  %v12099_v30 = vld [vmem:[#allocation6 + $0x47] ss:$8 sm:$0x3] }
 0x743   :  { %v11790_v33 = vmax.f32 %v11774_v20, 0.0  ;;  %v12081_v28 = vmax.f32 %v12075_v55, %v12080_v19  ;;  %v12100_v36 = vmax.f32 %v12097_v24, %v12099_v30  ;;  %s14663_s9 = smov 92  }
 0x744   :  { %v11791_v37 = vmax.f32 %v11775_v12, 0.0 }
 0x745   :  { %11806 = vst [vmem:[#allocation6 + $0x50] sm:$0xff] %v11790_v33  ;;  %12083 = vrot.lane.b32.xlu0 %v12081_v28, %s14662_s13  ;;  %v12101_v26 = vmax.f32 %v12095_v23, %v12100_v36 }
 0x746   :  { %11807 = vst.msk [vmem:[#allocation6 + $0x58] sm:$0xff] %vm11590_vm0, %v11791_v37 }
 0x747   :  { %v11941_v39 = vpop.permute.xlu1 %11940  ;;  %12103 = vrot.lane.b32.xlu1 %v12101_v26, %s14663_s9 }
 0x748   :  { %v11942_v44 = vrot.slane %v11941_v39, 7 }
 0x749   :  { %v11961_v45 = vpop.permute.xlu0 %11960 }
 0x74a   :  { %v11944_v48 = vsel %vm11943_vm14, %v11942_v44, %v11941_v39  ;;  %v11962_v46 = vrot.slane %v11961_v45, 7  ;;  %vm19164_vm14 = vcmp.ge.s32.totalorder %v11727_v13, 50 }
 0x74b   :  { %11949 = vst.msk [vmem:[#allocation7 + $0x7] sm:$0x3] %vm11948_vm4, %v11944_v48  ;;  %v11981_v27 = vpop.permute.xlu1 %11980  ;;  %vm19179_vm4 = vcmp.lt.s32.totalorder %v11727_v13, 246  ;;  %vm12010_vm8 = vmand %vm19164_vm14, %vm19169_vm15  ;;  %vm19223_vm14 = vcmp.ge.s32.totalorder %v11727_v13, 58  ;;  %vm12090_vm15 = vcmp.lt.s32.totalorder %v11727_v13, 220 }
 0x74c   :  { %v11964_v47 = vsel %vm11963_vm5, %v11962_v46, %v11961_v45  ;;  %v11982_v51 = vrot.slane %v11981_v27, 7  ;;  %vm12045_vm5 = vcmask 965632  }
 0x74d   :  { %11969 = vst.msk [vmem:[#allocation7 + $0x8] sm:$0x7] %vm11968_vm9, %v11964_v47  ;;  %v12135_v56 = vld [vmem:[#allocation6 + $0x52] ss:$8 sm:$0x3]  ;;  %vm19193_vm9 = vcmp.lt.s32.totalorder %v11727_v13, 280 }
 0x74e   :  { %v11984_v52 = vsel %vm11983_vm10, %v11982_v51, %v11981_v27  ;;  %v12136_v57 = vld [vmem:[#allocation6 + $0x53] ss:$8 sm:$0x3]  ;;  %v12139_v59 = vld [vmem:[#allocation6 + $0x54] ss:$8 sm:$0x3]  ;;  %vm12030_vm10 = vmand %vm19174_vm2, %vm19179_vm4 }
 0x74f   :  { %11989 = vst.msk [vmem:[#allocation7 + $0xa] sm:$0x3] %vm11988_vm11, %v11984_v52  ;;  %v12137_v58 = vmax.f32 %v12135_v56, %v12136_v57  ;;  %v12141_v60 = vld [vmem:[#allocation6 + $0x55] ss:$8 sm:$0x3]  ;;  %vm12050_vm11 = vmand %vm19184_vm7, %vm19193_vm9  ;;  %vm12086_vm2 = vcmask 474112  }
 0x750   :  { %v12142_v61 = vmax.f32 %v12139_v59, %v12141_v60  ;;  %v12114_v62 = vld [vmem:[#allocation6 + $0x50] ss:$8 sm:$0x3]  ;;  %v12116_v63 = vld [vmem:[#allocation6 + $0x51] ss:$8 sm:$0x3]  ;;  %vm12091_vm7 = vmand %vm19223_vm14, %vm12090_vm15 }
 0x751   :  { %v12117_v0 = vmax.f32 %v12114_v62, %v12116_v63  ;;  %v12119_v18 = vld [vmem:[#allocation6 + $0x52] ss:$8 sm:$0x3]  ;;  %v12121_v1 = vld [vmem:[#allocation6 + $0x53] ss:$8 sm:$0x3] }
 0x752   :  { %v12143_v6 = vmax.f32 %v12137_v58, %v12142_v61  ;;  %v12122_v7 = vmax.f32 %v12119_v18, %v12121_v1  ;;  %v12155_v10 = vld [vmem:[#allocation6 + $0x54] ss:$8 sm:$0x3]  ;;  %v12156_v11 = vld [vmem:[#allocation6 + $0x55] ss:$8 sm:$0x3] }
 0x753   :  { %v12159_v14 = vld [vmem:[#allocation6 + $0x56] ss:$8 sm:$0x3]  ;;  %v12161_v8 = vld [vmem:[#allocation6 + $0x57] ss:$8 sm:$0x3]  ;;  %v12157_v4 = vmax.f32 %v12155_v10, %v12156_v11 }
 0x754   :  { %12145 = vrot.lane.b32.xlu1 %v12143_v6, %s14664_s14  ;;  %v12123_v9 = vmax.f32 %v12117_v0, %v12122_v7  ;;  %v12162_v5 = vmax.f32 %v12159_v14, %v12161_v8  ;;  %vm12109_vm4 = vcmp.ge.s32.totalorder %v11727_v13, 92 }
 0x756   :  { %12125 = vrot.lane.b32.xlu0 %v12123_v9, %s14665_s2  ;;  %v12163_v15 = vmax.f32 %v12157_v4, %v12162_v5 }
 0x75a   :  { %12165 = vrot.lane.b32.xlu0 %v12163_v15, %s14666_s15 }
 0x761   :  { %v11715_v16 = vpop.f32.mrb[60].mxu1 }
 0x762   :  { %v11749_v17 = vmul.f32 %v19022_v49, %v11715_v16  ;;  %v11717_v54 = vpop.f32.mrb[61].mxu1 }
 0x763   :  { %v11750_v55 = vmul.f32 %v19025_v34, %v11717_v54 }
 0x764   :  { %v11776_v2 = vadd.f32 %v19028_v50, %v11749_v17 }
 0x765   :  { %v11777_v3 = vadd.f32 %v19032_v53, %v11750_v55 }
 0x766   :  { %v11792_v20 = vmax.f32 %v11776_v2, 0.0 }
 0x767   :  { %v11793_v19 = vmax.f32 %v11777_v3, 0.0 }
 0x768   :  { %11808 = vst [vmem:[#allocation6 + $0x60] sm:$0xff] %v11792_v20 }
 0x769   :  { %11809 = vst.msk [vmem:[#allocation6 + $0x68] sm:$0xff] %vm11590_vm0, %v11793_v19 }
 0x76d   :  { %v12023_v21 = vpop.permute.xlu1 %12022 }
 0x76e   :  { %v12024_v30 = vrot.slane %v12023_v21, 7 }
 0x76f   :  { %v12003_v32 = vpop.permute.xlu0 %12002 }
 0x770   :  { %v12176_v28 = vld [vmem:[#allocation6 + $0x60] ss:$8 sm:$0x3]  ;;  %v12178_v36 = vld [vmem:[#allocation6 + $0x61] ss:$8 sm:$0x3]  ;;  %v12026_v44 = vsel %vm12025_vm12, %v12024_v30, %v12023_v21 }
 0x771   :  { %v12181_v37 = vld [vmem:[#allocation6 + $0x62] ss:$8 sm:$0x3]  ;;  %v12004_v39 = vrot.slane %v12003_v32, 7  ;;  %v12179_v25 = vmax.f32 %v12176_v28, %v12178_v36  ;;  %vm12070_vm12 = vcmp.lt.s32.totalorder %v11727_v13, 186 }
 0x772   :  { %v12183_v26 = vld [vmem:[#allocation6 + $0x63] ss:$8 sm:$0x3]  ;;  %v12197_v48 = vld [vmem:[#allocation6 + $0x62] ss:$8 sm:$0x3] }
 0x773   :  { %v12184_v45 = vmax.f32 %v12181_v37, %v12183_v26  ;;  %v12198_v46 = vld [vmem:[#allocation6 + $0x63] ss:$8 sm:$0x3]  ;;  %v12006_v27 = vsel %vm12005_vm13, %v12004_v39, %v12003_v32  ;;  %v12201_v51 = vld [vmem:[#allocation6 + $0x64] ss:$8 sm:$0x3]  ;;  %v12043_v56 = vpop.permute.xlu0 %12042 }
 0x774   :  { %v12199_v47 = vmax.f32 %v12197_v48, %v12198_v46  ;;  %v12203_v52 = vld [vmem:[#allocation6 + $0x65] ss:$8 sm:$0x3]  ;;  %12011 = vst.msk [vmem:[#allocation7 + $0xb] sm:$0x3] %vm12010_vm8, %v12006_v27  ;;  %v12044_v61 = vrot.slane %v12043_v56, 7 }
 0x775   :  { %v12185_v57 = vmax.f32 %v12179_v25, %v12184_v45  ;;  %v12204_v58 = vmax.f32 %v12201_v51, %v12203_v52  ;;  %v12216_v59 = vld [vmem:[#allocation6 + $0x64] ss:$8 sm:$0x3]  ;;  %v12217_v60 = vld [vmem:[#allocation6 + $0x65] ss:$8 sm:$0x3] }
 0x776   :  { %12031 = vst.msk [vmem:[#allocation7 + $0xc] sm:$0x3] %vm12030_vm10, %v12026_v44  ;;  %v11721_v62 = vpop.f32.mrb[62].mxu1  ;;  %v12218_v63 = vmax.f32 %v12216_v59, %v12217_v60  ;;  %v12220_v0 = vld [vmem:[#allocation6 + $0x66] ss:$8 sm:$0x3]  ;;  %v12046_v10 = vsel %vm12045_vm5, %v12044_v61, %v12043_v56 }
 0x777   :  { %v11751_v18 = vmul.f32 %v19022_v49, %v11721_v62  ;;  %12187 = vrot.lane.b32.xlu1 %v12185_v57, %s14667_s16  ;;  %v12205_v1 = vmax.f32 %v12199_v47, %v12204_v58  ;;  %v11723_v6 = vpop.f32.mrb[63].mxu1  ;;  %v12222_v7 = vld [vmem:[#allocation6 + $0x67] ss:$8 sm:$0x3]  ;;  %12051 = vst.msk [vmem:[#allocation7 + $0xd] sm:$0x7] %vm12050_vm11, %v12046_v10 }
 0x778   :  { %v11752_v11 = vmul.f32 %v19025_v34, %v11723_v6  ;;  %v12223_v14 = vmax.f32 %v12220_v0, %v12222_v7  ;;  %vm12110_vm5 = vcmp.lt.s32.totalorder %v11727_v13, 254  ;;  %vm12106_vm8 = vcmask 752640  }
 0x779   :  { %v11778_v8 = vadd.f32 %v19028_v50, %v11751_v18  ;;  %12207 = vrot.lane.b32.xlu0 %v12205_v1, %s14642_s18  ;;  %s14669_s18 = smov 74   ;;  %vm12111_vm9 = vmand %vm12109_vm4, %vm12110_vm5  ;;  %vm12132_vm10 = vcmp.lt.s32.totalorder %v11727_v13, 288  ;;  %vm12148_vm11 = vcmask 261120   ;;  %vm12172_vm4 = vcmp.lt.s32.totalorder %v11727_v13, 228 }
 0x77a   :  { %v11779_v9 = vadd.f32 %v19032_v53, %v11752_v11  ;;  %v12224_v4 = vmax.f32 %v12218_v63, %v12223_v14  ;;  %vm12168_vm5 = vcmask 539648  }
 0x77b   :  { %v11794_v5 = vmax.f32 %v11778_v8, 0.0 }
 0x77c   :  { %v11795_v49 = vmax.f32 %v11779_v9, 0.0  ;;  %12226 = vrot.lane.b32.xlu1 %v12224_v4, %s14668_s23 }
 0x77d   :  { %11810 = vst [vmem:[#allocation6 + $0x70] sm:$0xff] %v11794_v5 }
 0x77e   :  { %11811 = vst.msk [vmem:[#allocation6 + $0x78] sm:$0xff] %vm11590_vm0, %v11795_v49  ;;  %vm12069_vm0 = vcmp.ge.s32.totalorder %v11727_v13, 24 }
 0x77f   :  { %vm12071_vm13 = vmand %vm12069_vm0, %vm12070_vm12  ;;  %vm19240_vm0 = vcmp.ge.s32.totalorder %v11727_v13, 32  ;;  %vm12152_vm12 = vcmp.lt.s32.totalorder %v11727_v13, 194 }
 0x780   :  { %vm12153_vm15 = vmand %vm19240_vm0, %vm12152_vm12 }
 0x785   :  { %v12258_v15 = vld [vmem:[#allocation6 + $0x72] ss:$8 sm:$0x3]  ;;  %v12259_v16 = vld [vmem:[#allocation6 + $0x73] ss:$8 sm:$0x3] }
 0x786   :  { %v12260_v17 = vmax.f32 %v12258_v15, %v12259_v16  ;;  %v12262_v34 = vld [vmem:[#allocation6 + $0x74] ss:$8 sm:$0x3]  ;;  %v12264_v54 = vld [vmem:[#allocation6 + $0x75] ss:$8 sm:$0x3] }
 0x787   :  { %v12265_v55 = vmax.f32 %v12262_v34, %v12264_v54  ;;  %v12237_v2 = vld [vmem:[#allocation6 + $0x70] ss:$8 sm:$0x3]  ;;  %v12239_v50 = vld [vmem:[#allocation6 + $0x71] ss:$8 sm:$0x3] }
 0x788   :  { %v12240_v3 = vmax.f32 %v12237_v2, %v12239_v50  ;;  %v12242_v20 = vld [vmem:[#allocation6 + $0x72] ss:$8 sm:$0x3]  ;;  %v12244_v19 = vld [vmem:[#allocation6 + $0x73] ss:$8 sm:$0x3] }
 0x789   :  { %v12266_v53 = vmax.f32 %v12260_v17, %v12265_v55  ;;  %v12245_v21 = vmax.f32 %v12242_v20, %v12244_v19  ;;  %v12277_v22 = vld [vmem:[#allocation6 + $0x74] ss:$8 sm:$0x3]  ;;  %v12278_v12 = vld [vmem:[#allocation6 + $0x75] ss:$8 sm:$0x3] }
 0x78a   :  { %v12281_v23 = vld [vmem:[#allocation6 + $0x76] ss:$8 sm:$0x3]  ;;  %v12283_v24 = vld [vmem:[#allocation6 + $0x77] ss:$8 sm:$0x3]  ;;  %v12279_v33 = vmax.f32 %v12277_v22, %v12278_v12 }
 0x78b   :  { %12268 = vrot.lane.b32.xlu1 %v12266_v53, %s14650_s21  ;;  %v12246_v30 = vmax.f32 %v12240_v3, %v12245_v21  ;;  %v12284_v28 = vmax.f32 %v12281_v23, %v12283_v24 }
 0x78d   :  { %12248 = vrot.lane.b32.xlu0 %v12246_v30, %s14669_s18  ;;  %v12285_v32 = vmax.f32 %v12279_v33, %v12284_v28 }
 0x791   :  { %12287 = vrot.lane.b32.xlu0 %v12285_v32, %s14670_s19 }
 0x7b4   :  { %v12065_v36 = vpop.permute.xlu1 %12064 }
 0x7b5   :  { %v12066_v37 = vrot.slane %v12065_v36, 7 }
 0x7b7   :  { %v12067_v43 = vsel %vm9243_vm6, %v12066_v37, %v12065_v36  ;;  %v12084_v25 = vpop.permute.xlu0 %12083  ;;  %vm19234_vm6 = vcmp.ge.s32.totalorder %v11727_v13, 126 }
 0x7b8   :  { %12072 = vst.msk [vmem:[#allocation7 + $0xf] sm:$0x3] %vm12071_vm13, %v12067_v43  ;;  %v12085_v26 = vrot.slane %v12084_v25, 7  ;;  %vm12128_vm13 = vcmask 1031168   ;;  %vm12133_vm14 = vmand %vm19234_vm6, %vm12132_vm10  ;;  %vm12190_vm6 = vcmask 818176   ;;  %vm12212_vm10 = vcmp.ge.s32.totalorder %v11727_v13, 6 }
 0x7b9   :  { %v12104_v44 = vpop.permute.xlu1 %12103 }
 0x7ba   :  { %v12087_v45 = vsel %vm12086_vm2, %v12085_v26, %v12084_v25  ;;  %v12105_v48 = vrot.slane %v12104_v44, 7  ;;  %vm12171_vm2 = vcmp.ge.s32.totalorder %v11727_v13, 66 }
 0x7bb   :  { %12092 = vst.msk [vmem:[#allocation7 + $0x10] sm:$0x3] %vm12091_vm7, %v12087_v45  ;;  %vm12173_vm7 = vmand %vm12171_vm2, %vm12172_vm4  ;;  %vm12254_vm4 = vcmp.ge.s32.totalorder %v11727_v13, 74 }
 0x7bc   :  { %v12107_v46 = vsel %vm12106_vm8, %v12105_v48, %v12104_v44  ;;  %vm12193_vm8 = vcmp.ge.s32.totalorder %v11727_v13, 100 }
 0x7bd   :  { %12112 = vst.msk [vmem:[#allocation7 + $0x11] sm:$0x3] %vm12111_vm9, %v12107_v46  ;;  %vm12194_vm9 = vcmp.lt.s32.totalorder %v11727_v13, 262 }
 0x7be   :  { %vm12195_vm0 = vmand %vm12193_vm8, %vm12194_vm9  ;;  %vm12251_vm8 = vcmask 605184  }
 0x7c6   :  { %v12146_v27 = vpop.permute.xlu1 %12145 }
 0x7c7   :  { %v12147_v51 = vrot.slane %v12146_v27, 7 }
 0x7c8   :  { %v12126_v56 = vpop.permute.xlu0 %12125 }
 0x7c9   :  { %v12127_v57 = vrot.slane %v12126_v56, 7  ;;  %v12149_v58 = vsel %vm12148_vm11, %v12147_v51, %v12146_v27  ;;  %vm12213_vm11 = vcmp.lt.s32.totalorder %v11727_v13, 168 }
 0x7ca   :  { %vm12214_vm12 = vmand %vm12212_vm10, %vm12213_vm11  ;;  %vm12293_vm10 = vcmp.ge.s32.totalorder %v11727_v13, 14  ;;  %vm12294_vm11 = vcmp.lt.s32.totalorder %v11727_v13, 176 }
 0x7cb   :  { %v12129_v59 = vsel %vm12128_vm13, %v12127_v57, %v12126_v56  ;;  %vm12232_vm13 = vcmp.ge.s32.totalorder %v11727_v13, 40 }
 0x7cc   :  { %12134 = vst.msk [vmem:[#allocation7 + $0x12] sm:$0x7] %vm12133_vm14, %v12129_v59  ;;  %v12166_v60 = vpop.permute.xlu0 %12165  ;;  %vm12233_vm14 = vcmp.lt.s32.totalorder %v11727_v13, 202 }
 0x7cd   :  { %12154 = vst.msk [vmem:[#allocation7 + $0x14] sm:$0x3] %vm12153_vm15, %v12149_v58  ;;  %v12167_v61 = vrot.slane %v12166_v60, 7  ;;  %vm12229_vm15 = vcmask 326656   ;;  %vm12234_vm2 = vmand %vm12232_vm13, %vm12233_vm14 }
 0x7cf   :  { %v12169_v62 = vsel %vm12168_vm5, %v12167_v61, %v12166_v60  ;;  %vm12255_vm5 = vcmp.lt.s32.totalorder %v11727_v13, 236 }
 0x7d0   :  { %12174 = vst.msk [vmem:[#allocation7 + $0x15] sm:$0x3] %vm12173_vm7, %v12169_v62  ;;  %vm19261_vm7 = vcmp.ge.s32.totalorder %v11727_v13, 108  ;;  %vm12256_vm9 = vmand %vm12254_vm4, %vm12255_vm5 }
 0x7e9   :  { %v12188_v63 = vpop.permute.xlu1 %12187 }
 0x7ea   :  { %v12189_v0 = vrot.slane %v12188_v63, 7 }
 0x7eb   :  { %v12208_v18 = vpop.permute.xlu0 %12207 }
 0x7ec   :  { %v12191_v1 = vsel %vm12190_vm6, %v12189_v0, %v12188_v63  ;;  %v12209_v6 = vrot.slane %v12208_v18, 7 }
 0x7ed   :  { %12196 = vst.msk [vmem:[#allocation7 + $0x16] sm:$0x7] %vm12195_vm0, %v12191_v1  ;;  %vm12290_vm0 = vcmask 113664  }
 0x7ee   :  { %v12210_v7 = vsel %vm9072_vm3, %v12209_v6, %v12208_v18  ;;  %v12227_v10 = vpop.permute.xlu1 %12226  ;;  %vm12274_vm3 = vcmp.lt.s32.totalorder %v11727_v13, 270 }
 0x7ef   :  { %12215 = vst.msk [vmem:[#allocation7 + $0x18] sm:$0x3] %vm12214_vm12, %v12210_v7  ;;  %v12228_v11 = vrot.slane %v12227_v10, 7  ;;  %vm12275_vm6 = vmand %vm19261_vm7, %vm12274_vm3 }
 0x7f0   :  { %vm12295_vm12 = vmand %vm12293_vm10, %vm12294_vm11 }
 0x7f1   :  { %v12230_v14 = vsel %vm12229_vm15, %v12228_v11, %v12227_v10 }
 0x7f2   :  { %12235 = vst.msk [vmem:[#allocation7 + $0x19] sm:$0x3] %vm12234_vm2, %v12230_v14 }
 0x7fd   :  { %v12269_v8 = vpop.permute.xlu1 %12268 }
 0x7fe   :  { %v12270_v9 = vrot.slane %v12269_v8, 7 }
 0x7ff   :  { %v12249_v5 = vpop.permute.xlu0 %12248 }
 0x800   :  { %v12250_v49 = vrot.slane %v12249_v5, 7  ;;  %v12271_v15 = vsel %vm11539_vm1, %v12270_v9, %v12269_v8 }
 0x802   :  { %v12252_v16 = vsel %vm12251_vm8, %v12250_v49, %v12249_v5 }
 0x803   :  { %12257 = vst.msk [vmem:[#allocation7 + $0x1a] sm:$0x3] %vm12256_vm9, %v12252_v16  ;;  %v12288_v17 = vpop.permute.xlu0 %12287 }
 0x804   :  { %12276 = vst.msk [vmem:[#allocation7 + $0x1b] sm:$0x7] %vm12275_vm6, %v12271_v15  ;;  %v12289_v34 = vrot.slane %v12288_v17, 7 }
 0x806   :  { %v12291_v54 = vsel %vm12290_vm0, %v12289_v34, %v12288_v17 }
 0x807   :  { %12296 = vst.msk [vmem:[#allocation7 + $0x1d] sm:$0x3] %vm12295_vm12, %v12291_v54 }
 0x808   :  { %14637 = dma.done.wait [#allocation9], 62208 }
 0x809   :  { %14638 = vsyncadd [#allocation9], 4294905088  ;;  %v12496_v55 = vld [vmem:[#allocation8 + $0x8] sm:$0xff]  ;;  %v12495_v50 = vld [vmem:[#allocation8] sm:$0xff]  ;;  %v19272_v45 = vsub.s32 5, %v19005_v29  ;;  %vm12992_vm1 = vcmask 392192  }
 0x80a   :  { %v12688_v2 = vld [vmem:[#allocation8 + $0x608] sm:$0xff]  ;;  %12996 = vmatprep.subr.bf16.mxu1 %v12496_v55  ;;  %v12687_v3 = vld [vmem:[#allocation8 + $0x600] sm:$0xff]  ;;  %v12498_v20 = vld [vmem:[#allocation8 + $0x18] sm:$0xff]  ;;  %vm13682_vm13 = vcmask 916480   ;;  %vm14673_vm14 = vmmov 0   ;;  %vm13771_vm15 = vcmask 982016  }
 0x80b   :  { %13242 = vmatprep.subr.bf16.mxu0 %v12688_v2  ;;  %v12690_v19 = vld [vmem:[#allocation8 + $0x618] sm:$0xff]  ;;  %12997 = vmatpush1.bf16.msra.mxu1 %v12495_v50  ;;  %v12497_v13 = vld [vmem:[#allocation8 + $0x10] sm:$0xff]  ;;  %v12500_v21 = vld [vmem:[#allocation8 + $0x28] sm:$0xff]  ;;  %vm13851_vm2 = vcmask 57344  }
 0x80c   :  { %13243 = vmatpush1.bf16.msra.mxu0 %v12687_v3  ;;  %12998 = vmatprep.subr.bf16.mxu1 %v12498_v20  ;;  %v12689_v53 = vld [vmem:[#allocation8 + $0x610] sm:$0xff]  ;;  %v12692_v22 = vld [vmem:[#allocation8 + $0x628] sm:$0xff]  ;;  %v12499_v12 = vld [vmem:[#allocation8 + $0x20] sm:$0xff] }
 0x80d   :  { %13244 = vmatprep.subr.bf16.mxu0 %v12690_v19  ;;  %v12691_v23 = vld [vmem:[#allocation8 + $0x620] sm:$0xff]  ;;  %v12502_v24 = vld [vmem:[#allocation8 + $0x38] sm:$0xff]  ;;  %v12501_v33 = vld [vmem:[#allocation8 + $0x30] sm:$0xff] }
 0x80e   :  { %v12694_v30 = vld [vmem:[#allocation8 + $0x638] sm:$0xff]  ;;  %v12693_v28 = vld [vmem:[#allocation8 + $0x630] sm:$0xff]  ;;  %v12504_v32 = vld [vmem:[#allocation8 + $0x48] sm:$0xff] }
 0x80f   :  { %12999 = vmatpush1.bf16.msra.mxu1 %v12497_v13  ;;  %v12696_v36 = vld [vmem:[#allocation8 + $0x648] sm:$0xff]  ;;  %v12503_v37 = vld [vmem:[#allocation8 + $0x40] sm:$0xff]  ;;  %v12506_v43 = vld [vmem:[#allocation8 + $0x58] sm:$0xff] }
 0x810   :  { %13245 = vmatpush1.bf16.msra.mxu0 %v12689_v53  ;;  %13000 = vmatprep.subr.bf16.mxu1 %v12500_v21  ;;  %v12695_v39 = vld [vmem:[#allocation8 + $0x640] sm:$0xff]  ;;  %v12698_v25 = vld [vmem:[#allocation8 + $0x658] sm:$0xff]  ;;  %v12505_v26 = vld [vmem:[#allocation8 + $0x50] sm:$0xff]  ;;  %v19283_v21 = vsub.s32 4, %v19005_v29 }
 0x811   :  { %13246 = vmatprep.subr.bf16.mxu0 %v12692_v22  ;;  %v12697_v44 = vld [vmem:[#allocation8 + $0x650] sm:$0xff]  ;;  %v12508_v48 = vld [vmem:[#allocation8 + $0x68] sm:$0xff]  ;;  %v12507_v52 = vld [vmem:[#allocation8 + $0x60] sm:$0xff] }
 0x812   :  { %v12700_v46 = vld [vmem:[#allocation8 + $0x668] sm:$0xff]  ;;  %v12699_v56 = vld [vmem:[#allocation8 + $0x660] sm:$0xff]  ;;  %v12510_v58 = vld [vmem:[#allocation8 + $0x78] sm:$0xff] }
 0x813   :  { %13001 = vmatpush1.bf16.msra.mxu1 %v12499_v12  ;;  %v19274_v27 = vld [vmem:[#allocation7] sm:$0xff]  ;;  %v19278_v51 = vld [vmem:[#allocation7 + $0x8] sm:$0xff]  ;;  %v12702_v59 = vld [vmem:[#allocation8 + $0x678] sm:$0xff] }
 0x814   :  { %13247 = vmatpush1.bf16.msra.mxu0 %v12691_v23  ;;  %13002 = vmatprep.subr.bf16.mxu1 %v12502_v24  ;;  %v12316_v47 = vrot.slane %v19274_v27, %v19016_v38  ;;  %v12364_v57 = vrot.slane %v19278_v51, %v19272_v45  ;;  %v12509_v62 = vld [vmem:[#allocation8 + $0x70] sm:$0xff]  ;;  %v12512_v0 = vld [vmem:[#allocation8 + $0x88] sm:$0xff]  ;;  %v12511_v1 = vld [vmem:[#allocation8 + $0x80] sm:$0xff] }
 0x815   :  { %13248 = vmatprep.subr.bf16.mxu0 %v12694_v30  ;;  %v12701_v63 = vld [vmem:[#allocation8 + $0x670] sm:$0xff]  ;;  %v12704_v18 = vld [vmem:[#allocation8 + $0x688] sm:$0xff]  ;;  %v12703_v6 = vld [vmem:[#allocation8 + $0x680] sm:$0xff]  ;;  %v19286_v30 = vsub.s32 3, %v19005_v29 }
 0x816   :  { %v12465_v60 = vpack.c.bf16 %v12316_v47, %v12316_v47  ;;  %v12477_v61 = vpack.c.bf16 %v12364_v57, %v12364_v57  ;;  %v12514_v7 = vld [vmem:[#allocation8 + $0x98] sm:$0xff]  ;;  %v12513_v11 = vld [vmem:[#allocation8 + $0x90] sm:$0xff]  ;;  %v12516_v8 = vld [vmem:[#allocation8 + $0xa8] sm:$0xff] }
 0x817   :  { %13003 = vmatpush1.bf16.msra.mxu1 %v12501_v33  ;;  %v12706_v10 = vld [vmem:[#allocation8 + $0x698] sm:$0xff]  ;;  %v12705_v14 = vld [vmem:[#allocation8 + $0x690] sm:$0xff]  ;;  %v12708_v9 = vld [vmem:[#allocation8 + $0x6a8] sm:$0xff]  ;;  %v19289_v33 = vsub.s32 7, %v19005_v29 }
 0x818   :  { %13249 = vmatpush1.bf16.msra.mxu0 %v12693_v28  ;;  %13004 = vmatprep.subr.bf16.mxu1 %v12504_v32  ;;  %v12515_v4 = vld [vmem:[#allocation8 + $0xa0] sm:$0xff]  ;;  %v12518_v49 = vld [vmem:[#allocation8 + $0xb8] sm:$0xff]  ;;  %v12517_v16 = vld [vmem:[#allocation8 + $0xb0] sm:$0xff]  ;;  %v12312_v28 = vrot.slane %v19274_v27, %v19013_v31  ;;  %v12360_v32 = vrot.slane %v19278_v51, %v19283_v21 }
 0x819   :  { %13250 = vmatprep.subr.bf16.mxu0 %v12696_v36  ;;  %13028 = vmatprep.mubr.bf16.mxu1 %v12465_v60  ;;  %v12707_v5 = vld [vmem:[#allocation8 + $0x6a0] sm:$0xff]  ;;  %v12710_v15 = vld [vmem:[#allocation8 + $0x6b8] sm:$0xff]  ;;  %v12709_v17 = vld [vmem:[#allocation8 + $0x6b0] sm:$0xff] }
 0x81a   :  { %13274 = vmatprep.mubr.bf16.mxu0 %v12477_v61  ;;  %v12520_v34 = vld [vmem:[#allocation8 + $0xc8] sm:$0xff]  ;;  %v12519_v55 = vld [vmem:[#allocation8 + $0xc0] sm:$0xff]  ;;  %v12522_v50 = vld [vmem:[#allocation8 + $0xd8] sm:$0xff] }
 0x81b   :  { %13005 = vmatpush1.bf16.msra.mxu1 %v12503_v37  ;;  %v12712_v54 = vld [vmem:[#allocation8 + $0x6c8] sm:$0xff]  ;;  %v12711_v2 = vld [vmem:[#allocation8 + $0x6c0] sm:$0xff]  ;;  %v12714_v3 = vld [vmem:[#allocation8 + $0x6d8] sm:$0xff] }
 0x81c   :  { %13251 = vmatpush1.bf16.msra.mxu0 %v12695_v39  ;;  %13006 = vmatprep.subr.bf16.mxu1 %v12506_v43  ;;  %v12521_v20 = vld [vmem:[#allocation8 + $0xd0] sm:$0xff]  ;;  %v12524_v13 = vld [vmem:[#allocation8 + $0xe8] sm:$0xff]  ;;  %v12523_v22 = vld [vmem:[#allocation8 + $0xe0] sm:$0xff] }
 0x81d   :  { %13252 = vmatprep.subr.bf16.mxu0 %v12698_v25  ;;  %v12713_v19 = vld [vmem:[#allocation8 + $0x6d0] sm:$0xff]  ;;  %v12716_v53 = vld [vmem:[#allocation8 + $0x6e8] sm:$0xff]  ;;  %v12715_v12 = vld [vmem:[#allocation8 + $0x6e0] sm:$0xff]  ;;  %v12324_v25 = vrot.slane %v19274_v27, %v19286_v30 }
 0x81e   :  { %v12526_v23 = vld [vmem:[#allocation8 + $0xf8] sm:$0xff]  ;;  %v12525_v36 = vld [vmem:[#allocation8 + $0xf0] sm:$0xff]  ;;  %v12528_v39 = vld [vmem:[#allocation8 + $0x108] sm:$0xff] }
 0x81f   :  { %13007 = vmatpush1.bf16.msra.mxu1 %v12505_v26  ;;  %v12718_v24 = vld [vmem:[#allocation8 + $0x6f8] sm:$0xff]  ;;  %v12717_v37 = vld [vmem:[#allocation8 + $0x6f0] sm:$0xff]  ;;  %v12720_v43 = vld [vmem:[#allocation8 + $0x708] sm:$0xff]  ;;  %v12372_v26 = vrot.slane %v19278_v51, %v19289_v33  ;;  %v12467_v57 = vpack.c.bf16 %v12324_v25, %v12324_v25 }
 0x820   :  { %13253 = vmatpush1.bf16.msra.mxu0 %v12697_v44  ;;  %13008 = vmatprep.subr.bf16.mxu1 %v12508_v48  ;;  %v12464_v44 = vpack.c.bf16 %v12312_v28, %v12312_v28  ;;  %v12476_v48 = vpack.c.bf16 %v12360_v32, %v12360_v32  ;;  %v12719_v47 = vld [vmem:[#allocation8 + $0x700] sm:$0xff]  ;;  %v12721_v60 = vld [vmem:[#allocation8 + $0x710] sm:$0xff]  ;;  %v12532_v61 = vld [vmem:[#allocation8 + $0x128] sm:$0xff] }
 0x821   :  { %13254 = vmatprep.subr.bf16.mxu0 %v12700_v46  ;;  %v12527_v46 = vld [vmem:[#allocation8 + $0x100] sm:$0xff]  ;;  %v12740_v28 = vld [vmem:[#allocation8 + $0x7a8] sm:$0xff]  ;;  %v12741_v25 = vld [vmem:[#allocation8 + $0x7b0] sm:$0xff] }
 0x822   :  { %v12547_v32 = vld [vmem:[#allocation8 + $0x1a0] sm:$0xff] }
 0x823   :  { %13009 = vmatpush1.bf16.msra.mxu1 %v12507_v52  ;;  %v12530_v52 = vld [vmem:[#allocation8 + $0x118] sm:$0xff] }
 0x824   :  { %13255 = vmatpush1.bf16.msra.mxu0 %v12699_v56  ;;  %13010 = vmatprep.subr.bf16.mxu1 %v12510_v58  ;;  %v12722_v56 = vld [vmem:[#allocation8 + $0x718] sm:$0xff]  ;;  %v12479_v58 = vpack.c.bf16 %v12372_v26, %v12372_v26  ;;  %v12552_v26 = vld [vmem:[#allocation8 + $0x1c8] sm:$0xff] }
 0x825   :  { %13256 = vmatprep.subr.bf16.mxu0 %v12702_v59  ;;  %v12529_v59 = vld [vmem:[#allocation8 + $0x110] sm:$0xff] }
 0x827   :  { %13011 = vmatpush1.bf16.msra.mxu1 %v12509_v62  ;;  %v12724_v62 = vld [vmem:[#allocation8 + $0x728] sm:$0xff] }
 0x828   :  { %13257 = vmatpush1.bf16.msra.mxu0 %v12701_v63  ;;  %13012 = vmatprep.subr.bf16.mxu1 %v12512_v0  ;;  %v12531_v63 = vld [vmem:[#allocation8 + $0x120] sm:$0xff] }
 0x829   :  { %13258 = vmatprep.subr.bf16.mxu0 %v12704_v18  ;;  %v12723_v0 = vld [vmem:[#allocation8 + $0x720] sm:$0xff]  ;;  %v12534_v18 = vld [vmem:[#allocation8 + $0x138] sm:$0xff] }
 0x82b   :  { %13013 = vmatpush1.bf16.msra.mxu1 %v12511_v1  ;;  %v12726_v1 = vld [vmem:[#allocation8 + $0x738] sm:$0xff] }
 0x82c   :  { %13259 = vmatpush1.bf16.msra.mxu0 %v12703_v6  ;;  %13014 = vmatprep.subr.bf16.mxu1 %v12514_v7  ;;  %v12533_v6 = vld [vmem:[#allocation8 + $0x130] sm:$0xff] }
 0x82d   :  { %13260 = vmatprep.subr.bf16.mxu0 %v12706_v10  ;;  %v12725_v7 = vld [vmem:[#allocation8 + $0x730] sm:$0xff]  ;;  %v12536_v10 = vld [vmem:[#allocation8 + $0x148] sm:$0xff] }
 0x82f   :  { %13015 = vmatpush1.bf16.msra.mxu1 %v12513_v11  ;;  %v12728_v11 = vld [vmem:[#allocation8 + $0x748] sm:$0xff] }
 0x830   :  { %13261 = vmatpush1.bf16.msra.mxu0 %v12705_v14  ;;  %13016 = vmatprep.subr.bf16.mxu1 %v12516_v8  ;;  %v12535_v14 = vld [vmem:[#allocation8 + $0x140] sm:$0xff] }
 0x831   :  { %13262 = vmatprep.subr.bf16.mxu0 %v12708_v9  ;;  %v12727_v8 = vld [vmem:[#allocation8 + $0x740] sm:$0xff]  ;;  %v12538_v9 = vld [vmem:[#allocation8 + $0x158] sm:$0xff] }
 0x833   :  { %13017 = vmatpush1.bf16.msra.mxu1 %v12515_v4  ;;  %v12730_v4 = vld [vmem:[#allocation8 + $0x758] sm:$0xff] }
 0x834   :  { %13263 = vmatpush1.bf16.msra.mxu0 %v12707_v5  ;;  %13018 = vmatprep.subr.bf16.mxu1 %v12518_v49  ;;  %v12537_v5 = vld [vmem:[#allocation8 + $0x150] sm:$0xff] }
 0x835   :  { %13264 = vmatprep.subr.bf16.mxu0 %v12710_v15  ;;  %v12729_v49 = vld [vmem:[#allocation8 + $0x750] sm:$0xff]  ;;  %v12540_v15 = vld [vmem:[#allocation8 + $0x168] sm:$0xff] }
 0x837   :  { %13019 = vmatpush1.bf16.msra.mxu1 %v12517_v16  ;;  %v12732_v16 = vld [vmem:[#allocation8 + $0x768] sm:$0xff] }
 0x838   :  { %13265 = vmatpush1.bf16.msra.mxu0 %v12709_v17  ;;  %13020 = vmatprep.subr.bf16.mxu1 %v12520_v34  ;;  %v12539_v17 = vld [vmem:[#allocation8 + $0x160] sm:$0xff] }
 0x839   :  { %13266 = vmatprep.subr.bf16.mxu0 %v12712_v54  ;;  %v12731_v34 = vld [vmem:[#allocation8 + $0x760] sm:$0xff]  ;;  %v12542_v54 = vld [vmem:[#allocation8 + $0x178] sm:$0xff] }
 0x83b   :  { %13021 = vmatpush1.bf16.msra.mxu1 %v12519_v55  ;;  %v12734_v55 = vld [vmem:[#allocation8 + $0x778] sm:$0xff] }
 0x83c   :  { %13267 = vmatpush1.bf16.msra.mxu0 %v12711_v2  ;;  %13022 = vmatprep.subr.bf16.mxu1 %v12522_v50  ;;  %v12541_v2 = vld [vmem:[#allocation8 + $0x170] sm:$0xff] }
 0x83d   :  { %13268 = vmatprep.subr.bf16.mxu0 %v12714_v3  ;;  %v12733_v50 = vld [vmem:[#allocation8 + $0x770] sm:$0xff]  ;;  %v12544_v3 = vld [vmem:[#allocation8 + $0x188] sm:$0xff] }
 0x83f   :  { %13023 = vmatpush1.bf16.msra.mxu1 %v12521_v20  ;;  %v12736_v20 = vld [vmem:[#allocation8 + $0x788] sm:$0xff] }
 0x840   :  { %13269 = vmatpush1.bf16.msra.mxu0 %v12713_v19  ;;  %13024 = vmatprep.subr.bf16.mxu1 %v12524_v13  ;;  %v12543_v19 = vld [vmem:[#allocation8 + $0x180] sm:$0xff] }
 0x841   :  { %13270 = vmatprep.subr.bf16.mxu0 %v12716_v53  ;;  %v12735_v13 = vld [vmem:[#allocation8 + $0x780] sm:$0xff]  ;;  %v12546_v53 = vld [vmem:[#allocation8 + $0x198] sm:$0xff] }
 0x843   :  { %13025 = vmatpush1.bf16.msra.mxu1 %v12523_v22  ;;  %v12738_v22 = vld [vmem:[#allocation8 + $0x798] sm:$0xff] }
 0x844   :  { %13271 = vmatpush1.bf16.msra.mxu0 %v12715_v12  ;;  %13026 = vmatprep.subr.bf16.mxu1 %v12526_v23  ;;  %v12545_v12 = vld [vmem:[#allocation8 + $0x190] sm:$0xff] }
 0x845   :  { %13272 = vmatprep.subr.bf16.mxu0 %v12718_v24  ;;  %v12737_v23 = vld [vmem:[#allocation8 + $0x790] sm:$0xff]  ;;  %v12548_v24 = vld [vmem:[#allocation8 + $0x1a8] sm:$0xff] }
 0x847   :  { %13027 = vmatpush1.bf16.msra.mxu1 %v12525_v36  ;;  %v12739_v36 = vld [vmem:[#allocation8 + $0x7a0] sm:$0xff] }
 0x848   :  { %13273 = vmatpush1.bf16.msra.mxu0 %v12717_v37  ;;  %13037 = vmatprep.subr.bf16.mxu1 %v12528_v39  ;;  %v12550_v37 = vld [vmem:[#allocation8 + $0x1b8] sm:$0xff] }
 0x849   :  { %13283 = vmatprep.subr.bf16.mxu0 %v12720_v43  ;;  %v12742_v39 = vld [vmem:[#allocation8 + $0x7b8] sm:$0xff]  ;;  %v12549_v43 = vld [vmem:[#allocation8 + $0x1b0] sm:$0xff] }
 0x84a   :  { %13029 = vmatmul.mubr.bf16.vlgmr.msra.gmra.mrb[64].mxu1 %v12464_v44  ;;  %v12744_v44 = vld [vmem:[#allocation8 + $0x7c8] sm:$0xff] }
 0x84b   :  { %13275 = vmatmul.mubr.bf16.vlgmr.msra.gmra.mrb[32].mxu0 %v12476_v48  ;;  %13038 = vmatpush1.bf16.msra.mxu1 %v12527_v46  ;;  %v12551_v48 = vld [vmem:[#allocation8 + $0x1c0] sm:$0xff] }
 0x84c   :  { %13284 = vmatpush1.bf16.msra.mxu0 %v12719_v47  ;;  %13039 = vmatprep.subr.bf16.mxu1 %v12530_v52  ;;  %v12743_v46 = vld [vmem:[#allocation8 + $0x7c0] sm:$0xff]  ;;  %v12554_v47 = vld [vmem:[#allocation8 + $0x1d8] sm:$0xff] }
 0x84d   :  { %13285 = vmatprep.subr.bf16.mxu0 %v12722_v56  ;;  %13069 = vmatprep.mubr.bf16.mxu1 %v12467_v57  ;;  %v12746_v52 = vld [vmem:[#allocation8 + $0x7d8] sm:$0xff]  ;;  %v12553_v56 = vld [vmem:[#allocation8 + $0x1d0] sm:$0xff] }
 0x84e   :  { %13315 = vmatprep.mubr.bf16.mxu0 %v12479_v58  ;;  %v12745_v57 = vld [vmem:[#allocation8 + $0x7d0] sm:$0xff]  ;;  %v12556_v58 = vld [vmem:[#allocation8 + $0x1e8] sm:$0xff] }
 0x84f   :  { %13040 = vmatpush1.bf16.msra.mxu1 %v12529_v59  ;;  %v12748_v59 = vld [vmem:[#allocation8 + $0x7e8] sm:$0xff] }
 0x850   :  { %13286 = vmatpush1.bf16.msra.mxu0 %v12721_v60  ;;  %13041 = vmatprep.subr.bf16.mxu1 %v12532_v61  ;;  %v19300_v60 = vsub.s32 2, %v19005_v29  ;;  %v19303_v61 = vsub.s32 6, %v19005_v29  ;;  %v12557_v29 = vld [vmem:[#allocation8 + $0x1f0] sm:$0xff] }
 0x851   :  { %13287 = vmatprep.subr.bf16.mxu0 %v12724_v62  ;;  %v12555_v62 = vld [vmem:[#allocation8 + $0x1e0] sm:$0xff] }
 0x853   :  { %13042 = vmatpush1.bf16.msra.mxu1 %v12531_v63  ;;  %v12747_v63 = vld [vmem:[#allocation8 + $0x7e0] sm:$0xff] }
 0x854   :  { %13288 = vmatpush1.bf16.msra.mxu0 %v12723_v0  ;;  %13043 = vmatprep.subr.bf16.mxu1 %v12534_v18  ;;  %v12558_v0 = vld [vmem:[#allocation8 + $0x1f8] sm:$0xff] }
 0x855   :  { %13289 = vmatprep.subr.bf16.mxu0 %v12726_v1  ;;  %v12750_v18 = vld [vmem:[#allocation8 + $0x7f8] sm:$0xff]  ;;  %v12320_v1 = vrot.slane %v19274_v27, %v19300_v60 }
 0x857   :  { %13044 = vmatpush1.bf16.msra.mxu1 %v12533_v6  ;;  %v12368_v6 = vrot.slane %v19278_v51, %v19303_v61  ;;  %v12559_v51 = vld [vmem:[#allocation8 + $0x200] sm:$0xff] }
 0x858   :  { %13290 = vmatpush1.bf16.msra.mxu0 %v12725_v7  ;;  %13045 = vmatprep.subr.bf16.mxu1 %v12536_v10  ;;  %v19309_v7 = vld [vmem:[#allocation7 + $0x10] sm:$0xff] }
 0x859   :  { %13291 = vmatprep.subr.bf16.mxu0 %v12728_v11  ;;  %v12749_v10 = vld [vmem:[#allocation8 + $0x7f0] sm:$0xff]  ;;  %v12560_v11 = vld [vmem:[#allocation8 + $0x208] sm:$0xff] }
 0x85b   :  { %13046 = vmatpush1.bf16.msra.mxu1 %v12535_v14  ;;  %v12752_v14 = vld [vmem:[#allocation8 + $0x808] sm:$0xff] }
 0x85c   :  { %13292 = vmatpush1.bf16.msra.mxu0 %v12727_v8  ;;  %13047 = vmatprep.subr.bf16.mxu1 %v12538_v9  ;;  %v12332_v8 = vrot.slane %v19274_v27, %v19272_v45  ;;  %v12380_v9 = vrot.slane %v19309_v7, %v19016_v38 }
 0x85d   :  { %13293 = vmatprep.subr.bf16.mxu0 %v12730_v4  ;;  %v12466_v4 = vpack.c.bf16 %v12320_v1, %v12320_v1  ;;  %v12580_v1 = vld [vmem:[#allocation8 + $0x2a8] sm:$0xff] }
 0x85f   :  { %13048 = vmatpush1.bf16.msra.mxu1 %v12537_v5  ;;  %v12478_v5 = vpack.c.bf16 %v12368_v6, %v12368_v6  ;;  %v12772_v6 = vld [vmem:[#allocation8 + $0x8a8] sm:$0xff] }
 0x860   :  { %13294 = vmatpush1.bf16.msra.mxu0 %v12729_v49  ;;  %13049 = vmatprep.subr.bf16.mxu1 %v12540_v15  ;;  %v12751_v49 = vld [vmem:[#allocation8 + $0x800] sm:$0xff]  ;;  %v12562_v15 = vld [vmem:[#allocation8 + $0x218] sm:$0xff] }
 0x861   :  { %13295 = vmatprep.subr.bf16.mxu0 %v12732_v16  ;;  %v12754_v16 = vld [vmem:[#allocation8 + $0x818] sm:$0xff] }
 0x863   :  { %13050 = vmatpush1.bf16.msra.mxu1 %v12539_v17  ;;  %v12469_v17 = vpack.c.bf16 %v12332_v8, %v12332_v8  ;;  %v12581_v8 = vld [vmem:[#allocation8 + $0x2b0] sm:$0xff] }
 0x864   :  { %13296 = vmatpush1.bf16.msra.mxu0 %v12731_v34  ;;  %13051 = vmatprep.subr.bf16.mxu1 %v12542_v54  ;;  %v12481_v34 = vpack.c.bf16 %v12380_v9, %v12380_v9  ;;  %v12561_v54 = vld [vmem:[#allocation8 + $0x210] sm:$0xff] }
 0x865   :  { %13297 = vmatprep.subr.bf16.mxu0 %v12734_v55  ;;  %v12753_v55 = vld [vmem:[#allocation8 + $0x810] sm:$0xff] }
 0x866   :  { %v12773_v9 = vld [vmem:[#allocation8 + $0x8b0] sm:$0xff] }
 0x867   :  { %13052 = vmatpush1.bf16.msra.mxu1 %v12541_v2  ;;  %v12564_v2 = vld [vmem:[#allocation8 + $0x228] sm:$0xff] }
 0x868   :  { %13298 = vmatpush1.bf16.msra.mxu0 %v12733_v50  ;;  %13053 = vmatprep.subr.bf16.mxu1 %v12544_v3  ;;  %v12756_v50 = vld [vmem:[#allocation8 + $0x828] sm:$0xff]  ;;  %v12563_v3 = vld [vmem:[#allocation8 + $0x220] sm:$0xff] }
 0x869   :  { %13299 = vmatprep.subr.bf16.mxu0 %v12736_v20  ;;  %v12755_v20 = vld [vmem:[#allocation8 + $0x820] sm:$0xff] }
 0x86b   :  { %13054 = vmatpush1.bf16.msra.mxu1 %v12543_v19  ;;  %v12566_v19 = vld [vmem:[#allocation8 + $0x238] sm:$0xff] }
 0x86c   :  { %13300 = vmatpush1.bf16.msra.mxu0 %v12735_v13  ;;  %13055 = vmatprep.subr.bf16.mxu1 %v12546_v53  ;;  %v12758_v13 = vld [vmem:[#allocation8 + $0x838] sm:$0xff]  ;;  %v12565_v53 = vld [vmem:[#allocation8 + $0x230] sm:$0xff] }
 0x86d   :  { %13301 = vmatprep.subr.bf16.mxu0 %v12738_v22  ;;  %v12757_v22 = vld [vmem:[#allocation8 + $0x830] sm:$0xff] }
 0x86f   :  { %13056 = vmatpush1.bf16.msra.mxu1 %v12545_v12  ;;  %v12568_v12 = vld [vmem:[#allocation8 + $0x248] sm:$0xff] }
 0x870   :  { %13302 = vmatpush1.bf16.msra.mxu0 %v12737_v23  ;;  %13057 = vmatprep.subr.bf16.mxu1 %v12548_v24  ;;  %v12760_v23 = vld [vmem:[#allocation8 + $0x848] sm:$0xff]  ;;  %v12567_v24 = vld [vmem:[#allocation8 + $0x240] sm:$0xff] }
 0x871   :  { %13303 = vmatprep.subr.bf16.mxu0 %v12740_v28  ;;  %v12759_v28 = vld [vmem:[#allocation8 + $0x840] sm:$0xff] }
 0x873   :  { %13058 = vmatpush1.bf16.msra.mxu1 %v12547_v32  ;;  %v12570_v32 = vld [vmem:[#allocation8 + $0x258] sm:$0xff] }
 0x874   :  { %13304 = vmatpush1.bf16.msra.mxu0 %v12739_v36  ;;  %13059 = vmatprep.subr.bf16.mxu1 %v12550_v37  ;;  %v12762_v36 = vld [vmem:[#allocation8 + $0x858] sm:$0xff]  ;;  %v12569_v37 = vld [vmem:[#allocation8 + $0x250] sm:$0xff] }
 0x875   :  { %13305 = vmatprep.subr.bf16.mxu0 %v12742_v39  ;;  %v12761_v39 = vld [vmem:[#allocation8 + $0x850] sm:$0xff] }
 0x877   :  { %13060 = vmatpush1.bf16.msra.mxu1 %v12549_v43  ;;  %v12572_v43 = vld [vmem:[#allocation8 + $0x268] sm:$0xff] }
 0x878   :  { %13306 = vmatpush1.bf16.msra.mxu0 %v12741_v25  ;;  %13061 = vmatprep.subr.bf16.mxu1 %v12552_v26  ;;  %v12764_v25 = vld [vmem:[#allocation8 + $0x868] sm:$0xff]  ;;  %v12571_v26 = vld [vmem:[#allocation8 + $0x260] sm:$0xff] }
 0x879   :  { %13307 = vmatprep.subr.bf16.mxu0 %v12744_v44  ;;  %v12763_v44 = vld [vmem:[#allocation8 + $0x860] sm:$0xff] }
 0x87b   :  { %13062 = vmatpush1.bf16.msra.mxu1 %v12551_v48  ;;  %v12574_v48 = vld [vmem:[#allocation8 + $0x278] sm:$0xff] }
 0x87c   :  { %13308 = vmatpush1.bf16.msra.mxu0 %v12743_v46  ;;  %13063 = vmatprep.subr.bf16.mxu1 %v12554_v47  ;;  %v12766_v46 = vld [vmem:[#allocation8 + $0x878] sm:$0xff]  ;;  %v12573_v47 = vld [vmem:[#allocation8 + $0x270] sm:$0xff] }
 0x87d   :  { %13309 = vmatprep.subr.bf16.mxu0 %v12746_v52  ;;  %v12765_v52 = vld [vmem:[#allocation8 + $0x870] sm:$0xff] }
 0x87f   :  { %13064 = vmatpush1.bf16.msra.mxu1 %v12553_v56  ;;  %v12576_v56 = vld [vmem:[#allocation8 + $0x288] sm:$0xff] }
 0x880   :  { %13310 = vmatpush1.bf16.msra.mxu0 %v12745_v57  ;;  %13065 = vmatprep.subr.bf16.mxu1 %v12556_v58  ;;  %v12768_v57 = vld [vmem:[#allocation8 + $0x888] sm:$0xff]  ;;  %v12575_v58 = vld [vmem:[#allocation8 + $0x280] sm:$0xff] }
 0x881   :  { %13311 = vmatprep.subr.bf16.mxu0 %v12748_v59  ;;  %v12767_v59 = vld [vmem:[#allocation8 + $0x880] sm:$0xff] }
 0x883   :  { %13066 = vmatpush1.bf16.msra.mxu1 %v12555_v62  ;;  %v12578_v62 = vld [vmem:[#allocation8 + $0x298] sm:$0xff] }
 0x884   :  { %13312 = vmatpush1.bf16.msra.mxu0 %v12747_v63  ;;  %13067 = vmatprep.subr.bf16.mxu1 %v12558_v0  ;;  %v12770_v63 = vld [vmem:[#allocation8 + $0x898] sm:$0xff]  ;;  %v12577_v0 = vld [vmem:[#allocation8 + $0x290] sm:$0xff] }
 0x885   :  { %13313 = vmatprep.subr.bf16.mxu0 %v12750_v18  ;;  %v12769_v18 = vld [vmem:[#allocation8 + $0x890] sm:$0xff] }
 0x887   :  { %13068 = vmatpush1.bf16.msra.mxu1 %v12557_v29  ;;  %v12579_v29 = vld [vmem:[#allocation8 + $0x2a0] sm:$0xff] }
 0x888   :  { %13314 = vmatpush1.bf16.msra.mxu0 %v12749_v10  ;;  %13078 = vmatprep.subr.bf16.mxu1 %v12560_v11  ;;  %v12771_v10 = vld [vmem:[#allocation8 + $0x8a0] sm:$0xff]  ;;  %v12582_v11 = vld [vmem:[#allocation8 + $0x2b8] sm:$0xff] }
 0x889   :  { %13324 = vmatprep.subr.bf16.mxu0 %v12752_v14  ;;  %v12774_v14 = vld [vmem:[#allocation8 + $0x8b8] sm:$0xff] }
 0x88a   :  { %13070 = vmatmul.mubr.bf16.vlgmr.msra.gmra.mrb[64].mxu1 %v12466_v4  ;;  %v12584_v4 = vld [vmem:[#allocation8 + $0x2c8] sm:$0xff] }
 0x88b   :  { %13316 = vmatmul.mubr.bf16.vlgmr.msra.gmra.mrb[32].mxu0 %v12478_v5  ;;  %13079 = vmatpush1.bf16.msra.mxu1 %v12559_v51  ;;  %v12776_v5 = vld [vmem:[#allocation8 + $0x8c8] sm:$0xff]  ;;  %v12583_v51 = vld [vmem:[#allocation8 + $0x2c0] sm:$0xff] }
 0x88c   :  { %13325 = vmatpush1.bf16.msra.mxu0 %v12751_v49  ;;  %13080 = vmatprep.subr.bf16.mxu1 %v12562_v15  ;;  %v12775_v49 = vld [vmem:[#allocation8 + $0x8c0] sm:$0xff]  ;;  %v12586_v15 = vld [vmem:[#allocation8 + $0x2d8] sm:$0xff] }
 0x88d   :  { %13326 = vmatprep.subr.bf16.mxu0 %v12754_v16  ;;  %13110 = vmatprep.mubr.bf16.mxu1 %v12469_v17  ;;  %v12778_v16 = vld [vmem:[#allocation8 + $0x8d8] sm:$0xff]  ;;  %v12585_v17 = vld [vmem:[#allocation8 + $0x2d0] sm:$0xff] }
 0x88e   :  { %13356 = vmatprep.mubr.bf16.mxu0 %v12481_v34  ;;  %v12777_v34 = vld [vmem:[#allocation8 + $0x8d0] sm:$0xff] }
 0x88f   :  { %13081 = vmatpush1.bf16.msra.mxu1 %v12561_v54  ;;  %v12588_v54 = vld [vmem:[#allocation8 + $0x2e8] sm:$0xff] }
 0x890   :  { %13327 = vmatpush1.bf16.msra.mxu0 %v12753_v55  ;;  %13082 = vmatprep.subr.bf16.mxu1 %v12564_v2  ;;  %v12780_v55 = vld [vmem:[#allocation8 + $0x8e8] sm:$0xff]  ;;  %v12587_v2 = vld [vmem:[#allocation8 + $0x2e0] sm:$0xff] }
 0x891   :  { %13328 = vmatprep.subr.bf16.mxu0 %v12756_v50  ;;  %v12779_v50 = vld [vmem:[#allocation8 + $0x8e0] sm:$0xff] }
 0x893   :  { %13083 = vmatpush1.bf16.msra.mxu1 %v12563_v3  ;;  %v12590_v3 = vld [vmem:[#allocation8 + $0x2f8] sm:$0xff] }
 0x894   :  { %13329 = vmatpush1.bf16.msra.mxu0 %v12755_v20  ;;  %13084 = vmatprep.subr.bf16.mxu1 %v12566_v19  ;;  %v12782_v20 = vld [vmem:[#allocation8 + $0x8f8] sm:$0xff]  ;;  %v12328_v19 = vrot.slane %v19274_v27, %v19283_v21 }
 0x895   :  { %13330 = vmatprep.subr.bf16.mxu0 %v12758_v13  ;;  %v12376_v13 = vrot.slane %v19309_v7, %v19013_v31 }
 0x897   :  { %13085 = vmatpush1.bf16.msra.mxu1 %v12565_v53  ;;  %v12589_v53 = vld [vmem:[#allocation8 + $0x2f0] sm:$0xff] }
 0x898   :  { %13331 = vmatpush1.bf16.msra.mxu0 %v12757_v22  ;;  %13086 = vmatprep.subr.bf16.mxu1 %v12568_v12  ;;  %v12781_v22 = vld [vmem:[#allocation8 + $0x8f0] sm:$0xff]  ;;  %v12592_v12 = vld [vmem:[#allocation8 + $0x308] sm:$0xff] }
 0x899   :  { %13332 = vmatprep.subr.bf16.mxu0 %v12760_v23  ;;  %v12784_v23 = vld [vmem:[#allocation8 + $0x908] sm:$0xff] }
 0x89b   :  { %13087 = vmatpush1.bf16.msra.mxu1 %v12567_v24  ;;  %v12340_v24 = vrot.slane %v19274_v27, %v19289_v33 }
 0x89c   :  { %13333 = vmatpush1.bf16.msra.mxu0 %v12759_v28  ;;  %13088 = vmatprep.subr.bf16.mxu1 %v12570_v32  ;;  %v12388_v28 = vrot.slane %v19309_v7, %v19286_v30  ;;  %v12468_v32 = vpack.c.bf16 %v12328_v19, %v12328_v19  ;;  %v12612_v19 = vld [vmem:[#allocation8 + $0x3a8] sm:$0xff] }
 0x89d   :  { %13334 = vmatprep.subr.bf16.mxu0 %v12762_v36  ;;  %v12480_v36 = vpack.c.bf16 %v12376_v13, %v12376_v13  ;;  %v12804_v13 = vld [vmem:[#allocation8 + $0x9a8] sm:$0xff] }
 0x89f   :  { %13089 = vmatpush1.bf16.msra.mxu1 %v12569_v37  ;;  %v12591_v37 = vld [vmem:[#allocation8 + $0x300] sm:$0xff] }
 0x8a0   :  { %13335 = vmatpush1.bf16.msra.mxu0 %v12761_v39  ;;  %13090 = vmatprep.subr.bf16.mxu1 %v12572_v43  ;;  %v12783_v39 = vld [vmem:[#allocation8 + $0x900] sm:$0xff]  ;;  %v12594_v43 = vld [vmem:[#allocation8 + $0x318] sm:$0xff] }
 0x8a1   :  { %13336 = vmatprep.subr.bf16.mxu0 %v12764_v25  ;;  %v12786_v25 = vld [vmem:[#allocation8 + $0x918] sm:$0xff] }
 0x8a3   :  { %13091 = vmatpush1.bf16.msra.mxu1 %v12571_v26  ;;  %v12471_v26 = vpack.c.bf16 %v12340_v24, %v12340_v24  ;;  %v12613_v24 = vld [vmem:[#allocation8 + $0x3b0] sm:$0xff] }
 0x8a4   :  { %13337 = vmatpush1.bf16.msra.mxu0 %v12763_v44  ;;  %13092 = vmatprep.subr.bf16.mxu1 %v12574_v48  ;;  %v12483_v44 = vpack.c.bf16 %v12388_v28, %v12388_v28  ;;  %v12593_v48 = vld [vmem:[#allocation8 + $0x310] sm:$0xff] }
 0x8a5   :  { %13338 = vmatprep.subr.bf16.mxu0 %v12766_v46  ;;  %v12785_v46 = vld [vmem:[#allocation8 + $0x910] sm:$0xff] }
 0x8a6   :  { %v12805_v28 = vld [vmem:[#allocation8 + $0x9b0] sm:$0xff] }
 0x8a7   :  { %13093 = vmatpush1.bf16.msra.mxu1 %v12573_v47  ;;  %v12596_v47 = vld [vmem:[#allocation8 + $0x328] sm:$0xff] }
 0x8a8   :  { %13339 = vmatpush1.bf16.msra.mxu0 %v12765_v52  ;;  %13094 = vmatprep.subr.bf16.mxu1 %v12576_v56  ;;  %v12788_v52 = vld [vmem:[#allocation8 + $0x928] sm:$0xff]  ;;  %v12595_v56 = vld [vmem:[#allocation8 + $0x320] sm:$0xff] }
 0x8a9   :  { %13340 = vmatprep.subr.bf16.mxu0 %v12768_v57  ;;  %v12787_v57 = vld [vmem:[#allocation8 + $0x920] sm:$0xff] }
 0x8ab   :  { %13095 = vmatpush1.bf16.msra.mxu1 %v12575_v58  ;;  %v12598_v58 = vld [vmem:[#allocation8 + $0x338] sm:$0xff] }
 0x8ac   :  { %13341 = vmatpush1.bf16.msra.mxu0 %v12767_v59  ;;  %13096 = vmatprep.subr.bf16.mxu1 %v12578_v62  ;;  %v12790_v59 = vld [vmem:[#allocation8 + $0x938] sm:$0xff]  ;;  %v12597_v62 = vld [vmem:[#allocation8 + $0x330] sm:$0xff] }
 0x8ad   :  { %13342 = vmatprep.subr.bf16.mxu0 %v12770_v63  ;;  %v12789_v63 = vld [vmem:[#allocation8 + $0x930] sm:$0xff] }
 0x8af   :  { %13097 = vmatpush1.bf16.msra.mxu1 %v12577_v0  ;;  %v12600_v0 = vld [vmem:[#allocation8 + $0x348] sm:$0xff] }
 0x8b0   :  { %13343 = vmatpush1.bf16.msra.mxu0 %v12769_v18  ;;  %13098 = vmatprep.subr.bf16.mxu1 %v12580_v1  ;;  %v12792_v18 = vld [vmem:[#allocation8 + $0x948] sm:$0xff]  ;;  %v12599_v1 = vld [vmem:[#allocation8 + $0x340] sm:$0xff] }
 0x8b1   :  { %13344 = vmatprep.subr.bf16.mxu0 %v12772_v6  ;;  %v12791_v6 = vld [vmem:[#allocation8 + $0x940] sm:$0xff] }
 0x8b3   :  { %13099 = vmatpush1.bf16.msra.mxu1 %v12579_v29  ;;  %v12602_v29 = vld [vmem:[#allocation8 + $0x358] sm:$0xff] }
 0x8b4   :  { %13345 = vmatpush1.bf16.msra.mxu0 %v12771_v10  ;;  %13100 = vmatprep.subr.bf16.mxu1 %v12582_v11  ;;  %v12794_v10 = vld [vmem:[#allocation8 + $0x958] sm:$0xff]  ;;  %v12601_v11 = vld [vmem:[#allocation8 + $0x350] sm:$0xff] }
 0x8b5   :  { %13346 = vmatprep.subr.bf16.mxu0 %v12774_v14  ;;  %v12793_v14 = vld [vmem:[#allocation8 + $0x950] sm:$0xff] }
 0x8b7   :  { %13101 = vmatpush1.bf16.msra.mxu1 %v12581_v8  ;;  %v12604_v8 = vld [vmem:[#allocation8 + $0x368] sm:$0xff] }
 0x8b8   :  { %13347 = vmatpush1.bf16.msra.mxu0 %v12773_v9  ;;  %13102 = vmatprep.subr.bf16.mxu1 %v12584_v4  ;;  %v12796_v9 = vld [vmem:[#allocation8 + $0x968] sm:$0xff]  ;;  %v12603_v4 = vld [vmem:[#allocation8 + $0x360] sm:$0xff] }
 0x8b9   :  { %13348 = vmatprep.subr.bf16.mxu0 %v12776_v5  ;;  %v12795_v5 = vld [vmem:[#allocation8 + $0x960] sm:$0xff] }
 0x8bb   :  { %13103 = vmatpush1.bf16.msra.mxu1 %v12583_v51  ;;  %v12606_v51 = vld [vmem:[#allocation8 + $0x378] sm:$0xff] }
 0x8bc   :  { %13349 = vmatpush1.bf16.msra.mxu0 %v12775_v49  ;;  %13104 = vmatprep.subr.bf16.mxu1 %v12586_v15  ;;  %v12798_v49 = vld [vmem:[#allocation8 + $0x978] sm:$0xff]  ;;  %v12605_v15 = vld [vmem:[#allocation8 + $0x370] sm:$0xff] }
 0x8bd   :  { %13350 = vmatprep.subr.bf16.mxu0 %v12778_v16  ;;  %v12797_v16 = vld [vmem:[#allocation8 + $0x970] sm:$0xff] }
 0x8bf   :  { %13105 = vmatpush1.bf16.msra.mxu1 %v12585_v17  ;;  %v12608_v17 = vld [vmem:[#allocation8 + $0x388] sm:$0xff] }
 0x8c0   :  { %13351 = vmatpush1.bf16.msra.mxu0 %v12777_v34  ;;  %13106 = vmatprep.subr.bf16.mxu1 %v12588_v54  ;;  %v12800_v34 = vld [vmem:[#allocation8 + $0x988] sm:$0xff]  ;;  %v12607_v54 = vld [vmem:[#allocation8 + $0x380] sm:$0xff] }
 0x8c1   :  { %13352 = vmatprep.subr.bf16.mxu0 %v12780_v55  ;;  %v12799_v55 = vld [vmem:[#allocation8 + $0x980] sm:$0xff] }
 0x8c3   :  { %13107 = vmatpush1.bf16.msra.mxu1 %v12587_v2  ;;  %v12610_v2 = vld [vmem:[#allocation8 + $0x398] sm:$0xff] }
 0x8c4   :  { %13353 = vmatpush1.bf16.msra.mxu0 %v12779_v50  ;;  %13108 = vmatprep.subr.bf16.mxu1 %v12590_v3  ;;  %v12802_v50 = vld [vmem:[#allocation8 + $0x998] sm:$0xff]  ;;  %v12609_v3 = vld [vmem:[#allocation8 + $0x390] sm:$0xff] }
 0x8c5   :  { %13354 = vmatprep.subr.bf16.mxu0 %v12782_v20  ;;  %v12801_v20 = vld [vmem:[#allocation8 + $0x990] sm:$0xff] }
 0x8c7   :  { %13109 = vmatpush1.bf16.msra.mxu1 %v12589_v53  ;;  %v12611_v53 = vld [vmem:[#allocation8 + $0x3a0] sm:$0xff] }
 0x8c8   :  { %13355 = vmatpush1.bf16.msra.mxu0 %v12781_v22  ;;  %13119 = vmatprep.subr.bf16.mxu1 %v12592_v12  ;;  %v12803_v22 = vld [vmem:[#allocation8 + $0x9a0] sm:$0xff]  ;;  %v12614_v12 = vld [vmem:[#allocation8 + $0x3b8] sm:$0xff] }
 0x8c9   :  { %13365 = vmatprep.subr.bf16.mxu0 %v12784_v23  ;;  %v12806_v23 = vld [vmem:[#allocation8 + $0x9b8] sm:$0xff] }
 0x8ca   :  { %13111 = vmatmul.mubr.bf16.vlgmr.msra.gmra.mrb[64].mxu1 %v12468_v32  ;;  %v12616_v32 = vld [vmem:[#allocation8 + $0x3c8] sm:$0xff] }
 0x8cb   :  { %13357 = vmatmul.mubr.bf16.vlgmr.msra.gmra.mrb[32].mxu0 %v12480_v36  ;;  %13120 = vmatpush1.bf16.msra.mxu1 %v12591_v37  ;;  %v12808_v36 = vld [vmem:[#allocation8 + $0x9c8] sm:$0xff]  ;;  %v12615_v37 = vld [vmem:[#allocation8 + $0x3c0] sm:$0xff] }
 0x8cc   :  { %13366 = vmatpush1.bf16.msra.mxu0 %v12783_v39  ;;  %13121 = vmatprep.subr.bf16.mxu1 %v12594_v43  ;;  %v12807_v39 = vld [vmem:[#allocation8 + $0x9c0] sm:$0xff]  ;;  %v12618_v43 = vld [vmem:[#allocation8 + $0x3d8] sm:$0xff] }
 0x8cd   :  { %13367 = vmatprep.subr.bf16.mxu0 %v12786_v25  ;;  %13151 = vmatprep.mubr.bf16.mxu1 %v12471_v26  ;;  %v12810_v25 = vld [vmem:[#allocation8 + $0x9d8] sm:$0xff]  ;;  %v12617_v26 = vld [vmem:[#allocation8 + $0x3d0] sm:$0xff] }
 0x8ce   :  { %13397 = vmatprep.mubr.bf16.mxu0 %v12483_v44  ;;  %v12809_v44 = vld [vmem:[#allocation8 + $0x9d0] sm:$0xff] }
 0x8cf   :  { %13122 = vmatpush1.bf16.msra.mxu1 %v12593_v48  ;;  %v12620_v48 = vld [vmem:[#allocation8 + $0x3e8] sm:$0xff] }
 0x8d0   :  { %13368 = vmatpush1.bf16.msra.mxu0 %v12785_v46  ;;  %13123 = vmatprep.subr.bf16.mxu1 %v12596_v47  ;;  %v12812_v46 = vld [vmem:[#allocation8 + $0x9e8] sm:$0xff]  ;;  %v12619_v47 = vld [vmem:[#allocation8 + $0x3e0] sm:$0xff] }
 0x8d1   :  { %13369 = vmatprep.subr.bf16.mxu0 %v12788_v52  ;;  %v12811_v52 = vld [vmem:[#allocation8 + $0x9e0] sm:$0xff] }
 0x8d3   :  { %13124 = vmatpush1.bf16.msra.mxu1 %v12595_v56  ;;  %v12622_v56 = vld [vmem:[#allocation8 + $0x3f8] sm:$0xff] }
 0x8d4   :  { %13370 = vmatpush1.bf16.msra.mxu0 %v12787_v57  ;;  %13125 = vmatprep.subr.bf16.mxu1 %v12598_v58  ;;  %v12814_v57 = vld [vmem:[#allocation8 + $0x9f8] sm:$0xff]  ;;  %v12336_v58 = vrot.slane %v19274_v27, %v19303_v61 }
 0x8d5   :  { %13371 = vmatprep.subr.bf16.mxu0 %v12790_v59  ;;  %v12384_v59 = vrot.slane %v19309_v7, %v19300_v60 }
 0x8d6   :  { %v12470_v27 = vpack.c.bf16 %v12336_v58, %v12336_v58  ;;  %v12644_v58 = vld [vmem:[#allocation8 + $0x4a8] sm:$0xff] }
 0x8d7   :  { %13126 = vmatpush1.bf16.msra.mxu1 %v12597_v62  ;;  %v12621_v62 = vld [vmem:[#allocation8 + $0x3f0] sm:$0xff] }
 0x8d8   :  { %13372 = vmatpush1.bf16.msra.mxu0 %v12789_v63  ;;  %13127 = vmatprep.subr.bf16.mxu1 %v12600_v0  ;;  %v12813_v63 = vld [vmem:[#allocation8 + $0x9f0] sm:$0xff]  ;;  %v12624_v0 = vld [vmem:[#allocation8 + $0x408] sm:$0xff] }
 0x8d9   :  { %13373 = vmatprep.subr.bf16.mxu0 %v12792_v18  ;;  %v12816_v18 = vld [vmem:[#allocation8 + $0xa08] sm:$0xff] }
 0x8db   :  { %13128 = vmatpush1.bf16.msra.mxu1 %v12599_v1  ;;  %v19327_v1 = vld [vmem:[#allocation7 + $0x8] sm:$0xff] }
 0x8dc   :  { %13374 = vmatpush1.bf16.msra.mxu0 %v12791_v6  ;;  %13129 = vmatprep.subr.bf16.mxu1 %v12602_v29  ;;  %v12348_v6 = vrot.slane %v19327_v1, %v19016_v38  ;;  %v12396_v29 = vrot.slane %v19309_v7, %v19272_v45 }
 0x8dd   :  { %13375 = vmatprep.subr.bf16.mxu0 %v12794_v10  ;;  %v12482_v10 = vpack.c.bf16 %v12384_v59, %v12384_v59  ;;  %v12836_v59 = vld [vmem:[#allocation8 + $0xaa8] sm:$0xff] }
 0x8df   :  { %13130 = vmatpush1.bf16.msra.mxu1 %v12601_v11  ;;  %v12623_v11 = vld [vmem:[#allocation8 + $0x400] sm:$0xff] }
 0x8e0   :  { %13376 = vmatpush1.bf16.msra.mxu0 %v12793_v14  ;;  %13131 = vmatprep.subr.bf16.mxu1 %v12604_v8  ;;  %v12815_v14 = vld [vmem:[#allocation8 + $0xa00] sm:$0xff]  ;;  %v12626_v8 = vld [vmem:[#allocation8 + $0x418] sm:$0xff] }
 0x8e1   :  { %13377 = vmatprep.subr.bf16.mxu0 %v12796_v9  ;;  %v12818_v9 = vld [vmem:[#allocation8 + $0xa18] sm:$0xff] }
 0x8e3   :  { %13132 = vmatpush1.bf16.msra.mxu1 %v12603_v4  ;;  %v12473_v4 = vpack.c.bf16 %v12348_v6, %v12348_v6  ;;  %v12645_v6 = vld [vmem:[#allocation8 + $0x4b0] sm:$0xff] }
 0x8e4   :  { %13378 = vmatpush1.bf16.msra.mxu0 %v12795_v5  ;;  %13133 = vmatprep.subr.bf16.mxu1 %v12606_v51  ;;  %v12485_v5 = vpack.c.bf16 %v12396_v29, %v12396_v29  ;;  %v12625_v51 = vld [vmem:[#allocation8 + $0x410] sm:$0xff] }
 0x8e5   :  { %13379 = vmatprep.subr.bf16.mxu0 %v12798_v49  ;;  %v12817_v49 = vld [vmem:[#allocation8 + $0xa10] sm:$0xff] }
 0x8e6   :  { %v12837_v29 = vld [vmem:[#allocation8 + $0xab0] sm:$0xff] }
 0x8e7   :  { %13134 = vmatpush1.bf16.msra.mxu1 %v12605_v15  ;;  %v12628_v15 = vld [vmem:[#allocation8 + $0x428] sm:$0xff] }
 0x8e8   :  { %13380 = vmatpush1.bf16.msra.mxu0 %v12797_v16  ;;  %13135 = vmatprep.subr.bf16.mxu1 %v12608_v17  ;;  %v12820_v16 = vld [vmem:[#allocation8 + $0xa28] sm:$0xff]  ;;  %v12627_v17 = vld [vmem:[#allocation8 + $0x420] sm:$0xff] }
 0x8e9   :  { %13381 = vmatprep.subr.bf16.mxu0 %v12800_v34  ;;  %v12819_v34 = vld [vmem:[#allocation8 + $0xa20] sm:$0xff] }
 0x8eb   :  { %13136 = vmatpush1.bf16.msra.mxu1 %v12607_v54  ;;  %v12630_v54 = vld [vmem:[#allocation8 + $0x438] sm:$0xff] }
 0x8ec   :  { %13382 = vmatpush1.bf16.msra.mxu0 %v12799_v55  ;;  %13137 = vmatprep.subr.bf16.mxu1 %v12610_v2  ;;  %v12822_v55 = vld [vmem:[#allocation8 + $0xa38] sm:$0xff]  ;;  %v12629_v2 = vld [vmem:[#allocation8 + $0x430] sm:$0xff] }
 0x8ed   :  { %13383 = vmatprep.subr.bf16.mxu0 %v12802_v50  ;;  %v12821_v50 = vld [vmem:[#allocation8 + $0xa30] sm:$0xff] }
 0x8ef   :  { %13138 = vmatpush1.bf16.msra.mxu1 %v12609_v3  ;;  %v12632_v3 = vld [vmem:[#allocation8 + $0x448] sm:$0xff] }
 0x8f0   :  { %13384 = vmatpush1.bf16.msra.mxu0 %v12801_v20  ;;  %13139 = vmatprep.subr.bf16.mxu1 %v12612_v19  ;;  %v12824_v20 = vld [vmem:[#allocation8 + $0xa48] sm:$0xff]  ;;  %v12631_v19 = vld [vmem:[#allocation8 + $0x440] sm:$0xff] }
 0x8f1   :  { %13385 = vmatprep.subr.bf16.mxu0 %v12804_v13  ;;  %v12823_v13 = vld [vmem:[#allocation8 + $0xa40] sm:$0xff] }
 0x8f3   :  { %13140 = vmatpush1.bf16.msra.mxu1 %v12611_v53  ;;  %v12634_v53 = vld [vmem:[#allocation8 + $0x458] sm:$0xff] }
 0x8f4   :  { %13386 = vmatpush1.bf16.msra.mxu0 %v12803_v22  ;;  %13141 = vmatprep.subr.bf16.mxu1 %v12614_v12  ;;  %v12826_v22 = vld [vmem:[#allocation8 + $0xa58] sm:$0xff]  ;;  %v12633_v12 = vld [vmem:[#allocation8 + $0x450] sm:$0xff] }
 0x8f5   :  { %13387 = vmatprep.subr.bf16.mxu0 %v12806_v23  ;;  %v12825_v23 = vld [vmem:[#allocation8 + $0xa50] sm:$0xff] }
 0x8f7   :  { %13142 = vmatpush1.bf16.msra.mxu1 %v12613_v24  ;;  %v12636_v24 = vld [vmem:[#allocation8 + $0x468] sm:$0xff] }
 0x8f8   :  { %13388 = vmatpush1.bf16.msra.mxu0 %v12805_v28  ;;  %13143 = vmatprep.subr.bf16.mxu1 %v12616_v32  ;;  %v12828_v28 = vld [vmem:[#allocation8 + $0xa68] sm:$0xff]  ;;  %v12635_v32 = vld [vmem:[#allocation8 + $0x460] sm:$0xff] }
 0x8f9   :  { %13389 = vmatprep.subr.bf16.mxu0 %v12808_v36  ;;  %v12827_v36 = vld [vmem:[#allocation8 + $0xa60] sm:$0xff] }
 0x8fb   :  { %13144 = vmatpush1.bf16.msra.mxu1 %v12615_v37  ;;  %v12638_v37 = vld [vmem:[#allocation8 + $0x478] sm:$0xff] }
 0x8fc   :  { %13390 = vmatpush1.bf16.msra.mxu0 %v12807_v39  ;;  %13145 = vmatprep.subr.bf16.mxu1 %v12618_v43  ;;  %v12830_v39 = vld [vmem:[#allocation8 + $0xa78] sm:$0xff]  ;;  %v12637_v43 = vld [vmem:[#allocation8 + $0x470] sm:$0xff] }
 0x8fd   :  { %13391 = vmatprep.subr.bf16.mxu0 %v12810_v25  ;;  %v12829_v25 = vld [vmem:[#allocation8 + $0xa70] sm:$0xff] }
 0x8ff   :  { %13146 = vmatpush1.bf16.msra.mxu1 %v12617_v26  ;;  %v12640_v26 = vld [vmem:[#allocation8 + $0x488] sm:$0xff] }
 0x900   :  { %13392 = vmatpush1.bf16.msra.mxu0 %v12809_v44  ;;  %13147 = vmatprep.subr.bf16.mxu1 %v12620_v48  ;;  %v12832_v44 = vld [vmem:[#allocation8 + $0xa88] sm:$0xff]  ;;  %v12639_v48 = vld [vmem:[#allocation8 + $0x480] sm:$0xff] }
 0x901   :  { %13393 = vmatprep.subr.bf16.mxu0 %v12812_v46  ;;  %v12831_v46 = vld [vmem:[#allocation8 + $0xa80] sm:$0xff] }
 0x903   :  { %13148 = vmatpush1.bf16.msra.mxu1 %v12619_v47  ;;  %v12642_v47 = vld [vmem:[#allocation8 + $0x498] sm:$0xff] }
 0x904   :  { %13394 = vmatpush1.bf16.msra.mxu0 %v12811_v52  ;;  %13149 = vmatprep.subr.bf16.mxu1 %v12622_v56  ;;  %v12834_v52 = vld [vmem:[#allocation8 + $0xa98] sm:$0xff]  ;;  %v12641_v56 = vld [vmem:[#allocation8 + $0x490] sm:$0xff] }
 0x905   :  { %13395 = vmatprep.subr.bf16.mxu0 %v12814_v57  ;;  %v12833_v57 = vld [vmem:[#allocation8 + $0xa90] sm:$0xff] }
 0x907   :  { %13150 = vmatpush1.bf16.msra.mxu1 %v12621_v62  ;;  %v12643_v62 = vld [vmem:[#allocation8 + $0x4a0] sm:$0xff] }
 0x908   :  { %13396 = vmatpush1.bf16.msra.mxu0 %v12813_v63  ;;  %13160 = vmatprep.subr.bf16.mxu1 %v12624_v0  ;;  %v12835_v63 = vld [vmem:[#allocation8 + $0xaa0] sm:$0xff]  ;;  %v12646_v0 = vld [vmem:[#allocation8 + $0x4b8] sm:$0xff] }
 0x909   :  { %13406 = vmatprep.subr.bf16.mxu0 %v12816_v18  ;;  %v12838_v18 = vld [vmem:[#allocation8 + $0xab8] sm:$0xff] }
 0x90a   :  { %13152 = vmatmul.mubr.bf16.vlgmr.msra.gmra.mrb[64].mxu1 %v12470_v27  ;;  %v12648_v27 = vld [vmem:[#allocation8 + $0x4c8] sm:$0xff] }
 0x90b   :  { %13398 = vmatmul.mubr.bf16.vlgmr.msra.gmra.mrb[32].mxu0 %v12482_v10  ;;  %13161 = vmatpush1.bf16.msra.mxu1 %v12623_v11  ;;  %v12840_v10 = vld [vmem:[#allocation8 + $0xac8] sm:$0xff]  ;;  %v12647_v11 = vld [vmem:[#allocation8 + $0x4c0] sm:$0xff] }
 0x90c   :  { %13407 = vmatpush1.bf16.msra.mxu0 %v12815_v14  ;;  %13162 = vmatprep.subr.bf16.mxu1 %v12626_v8  ;;  %v12839_v14 = vld [vmem:[#allocation8 + $0xac0] sm:$0xff]  ;;  %v12650_v8 = vld [vmem:[#allocation8 + $0x4d8] sm:$0xff] }
 0x90d   :  { %13408 = vmatprep.subr.bf16.mxu0 %v12818_v9  ;;  %13192 = vmatprep.mubr.bf16.mxu1 %v12473_v4  ;;  %v12842_v9 = vld [vmem:[#allocation8 + $0xad8] sm:$0xff]  ;;  %v12649_v4 = vld [vmem:[#allocation8 + $0x4d0] sm:$0xff] }
 0x90e   :  { %13438 = vmatprep.mubr.bf16.mxu0 %v12485_v5  ;;  %v12841_v5 = vld [vmem:[#allocation8 + $0xad0] sm:$0xff] }
 0x90f   :  { %13163 = vmatpush1.bf16.msra.mxu1 %v12625_v51  ;;  %v12652_v51 = vld [vmem:[#allocation8 + $0x4e8] sm:$0xff] }
 0x910   :  { %13409 = vmatpush1.bf16.msra.mxu0 %v12817_v49  ;;  %13164 = vmatprep.subr.bf16.mxu1 %v12628_v15  ;;  %v12844_v49 = vld [vmem:[#allocation8 + $0xae8] sm:$0xff]  ;;  %v12651_v15 = vld [vmem:[#allocation8 + $0x4e0] sm:$0xff] }
 0x911   :  { %13410 = vmatprep.subr.bf16.mxu0 %v12820_v16  ;;  %v12843_v16 = vld [vmem:[#allocation8 + $0xae0] sm:$0xff] }
 0x913   :  { %13165 = vmatpush1.bf16.msra.mxu1 %v12627_v17  ;;  %v12654_v17 = vld [vmem:[#allocation8 + $0x4f8] sm:$0xff] }
 0x914   :  { %13411 = vmatpush1.bf16.msra.mxu0 %v12819_v34  ;;  %13166 = vmatprep.subr.bf16.mxu1 %v12630_v54  ;;  %v12846_v34 = vld [vmem:[#allocation8 + $0xaf8] sm:$0xff]  ;;  %v12344_v54 = vrot.slane %v19327_v1, %v19013_v31 }
 0x915   :  { %13412 = vmatprep.subr.bf16.mxu0 %v12822_v55  ;;  %v12392_v55 = vrot.slane %v19309_v7, %v19283_v21 }
 0x917   :  { %13167 = vmatpush1.bf16.msra.mxu1 %v12629_v2  ;;  %v12653_v2 = vld [vmem:[#allocation8 + $0x4f0] sm:$0xff] }
 0x918   :  { %13413 = vmatpush1.bf16.msra.mxu0 %v12821_v50  ;;  %13168 = vmatprep.subr.bf16.mxu1 %v12632_v3  ;;  %v12845_v50 = vld [vmem:[#allocation8 + $0xaf0] sm:$0xff]  ;;  %v12656_v3 = vld [vmem:[#allocation8 + $0x508] sm:$0xff] }
 0x919   :  { %13414 = vmatprep.subr.bf16.mxu0 %v12824_v20  ;;  %v12848_v20 = vld [vmem:[#allocation8 + $0xb08] sm:$0xff] }
 0x91b   :  { %13169 = vmatpush1.bf16.msra.mxu1 %v12631_v19  ;;  %v12356_v19 = vrot.slane %v19327_v1, %v19286_v30 }
 0x91c   :  { %13415 = vmatpush1.bf16.msra.mxu0 %v12823_v13  ;;  %13170 = vmatprep.subr.bf16.mxu1 %v12634_v53  ;;  %v12404_v13 = vrot.slane %v19309_v7, %v19289_v33  ;;  %v12472_v53 = vpack.c.bf16 %v12344_v54, %v12344_v54  ;;  %v12849_v33 = vld [vmem:[#allocation8 + $0xb10] sm:$0xff]  ;;  %v12660_v7 = vld [vmem:[#allocation8 + $0x528] sm:$0xff]  ;;  %v12675_v54 = vld [vmem:[#allocation8 + $0x5a0] sm:$0xff] }
 0x91d   :  { %13416 = vmatprep.subr.bf16.mxu0 %v12826_v22  ;;  %v12484_v22 = vpack.c.bf16 %v12392_v55, %v12392_v55  ;;  %v12867_v55 = vld [vmem:[#allocation8 + $0xba0] sm:$0xff] }
 0x91f   :  { %13171 = vmatpush1.bf16.msra.mxu1 %v12633_v12  ;;  %v12655_v12 = vld [vmem:[#allocation8 + $0x500] sm:$0xff] }
 0x920   :  { %13417 = vmatpush1.bf16.msra.mxu0 %v12825_v23  ;;  %13172 = vmatprep.subr.bf16.mxu1 %v12636_v24  ;;  %v12847_v23 = vld [vmem:[#allocation8 + $0xb00] sm:$0xff]  ;;  %v12658_v24 = vld [vmem:[#allocation8 + $0x518] sm:$0xff] }
 0x921   :  { %13418 = vmatprep.subr.bf16.mxu0 %v12828_v28  ;;  %v12850_v28 = vld [vmem:[#allocation8 + $0xb18] sm:$0xff] }
 0x923   :  { %13173 = vmatpush1.bf16.msra.mxu1 %v12635_v32  ;;  %v12475_v32 = vpack.c.bf16 %v12356_v19, %v12356_v19  ;;  %v12680_v19 = vld [vmem:[#allocation8 + $0x5c8] sm:$0xff] }
 0x924   :  { %13419 = vmatpush1.bf16.msra.mxu0 %v12827_v36  ;;  %13174 = vmatprep.subr.bf16.mxu1 %v12638_v37  ;;  %v12487_v36 = vpack.c.bf16 %v12404_v13, %v12404_v13  ;;  %v12657_v37 = vld [vmem:[#allocation8 + $0x510] sm:$0xff]  ;;  %v12872_v13 = vld [vmem:[#allocation8 + $0xbc8] sm:$0xff] }
 0x925   :  { %13420 = vmatprep.subr.bf16.mxu0 %v12830_v39  ;;  %v12852_v39 = vld [vmem:[#allocation8 + $0xb28] sm:$0xff] }
 0x927   :  { %13175 = vmatpush1.bf16.msra.mxu1 %v12637_v43  ;;  %v12659_v43 = vld [vmem:[#allocation8 + $0x520] sm:$0xff] }
 0x928   :  { %13421 = vmatpush1.bf16.msra.mxu0 %v12829_v25  ;;  %13176 = vmatprep.subr.bf16.mxu1 %v12640_v26  ;;  %v12851_v25 = vld [vmem:[#allocation8 + $0xb20] sm:$0xff]  ;;  %v12662_v26 = vld [vmem:[#allocation8 + $0x538] sm:$0xff] }
 0x929   :  { %13422 = vmatprep.subr.bf16.mxu0 %v12832_v44  ;;  %v12854_v44 = vld [vmem:[#allocation8 + $0xb38] sm:$0xff] }
 0x92b   :  { %13177 = vmatpush1.bf16.msra.mxu1 %v12639_v48  ;;  %v12661_v48 = vld [vmem:[#allocation8 + $0x530] sm:$0xff] }
 0x92c   :  { %13423 = vmatpush1.bf16.msra.mxu0 %v12831_v46  ;;  %13178 = vmatprep.subr.bf16.mxu1 %v12642_v47  ;;  %v12853_v46 = vld [vmem:[#allocation8 + $0xb30] sm:$0xff]  ;;  %v12664_v47 = vld [vmem:[#allocation8 + $0x548] sm:$0xff] }
 0x92d   :  { %13424 = vmatprep.subr.bf16.mxu0 %v12834_v52  ;;  %v12856_v52 = vld [vmem:[#allocation8 + $0xb48] sm:$0xff] }
 0x92f   :  { %13179 = vmatpush1.bf16.msra.mxu1 %v12641_v56  ;;  %v12663_v56 = vld [vmem:[#allocation8 + $0x540] sm:$0xff] }
 0x930   :  { %13425 = vmatpush1.bf16.msra.mxu0 %v12833_v57  ;;  %13180 = vmatprep.subr.bf16.mxu1 %v12644_v58  ;;  %v12855_v57 = vld [vmem:[#allocation8 + $0xb40] sm:$0xff]  ;;  %v12666_v58 = vld [vmem:[#allocation8 + $0x558] sm:$0xff] }
 0x931   :  { %13426 = vmatprep.subr.bf16.mxu0 %v12836_v59  ;;  %v12858_v59 = vld [vmem:[#allocation8 + $0xb58] sm:$0xff] }
 0x933   :  { %13181 = vmatpush1.bf16.msra.mxu1 %v12643_v62  ;;  %v12665_v62 = vld [vmem:[#allocation8 + $0x550] sm:$0xff] }
 0x934   :  { %13427 = vmatpush1.bf16.msra.mxu0 %v12835_v63  ;;  %13182 = vmatprep.subr.bf16.mxu1 %v12646_v0  ;;  %v12857_v63 = vld [vmem:[#allocation8 + $0xb50] sm:$0xff]  ;;  %v12668_v0 = vld [vmem:[#allocation8 + $0x568] sm:$0xff] }
 0x935   :  { %13428 = vmatprep.subr.bf16.mxu0 %v12838_v18  ;;  %v12860_v18 = vld [vmem:[#allocation8 + $0xb68] sm:$0xff] }
 0x937   :  { %13183 = vmatpush1.bf16.msra.mxu1 %v12645_v6  ;;  %v12667_v6 = vld [vmem:[#allocation8 + $0x560] sm:$0xff] }
 0x938   :  { %13429 = vmatpush1.bf16.msra.mxu0 %v12837_v29  ;;  %13184 = vmatprep.subr.bf16.mxu1 %v12648_v27  ;;  %v12859_v29 = vld [vmem:[#allocation8 + $0xb60] sm:$0xff]  ;;  %v12670_v27 = vld [vmem:[#allocation8 + $0x578] sm:$0xff] }
 0x939   :  { %13430 = vmatprep.subr.bf16.mxu0 %v12840_v10  ;;  %v12862_v10 = vld [vmem:[#allocation8 + $0xb78] sm:$0xff] }
 0x93b   :  { %13185 = vmatpush1.bf16.msra.mxu1 %v12647_v11  ;;  %v12669_v11 = vld [vmem:[#allocation8 + $0x570] sm:$0xff] }
 0x93c   :  { %13431 = vmatpush1.bf16.msra.mxu0 %v12839_v14  ;;  %13186 = vmatprep.subr.bf16.mxu1 %v12650_v8  ;;  %v12861_v14 = vld [vmem:[#allocation8 + $0xb70] sm:$0xff]  ;;  %v12672_v8 = vld [vmem:[#allocation8 + $0x588] sm:$0xff] }
 0x93d   :  { %13432 = vmatprep.subr.bf16.mxu0 %v12842_v9  ;;  %v12864_v9 = vld [vmem:[#allocation8 + $0xb88] sm:$0xff] }
 0x93f   :  { %13187 = vmatpush1.bf16.msra.mxu1 %v12649_v4  ;;  %v12671_v4 = vld [vmem:[#allocation8 + $0x580] sm:$0xff] }
 0x940   :  { %13433 = vmatpush1.bf16.msra.mxu0 %v12841_v5  ;;  %13188 = vmatprep.subr.bf16.mxu1 %v12652_v51  ;;  %v12863_v5 = vld [vmem:[#allocation8 + $0xb80] sm:$0xff]  ;;  %v12674_v51 = vld [vmem:[#allocation8 + $0x598] sm:$0xff] }
 0x941   :  { %13434 = vmatprep.subr.bf16.mxu0 %v12844_v49  ;;  %v12866_v49 = vld [vmem:[#allocation8 + $0xb98] sm:$0xff] }
 0x943   :  { %13189 = vmatpush1.bf16.msra.mxu1 %v12651_v15  ;;  %v12673_v15 = vld [vmem:[#allocation8 + $0x590] sm:$0xff] }
 0x944   :  { %13435 = vmatpush1.bf16.msra.mxu0 %v12843_v16  ;;  %13190 = vmatprep.subr.bf16.mxu1 %v12654_v17  ;;  %v12865_v16 = vld [vmem:[#allocation8 + $0xb90] sm:$0xff]  ;;  %v12676_v17 = vld [vmem:[#allocation8 + $0x5a8] sm:$0xff] }
 0x945   :  { %13436 = vmatprep.subr.bf16.mxu0 %v12846_v34  ;;  %v12868_v34 = vld [vmem:[#allocation8 + $0xba8] sm:$0xff] }
 0x947   :  { %13191 = vmatpush1.bf16.msra.mxu1 %v12653_v2  ;;  %v12678_v2 = vld [vmem:[#allocation8 + $0x5b8] sm:$0xff] }
 0x948   :  { %13437 = vmatpush1.bf16.msra.mxu0 %v12845_v50  ;;  %13201 = vmatprep.subr.bf16.mxu1 %v12656_v3  ;;  %v12870_v50 = vld [vmem:[#allocation8 + $0xbb8] sm:$0xff]  ;;  %v12677_v3 = vld [vmem:[#allocation8 + $0x5b0] sm:$0xff] }
 0x949   :  { %13447 = vmatprep.subr.bf16.mxu0 %v12848_v20  ;;  %v12869_v20 = vld [vmem:[#allocation8 + $0xbb0] sm:$0xff] }
 0x94a   :  { %13193 = vmatmul.mubr.bf16.vlgmr.msra.gmra.mrb[64].mxu1 %v12472_v53  ;;  %v12679_v53 = vld [vmem:[#allocation8 + $0x5c0] sm:$0xff] }
 0x94b   :  { %13439 = vmatmul.mubr.bf16.vlgmr.msra.gmra.mrb[32].mxu0 %v12484_v22  ;;  %13202 = vmatpush1.bf16.msra.mxu1 %v12655_v12  ;;  %v12871_v22 = vld [vmem:[#allocation8 + $0xbc0] sm:$0xff]  ;;  %v12682_v12 = vld [vmem:[#allocation8 + $0x5d8] sm:$0xff] }
 0x94c   :  { %13448 = vmatpush1.bf16.msra.mxu0 %v12847_v23  ;;  %13203 = vmatprep.subr.bf16.mxu1 %v12658_v24  ;;  %v12874_v23 = vld [vmem:[#allocation8 + $0xbd8] sm:$0xff]  ;;  %v12681_v24 = vld [vmem:[#allocation8 + $0x5d0] sm:$0xff] }
 0x94d   :  { %13449 = vmatprep.subr.bf16.mxu0 %v12850_v28  ;;  %13233 = vmatprep.mubr.bf16.mxu1 %v12475_v32  ;;  %v12873_v28 = vld [vmem:[#allocation8 + $0xbd0] sm:$0xff]  ;;  %v12684_v32 = vld [vmem:[#allocation8 + $0x5e8] sm:$0xff] }
 0x94e   :  { %13479 = vmatprep.mubr.bf16.mxu0 %v12487_v36  ;;  %v12876_v36 = vld [vmem:[#allocation8 + $0xbe8] sm:$0xff] }
 0x94f   :  { %13204 = vmatpush1.bf16.msra.mxu1 %v12657_v37  ;;  %v12683_v37 = vld [vmem:[#allocation8 + $0x5e0] sm:$0xff] }
 0x950   :  { %13450 = vmatpush1.bf16.msra.mxu0 %v12849_v33  ;;  %13205 = vmatprep.subr.bf16.mxu1 %v12660_v7  ;;  %v12875_v33 = vld [vmem:[#allocation8 + $0xbe0] sm:$0xff]  ;;  %v19341_v7 = vld [vmem:[#allocation7 + $0x18] sm:$0x7f] }
 0x951   :  { %13451 = vmatprep.subr.bf16.mxu0 %v12852_v39  ;;  %v12686_v39 = vld [vmem:[#allocation8 + $0x5f8] sm:$0xff] }
 0x953   :  { %13206 = vmatpush1.bf16.msra.mxu1 %v12659_v43  ;;  %v12878_v43 = vld [vmem:[#allocation8 + $0xbf8] sm:$0xff] }
 0x954   :  { %13452 = vmatpush1.bf16.msra.mxu0 %v12851_v25  ;;  %13207 = vmatprep.subr.bf16.mxu1 %v12662_v26  ;;  %v12352_v25 = vrot.slane %v19327_v1, %v19300_v60  ;;  %v14614_v26 = vld [vmem:[#allocation7 + $0x10] sm:$0xff]  ;;  %v12879_v1 = vld [vmem:[#allocation8 + $0xc00] sm:$0xff] }
 0x955   :  { %13453 = vmatprep.subr.bf16.mxu0 %v12854_v44  ;;  %v12400_v44 = vrot.slane %v14614_v26, %v19303_v61 }
 0x957   :  { %13208 = vmatpush1.bf16.msra.mxu1 %v12661_v48  ;;  %v12412_v48 = vrot.slane %v19341_v7, %v19016_v38 }
 0x958   :  { %13454 = vmatpush1.bf16.msra.mxu0 %v12853_v46  ;;  %13209 = vmatprep.subr.bf16.mxu1 %v12664_v47  ;;  %v12685_v46 = vld [vmem:[#allocation8 + $0x5f0] sm:$0xff] }
 0x959   :  { %13455 = vmatprep.subr.bf16.mxu0 %v12856_v52  ;;  %v12877_v47 = vld [vmem:[#allocation8 + $0xbf0] sm:$0xff]  ;;  %v12880_v52 = vld [vmem:[#allocation8 + $0xc08] sm:$0xff] }
 0x95b   :  { %13210 = vmatpush1.bf16.msra.mxu1 %v12663_v56  ;;  %v12474_v56 = vpack.c.bf16 %v12352_v25, %v12352_v25 }
 0x95c   :  { %13456 = vmatpush1.bf16.msra.mxu0 %v12855_v57  ;;  %13211 = vmatprep.subr.bf16.mxu1 %v12666_v58  ;;  %v12486_v57 = vpack.c.bf16 %v12400_v44, %v12400_v44  ;;  %v12489_v58 = vpack.c.bf16 %v12412_v48, %v12412_v48  ;;  %v12911_v44 = vld [vmem:[#allocation8 + $0xd00] sm:$0xff]  ;;  %v14671_v48 = vmov 0  }
 0x95d   :  { %13457 = vmatprep.subr.bf16.mxu0 %v12858_v59  ;;  %v12882_v59 = vld [vmem:[#allocation8 + $0xc18] sm:$0xff] }
 0x95f   :  { %13212 = vmatpush1.bf16.msra.mxu1 %v12665_v62  ;;  %v12881_v62 = vld [vmem:[#allocation8 + $0xc10] sm:$0xff] }
 0x960   :  { %13458 = vmatpush1.bf16.msra.mxu0 %v12857_v63  ;;  %13213 = vmatprep.subr.bf16.mxu1 %v12668_v0  ;;  %v12884_v63 = vld [vmem:[#allocation8 + $0xc28] sm:$0xff]  ;;  %v12883_v0 = vld [vmem:[#allocation8 + $0xc20] sm:$0xff] }
 0x961   :  { %13459 = vmatprep.subr.bf16.mxu0 %v12860_v18  ;;  %v12886_v18 = vld [vmem:[#allocation8 + $0xc38] sm:$0xff] }
 0x963   :  { %13214 = vmatpush1.bf16.msra.mxu1 %v12667_v6  ;;  %v12885_v6 = vld [vmem:[#allocation8 + $0xc30] sm:$0xff] }
 0x964   :  { %13460 = vmatpush1.bf16.msra.mxu0 %v12859_v29  ;;  %13215 = vmatprep.subr.bf16.mxu1 %v12670_v27  ;;  %v12888_v29 = vld [vmem:[#allocation8 + $0xc48] sm:$0xff]  ;;  %v12887_v27 = vld [vmem:[#allocation8 + $0xc40] sm:$0xff] }
 0x965   :  { %13461 = vmatprep.subr.bf16.mxu0 %v12862_v10  ;;  %v12890_v10 = vld [vmem:[#allocation8 + $0xc58] sm:$0xff] }
 0x967   :  { %13216 = vmatpush1.bf16.msra.mxu1 %v12669_v11  ;;  %v12889_v11 = vld [vmem:[#allocation8 + $0xc50] sm:$0xff] }
 0x968   :  { %13462 = vmatpush1.bf16.msra.mxu0 %v12861_v14  ;;  %13217 = vmatprep.subr.bf16.mxu1 %v12672_v8  ;;  %v12892_v14 = vld [vmem:[#allocation8 + $0xc68] sm:$0xff]  ;;  %v12891_v8 = vld [vmem:[#allocation8 + $0xc60] sm:$0xff] }
 0x969   :  { %13463 = vmatprep.subr.bf16.mxu0 %v12864_v9  ;;  %v12894_v9 = vld [vmem:[#allocation8 + $0xc78] sm:$0xff] }
 0x96b   :  { %13218 = vmatpush1.bf16.msra.mxu1 %v12671_v4  ;;  %v12893_v4 = vld [vmem:[#allocation8 + $0xc70] sm:$0xff] }
 0x96c   :  { %13464 = vmatpush1.bf16.msra.mxu0 %v12863_v5  ;;  %13219 = vmatprep.subr.bf16.mxu1 %v12674_v51  ;;  %v12896_v5 = vld [vmem:[#allocation8 + $0xc88] sm:$0xff]  ;;  %v12895_v51 = vld [vmem:[#allocation8 + $0xc80] sm:$0xff] }
 0x96d   :  { %13465 = vmatprep.subr.bf16.mxu0 %v12866_v49  ;;  %v12898_v49 = vld [vmem:[#allocation8 + $0xc98] sm:$0xff] }
 0x96f   :  { %13220 = vmatpush1.bf16.msra.mxu1 %v12673_v15  ;;  %v12897_v15 = vld [vmem:[#allocation8 + $0xc90] sm:$0xff] }
 0x970   :  { %13466 = vmatpush1.bf16.msra.mxu0 %v12865_v16  ;;  %13221 = vmatprep.subr.bf16.mxu1 %v12676_v17  ;;  %v12900_v16 = vld [vmem:[#allocation8 + $0xca8] sm:$0xff]  ;;  %v12899_v17 = vld [vmem:[#allocation8 + $0xca0] sm:$0xff] }
 0x971   :  { %13467 = vmatprep.subr.bf16.mxu0 %v12868_v34  ;;  %v12902_v34 = vld [vmem:[#allocation8 + $0xcb8] sm:$0xff] }
 0x973   :  { %13222 = vmatpush1.bf16.msra.mxu1 %v12675_v54  ;;  %v12901_v54 = vld [vmem:[#allocation8 + $0xcb0] sm:$0xff] }
 0x974   :  { %13468 = vmatpush1.bf16.msra.mxu0 %v12867_v55  ;;  %13223 = vmatprep.subr.bf16.mxu1 %v12678_v2  ;;  %v12904_v55 = vld [vmem:[#allocation8 + $0xcc8] sm:$0xff]  ;;  %v12903_v2 = vld [vmem:[#allocation8 + $0xcc0] sm:$0xff] }
 0x975   :  { %13469 = vmatprep.subr.bf16.mxu0 %v12870_v50  ;;  %v12906_v50 = vld [vmem:[#allocation8 + $0xcd8] sm:$0xff] }
 0x977   :  { %13224 = vmatpush1.bf16.msra.mxu1 %v12677_v3  ;;  %v12976_v3 = vld [vmem:[#allocation8 + $0xf08] sm:$0xff] }
 0x978   :  { %13470 = vmatpush1.bf16.msra.mxu0 %v12869_v20  ;;  %13225 = vmatprep.subr.bf16.mxu1 %v12680_v19  ;;  %v12905_v20 = vld [vmem:[#allocation8 + $0xcd0] sm:$0xff]  ;;  %v12975_v19 = vld [vmem:[#allocation8 + $0xf00] sm:$0xff] }
 0x979   :  { %13471 = vmatprep.subr.bf16.mxu0 %v12872_v13  ;;  %v12908_v13 = vld [vmem:[#allocation8 + $0xce8] sm:$0xff] }
 0x97b   :  { %13226 = vmatpush1.bf16.msra.mxu1 %v12679_v53  ;;  %v12978_v53 = vld [vmem:[#allocation8 + $0xf18] sm:$0xff] }
 0x97c   :  { %13472 = vmatpush1.bf16.msra.mxu0 %v12871_v22  ;;  %13227 = vmatprep.subr.bf16.mxu1 %v12682_v12  ;;  %v12907_v22 = vld [vmem:[#allocation8 + $0xce0] sm:$0xff]  ;;  %v12977_v12 = vld [vmem:[#allocation8 + $0xf10] sm:$0xff] }
 0x97d   :  { %13473 = vmatprep.subr.bf16.mxu0 %v12874_v23  ;;  %v12910_v23 = vld [vmem:[#allocation8 + $0xcf8] sm:$0xff] }
 0x97f   :  { %13228 = vmatpush1.bf16.msra.mxu1 %v12681_v24  ;;  %v12408_v24 = vrot.slane %v19341_v7, %v19013_v31 }
 0x980   :  { %13474 = vmatpush1.bf16.msra.mxu0 %v12873_v28  ;;  %13229 = vmatprep.subr.bf16.mxu1 %v12684_v32  ;;  %v12420_v28 = vrot.slane %v19341_v7, %v19286_v30  ;;  %v12980_v32 = vld [vmem:[#allocation8 + $0xf28] sm:$0xff]  ;;  %v12914_v30 = vld [vmem:[#allocation8 + $0xd18] sm:$0xff] }
 0x981   :  { %13475 = vmatprep.subr.bf16.mxu0 %v12876_v36  ;;  %v12909_v36 = vld [vmem:[#allocation8 + $0xcf0] sm:$0xff] }
 0x982   :  { %v12491_v25 = vpack.c.bf16 %v12420_v28, %v12420_v28  ;;  %v12936_v28 = vld [vmem:[#allocation8 + $0xdc8] sm:$0xff] }
 0x983   :  { %13230 = vmatpush1.bf16.msra.mxu1 %v12683_v37  ;;  %v12979_v37 = vld [vmem:[#allocation8 + $0xf20] sm:$0xff] }
 0x984   :  { %13476 = vmatpush1.bf16.msra.mxu0 %v12875_v33  ;;  %13231 = vmatprep.subr.bf16.mxu1 %v12686_v39  ;;  %v12912_v33 = vld [vmem:[#allocation8 + $0xd08] sm:$0xff]  ;;  %v12432_v39 = vrot.slane %v19341_v7, %v19303_v61  ;;  %v12915_v61 = vld [vmem:[#allocation8 + $0xd20] sm:$0xff] }
 0x985   :  { %13477 = vmatprep.subr.bf16.mxu0 %v12878_v43  ;;  %v12488_v43 = vpack.c.bf16 %v12408_v24, %v12408_v24  ;;  %v13665_v24 = vld [vmem:[%s19542_s5 + $0x68] sm:$0xff] }
 0x986   :  { %v12494_v26 = vpack.c.bf16 %v12432_v39, %v12432_v39  ;;  %v12938_v39 = vld [vmem:[#allocation8 + $0xdd8] sm:$0xff] }
 0x987   :  { %13232 = vmatpush1.bf16.msra.mxu1 %v12685_v46  ;;  %v12913_v46 = vld [vmem:[#allocation8 + $0xd10] sm:$0xff] }
 0x988   :  { %13478 = vmatpush1.bf16.msra.mxu0 %v12877_v47  ;;  %13611 = vmatprep.subr.bf16.mxu1 %v12976_v3  ;;  %v12916_v47 = vld [vmem:[#allocation8 + $0xd28] sm:$0xff] }
 0x989   :  { %13488 = vmatprep.subr.bf16.mxu0 %v12880_v52  ;;  %v12918_v52 = vld [vmem:[#allocation8 + $0xd38] sm:$0xff] }
 0x98a   :  { %13234 = vmatmul.mubr.bf16.vlgmr.msra.gmra.mrb[64].mxu1 %v12474_v56  ;;  %v12917_v56 = vld [vmem:[#allocation8 + $0xd30] sm:$0xff] }
 0x98b   :  { %13480 = vmatmul.mubr.bf16.vlgmr.msra.gmra.mrb[32].mxu0 %v12486_v57  ;;  %13612 = vmatpush1.bf16.msra.mxu1 %v12975_v19  ;;  %v12920_v57 = vld [vmem:[#allocation8 + $0xd48] sm:$0xff]  ;;  %v13662_v19 = vld [vmem:[%s19542_s5 + $0x50] sm:$0xff] }
 0x98c   :  { %13489 = vmatpush1.bf16.msra.mxu0 %v12879_v1  ;;  %13520 = vmatprep.mubr.bf16.mxu0 %v12489_v58  ;;  %v12919_v58 = vld [vmem:[#allocation8 + $0xd40] sm:$0xff]  ;;  %v12922_v1 = vld [vmem:[#allocation8 + $0xd58] sm:$0xff] }
 0x98d   :  { %13490 = vmatprep.subr.bf16.mxu0 %v12882_v59  ;;  %13613 = vmatprep.subr.bf16.mxu1 %v12978_v53  ;;  %v12921_v59 = vld [vmem:[#allocation8 + $0xd50] sm:$0xff]  ;;  %v12934_v53 = vld [vmem:[#allocation8 + $0xdb8] sm:$0xff] }
 0x98e   :  { %13643 = vmatprep.mubr.bf16.mxu1 %v14671_v48  ;;  %v12940_v48 = vld [vmem:[#allocation8 + $0xde8] sm:$0xff] }
 0x98f   :  { %13614 = vmatpush1.bf16.msra.mxu1 %v12977_v12  ;;  %v12933_v12 = vld [vmem:[#allocation8 + $0xdb0] sm:$0xff] }
 0x990   :  { %13491 = vmatpush1.bf16.msra.mxu0 %v12881_v62  ;;  %13615 = vmatprep.subr.bf16.mxu1 %v12980_v32  ;;  %v12924_v62 = vld [vmem:[#allocation8 + $0xd68] sm:$0xff] }
 0x991   :  { %13492 = vmatprep.subr.bf16.mxu0 %v12884_v63  ;;  %v12923_v63 = vld [vmem:[#allocation8 + $0xd60] sm:$0xff] }
 0x993   :  { %13616 = vmatpush1.bf16.msra.mxu1 %v12979_v37  ;;  %v13666_v37 = vld [vmem:[%s19542_s5 + $0x70] sm:$0xff] }
 0x994   :  { %13493 = vmatpush1.bf16.msra.mxu0 %v12883_v0  ;;  %v13652_v0 = vld [vmem:[%s19542_s5] sm:$0xff] }
 0x995   :  { %13494 = vmatprep.subr.bf16.mxu0 %v12886_v18  ;;  %v13653_v18 = vld [vmem:[%s19542_s5 + $0x8] sm:$0xff] }
 0x996   :  { %14067 = vmatmul.mubr.msk.bf16.vlgmr.msra.gmra.mrb[68].mxu1 %vm12992_vm1, %v12494_v26  ;;  %v13668_v26 = vld [vmem:[%s19542_s5 + $0x80] sm:$0xff] }
 0x998   :  { %13495 = vmatpush1.bf16.msra.mxu0 %v12885_v6  ;;  %v13654_v6 = vld [vmem:[%s19542_s5 + $0x10] sm:$0xff] }
 0x999   :  { %13496 = vmatprep.subr.bf16.mxu0 %v12888_v29  ;;  %v12926_v29 = vld [vmem:[#allocation8 + $0xd78] sm:$0xff] }
 0x99c   :  { %13497 = vmatpush1.bf16.msra.mxu0 %v12887_v27  ;;  %v14672_v27 = vmov 0.0|0.0  }
 0x99d   :  { %13498 = vmatprep.subr.bf16.mxu0 %v12890_v10  ;;  %14445 = vmatprep.subr.bf16.mxu1 %v14672_v27  ;;  %v14446_v10 = vpack.c.bf16 %v13653_v18, %v13652_v0 }
 0x99f   :  { %14447 = vmatpush1.bf16.msra.mxu1 %v14446_v10  ;;  %v13675_v10 = vld [vmem:[%s19542_s5 + $0xb8] sm:$0xff] }
 0x9a0   :  { %13499 = vmatpush1.bf16.msra.mxu0 %v12889_v11  ;;  %v13655_v11 = vld [vmem:[%s19542_s5 + $0x18] sm:$0xff]  ;;  %14448 = vmatprep.subr.bf16.mxu1 %v14672_v27 }
 0x9a1   :  { %13500 = vmatprep.subr.bf16.mxu0 %v12892_v14  ;;  %v14449_v14 = vpack.c.bf16 %v13655_v11, %v13654_v6  ;;  %v12946_v6 = vld [vmem:[#allocation8 + $0xe18] sm:$0xff]  ;;  %v12945_v11 = vld [vmem:[#allocation8 + $0xe10] sm:$0xff] }
 0x9a3   :  { %14450 = vmatpush1.bf16.msra.mxu1 %v14449_v14 }
 0x9a4   :  { %13501 = vmatpush1.bf16.msra.mxu0 %v12891_v8  ;;  %v12925_v8 = vld [vmem:[#allocation8 + $0xd70] sm:$0xff]  ;;  %14451 = vmatprep.subr.bf16.mxu1 %v14672_v27 }
 0x9a5   :  { %13502 = vmatprep.subr.bf16.mxu0 %v12894_v9  ;;  %v13656_v9 = vld [vmem:[%s19542_s5 + $0x20] sm:$0xff] }
 0x9a8   :  { %13503 = vmatpush1.bf16.msra.mxu0 %v12893_v4  ;;  %v13657_v4 = vld [vmem:[%s19542_s5 + $0x28] sm:$0xff] }
 0x9a9   :  { %13504 = vmatprep.subr.bf16.mxu0 %v12896_v5  ;;  %v12928_v5 = vld [vmem:[#allocation8 + $0xd88] sm:$0xff] }
 0x9ac   :  { %13505 = vmatpush1.bf16.msra.mxu0 %v12895_v51  ;;  %v14452_v51 = vpack.c.bf16 %v13657_v4, %v13656_v9  ;;  %v13676_v9 = vld [vmem:[%s19542_s5 + $0xc0] sm:$0xff]  ;;  %v13677_v4 = vld [vmem:[%s19542_s5 + $0xc8] sm:$0xff] }
 0x9ad   :  { %13506 = vmatprep.subr.bf16.mxu0 %v12898_v49  ;;  %v12927_v49 = vld [vmem:[#allocation8 + $0xd80] sm:$0xff] }
 0x9ae   :  { %14453 = vmatpush1.bf16.msra.mxu1 %v14452_v51  ;;  %v14482_v51 = vpack.c.bf16 %v13677_v4, %v13676_v9 }
 0x9af   :  { %14454 = vmatprep.subr.bf16.mxu1 %v14672_v27 }
 0x9b0   :  { %13507 = vmatpush1.bf16.msra.mxu0 %v12897_v15  ;;  %v13658_v15 = vld [vmem:[%s19542_s5 + $0x30] sm:$0xff] }
 0x9b1   :  { %13508 = vmatprep.subr.bf16.mxu0 %v12900_v16  ;;  %v13659_v16 = vld [vmem:[%s19542_s5 + $0x38] sm:$0xff] }
 0x9b4   :  { %13509 = vmatpush1.bf16.msra.mxu0 %v12899_v17  ;;  %v12930_v17 = vld [vmem:[#allocation8 + $0xd98] sm:$0xff] }
 0x9b5   :  { %13510 = vmatprep.subr.bf16.mxu0 %v12902_v34  ;;  %v14455_v34 = vpack.c.bf16 %v13659_v16, %v13658_v15  ;;  %v12949_v15 = vld [vmem:[#allocation8 + $0xe30] sm:$0xff]  ;;  %v12952_v16 = vld [vmem:[#allocation8 + $0xe48] sm:$0xff] }
 0x9b7   :  { %14456 = vmatpush1.bf16.msra.mxu1 %v14455_v34  ;;  %v12954_v34 = vld [vmem:[#allocation8 + $0xe58] sm:$0xff] }
 0x9b8   :  { %13511 = vmatpush1.bf16.msra.mxu0 %v12901_v54  ;;  %v12929_v54 = vld [vmem:[#allocation8 + $0xd90] sm:$0xff]  ;;  %14457 = vmatprep.subr.bf16.mxu1 %v14672_v27 }
 0x9b9   :  { %13512 = vmatprep.subr.bf16.mxu0 %v12904_v55  ;;  %v13660_v55 = vld [vmem:[%s19542_s5 + $0x40] sm:$0xff] }
 0x9bc   :  { %13513 = vmatpush1.bf16.msra.mxu0 %v12903_v2  ;;  %v13661_v2 = vld [vmem:[%s19542_s5 + $0x48] sm:$0xff] }
 0x9bd   :  { %13514 = vmatprep.subr.bf16.mxu0 %v12906_v50  ;;  %v12932_v50 = vld [vmem:[#allocation8 + $0xda8] sm:$0xff]  ;;  %v14458_v3 = vpack.c.bf16 %v13661_v2, %v13660_v55  ;;  %v12955_v2 = vld [vmem:[#allocation8 + $0xe60] sm:$0xff] }
 0x9be   :  { %v12956_v55 = vld [vmem:[#allocation8 + $0xe68] sm:$0xff] }
 0x9bf   :  { %14459 = vmatpush1.bf16.msra.mxu1 %v14458_v3  ;;  %v12957_v3 = vld [vmem:[#allocation8 + $0xe70] sm:$0xff] }
 0x9c0   :  { %13515 = vmatpush1.bf16.msra.mxu0 %v12905_v20  ;;  %v12931_v20 = vld [vmem:[#allocation8 + $0xda0] sm:$0xff]  ;;  %14460 = vmatprep.subr.bf16.mxu1 %v14672_v27 }
 0x9c1   :  { %13516 = vmatprep.subr.bf16.mxu0 %v12908_v13  ;;  %v13663_v13 = vld [vmem:[%s19542_s5 + $0x58] sm:$0xff] }
 0x9c4   :  { %13517 = vmatpush1.bf16.msra.mxu0 %v12907_v22  ;;  %v14461_v22 = vpack.c.bf16 %v13663_v13, %v13662_v19  ;;  %v12959_v19 = vld [vmem:[#allocation8 + $0xe80] sm:$0xff]  ;;  %v12962_v13 = vld [vmem:[#allocation8 + $0xe98] sm:$0xff] }
 0x9c5   :  { %13518 = vmatprep.subr.bf16.mxu0 %v12910_v23  ;;  %v13664_v23 = vld [vmem:[%s19542_s5 + $0x60] sm:$0xff] }
 0x9c6   :  { %14462 = vmatpush1.bf16.msra.mxu1 %v14461_v22  ;;  %v14464_v32 = vpack.c.bf16 %v13665_v24, %v13664_v23  ;;  %v12964_v22 = vld [vmem:[#allocation8 + $0xea8] sm:$0xff]  ;;  %v12966_v23 = vld [vmem:[#allocation8 + $0xeb8] sm:$0xff]  ;;  %v12965_v24 = vld [vmem:[#allocation8 + $0xeb0] sm:$0xff] }
 0x9c7   :  { %14463 = vmatprep.subr.bf16.mxu1 %v14672_v27 }
 0x9c8   :  { %13519 = vmatpush1.bf16.msra.mxu0 %v12909_v36  ;;  %v12935_v36 = vld [vmem:[#allocation8 + $0xdc0] sm:$0xff] }
 0x9c9   :  { %13529 = vmatprep.subr.bf16.mxu0 %v12912_v33  ;;  %v13667_v33 = vld [vmem:[%s19542_s5 + $0x78] sm:$0xff] }
 0x9ca   :  { %14465 = vmatpush1.bf16.msra.mxu1 %v14464_v32  ;;  %v12967_v32 = vld [vmem:[#allocation8 + $0xec0] sm:$0xff] }
 0x9cb   :  { %13521 = vmatmul.mubr.bf16.vlgmr.msra.gmra.mrb[32].mxu0 %v12488_v43  ;;  %v14467_v43 = vpack.c.bf16 %v13667_v33, %v13666_v37  ;;  %14466 = vmatprep.subr.bf16.mxu1 %v14672_v27  ;;  %v12969_v37 = vld [vmem:[#allocation8 + $0xed0] sm:$0xff]  ;;  %v12972_v33 = vld [vmem:[#allocation8 + $0xee8] sm:$0xff] }
 0x9cc   :  { %13530 = vmatpush1.bf16.msra.mxu0 %v12911_v44  ;;  %13561 = vmatprep.mubr.bf16.mxu0 %v12491_v25  ;;  %v12937_v25 = vld [vmem:[#allocation8 + $0xdd0] sm:$0xff] }
 0x9cd   :  { %13531 = vmatprep.subr.bf16.mxu0 %v12914_v30  ;;  %v13669_v44 = vld [vmem:[%s19542_s5 + $0x88] sm:$0xff] }
 0x9ce   :  { %14468 = vmatpush1.bf16.msra.mxu1 %v14467_v43  ;;  %v14470_v30 = vpack.c.bf16 %v13669_v44, %v13668_v26  ;;  %v12974_v43 = vld [vmem:[#allocation8 + $0xef8] sm:$0xff]  ;;  %v12973_v26 = vld [vmem:[#allocation8 + $0xef0] sm:$0xff] }
 0x9cf   :  { %14469 = vmatprep.subr.bf16.mxu1 %v14672_v27 }
 0x9d0   :  { %13532 = vmatpush1.bf16.msra.mxu0 %v12913_v46  ;;  %v12939_v46 = vld [vmem:[#allocation8 + $0xde0] sm:$0xff] }
 0x9d1   :  { %13533 = vmatprep.subr.bf16.mxu0 %v12916_v47  ;;  %v13670_v47 = vld [vmem:[%s19542_s5 + $0x90] sm:$0xff] }
 0x9d2   :  { %14471 = vmatpush1.bf16.msra.mxu1 %v14470_v30 }
 0x9d3   :  { %14472 = vmatprep.subr.bf16.mxu1 %v14672_v27 }
 0x9d4   :  { %13534 = vmatpush1.bf16.msra.mxu0 %v12915_v61  ;;  %v13671_v61 = vld [vmem:[%s19542_s5 + $0x98] sm:$0xff] }
 0x9d5   :  { %13535 = vmatprep.subr.bf16.mxu0 %v12918_v52  ;;  %v12942_v52 = vld [vmem:[#allocation8 + $0xdf8] sm:$0xff] }
 0x9d8   :  { %13536 = vmatpush1.bf16.msra.mxu0 %v12917_v56  ;;  %v12416_v56 = vrot.slane %v19341_v7, %v19300_v60 }
 0x9d9   :  { %13537 = vmatprep.subr.bf16.mxu0 %v12920_v57  ;;  %v12428_v57 = vrot.slane %v19341_v7, %v19272_v45  ;;  %v12943_v45 = vld [vmem:[#allocation8 + $0xe00] sm:$0xff] }
 0x9da   :  { %v12490_v60 = vpack.c.bf16 %v12416_v56, %v12416_v56 }
 0x9db   :  { %v12493_v0 = vpack.c.bf16 %v12428_v57, %v12428_v57 }
 0x9dc   :  { %13538 = vmatpush1.bf16.msra.mxu0 %v12919_v58  ;;  %v14473_v58 = vpack.c.bf16 %v13671_v61, %v13670_v47  ;;  %v13678_v61 = vld [vmem:[%s19542_s5 + $0xd0] sm:$0xff] }
 0x9dd   :  { %13539 = vmatprep.subr.bf16.mxu0 %v12922_v1  ;;  %v12941_v1 = vld [vmem:[#allocation8 + $0xdf0] sm:$0xff] }
 0x9de   :  { %14474 = vmatpush1.bf16.msra.mxu1 %v14473_v58  ;;  %v13680_v58 = vld [vmem:[%s19542_s5 + $0xe0] sm:$0xff] }
 0x9df   :  { %14475 = vmatprep.subr.bf16.mxu1 %v14672_v27 }
 0x9e0   :  { %13540 = vmatpush1.bf16.msra.mxu0 %v12921_v59  ;;  %v12944_v59 = vld [vmem:[#allocation8 + $0xe08] sm:$0xff] }
 0x9e1   :  { %13541 = vmatprep.subr.bf16.mxu0 %v12924_v62  ;;  %v13672_v62 = vld [vmem:[%s19542_s5 + $0xa0] sm:$0xff] }
 0x9e4   :  { %13542 = vmatpush1.bf16.msra.mxu0 %v12923_v63  ;;  %v13673_v63 = vld [vmem:[%s19542_s5 + $0xa8] sm:$0xff] }
 0x9e5   :  { %13543 = vmatprep.subr.bf16.mxu0 %v12926_v29  ;;  %v14476_v18 = vpack.c.bf16 %v13673_v63, %v13672_v62  ;;  %v13674_v29 = vld [vmem:[%s19542_s5 + $0xb0] sm:$0xff]  ;;  %v12985_v63 = vrot.slane %v16967_v40, %v19013_v31 }
 0x9e6   :  { %v14479_v14 = vpack.c.bf16 %v13675_v10, %v13674_v29  ;;  %v13756_v10 = vld [vmem:[%s19543_s6] sm:$0xff] }
 0x9e7   :  { %14477 = vmatpush1.bf16.msra.mxu1 %v14476_v18 }
 0x9e8   :  { %13544 = vmatpush1.bf16.msra.mxu0 %v12925_v8  ;;  %v12948_v8 = vld [vmem:[#allocation8 + $0xe28] sm:$0xff]  ;;  %14478 = vmatprep.subr.bf16.mxu1 %v14672_v27 }
 0x9e9   :  { %13545 = vmatprep.subr.bf16.mxu0 %v12928_v5  ;;  %v12947_v5 = vld [vmem:[#allocation8 + $0xe20] sm:$0xff] }
 0x9eb   :  { %14480 = vmatpush1.bf16.msra.mxu1 %v14479_v14 }
 0x9ec   :  { %13546 = vmatpush1.bf16.msra.mxu0 %v12927_v49  ;;  %v12950_v49 = vld [vmem:[#allocation8 + $0xe38] sm:$0xff]  ;;  %14481 = vmatprep.subr.bf16.mxu1 %v14672_v27 }
 0x9ed   :  { %13547 = vmatprep.subr.bf16.mxu0 %v12930_v17  ;;  %v12951_v17 = vld [vmem:[#allocation8 + $0xe40] sm:$0xff] }
 0x9ef   :  { %14483 = vmatpush1.bf16.msra.mxu1 %v14482_v51 }
 0x9f0   :  { %13548 = vmatpush1.bf16.msra.mxu0 %v12929_v54  ;;  %14484 = vmatprep.subr.bf16.mxu1 %v14672_v27  ;;  %v12953_v54 = vld [vmem:[#allocation8 + $0xe50] sm:$0xff] }
 0x9f1   :  { %13549 = vmatprep.subr.bf16.mxu0 %v12932_v50  ;;  %v12958_v50 = vld [vmem:[#allocation8 + $0xe78] sm:$0xff] }
 0x9f4   :  { %13550 = vmatpush1.bf16.msra.mxu0 %v12931_v20  ;;  %v12960_v20 = vld [vmem:[#allocation8 + $0xe88] sm:$0xff] }
 0x9f5   :  { %13551 = vmatprep.subr.bf16.mxu0 %v12934_v53  ;;  %v12961_v53 = vld [vmem:[#allocation8 + $0xe90] sm:$0xff] }
 0x9f8   :  { %13552 = vmatpush1.bf16.msra.mxu0 %v12933_v12  ;;  %v12963_v12 = vld [vmem:[#allocation8 + $0xea0] sm:$0xff] }
 0x9f9   :  { %13553 = vmatprep.subr.bf16.mxu0 %v12936_v28  ;;  %v12968_v28 = vld [vmem:[#allocation8 + $0xec8] sm:$0xff] }
 0x9fc   :  { %13554 = vmatpush1.bf16.msra.mxu0 %v12935_v36  ;;  %v12970_v36 = vld [vmem:[#allocation8 + $0xed8] sm:$0xff] }
 0x9fd   :  { %13555 = vmatprep.subr.bf16.mxu0 %v12938_v39  ;;  %v12971_v39 = vld [vmem:[#allocation8 + $0xee0] sm:$0xff] }
 0xa00   :  { %13556 = vmatpush1.bf16.msra.mxu0 %v12937_v25  ;;  %v12424_v25 = vrot.slane %v19341_v7, %v19283_v21 }
 0xa01   :  { %13557 = vmatprep.subr.bf16.mxu0 %v12940_v48 }
 0xa02   :  { %v12492_v44 = vpack.c.bf16 %v12424_v25, %v12424_v25 }
 0xa04   :  { %13558 = vmatpush1.bf16.msra.mxu0 %v12939_v46 }
 0xa05   :  { %13559 = vmatprep.subr.bf16.mxu0 %v12942_v52  ;;  %v13679_v52 = vld [vmem:[%s19542_s5 + $0xd8] sm:$0xff] }
 0xa06   :  { %v14485_v56 = vpack.c.bf16 %v13679_v52, %v13678_v61 }
 0xa08   :  { %13560 = vmatpush1.bf16.msra.mxu0 %v12941_v1  ;;  %14486 = vmatpush1.bf16.msra.mxu1 %v14485_v56  ;;  %v13681_v1 = vld [vmem:[%s19542_s5 + $0xe8] sm:$0xff] }
 0xa09   :  { %13570 = vmatprep.subr.bf16.mxu0 %v12944_v59  ;;  %14487 = vmatprep.subr.bf16.mxu1 %v14672_v27  ;;  %v14488_v62 = vpack.c.bf16 %v13681_v1, %v13680_v58 }
 0xa0b   :  { %13562 = vmatmul.mubr.bf16.vlgmr.msra.gmra.mrb[32].mxu0 %v12490_v60  ;;  %v12989_v60 = vrot.slane %v16967_v40, %v19016_v38  ;;  %v13758_v38 = vld [vmem:[%s19543_s6 + $0x10] sm:$0xff] }
 0xa0c   :  { %13571 = vmatpush1.bf16.msra.mxu0 %v12943_v45  ;;  %13602 = vmatprep.mubr.bf16.mxu0 %v12493_v0 }
 0xa0d   :  { %13572 = vmatprep.subr.bf16.mxu0 %v12946_v6  ;;  %14489 = vmatpush1.bf16.msra.mxu1 %v14488_v62 }
 0xa0e   :  { %14490 = vmatprep.subr.bf16.mxu1 %v14672_v27 }
 0xa10   :  { %13573 = vmatpush1.bf16.msra.mxu0 %v12945_v11  ;;  %v13757_v11 = vld [vmem:[%s19543_s6 + $0x8] sm:$0xff] }
 0xa11   :  { %13574 = vmatprep.subr.bf16.mxu0 %v12948_v8  ;;  %v14491_v40 = vpack.c.bf16 %v13757_v11, %v13756_v10 }
 0xa14   :  { %13575 = vmatpush1.bf16.msra.mxu0 %v12947_v5  ;;  %v13759_v5 = vld [vmem:[%s19543_s6 + $0x18] sm:$0xff] }
 0xa15   :  { %13576 = vmatprep.subr.bf16.mxu0 %v12950_v49  ;;  %v14494_v51 = vpack.c.bf16 %v13759_v5, %v13758_v38  ;;  %v13760_v49 = vld [vmem:[%s19543_s6 + $0x20] sm:$0xff] }
 0xa18   :  { %13577 = vmatpush1.bf16.msra.mxu0 %v12949_v15  ;;  %v13761_v15 = vld [vmem:[%s19543_s6 + $0x28] sm:$0xff] }
 0xa19   :  { %13578 = vmatprep.subr.bf16.mxu0 %v12952_v16  ;;  %v14497_v16 = vpack.c.bf16 %v13761_v15, %v13760_v49 }
 0xa1c   :  { %13579 = vmatpush1.bf16.msra.mxu0 %v12951_v17  ;;  %v13762_v17 = vld [vmem:[%s19543_s6 + $0x30] sm:$0xff] }
 0xa1d   :  { %13580 = vmatprep.subr.bf16.mxu0 %v12954_v34  ;;  %v13763_v34 = vld [vmem:[%s19543_s6 + $0x38] sm:$0xff] }
 0xa20   :  { %13581 = vmatpush1.bf16.msra.mxu0 %v12953_v54  ;;  %v14500_v54 = vpack.c.bf16 %v13763_v34, %v13762_v17 }
 0xa21   :  { %13582 = vmatprep.subr.bf16.mxu0 %v12956_v55  ;;  %v13764_v55 = vld [vmem:[%s19543_s6 + $0x40] sm:$0xff] }
 0xa24   :  { %13583 = vmatpush1.bf16.msra.mxu0 %v12955_v2  ;;  %v13765_v2 = vld [vmem:[%s19543_s6 + $0x48] sm:$0xff] }
 0xa25   :  { %13584 = vmatprep.subr.bf16.mxu0 %v12958_v50  ;;  %v14503_v50 = vpack.c.bf16 %v13765_v2, %v13764_v55 }
 0xa28   :  { %13585 = vmatpush1.bf16.msra.mxu0 %v12957_v3  ;;  %v13766_v3 = vld [vmem:[%s19543_s6 + $0x50] sm:$0xff] }
 0xa29   :  { %13586 = vmatprep.subr.bf16.mxu0 %v12960_v20  ;;  %v13767_v20 = vld [vmem:[%s19543_s6 + $0x58] sm:$0xff] }
 0xa2c   :  { %13587 = vmatpush1.bf16.msra.mxu0 %v12959_v19  ;;  %v14506_v19 = vpack.c.bf16 %v13767_v20, %v13766_v3 }
 0xa2d   :  { %13588 = vmatprep.subr.bf16.mxu0 %v12962_v13  ;;  %v13768_v13 = vld [vmem:[%s19543_s6 + $0x60] sm:$0xff] }
 0xa30   :  { %13589 = vmatpush1.bf16.msra.mxu0 %v12961_v53  ;;  %v13769_v53 = vld [vmem:[%s19543_s6 + $0x68] sm:$0xff] }
 0xa31   :  { %13590 = vmatprep.subr.bf16.mxu0 %v12964_v22  ;;  %v14509_v22 = vpack.c.bf16 %v13769_v53, %v13768_v13 }
 0xa34   :  { %13591 = vmatpush1.bf16.msra.mxu0 %v12963_v12  ;;  %v13770_v12 = vld [vmem:[%s19543_s6 + $0x70] sm:$0xff]  ;;  %s14674_s6 = smov [#allocation10]  }
 0xa35   :  { %13592 = vmatprep.subr.bf16.mxu0 %v12966_v23  ;;  %s13859_s22 = sshll.u32 %s14674_s6, 4  ;;  %s13860_s22 = int_to_ptr.vmem [resolvable:$true] %s13859_s22 }
 0xa36   :  { %s14615_s5 = scalar_lea.vmem %s13860_s22, 16  ;;  %s14619_s24 = scalar_lea.vmem %s13860_s22, 32 }
 0xa37   :  { %p14616_p0 = scmp.ne.s32.totalorder %s13860_s22, %s14615_s5  ;;  %p14620_p1 = scmp.lt.s32.totalorder %s13860_s22, %s13860_s22 }
 0xa38   :  { %13593 = vmatpush1.bf16.msra.mxu0 %v12965_v24  ;;  %p14621_p2 = scmp.lt.s32.totalorder %s14619_s24, %s14615_s5 }
 0xa39   :  { %13594 = vmatprep.subr.bf16.mxu0 %v12968_v28 }
 0xa3a   :  { %p14622_p3 = por %p14621_p2, %p14620_p1 }
 0xa3c   :  { %13595 = vmatpush1.bf16.msra.mxu0 %v12967_v32  ;;  %p14623_p4 = pnand %p14622_p3, %p14616_p0 }
 0xa3d   :  { %13596 = vmatprep.subr.bf16.mxu0 %v12970_v36 }
 0xa40   :  { %13597 = vmatpush1.bf16.msra.mxu0 %v12969_v37 }
 0xa41   :  { %13598 = vmatprep.subr.bf16.mxu0 %v12972_v33 }
 0xa44   :  { %13599 = vmatpush1.bf16.msra.mxu0 %v12971_v39 }
 0xa45   :  { %13600 = vmatprep.subr.bf16.mxu0 %v12974_v43 }
 0xa48   :  { %13601 = vmatpush1.bf16.msra.mxu0 %v12973_v26 }
 0xa4b   :  { %13603 = vmatmul.mubr.bf16.vlgmr.msra.gmra.mrb[32].mxu0 %v12492_v44 }
 0xa5d   :  { %v13235_v48 = vpop.f32.mrb[64].mxu1 }
 0xa5e   :  { %v13237_v30 = vpop.f32.mrb[65].mxu1  ;;  %v14515_v0 = vadd.f32 %v13235_v48, %v12985_v63 }
 0xa5f   :  { %v13239_v46 = vpop.f32.mrb[66].mxu1  ;;  %v14518_v45 = vadd.f32 %v13237_v30, %v12989_v60 }
 0xa60   :  { %v13240_v47 = vpop.f32.mrb[67].mxu1 }
 0xa69   :  { %v13645_v21 = vpop.f32.mrb[68].mxu1 }
 0xa6a   :  { %v13647_v7 = vpop.f32.mrb[69].mxu1 }
 0xa6b   :  { %v13649_v57 = vpop.f32.mrb[70].mxu1 }
 0xa6c   :  { %v13650_v59 = vpop.f32.mrb[71].mxu1 }
 0xb1e   :  { %v13604_v18 = vpop.f32.mrb[32].mxu0 }
 0xb1f   :  { %v14516_v6 = vadd.f32 %v14515_v0, %v13604_v18  ;;  %v13606_v29 = vpop.f32.mrb[33].mxu0 }
 0xb20   :  { %v14519_v14 = vadd.f32 %v14518_v45, %v13606_v29  ;;  %v13608_v8 = vpop.f32.mrb[34].mxu0 }
 0xb21   :  { %v14517_v9 = vadd.f32 %v14516_v6, %v13645_v21  ;;  %v13609_v31 = vpop.f32.mrb[35].mxu0 }
 0xb22   :  { %v14520_v4 = vadd.f32 %v14519_v14, %v13647_v7 }
 0xb24   :  { %14068 = vmatprep.mubr.msk.f32.mxu1 %vm13682_vm13, %v14520_v4 }
 0xb25   :  { %13751 = vmatmul.mubr.f32.vlgmr.msra.gmra.mrb[72].mxu1 %v14517_v9 }
 0xb26   :  { %14492 = vmatpush3.bf16.msra.mxu1 %v14491_v40  ;;  %14366 = vmatprep.mubr.msk.f32.mxu1 %vm14673_vm14, %v14646_v35 }
 0xb27   :  { %14493 = vmatprep.subr.bf16.mxu1 %v14672_v27 }
 0xb2a   :  { %14495 = vmatpush3.bf16.msra.mxu1 %v14494_v51 }
 0xb2b   :  { %14496 = vmatprep.subr.bf16.mxu1 %v14672_v27 }
 0xb2e   :  { %14498 = vmatpush3.bf16.msra.mxu1 %v14497_v16 }
 0xb2f   :  { %14499 = vmatprep.subr.bf16.mxu1 %v14672_v27 }
 0xb32   :  { %14501 = vmatpush3.bf16.msra.mxu1 %v14500_v54 }
 0xb33   :  { %14502 = vmatprep.subr.bf16.mxu1 %v14672_v27 }
 0xb36   :  { %14504 = vmatpush3.bf16.msra.mxu1 %v14503_v50 }
 0xb37   :  { %14505 = vmatprep.subr.bf16.mxu1 %v14672_v27 }
 0xb3a   :  { %14507 = vmatpush3.bf16.msra.mxu1 %v14506_v19 }
 0xb3b   :  { %14508 = vmatprep.subr.bf16.mxu1 %v14672_v27 }
 0xb3e   :  { %14510 = vmatpush3.bf16.msra.mxu1 %v14509_v22 }
 0xb3f   :  { %14364 = vmatprep.subr.mxu1 %v14646_v35 }
 0xb42   :  { %14365 = vmatpush3.msra.mxu1 %v13770_v12 }
 0xbf8   :  { %v13752_v23 = vpop.f32.mrb[72].mxu1 }
 0xbf9   :  { %v13753_v24 = vadd.f32 %v13752_v23, %v16972_v41  ;;  %v13754_v28 = vpop.f32.mrb[73].mxu1 }
 0xbfb   :  { %14367 = vmatmul.mubr.msk.f32.vlgmr.msra.gmra.mrb[74].mxu1 %vm13771_vm15, %v13753_v24 }
 0xcce   :  { %v13841_v32 = vpop.f32.mrb[74].mxu1 }
 0xccf   :  { %v13842_v27 = vadd.f32 %v13841_v32, %v16977_v42  ;;  %v14368_v36 = vpop.f32.mrb[75].mxu1 }
 0xcd1   :  { %v14070_v37 = vmul.f32 -1.442695, %v13842_v27 }
 0xcd3   :  { %14609 = vpow2.f32 %v14070_v37 }
 0xcdd   :  { %v14610_v33 = vpop.eup %14609 }
 0xcde   :  { %v13848_v39 = vadd.f32 1.0, %v14610_v33 }
 0xce0   :  { %14611 = vrcp.f32 %v13848_v39 }
 0xcea   :  { %v14612_v35 = vpop.eup %14611 }
 0xceb   :  { %13852 = vst.msk [vmem:[#allocation10] sm:$0x1] %vm13851_vm2, %v14612_v35 }
 0xcec   :  { %14626 = shalt.err (!%p14623_p4)
}
 0xced   :  { %s14627_s17 = scalar_lea.hbm %s19545_s8, 16 }
 0xcee   :  { %p14628_p5 = scmp.ne.s32.totalorder %s19545_s8, %s14627_s17  ;;  %p14631_p6 = scmp.lt.u32.totalorder %s14627_s17, %s19545_s8 }
 0xcf0   :  { %p14633_p7 = pnand %p14631_p6, %p14628_p5 }
 0xcf2   :  { %14636 = shalt.err (!%p14633_p7)
}
 0xcf3   :  { %13862 = dma.vmem_to_hbm [thread:$0]  %s13860_s22, 16, %s19545_s8, [#allocation11]  }
 0xcf4   :  { %14639 = dma.done.wait [#allocation11], 16  }
 0xcf5   :  { %14640 = vsyncadd [#allocation11], 4294967280 }
 0xcf6   :  { %13866 = vsyncpa [#allocation11], 1 }
 0xcf7   :  { %13867 = vsyncmov [#allocation9] }
 0xcfa   :  { %s13868_s10 = vpop.sfrf %13867 }
 0xcfb   :  { %p14071_p8 = scmp.ne.s32.totalorder %s13868_s10, 0 }
 0xcfd   :  { %13872 = shalt.err (%p14071_p8)  }

</bundles_post_ra>
